<compile_context>
chip_gen: v6e
topology: v6e:2x2x1
jax: 0.10.0
libtpu: 0.0.40
codegen_flags: <defaults>
</compile_context>

<pallas_src>
import numpy as np
import jax
import jax.numpy as jnp
from jax.experimental import pallas as pl
from jax.experimental.pallas import tpu as pltpu

_BN_EPS = 1e-5


def _compiler_params():
    return pltpu.CompilerParams(
        dimension_semantics=("parallel",),          # batch axis -> megacore on v7x
        vmem_limit_bytes=32 * 1024 * 1024,
    )


# ----------------------------------------------------------------------------
# Pallas kernels (one fused kernel per stem / BasicBlock / pooled-FC)
# ----------------------------------------------------------------------------
def _make_stem_kernel(H):
    """3x3 s1 conv (+folded BN) + ReLU.  Rows pre-padded; column pad in band."""
    def kernel(x_ref, band_ref, b_ref, o_ref):
        xv = x_ref[0].astype(jnp.float32)                       # [H+2, W*Cin]
        acc = jnp.dot(xv[0:H].astype(jnp.bfloat16), band_ref[0],
                      preferred_element_type=jnp.float32)
        acc += jnp.dot(xv[1:H + 1].astype(jnp.bfloat16), band_ref[1],
                       preferred_element_type=jnp.float32)
        acc += jnp.dot(xv[2:H + 2].astype(jnp.bfloat16), band_ref[2],
                       preferred_element_type=jnp.float32)
        o_ref[0] = jnp.maximum(acc + b_ref[...], 0.0).astype(o_ref.dtype)
    return kernel


def _make_block_s1_kernel(H, WC):
    """Fused stride-1 BasicBlock: conv1+bn+relu, conv2+bn, +identity, relu."""
    def kernel(x_ref, band1_ref, b1_ref, band2_ref, b2_ref, o_ref, hpad_ref):
        xv = x_ref[0].astype(jnp.float32)                       # [H+2, WC]
        # conv1 (+ folded BN scale) + bias + ReLU -- stays on chip
        acc = jnp.dot(xv[0:H].astype(jnp.bfloat16), band1_ref[0],
                      preferred_element_type=jnp.float32)
        acc += jnp.dot(xv[1:H + 1].astype(jnp.bfloat16), band1_ref[1],
                       preferred_element_type=jnp.float32)
        acc += jnp.dot(xv[2:H + 2].astype(jnp.bfloat16), band1_ref[2],
                       preferred_element_type=jnp.float32)
        h = jnp.maximum(acc + b1_ref[...], 0.0)

        # row-pad intermediate activation in a VMEM scratch (col pad is in band)
        hpad_ref[...] = jnp.zeros_like(hpad_ref)
        hpad_ref[1:H + 1, :] = h
        hv = hpad_ref[...]                                      # [H+2, WC]

        # conv2 (+ folded BN scale) + bias, residual add, ReLU
        acc2 = jnp.dot(hv[0:H].astype(jnp.bfloat16), band2_ref[0],
                       preferred_element_type=jnp.float32)
        acc2 += jnp.dot(hv[1:H + 1].astype(jnp.bfloat16), band2_ref[1],
                        preferred_element_type=jnp.float32)
        acc2 += jnp.dot(hv[2:H + 2].astype(jnp.bfloat16), band2_ref[2],
                        preferred_element_type=jnp.float32)
        y = acc2 + b2_ref[...] + xv[1:H + 1]                    # identity shortcut
        o_ref[0] = jnp.maximum(y, 0.0).astype(o_ref.dtype)
    return kernel


def _make_block_s2_kernel(Ho):
    """Fused stride-2 BasicBlock with 1x1 stride-2 downsample shortcut."""
    def kernel(xev_ref, xod_ref, band1_ref, b1_ref, band2_ref, b2_ref,
               bandd_ref, bd_ref, o_ref, hpad_ref):
        xev = xev_ref[0].astype(jnp.float32)                    # [Ho+1, WCin]
        xod = xod_ref[0].astype(jnp.float32)
        # conv1, 3x3 stride-2: row taps come from pre-split even/odd row phases
        acc = jnp.dot(xev[0:Ho].astype(jnp.bfloat16), band1_ref[0],
                      preferred_element_type=jnp.float32)
        acc += jnp.dot(xod[0:Ho].astype(jnp.bfloat16), band1_ref[1],
                       preferred_element_type=jnp.float32)
        acc += jnp.dot(xev[1:Ho + 1].astype(jnp.bfloat16), band1_ref[2],
                       preferred_element_type=jnp.float32)
        h = jnp.maximum(acc + b1_ref[...], 0.0)

        # 1x1 stride-2 downsample (+ folded BN) shortcut
        sc = jnp.dot(xod[0:Ho].astype(jnp.bfloat16), bandd_ref[...],
                     preferred_element_type=jnp.float32) + bd_ref[...]

        hpad_ref[...] = jnp.zeros_like(hpad_ref)
        hpad_ref[1:Ho + 1, :] = h
        hv = hpad_ref[...]

        acc2 = jnp.dot(hv[0:Ho].astype(jnp.bfloat16), band2_ref[0],
                       preferred_element_type=jnp.float32)
        acc2 += jnp.dot(hv[1:Ho + 1].astype(jnp.bfloat16), band2_ref[1],
                        preferred_element_type=jnp.float32)
        acc2 += jnp.dot(hv[2:Ho + 2].astype(jnp.bfloat16), band2_ref[2],
                        preferred_element_type=jnp.float32)
        y = acc2 + b2_ref[...] + sc
        o_ref[0] = jnp.maximum(y, 0.0).astype(o_ref.dtype)
    return kernel


def _pool_fc_kernel(x_ref, w_ref, b_ref, o_ref):
    # Global average pool is folded into w_ref; one matmul + sublane reduce.
    t = jnp.dot(x_ref[0], w_ref[...], preferred_element_type=jnp.float32)
    o_ref[0] = jnp.sum(t, axis=0, keepdims=True) + b_ref[...]


# ----------------------------------------------------------------------------
# pallas_call wrappers
# ----------------------------------------------------------------------------
def _run_stem(x_m, band, bias):
    N, H, WCin = x_m.shape
    WCout = band.shape[2]
    xp = jnp.pad(x_m, ((0, 0), (1, 1), (0, 0)))                  # row pad only
    return pl.pallas_call(
        _make_stem_kernel(H),
        out_shape=jax.ShapeDtypeStruct((N, H, WCout), jnp.bfloat16),
        grid=(N,),
        in_specs=[
            pl.BlockSpec((1, H + 2, WCin), lambda n: (n, 0, 0)),
            pl.BlockSpec(band.shape, lambda n: (0, 0, 0)),
            pl.BlockSpec(bias.shape, lambda n: (0, 0)),
        ],
        out_specs=pl.BlockSpec((1, H, WCout), lambda n: (n, 0, 0)),
        compiler_params=_compiler_params(),
    )(xp, band, bias)


def _run_block_s1(x_m, bp):
    N, H, WC = x_m.shape
    xp = jnp.pad(x_m, ((0, 0), (1, 1), (0, 0)))
    return pl.pallas_call(
        _make_block_s1_kernel(H, WC),
        out_shape=jax.ShapeDtypeStruct((N, H, WC), jnp.bfloat16),
        grid=(N,),
        in_specs=[
            pl.BlockSpec((1, H + 2, WC), lambda n: (n, 0, 0)),
            pl.BlockSpec((3, WC, WC), lambda n: (0, 0, 0)),
            pl.BlockSpec((1, WC), lambda n: (0, 0)),
            pl.BlockSpec((3, WC, WC), lambda n: (0, 0, 0)),
            pl.BlockSpec((1, WC), lambda n: (0, 0)),
        ],
        out_specs=pl.BlockSpec((1, H, WC), lambda n: (n, 0, 0)),
        scratch_shapes=[pltpu.VMEM((H + 2, WC), jnp.float32)],
        compiler_params=_compiler_params(),
    )(xp, bp['band1'], bp['bias1'], bp['band2'], bp['bias2'])


def _run_block_s2(x_m, bp):
    N, _, WCin = x_m.shape
    Ho, WCout = bp['Hout'], bp['WCout']
    xp = jnp.pad(x_m, ((0, 0), (1, 1), (0, 0)))
    xev = xp[:, 0::2, :]                       # even padded rows [N, Ho+1, WCin]
    xod = xp[:, 1::2, :]                       # odd  padded rows [N, Ho+1, WCin]
    Hh = Ho + 1
    return pl.pallas_call(
        _make_block_s2_kernel(Ho),
        out_shape=jax.ShapeDtypeStruct((N, Ho, WCout), jnp.bfloat16),
        grid=(N,),
        in_specs=[
            pl.BlockSpec((1, Hh, WCin), lambda n: (n, 0, 0)),
            pl.BlockSpec((1, Hh, WCin), lambda n: (n, 0, 0)),
            pl.BlockSpec((3, WCin, WCout), lambda n: (0, 0, 0)),
            pl.BlockSpec((1, WCout), lambda n: (0, 0)),
            pl.BlockSpec((3, WCout, WCout), lambda n: (0, 0, 0)),
            pl.BlockSpec((1, WCout), lambda n: (0, 0)),
            pl.BlockSpec((WCin, WCout), lambda n: (0, 0)),
            pl.BlockSpec((1, WCout), lambda n: (0, 0)),
        ],
        out_specs=pl.BlockSpec((1, Ho, WCout), lambda n: (n, 0, 0)),
        scratch_shapes=[pltpu.VMEM((Ho + 2, WCout), jnp.float32)],
        compiler_params=_compiler_params(),
    )(xev, xod, bp['band1'], bp['bias1'], bp['band2'], bp['bias2'],
      bp['bandd'], bp['biasd'])


def _run_pool_fc(x_m, w_pool, bias_pad, num_classes):
    N, H, WC = x_m.shape
    K = w_pool.shape[1]                        # 128 lane-padded logits
    out = pl.pallas_call(
        _pool_fc_kernel,
        out_shape=jax.ShapeDtypeStruct((N, 1, K), jnp.float32),
        grid=(N,),
        in_specs=[
            pl.BlockSpec((1, H, WC), lambda n: (n, 0, 0)),
            pl.BlockSpec((WC, K), lambda n: (0, 0)),
            pl.BlockSpec((1, K), lambda n: (0, 0)),
        ],
        out_specs=pl.BlockSpec((1, 1, K), lambda n: (n, 0, 0)),
        compiler_params=_compiler_params(),
    )(x_m, w_pool, bias_pad)
    return out[:, 0, :num_classes]


# ----------------------------------------------------------------------------
# Deterministic parameter construction for ResNet20 (CIFAR-style, 1 channel)
# ----------------------------------------------------------------------------
def _init_conv(key, o, i, kh, kw):
    fan_in = i * kh * kw
    return (jax.random.normal(key, (o, i, kh, kw), jnp.float32)
            / np.sqrt(fan_in))


def _init_bn(key, c):
    k1, k2, k3, k4 = jax.random.split(key, 4)
    gamma = 1.0 + 0.1 * jax.random.normal(k1, (c,), jnp.float32)
    beta = 0.1 * jax.random.normal(k2, (c,), jnp.float32)
    run_mean = 0.1 * jax.random.normal(k3, (c,), jnp.float32)
    run_var = 1.0 + 0.1 * jax.random.uniform(k4, (c,), jnp.float32)
    scale = gamma / jnp.sqrt(run_var + _BN_EPS)
    bias = beta - run_mean * scale
    return scale, bias


def init_resnet20_params(key, in_channels=1, num_classes=10):
    widths = (16, 32, 64)
    params = {}
    key, k1, k2 = jax.random.split(key, 3)
    params['stem_w'] = _init_conv(k1, widths[0], in_channels, 3, 3)
    params['stem_bn'] = _init_bn(k2, widths[0])

    in_c = widths[0]
    for stage in range(3):
        out_c = widths[stage]
        for blk in range(3):
            stride = 2 if (stage > 0 and blk == 0) else 1
            p = {}
            key, ka, kb, kc, kd = jax.random.split(key, 5)
            p['w1'] = _init_conv(ka, out_c, in_c, 3, 3)
            p['bn1'] = _init_bn(kb, out_c)
            p['w2'] = _init_conv(kc, out_c, out_c, 3, 3)
            p['bn2'] = _init_bn(kd, out_c)
            if stride != 1 or in_c != out_c:
                key, ke, kf = jax.random.split(key, 3)
                p['down_w'] = _init_conv(ke, out_c, in_c, 1, 1)
                p['down_bn'] = _init_bn(kf, out_c)
            params[f's{stage}b{blk}'] = p
            in_c = out_c

    key, kw_, kb_ = jax.random.split(key, 3)
    params['fc_w'] = (jax.random.normal(kw_, (num_classes, widths[2]),
                                        jnp.float32) / np.sqrt(widths[2]))
    params['fc_b'] = 0.01 * jax.random.normal(kb_, (num_classes,), jnp.float32)
    return params


# ----------------------------------------------------------------------------
# Parameter preparation: fold BN scale into weights, build banded matrices
# ----------------------------------------------------------------------------
def _fold_bn_into_weight(w_oihw, bn):
    scale, bias = bn
    w = (np.asarray(w_oihw, np.float32)
         * np.asarray(scale, np.float32)[:, None, None, None])
    return w, np.asarray(bias, np.float32)


def _make_band(w_folded_oihw, w_in, w_out, stride, pad):
    """Banded weight [kh, w_in*I, w_out*O]; folds kw taps + column zero-pad."""
    O, I, kh, kw = w_folded_oihw.shape
    w = np.transpose(w_folded_oihw, (2, 3, 1, 0))               # [kh, kw, I, O]
    band = np.zeros((kh, w_in * I, w_out * O), np.float32)
    for di in range(kh):
        for wo in range(w_out):
            for dj in range(kw):
                wi = stride * wo + dj - pad
                if 0 <= wi < w_in:
                    band[di, wi * I:(wi + 1) * I, wo * O:(wo + 1) * O] = w[di, dj]
    return jnp.asarray(band, jnp.bfloat16)


def _tile_bias(bias_c, w_out):
    return jnp.asarray(np.tile(np.asarray(bias_c, np.float32), w_out)[None, :],
                       jnp.float32)


def prepare_pallas_params(params, in_h=16, in_w=16, num_classes=10,
                          widths=(16, 32, 64)):
    pp = {}
    w0, b0 = _fold_bn_into_weight(params['stem_w'], params['stem_bn'])
    pp['stem'] = {'band': _make_band(w0, in_w, in_w, 1, 1),
                  'bias': _tile_bias(b0, in_w)}

    h, w, in_c = in_h, in_w, widths[0]
    blocks = []
    for stage in range(3):
        out_c = widths[stage]
        for blk in range(3):
            stride = 2 if (stage > 0 and blk == 0) else 1
            p = params[f's{stage}b{blk}']
            h_out, w_out = h // stride, w // stride
            w1, b1 = _fold_bn_into_weight(p['w1'], p['bn1'])
            w2, b2 = _fold_bn_into_weight(p['w2'], p['bn2'])
            bp = {'stride': stride, 'Hout': h_out,
                  'WCin': w * in_c, 'WCout': w_out * out_c,
                  'band1': _make_band(w1, w, w_out, stride, 1),
                  'bias1': _tile_bias(b1, w_out),
                  'band2': _make_band(w2, w_out, w_out, 1, 1),
                  'bias2': _tile_bias(b2, w_out)}
            if 'down_w' in p:
                wd, bd = _fold_bn_into_weight(p['down_w'], p['down_bn'])
                bp['bandd'] = _make_band(wd, w, w_out, stride, 0)[0]
                bp['biasd'] = _tile_bias(bd, w_out)
            blocks.append(bp)
            h, w, in_c = h_out, w_out, out_c
    pp['blocks'] = blocks

    # Global-average-pool folded into a 128-lane-padded FC weight.
    C = widths[2]
    hw = h * w
    fcw = np.asarray(params['fc_w'], np.float32)                # [classes, C]
    fcb = np.asarray(params['fc_b'], np.float32)
    lanes = 128
    wp = np.zeros((w * C, lanes), np.float32)
    for col in range(w):
        wp[col * C:(col + 1) * C, :num_classes] = fcw.T / hw
    bpad = np.zeros((1, lanes), np.float32)
    bpad[0, :num_classes] = fcb
    pp['fc'] = {'w': jnp.asarray(wp, jnp.bfloat16),
                'b': jnp.asarray(bpad, jnp.float32),
                'num_classes': num_classes}
    return pp


# ----------------------------------------------------------------------------
# Forward pass (== MnistResNet.forward with eval-mode BatchNorm)
# ----------------------------------------------------------------------------
def mnist_resnet_forward(x_nchw, pp):
    N, C, H, W = x_nchw.shape
    x = jnp.transpose(x_nchw, (0, 2, 3, 1)).astype(jnp.bfloat16)  # NHWC, bf16
    x = x.reshape(N, H, W * C)                                    # lane-dense
    x = _run_stem(x, pp['stem']['band'], pp['stem']['bias'])
    for bp in pp['blocks']:
        x = _run_block_s1(x, bp) if bp['stride'] == 1 else _run_block_s2(x, bp)
    return _run_pool_fc(x, pp['fc']['w'], pp['fc']['b'], pp['fc']['num_classes'])


# ----------------------------------------------------------------------------
# Pure-JAX reference (lax.conv) with the same bf16 rounding points
# ----------------------------------------------------------------------------
def _ref_forward(x_nchw, params):
    def conv(x_nhwc, w_oihw, bn, stride, pad):
        scale, bias = bn
        wf = (jnp.asarray(w_oihw, jnp.float32)
              * scale[:, None, None, None]).astype(jnp.bfloat16)
        w_hwio = jnp.transpose(wf, (2, 3, 1, 0))
        y = jax.lax.conv_general_dilated(
            x_nhwc.astype(jnp.bfloat16), w_hwio,
            window_strides=(stride, stride),
            padding=[(pad, pad), (pad, pad)],
            dimension_numbers=('NHWC', 'HWIO', 'NHWC'),
            preferred_element_type=jnp.float32)
        return y + bias[None, None, None, :]

    x = jnp.transpose(x_nchw, (0, 2, 3, 1)).astype(jnp.bfloat16)
    x = jnp.maximum(conv(x, params['stem_w'], params['stem_bn'], 1, 1),
                    0.0).astype(jnp.bfloat16)
    for stage in range(3):
        for blk in range(3):
            p = params[f's{stage}b{blk}']
            stride = 2 if (stage > 0 and blk == 0) else 1
            if 'down_w' in p:
                sc = conv(x, p['down_w'], p['down_bn'], stride, 0)
            else:
                sc = x.astype(jnp.float32)
            h = jnp.maximum(conv(x, p['w1'], p['bn1'], stride, 1),
                            0.0).astype(jnp.bfloat16)
            y = conv(h, p['w2'], p['bn2'], 1, 1) + sc
            x = jnp.maximum(y, 0.0).astype(jnp.bfloat16)
    n, hh, ww, c = x.shape
    w_s = (jnp.asarray(params['fc_w'], jnp.float32).T / (hh * ww)
           ).astype(jnp.bfloat16)
    logits = jnp.einsum('nhwc,ck->nk', x, w_s,
                        preferred_element_type=jnp.float32)
    return logits + params['fc_b'][None, :]


# ----------------------------------------------------------------------------
if __name__ == "__main__":
    key = jax.random.PRNGKey(0)
    k_x, k_p = jax.random.split(key)

    # MNIST-like input: batch=2, channels=1, spatial=16x16 (NCHW).
    x = jax.random.normal(k_x, (2, 1, 16, 16), jnp.float32)
    params = init_resnet20_params(k_p, in_channels=1, num_classes=10)
    pp = prepare_pallas_params(params, in_h=16, in_w=16, num_classes=10)

    fwd = jax.jit(lambda inp: mnist_resnet_forward(inp, pp))
    logits = jax.block_until_ready(fwd(x))
    assert logits.shape == (2, 10) and logits.dtype == jnp.float32

    ref = jax.block_until_ready(_ref_forward(x, params))
    err = float(jnp.max(jnp.abs(logits - ref)))
    assert np.isfinite(err) and err < 5e-2, f"mismatch vs reference: {err}"
    print("KERNEL_OK")
</pallas_src>

<mosaic_0001>
module attributes {stable_mosaic.version = 11 : i64} {
  func.func @kernel(%arg0: i32, %arg1: memref<1x18x16xbf16, #tpu.memory_space<vmem>>, %arg2: memref<3x16x256xbf16, #tpu.memory_space<vmem>>, %arg3: memref<1x256xf32, #tpu.memory_space<vmem>>, %arg4: memref<1x16x256xbf16, #tpu.memory_space<vmem>>) attributes {dimension_semantics = [#tpu.dimension_semantics<parallel>], iteration_bounds = array<i64: 2>, scalar_prefetch = 0 : i64, scratch_operands = 0 : i64, tpu.core_type = #tpu.core_type<tc>, window_params = [{transform_indices = @transform_0, window_bounds = array<i64: 1, 18, 16>}, {pipeline_mode = #tpu.pipeline_mode<synchronous>, transform_indices = @transform_1, window_bounds = array<i64: 3, 16, 256>}, {pipeline_mode = #tpu.pipeline_mode<synchronous>, transform_indices = @transform_2, window_bounds = array<i64: 1, 256>}, {transform_indices = @transform_3, window_bounds = array<i64: 1, 16, 256>}]} {
    %c0 = arith.constant 0 : index
    %c0_0 = arith.constant 0 : index
    %c0_1 = arith.constant 0 : index
    %0 = vector.load %arg1[%c0, %c0_0, %c0_1] : memref<1x18x16xbf16, #tpu.memory_space<vmem>>, vector<1x18x16xbf16>
    %1 = vector.shape_cast %0 : vector<1x18x16xbf16> to vector<18x16xbf16>
    %2 = arith.extf %1 : vector<18x16xbf16> to vector<18x16xf32>
    %3 = vector.extract_strided_slice %2 {offsets = [0, 0], sizes = [16, 16], strides = [1, 1]} : vector<18x16xf32> to vector<16x16xf32>
    %4 = arith.truncf %3 : vector<16x16xf32> to vector<16x16xbf16>
    %c0_2 = arith.constant 0 : index
    %c0_3 = arith.constant 0 : index
    %c0_4 = arith.constant 0 : index
    %5 = vector.load %arg2[%c0_2, %c0_3, %c0_4] : memref<3x16x256xbf16, #tpu.memory_space<vmem>>, vector<1x16x256xbf16>
    %6 = vector.shape_cast %5 : vector<1x16x256xbf16> to vector<16x256xbf16>
    %cst = arith.constant dense<0.000000e+00> : vector<16x256xf32>
    %7 = tpu.matmul %4, %6, %cst {dimension_numbers = #tpu.dot_dimension_numbers<[1], [0], [0], [1], [0, 0, 1, 1], [], []>} : vector<16x16xbf16>, vector<16x256xbf16>, vector<16x256xf32> -> vector<16x256xf32>
    %8 = vector.extract_strided_slice %2 {offsets = [1, 0], sizes = [16, 16], strides = [1, 1]} : vector<18x16xf32> to vector<16x16xf32>
    %9 = arith.truncf %8 : vector<16x16xf32> to vector<16x16xbf16>
    %c1 = arith.constant 1 : index
    %c0_5 = arith.constant 0 : index
    %c0_6 = arith.constant 0 : index
    %10 = vector.load %arg2[%c1, %c0_5, %c0_6] : memref<3x16x256xbf16, #tpu.memory_space<vmem>>, vector<1x16x256xbf16>
    %11 = vector.shape_cast %10 : vector<1x16x256xbf16> to vector<16x256xbf16>
    %cst_7 = arith.constant dense<0.000000e+00> : vector<16x256xf32>
    %12 = tpu.matmul %9, %11, %cst_7 {dimension_numbers = #tpu.dot_dimension_numbers<[1], [0], [0], [1], [0, 0, 1, 1], [], []>} : vector<16x16xbf16>, vector<16x256xbf16>, vector<16x256xf32> -> vector<16x256xf32>
    %13 = arith.addf %7, %12 : vector<16x256xf32>
    %14 = vector.extract_strided_slice %2 {offsets = [2, 0], sizes = [16, 16], strides = [1, 1]} : vector<18x16xf32> to vector<16x16xf32>
    %15 = arith.truncf %14 : vector<16x16xf32> to vector<16x16xbf16>
    %c2 = arith.constant 2 : index
    %c0_8 = arith.constant 0 : index
    %c0_9 = arith.constant 0 : index
    %16 = vector.load %arg2[%c2, %c0_8, %c0_9] : memref<3x16x256xbf16, #tpu.memory_space<vmem>>, vector<1x16x256xbf16>
    %17 = vector.shape_cast %16 : vector<1x16x256xbf16> to vector<16x256xbf16>
    %cst_10 = arith.constant dense<0.000000e+00> : vector<16x256xf32>
    %18 = tpu.matmul %15, %17, %cst_10 {dimension_numbers = #tpu.dot_dimension_numbers<[1], [0], [0], [1], [0, 0, 1, 1], [], []>} : vector<16x16xbf16>, vector<16x256xbf16>, vector<16x256xf32> -> vector<16x256xf32>
    %19 = arith.addf %13, %18 : vector<16x256xf32>
    %c0_11 = arith.constant 0 : index
    %c0_12 = arith.constant 0 : index
    %20 = vector.load %arg3[%c0_11, %c0_12] : memref<1x256xf32, #tpu.memory_space<vmem>>, vector<1x256xf32>
    %21 = vector.broadcast %20 : vector<1x256xf32> to vector<16x256xf32>
    %22 = arith.addf %19, %21 : vector<16x256xf32>
    %cst_13 = arith.constant 0.000000e+00 : f32
    %23 = vector.broadcast %cst_13 : f32 to vector<16x256xf32>
    %24 = arith.maximumf %22, %23 : vector<16x256xf32>
    %25 = arith.truncf %24 : vector<16x256xf32> to vector<16x256xbf16>
    %c0_14 = arith.constant 0 : index
    %c0_15 = arith.constant 0 : index
    %c0_16 = arith.constant 0 : index
    %26 = vector.load %arg4[%c0_14, %c0_15, %c0_16] : memref<1x16x256xbf16, #tpu.memory_space<vmem>>, vector<1x16x256xbf16>
    %27 = vector.shape_cast %26 : vector<1x16x256xbf16> to vector<16x256xbf16>
    %28 = vector.shape_cast %25 : vector<16x256xbf16> to vector<1x16x256xbf16>
    tpu.vector_store %arg4[%c0_14, %c0_15, %c0_16], %28 {strides = array<i32>} : memref<1x16x256xbf16, #tpu.memory_space<vmem>>, vector<1x16x256xbf16>,
    return
  }
  func.func @transform_0(%arg0: i32) -> (i32, i32, i32) {
    %c0_i32 = arith.constant 0 : i32
    %c0_i32_0 = arith.constant 0 : i32
    %c0_i32_1 = arith.constant 0 : i32
    return %arg0, %c0_i32, %c0_i32_0 : i32, i32, i32
  }
  func.func @transform_1(%arg0: i32) -> (i32, i32, i32) {
    %c0_i32 = arith.constant 0 : i32
    %c0_i32_0 = arith.constant 0 : i32
    %c0_i32_1 = arith.constant 0 : i32
    %c0_i32_2 = arith.constant 0 : i32
    return %c0_i32, %c0_i32_0, %c0_i32_1 : i32, i32, i32
  }
  func.func @transform_2(%arg0: i32) -> (i32, i32) {
    %c0_i32 = arith.constant 0 : i32
    %c0_i32_0 = arith.constant 0 : i32
    %c0_i32_1 = arith.constant 0 : i32
    return %c0_i32, %c0_i32_0 : i32, i32
  }
  func.func @transform_3(%arg0: i32) -> (i32, i32, i32) {
    %c0_i32 = arith.constant 0 : i32
    %c0_i32_0 = arith.constant 0 : i32
    %c0_i32_1 = arith.constant 0 : i32
    return %arg0, %c0_i32, %c0_i32_0 : i32, i32, i32
  }
}

module attributes {stable_mosaic.version = 11 : i64} {
  func.func @kernel(%arg0: i32, %arg1: memref<1x18x256xbf16, #tpu.memory_space<vmem>>, %arg2: memref<3x256x256xbf16, #tpu.memory_space<vmem>>, %arg3: memref<1x256xf32, #tpu.memory_space<vmem>>, %arg4: memref<3x256x256xbf16, #tpu.memory_space<vmem>>, %arg5: memref<1x256xf32, #tpu.memory_space<vmem>>, %arg6: memref<1x16x256xbf16, #tpu.memory_space<vmem>>, %arg7: memref<18x256xf32, #tpu.memory_space<vmem>>) attributes {dimension_semantics = [#tpu.dimension_semantics<parallel>], iteration_bounds = array<i64: 2>, scalar_prefetch = 0 : i64, scratch_operands = 1 : i64, tpu.core_type = #tpu.core_type<tc>, window_params = [{transform_indices = @transform_0, window_bounds = array<i64: 1, 18, 256>}, {pipeline_mode = #tpu.pipeline_mode<synchronous>, transform_indices = @transform_1, window_bounds = array<i64: 3, 256, 256>}, {pipeline_mode = #tpu.pipeline_mode<synchronous>, transform_indices = @transform_2, window_bounds = array<i64: 1, 256>}, {pipeline_mode = #tpu.pipeline_mode<synchronous>, transform_indices = @transform_3, window_bounds = array<i64: 3, 256, 256>}, {pipeline_mode = #tpu.pipeline_mode<synchronous>, transform_indices = @transform_4, window_bounds = array<i64: 1, 256>}, {transform_indices = @transform_5, window_bounds = array<i64: 1, 16, 256>}]} {
    %c0 = arith.constant 0 : index
    %c0_0 = arith.constant 0 : index
    %c0_1 = arith.constant 0 : index
    %0 = vector.load %arg1[%c0, %c0_0, %c0_1] : memref<1x18x256xbf16, #tpu.memory_space<vmem>>, vector<1x18x256xbf16>
    %1 = vector.shape_cast %0 : vector<1x18x256xbf16> to vector<18x256xbf16>
    %2 = arith.extf %1 : vector<18x256xbf16> to vector<18x256xf32>
    %3 = vector.extract_strided_slice %2 {offsets = [0, 0], sizes = [16, 256], strides = [1, 1]} : vector<18x256xf32> to vector<16x256xf32>
    %4 = arith.truncf %3 : vector<16x256xf32> to vector<16x256xbf16>
    %c0_2 = arith.constant 0 : index
    %c0_3 = arith.constant 0 : index
    %c0_4 = arith.constant 0 : index
    %5 = vector.load %arg2[%c0_2, %c0_3, %c0_4] : memref<3x256x256xbf16, #tpu.memory_space<vmem>>, vector<1x256x256xbf16>
    %6 = vector.shape_cast %5 : vector<1x256x256xbf16> to vector<256x256xbf16>
    %cst = arith.constant dense<0.000000e+00> : vector<16x256xf32>
    %7 = tpu.matmul %4, %6, %cst {dimension_numbers = #tpu.dot_dimension_numbers<[1], [0], [0], [1], [0, 0, 1, 1], [], []>} : vector<16x256xbf16>, vector<256x256xbf16>, vector<16x256xf32> -> vector<16x256xf32>
    %8 = vector.extract_strided_slice %2 {offsets = [1, 0], sizes = [16, 256], strides = [1, 1]} : vector<18x256xf32> to vector<16x256xf32>
    %9 = arith.truncf %8 : vector<16x256xf32> to vector<16x256xbf16>
    %c1 = arith.constant 1 : index
    %c0_5 = arith.constant 0 : index
    %c0_6 = arith.constant 0 : index
    %10 = vector.load %arg2[%c1, %c0_5, %c0_6] : memref<3x256x256xbf16, #tpu.memory_space<vmem>>, vector<1x256x256xbf16>
    %11 = vector.shape_cast %10 : vector<1x256x256xbf16> to vector<256x256xbf16>
    %cst_7 = arith.constant dense<0.000000e+00> : vector<16x256xf32>
    %12 = tpu.matmul %9, %11, %cst_7 {dimension_numbers = #tpu.dot_dimension_numbers<[1], [0], [0], [1], [0, 0, 1, 1], [], []>} : vector<16x256xbf16>, vector<256x256xbf16>, vector<16x256xf32> -> vector<16x256xf32>
    %13 = arith.addf %7, %12 : vector<16x256xf32>
    %14 = vector.extract_strided_slice %2 {offsets = [2, 0], sizes = [16, 256], strides = [1, 1]} : vector<18x256xf32> to vector<16x256xf32>
    %15 = arith.truncf %14 : vector<16x256xf32> to vector<16x256xbf16>
    %c2 = arith.constant 2 : index
    %c0_8 = arith.constant 0 : index
    %c0_9 = arith.constant 0 : index
    %16 = vector.load %arg2[%c2, %c0_8, %c0_9] : memref<3x256x256xbf16, #tpu.memory_space<vmem>>, vector<1x256x256xbf16>
    %17 = vector.shape_cast %16 : vector<1x256x256xbf16> to vector<256x256xbf16>
    %cst_10 = arith.constant dense<0.000000e+00> : vector<16x256xf32>
    %18 = tpu.matmul %15, %17, %cst_10 {dimension_numbers = #tpu.dot_dimension_numbers<[1], [0], [0], [1], [0, 0, 1, 1], [], []>} : vector<16x256xbf16>, vector<256x256xbf16>, vector<16x256xf32> -> vector<16x256xf32>
    %19 = arith.addf %13, %18 : vector<16x256xf32>
    %c0_11 = arith.constant 0 : index
    %c0_12 = arith.constant 0 : index
    %20 = vector.load %arg3[%c0_11, %c0_12] : memref<1x256xf32, #tpu.memory_space<vmem>>, vector<1x256xf32>
    %21 = vector.broadcast %20 : vector<1x256xf32> to vector<16x256xf32>
    %22 = arith.addf %19, %21 : vector<16x256xf32>
    %cst_13 = arith.constant 0.000000e+00 : f32
    %23 = vector.broadcast %cst_13 : f32 to vector<16x256xf32>
    %24 = arith.maximumf %22, %23 : vector<16x256xf32>
    %cst_14 = arith.constant 0.000000e+00 : f32
    %25 = vector.broadcast %cst_14 : f32 to vector<18x256xf32>
    %c0_15 = arith.constant 0 : index
    %c0_16 = arith.constant 0 : index
    %26 = vector.load %arg7[%c0_15, %c0_16] : memref<18x256xf32, #tpu.memory_space<vmem>>, vector<18x256xf32>
    tpu.vector_store %arg7[%c0_15, %c0_16], %25 {strides = array<i32>} : memref<18x256xf32, #tpu.memory_space<vmem>>, vector<18x256xf32>,
    %c1_17 = arith.constant 1 : index
    %c0_18 = arith.constant 0 : index
    %27 = vector.load %arg7[%c1_17, %c0_18] : memref<18x256xf32, #tpu.memory_space<vmem>>, vector<16x256xf32>
    tpu.vector_store %arg7[%c1_17, %c0_18], %24 {strides = array<i32>} : memref<18x256xf32, #tpu.memory_space<vmem>>, vector<16x256xf32>,
    %c0_19 = arith.constant 0 : index
    %c0_20 = arith.constant 0 : index
    %28 = vector.load %arg7[%c0_19, %c0_20] : memref<18x256xf32, #tpu.memory_space<vmem>>, vector<18x256xf32>
    %29 = vector.extract_strided_slice %28 {offsets = [0, 0], sizes = [16, 256], strides = [1, 1]} : vector<18x256xf32> to vector<16x256xf32>
    %30 = arith.truncf %29 : vector<16x256xf32> to vector<16x256xbf16>
    %c0_21 = arith.constant 0 : index
    %c0_22 = arith.constant 0 : index
    %c0_23 = arith.constant 0 : index
    %31 = vector.load %arg4[%c0_21, %c0_22, %c0_23] : memref<3x256x256xbf16, #tpu.memory_space<vmem>>, vector<1x256x256xbf16>
    %32 = vector.shape_cast %31 : vector<1x256x256xbf16> to vector<256x256xbf16>
    %cst_24 = arith.constant dense<0.000000e+00> : vector<16x256xf32>
    %33 = tpu.matmul %30, %32, %cst_24 {dimension_numbers = #tpu.dot_dimension_numbers<[1], [0], [0], [1], [0, 0, 1, 1], [], []>} : vector<16x256xbf16>, vector<256x256xbf16>, vector<16x256xf32> -> vector<16x256xf32>
    %34 = vector.extract_strided_slice %28 {offsets = [1, 0], sizes = [16, 256], strides = [1, 1]} : vector<18x256xf32> to vector<16x256xf32>
    %35 = arith.truncf %34 : vector<16x256xf32> to vector<16x256xbf16>
    %c1_25 = arith.constant 1 : index
    %c0_26 = arith.constant 0 : index
    %c0_27 = arith.constant 0 : index
    %36 = vector.load %arg4[%c1_25, %c0_26, %c0_27] : memref<3x256x256xbf16, #tpu.memory_space<vmem>>, vector<1x256x256xbf16>
    %37 = vector.shape_cast %36 : vector<1x256x256xbf16> to vector<256x256xbf16>
    %cst_28 = arith.constant dense<0.000000e+00> : vector<16x256xf32>
    %38 = tpu.matmul %35, %37, %cst_28 {dimension_numbers = #tpu.dot_dimension_numbers<[1], [0], [0], [1], [0, 0, 1, 1], [], []>} : vector<16x256xbf16>, vector<256x256xbf16>, vector<16x256xf32> -> vector<16x256xf32>
    %39 = arith.addf %33, %38 : vector<16x256xf32>
    %40 = vector.extract_strided_slice %28 {offsets = [2, 0], sizes = [16, 256], strides = [1, 1]} : vector<18x256xf32> to vector<16x256xf32>
    %41 = arith.truncf %40 : vector<16x256xf32> to vector<16x256xbf16>
    %c2_29 = arith.constant 2 : index
    %c0_30 = arith.constant 0 : index
    %c0_31 = arith.constant 0 : index
    %42 = vector.load %arg4[%c2_29, %c0_30, %c0_31] : memref<3x256x256xbf16, #tpu.memory_space<vmem>>, vector<1x256x256xbf16>
    %43 = vector.shape_cast %42 : vector<1x256x256xbf16> to vector<256x256xbf16>
    %cst_32 = arith.constant dense<0.000000e+00> : vector<16x256xf32>
    %44 = tpu.matmul %41, %43, %cst_32 {dimension_numbers = #tpu.dot_dimension_numbers<[1], [0], [0], [1], [0, 0, 1, 1], [], []>} : vector<16x256xbf16>, vector<256x256xbf16>, vector<16x256xf32> -> vector<16x256xf32>
    %45 = arith.addf %39, %44 : vector<16x256xf32>
    %c0_33 = arith.constant 0 : index
    %c0_34 = arith.constant 0 : index
    %46 = vector.load %arg5[%c0_33, %c0_34] : memref<1x256xf32, #tpu.memory_space<vmem>>, vector<1x256xf32>
    %47 = vector.broadcast %46 : vector<1x256xf32> to vector<16x256xf32>
    %48 = arith.addf %45, %47 : vector<16x256xf32>
    %49 = vector.extract_strided_slice %2 {offsets = [1, 0], sizes = [16, 256], strides = [1, 1]} : vector<18x256xf32> to vector<16x256xf32>
    %50 = arith.addf %48, %49 : vector<16x256xf32>
    %cst_35 = arith.constant 0.000000e+00 : f32
    %51 = vector.broadcast %cst_35 : f32 to vector<16x256xf32>
    %52 = arith.maximumf %50, %51 : vector<16x256xf32>
    %53 = arith.truncf %52 : vector<16x256xf32> to vector<16x256xbf16>
    %c0_36 = arith.constant 0 : index
    %c0_37 = arith.constant 0 : index
    %c0_38 = arith.constant 0 : index
    %54 = vector.load %arg6[%c0_36, %c0_37, %c0_38] : memref<1x16x256xbf16, #tpu.memory_space<vmem>>, vector<1x16x256xbf16>
    %55 = vector.shape_cast %54 : vector<1x16x256xbf16> to vector<16x256xbf16>
    %56 = vector.shape_cast %53 : vector<16x256xbf16> to vector<1x16x256xbf16>
    tpu.vector_store %arg6[%c0_36, %c0_37, %c0_38], %56 {strides = array<i32>} : memref<1x16x256xbf16, #tpu.memory_space<vmem>>, vector<1x16x256xbf16>,
    return
  }
  func.func @transform_0(%arg0: i32) -> (i32, i32, i32) {
    %c0_i32 = arith.constant 0 : i32
    %c0_i32_0 = arith.constant 0 : i32
    %c0_i32_1 = arith.constant 0 : i32
    return %arg0, %c0_i32, %c0_i32_0 : i32, i32, i32
  }
  func.func @transform_1(%arg0: i32) -> (i32, i32, i32) {
    %c0_i32 = arith.constant 0 : i32
    %c0_i32_0 = arith.constant 0 : i32
    %c0_i32_1 = arith.constant 0 : i32
    %c0_i32_2 = arith.constant 0 : i32
    return %c0_i32, %c0_i32_0, %c0_i32_1 : i32, i32, i32
  }
  func.func @transform_2(%arg0: i32) -> (i32, i32) {
    %c0_i32 = arith.constant 0 : i32
    %c0_i32_0 = arith.constant 0 : i32
    %c0_i32_1 = arith.constant 0 : i32
    return %c0_i32, %c0_i32_0 : i32, i32
  }
  func.func @transform_3(%arg0: i32) -> (i32, i32, i32) {
    %c0_i32 = arith.constant 0 : i32
    %c0_i32_0 = arith.constant 0 : i32
    %c0_i32_1 = arith.constant 0 : i32
    %c0_i32_2 = arith.constant 0 : i32
    return %c0_i32, %c0_i32_0, %c0_i32_1 : i32, i32, i32
  }
  func.func @transform_4(%arg0: i32) -> (i32, i32) {
    %c0_i32 = arith.constant 0 : i32
    %c0_i32_0 = arith.constant 0 : i32
    %c0_i32_1 = arith.constant 0 : i32
    return %c0_i32, %c0_i32_0 : i32, i32
  }
  func.func @transform_5(%arg0: i32) -> (i32, i32, i32) {
    %c0_i32 = arith.constant 0 : i32
    %c0_i32_0 = arith.constant 0 : i32
    %c0_i32_1 = arith.constant 0 : i32
    return %arg0, %c0_i32, %c0_i32_0 : i32, i32, i32
  }
}

module attributes {stable_mosaic.version = 11 : i64} {
  func.func @kernel(%arg0: i32, %arg1: memref<1x18x256xbf16, #tpu.memory_space<vmem>>, %arg2: memref<3x256x256xbf16, #tpu.memory_space<vmem>>, %arg3: memref<1x256xf32, #tpu.memory_space<vmem>>, %arg4: memref<3x256x256xbf16, #tpu.memory_space<vmem>>, %arg5: memref<1x256xf32, #tpu.memory_space<vmem>>, %arg6: memref<1x16x256xbf16, #tpu.memory_space<vmem>>, %arg7: memref<18x256xf32, #tpu.memory_space<vmem>>) attributes {dimension_semantics = [#tpu.dimension_semantics<parallel>], iteration_bounds = array<i64: 2>, scalar_prefetch = 0 : i64, scratch_operands = 1 : i64, tpu.core_type = #tpu.core_type<tc>, window_params = [{transform_indices = @transform_0, window_bounds = array<i64: 1, 18, 256>}, {pipeline_mode = #tpu.pipeline_mode<synchronous>, transform_indices = @transform_1, window_bounds = array<i64: 3, 256, 256>}, {pipeline_mode = #tpu.pipeline_mode<synchronous>, transform_indices = @transform_2, window_bounds = array<i64: 1, 256>}, {pipeline_mode = #tpu.pipeline_mode<synchronous>, transform_indices = @transform_3, window_bounds = array<i64: 3, 256, 256>}, {pipeline_mode = #tpu.pipeline_mode<synchronous>, transform_indices = @transform_4, window_bounds = array<i64: 1, 256>}, {transform_indices = @transform_5, window_bounds = array<i64: 1, 16, 256>}]} {
    %c0 = arith.constant 0 : index
    %c0_0 = arith.constant 0 : index
    %c0_1 = arith.constant 0 : index
    %0 = vector.load %arg1[%c0, %c0_0, %c0_1] : memref<1x18x256xbf16, #tpu.memory_space<vmem>>, vector<1x18x256xbf16>
    %1 = vector.shape_cast %0 : vector<1x18x256xbf16> to vector<18x256xbf16>
    %2 = arith.extf %1 : vector<18x256xbf16> to vector<18x256xf32>
    %3 = vector.extract_strided_slice %2 {offsets = [0, 0], sizes = [16, 256], strides = [1, 1]} : vector<18x256xf32> to vector<16x256xf32>
    %4 = arith.truncf %3 : vector<16x256xf32> to vector<16x256xbf16>
    %c0_2 = arith.constant 0 : index
    %c0_3 = arith.constant 0 : index
    %c0_4 = arith.constant 0 : index
    %5 = vector.load %arg2[%c0_2, %c0_3, %c0_4] : memref<3x256x256xbf16, #tpu.memory_space<vmem>>, vector<1x256x256xbf16>
    %6 = vector.shape_cast %5 : vector<1x256x256xbf16> to vector<256x256xbf16>
    %cst = arith.constant dense<0.000000e+00> : vector<16x256xf32>
    %7 = tpu.matmul %4, %6, %cst {dimension_numbers = #tpu.dot_dimension_numbers<[1], [0], [0], [1], [0, 0, 1, 1], [], []>} : vector<16x256xbf16>, vector<256x256xbf16>, vector<16x256xf32> -> vector<16x256xf32>
    %8 = vector.extract_strided_slice %2 {offsets = [1, 0], sizes = [16, 256], strides = [1, 1]} : vector<18x256xf32> to vector<16x256xf32>
    %9 = arith.truncf %8 : vector<16x256xf32> to vector<16x256xbf16>
    %c1 = arith.constant 1 : index
    %c0_5 = arith.constant 0 : index
    %c0_6 = arith.constant 0 : index
    %10 = vector.load %arg2[%c1, %c0_5, %c0_6] : memref<3x256x256xbf16, #tpu.memory_space<vmem>>, vector<1x256x256xbf16>
    %11 = vector.shape_cast %10 : vector<1x256x256xbf16> to vector<256x256xbf16>
    %cst_7 = arith.constant dense<0.000000e+00> : vector<16x256xf32>
    %12 = tpu.matmul %9, %11, %cst_7 {dimension_numbers = #tpu.dot_dimension_numbers<[1], [0], [0], [1], [0, 0, 1, 1], [], []>} : vector<16x256xbf16>, vector<256x256xbf16>, vector<16x256xf32> -> vector<16x256xf32>
    %13 = arith.addf %7, %12 : vector<16x256xf32>
    %14 = vector.extract_strided_slice %2 {offsets = [2, 0], sizes = [16, 256], strides = [1, 1]} : vector<18x256xf32> to vector<16x256xf32>
    %15 = arith.truncf %14 : vector<16x256xf32> to vector<16x256xbf16>
    %c2 = arith.constant 2 : index
    %c0_8 = arith.constant 0 : index
    %c0_9 = arith.constant 0 : index
    %16 = vector.load %arg2[%c2, %c0_8, %c0_9] : memref<3x256x256xbf16, #tpu.memory_space<vmem>>, vector<1x256x256xbf16>
    %17 = vector.shape_cast %16 : vector<1x256x256xbf16> to vector<256x256xbf16>
    %cst_10 = arith.constant dense<0.000000e+00> : vector<16x256xf32>
    %18 = tpu.matmul %15, %17, %cst_10 {dimension_numbers = #tpu.dot_dimension_numbers<[1], [0], [0], [1], [0, 0, 1, 1], [], []>} : vector<16x256xbf16>, vector<256x256xbf16>, vector<16x256xf32> -> vector<16x256xf32>
    %19 = arith.addf %13, %18 : vector<16x256xf32>
    %c0_11 = arith.constant 0 : index
    %c0_12 = arith.constant 0 : index
    %20 = vector.load %arg3[%c0_11, %c0_12] : memref<1x256xf32, #tpu.memory_space<vmem>>, vector<1x256xf32>
    %21 = vector.broadcast %20 : vector<1x256xf32> to vector<16x256xf32>
    %22 = arith.addf %19, %21 : vector<16x256xf32>
    %cst_13 = arith.constant 0.000000e+00 : f32
    %23 = vector.broadcast %cst_13 : f32 to vector<16x256xf32>
    %24 = arith.maximumf %22, %23 : vector<16x256xf32>
    %cst_14 = arith.constant 0.000000e+00 : f32
    %25 = vector.broadcast %cst_14 : f32 to vector<18x256xf32>
    %c0_15 = arith.constant 0 : index
    %c0_16 = arith.constant 0 : index
    %26 = vector.load %arg7[%c0_15, %c0_16] : memref<18x256xf32, #tpu.memory_space<vmem>>, vector<18x256xf32>
    tpu.vector_store %arg7[%c0_15, %c0_16], %25 {strides = array<i32>} : memref<18x256xf32, #tpu.memory_space<vmem>>, vector<18x256xf32>,
    %c1_17 = arith.constant 1 : index
    %c0_18 = arith.constant 0 : index
    %27 = vector.load %arg7[%c1_17, %c0_18] : memref<18x256xf32, #tpu.memory_space<vmem>>, vector<16x256xf32>
    tpu.vector_store %arg7[%c1_17, %c0_18], %24 {strides = array<i32>} : memref<18x256xf32, #tpu.memory_space<vmem>>, vector<16x256xf32>,
    %c0_19 = arith.constant 0 : index
    %c0_20 = arith.constant 0 : index
    %28 = vector.load %arg7[%c0_19, %c0_20] : memref<18x256xf32, #tpu.memory_space<vmem>>, vector<18x256xf32>
    %29 = vector.extract_strided_slice %28 {offsets = [0, 0], sizes = [16, 256], strides = [1, 1]} : vector<18x256xf32> to vector<16x256xf32>
    %30 = arith.truncf %29 : vector<16x256xf32> to vector<16x256xbf16>
    %c0_21 = arith.constant 0 : index
    %c0_22 = arith.constant 0 : index
    %c0_23 = arith.constant 0 : index
    %31 = vector.load %arg4[%c0_21, %c0_22, %c0_23] : memref<3x256x256xbf16, #tpu.memory_space<vmem>>, vector<1x256x256xbf16>
    %32 = vector.shape_cast %31 : vector<1x256x256xbf16> to vector<256x256xbf16>
    %cst_24 = arith.constant dense<0.000000e+00> : vector<16x256xf32>
    %33 = tpu.matmul %30, %32, %cst_24 {dimension_numbers = #tpu.dot_dimension_numbers<[1], [0], [0], [1], [0, 0, 1, 1], [], []>} : vector<16x256xbf16>, vector<256x256xbf16>, vector<16x256xf32> -> vector<16x256xf32>
    %34 = vector.extract_strided_slice %28 {offsets = [1, 0], sizes = [16, 256], strides = [1, 1]} : vector<18x256xf32> to vector<16x256xf32>
    %35 = arith.truncf %34 : vector<16x256xf32> to vector<16x256xbf16>
    %c1_25 = arith.constant 1 : index
    %c0_26 = arith.constant 0 : index
    %c0_27 = arith.constant 0 : index
    %36 = vector.load %arg4[%c1_25, %c0_26, %c0_27] : memref<3x256x256xbf16, #tpu.memory_space<vmem>>, vector<1x256x256xbf16>
    %37 = vector.shape_cast %36 : vector<1x256x256xbf16> to vector<256x256xbf16>
    %cst_28 = arith.constant dense<0.000000e+00> : vector<16x256xf32>
    %38 = tpu.matmul %35, %37, %cst_28 {dimension_numbers = #tpu.dot_dimension_numbers<[1], [0], [0], [1], [0, 0, 1, 1], [], []>} : vector<16x256xbf16>, vector<256x256xbf16>, vector<16x256xf32> -> vector<16x256xf32>
    %39 = arith.addf %33, %38 : vector<16x256xf32>
    %40 = vector.extract_strided_slice %28 {offsets = [2, 0], sizes = [16, 256], strides = [1, 1]} : vector<18x256xf32> to vector<16x256xf32>
    %41 = arith.truncf %40 : vector<16x256xf32> to vector<16x256xbf16>
    %c2_29 = arith.constant 2 : index
    %c0_30 = arith.constant 0 : index
    %c0_31 = arith.constant 0 : index
    %42 = vector.load %arg4[%c2_29, %c0_30, %c0_31] : memref<3x256x256xbf16, #tpu.memory_space<vmem>>, vector<1x256x256xbf16>
    %43 = vector.shape_cast %42 : vector<1x256x256xbf16> to vector<256x256xbf16>
    %cst_32 = arith.constant dense<0.000000e+00> : vector<16x256xf32>
    %44 = tpu.matmul %41, %43, %cst_32 {dimension_numbers = #tpu.dot_dimension_numbers<[1], [0], [0], [1], [0, 0, 1, 1], [], []>} : vector<16x256xbf16>, vector<256x256xbf16>, vector<16x256xf32> -> vector<16x256xf32>
    %45 = arith.addf %39, %44 : vector<16x256xf32>
    %c0_33 = arith.constant 0 : index
    %c0_34 = arith.constant 0 : index
    %46 = vector.load %arg5[%c0_33, %c0_34] : memref<1x256xf32, #tpu.memory_space<vmem>>, vector<1x256xf32>
    %47 = vector.broadcast %46 : vector<1x256xf32> to vector<16x256xf32>
    %48 = arith.addf %45, %47 : vector<16x256xf32>
    %49 = vector.extract_strided_slice %2 {offsets = [1, 0], sizes = [16, 256], strides = [1, 1]} : vector<18x256xf32> to vector<16x256xf32>
    %50 = arith.addf %48, %49 : vector<16x256xf32>
    %cst_35 = arith.constant 0.000000e+00 : f32
    %51 = vector.broadcast %cst_35 : f32 to vector<16x256xf32>
    %52 = arith.maximumf %50, %51 : vector<16x256xf32>
    %53 = arith.truncf %52 : vector<16x256xf32> to vector<16x256xbf16>
    %c0_36 = arith.constant 0 : index
    %c0_37 = arith.constant 0 : index
    %c0_38 = arith.constant 0 : index
    %54 = vector.load %arg6[%c0_36, %c0_37, %c0_38] : memref<1x16x256xbf16, #tpu.memory_space<vmem>>, vector<1x16x256xbf16>
    %55 = vector.shape_cast %54 : vector<1x16x256xbf16> to vector<16x256xbf16>
    %56 = vector.shape_cast %53 : vector<16x256xbf16> to vector<1x16x256xbf16>
    tpu.vector_store %arg6[%c0_36, %c0_37, %c0_38], %56 {strides = array<i32>} : memref<1x16x256xbf16, #tpu.memory_space<vmem>>, vector<1x16x256xbf16>,
    return
  }
  func.func @transform_0(%arg0: i32) -> (i32, i32, i32) {
    %c0_i32 = arith.constant 0 : i32
    %c0_i32_0 = arith.constant 0 : i32
    %c0_i32_1 = arith.constant 0 : i32
    return %arg0, %c0_i32, %c0_i32_0 : i32, i32, i32
  }
  func.func @transform_1(%arg0: i32) -> (i32, i32, i32) {
    %c0_i32 = arith.constant 0 : i32
    %c0_i32_0 = arith.constant 0 : i32
    %c0_i32_1 = arith.constant 0 : i32
    %c0_i32_2 = arith.constant 0 : i32
    return %c0_i32, %c0_i32_0, %c0_i32_1 : i32, i32, i32
  }
  func.func @transform_2(%arg0: i32) -> (i32, i32) {
    %c0_i32 = arith.constant 0 : i32
    %c0_i32_0 = arith.constant 0 : i32
    %c0_i32_1 = arith.constant 0 : i32
    return %c0_i32, %c0_i32_0 : i32, i32
  }
  func.func @transform_3(%arg0: i32) -> (i32, i32, i32) {
    %c0_i32 = arith.constant 0 : i32
    %c0_i32_0 = arith.constant 0 : i32
    %c0_i32_1 = arith.constant 0 : i32
    %c0_i32_2 = arith.constant 0 : i32
    return %c0_i32, %c0_i32_0, %c0_i32_1 : i32, i32, i32
  }
  func.func @transform_4(%arg0: i32) -> (i32, i32) {
    %c0_i32 = arith.constant 0 : i32
    %c0_i32_0 = arith.constant 0 : i32
    %c0_i32_1 = arith.constant 0 : i32
    return %c0_i32, %c0_i32_0 : i32, i32
  }
  func.func @transform_5(%arg0: i32) -> (i32, i32, i32) {
    %c0_i32 = arith.constant 0 : i32
    %c0_i32_0 = arith.constant 0 : i32
    %c0_i32_1 = arith.constant 0 : i32
    return %arg0, %c0_i32, %c0_i32_0 : i32, i32, i32
  }
}

module attributes {stable_mosaic.version = 11 : i64} {
  func.func @kernel(%arg0: i32, %arg1: memref<1x9x256xbf16, #tpu.memory_space<vmem>>, %arg2: memref<1x9x256xbf16, #tpu.memory_space<vmem>>, %arg3: memref<3x256x256xbf16, #tpu.memory_space<vmem>>, %arg4: memref<1x256xf32, #tpu.memory_space<vmem>>, %arg5: memref<3x256x256xbf16, #tpu.memory_space<vmem>>, %arg6: memref<1x256xf32, #tpu.memory_space<vmem>>, %arg7: memref<256x256xbf16, #tpu.memory_space<vmem>>, %arg8: memref<1x256xf32, #tpu.memory_space<vmem>>, %arg9: memref<1x8x256xbf16, #tpu.memory_space<vmem>>, %arg10: memref<10x256xf32, #tpu.memory_space<vmem>>) attributes {dimension_semantics = [#tpu.dimension_semantics<parallel>], iteration_bounds = array<i64: 2>, scalar_prefetch = 0 : i64, scratch_operands = 1 : i64, tpu.core_type = #tpu.core_type<tc>, window_params = [{transform_indices = @transform_0, window_bounds = array<i64: 1, 9, 256>}, {transform_indices = @transform_1, window_bounds = array<i64: 1, 9, 256>}, {pipeline_mode = #tpu.pipeline_mode<synchronous>, transform_indices = @transform_2, window_bounds = array<i64: 3, 256, 256>}, {pipeline_mode = #tpu.pipeline_mode<synchronous>, transform_indices = @transform_3, window_bounds = array<i64: 1, 256>}, {pipeline_mode = #tpu.pipeline_mode<synchronous>, transform_indices = @transform_4, window_bounds = array<i64: 3, 256, 256>}, {pipeline_mode = #tpu.pipeline_mode<synchronous>, transform_indices = @transform_5, window_bounds = array<i64: 1, 256>}, {pipeline_mode = #tpu.pipeline_mode<synchronous>, transform_indices = @transform_6, window_bounds = array<i64: 256, 256>}, {pipeline_mode = #tpu.pipeline_mode<synchronous>, transform_indices = @transform_7, window_bounds = array<i64: 1, 256>}, {transform_indices = @transform_8, window_bounds = array<i64: 1, 8, 256>}]} {
    %c0 = arith.constant 0 : index
    %c0_0 = arith.constant 0 : index
    %c0_1 = arith.constant 0 : index
    %0 = vector.load %arg1[%c0, %c0_0, %c0_1] : memref<1x9x256xbf16, #tpu.memory_space<vmem>>, vector<1x9x256xbf16>
    %1 = vector.shape_cast %0 : vector<1x9x256xbf16> to vector<9x256xbf16>
    %2 = arith.extf %1 : vector<9x256xbf16> to vector<9x256xf32>
    %c0_2 = arith.constant 0 : index
    %c0_3 = arith.constant 0 : index
    %c0_4 = arith.constant 0 : index
    %3 = vector.load %arg2[%c0_2, %c0_3, %c0_4] : memref<1x9x256xbf16, #tpu.memory_space<vmem>>, vector<1x9x256xbf16>
    %4 = vector.shape_cast %3 : vector<1x9x256xbf16> to vector<9x256xbf16>
    %5 = arith.extf %4 : vector<9x256xbf16> to vector<9x256xf32>
    %6 = vector.extract_strided_slice %2 {offsets = [0, 0], sizes = [8, 256], strides = [1, 1]} : vector<9x256xf32> to vector<8x256xf32>
    %7 = arith.truncf %6 : vector<8x256xf32> to vector<8x256xbf16>
    %c0_5 = arith.constant 0 : index
    %c0_6 = arith.constant 0 : index
    %c0_7 = arith.constant 0 : index
    %8 = vector.load %arg3[%c0_5, %c0_6, %c0_7] : memref<3x256x256xbf16, #tpu.memory_space<vmem>>, vector<1x256x256xbf16>
    %9 = vector.shape_cast %8 : vector<1x256x256xbf16> to vector<256x256xbf16>
    %cst = arith.constant dense<0.000000e+00> : vector<8x256xf32>
    %10 = tpu.matmul %7, %9, %cst {dimension_numbers = #tpu.dot_dimension_numbers<[1], [0], [0], [1], [0, 0, 1, 1], [], []>} : vector<8x256xbf16>, vector<256x256xbf16>, vector<8x256xf32> -> vector<8x256xf32>
    %11 = vector.extract_strided_slice %5 {offsets = [0, 0], sizes = [8, 256], strides = [1, 1]} : vector<9x256xf32> to vector<8x256xf32>
    %12 = arith.truncf %11 : vector<8x256xf32> to vector<8x256xbf16>
    %c1 = arith.constant 1 : index
    %c0_8 = arith.constant 0 : index
    %c0_9 = arith.constant 0 : index
    %13 = vector.load %arg3[%c1, %c0_8, %c0_9] : memref<3x256x256xbf16, #tpu.memory_space<vmem>>, vector<1x256x256xbf16>
    %14 = vector.shape_cast %13 : vector<1x256x256xbf16> to vector<256x256xbf16>
    %cst_10 = arith.constant dense<0.000000e+00> : vector<8x256xf32>
    %15 = tpu.matmul %12, %14, %cst_10 {dimension_numbers = #tpu.dot_dimension_numbers<[1], [0], [0], [1], [0, 0, 1, 1], [], []>} : vector<8x256xbf16>, vector<256x256xbf16>, vector<8x256xf32> -> vector<8x256xf32>
    %16 = arith.addf %10, %15 : vector<8x256xf32>
    %17 = vector.extract_strided_slice %2 {offsets = [1, 0], sizes = [8, 256], strides = [1, 1]} : vector<9x256xf32> to vector<8x256xf32>
    %18 = arith.truncf %17 : vector<8x256xf32> to vector<8x256xbf16>
    %c2 = arith.constant 2 : index
    %c0_11 = arith.constant 0 : index
    %c0_12 = arith.constant 0 : index
    %19 = vector.load %arg3[%c2, %c0_11, %c0_12] : memref<3x256x256xbf16, #tpu.memory_space<vmem>>, vector<1x256x256xbf16>
    %20 = vector.shape_cast %19 : vector<1x256x256xbf16> to vector<256x256xbf16>
    %cst_13 = arith.constant dense<0.000000e+00> : vector<8x256xf32>
    %21 = tpu.matmul %18, %20, %cst_13 {dimension_numbers = #tpu.dot_dimension_numbers<[1], [0], [0], [1], [0, 0, 1, 1], [], []>} : vector<8x256xbf16>, vector<256x256xbf16>, vector<8x256xf32> -> vector<8x256xf32>
    %22 = arith.addf %16, %21 : vector<8x256xf32>
    %c0_14 = arith.constant 0 : index
    %c0_15 = arith.constant 0 : index
    %23 = vector.load %arg4[%c0_14, %c0_15] : memref<1x256xf32, #tpu.memory_space<vmem>>, vector<1x256xf32>
    %24 = vector.broadcast %23 : vector<1x256xf32> to vector<8x256xf32>
    %25 = arith.addf %22, %24 : vector<8x256xf32>
    %cst_16 = arith.constant 0.000000e+00 : f32
    %26 = vector.broadcast %cst_16 : f32 to vector<8x256xf32>
    %27 = arith.maximumf %25, %26 : vector<8x256xf32>
    %28 = vector.extract_strided_slice %5 {offsets = [0, 0], sizes = [8, 256], strides = [1, 1]} : vector<9x256xf32> to vector<8x256xf32>
    %29 = arith.truncf %28 : vector<8x256xf32> to vector<8x256xbf16>
    %c0_17 = arith.constant 0 : index
    %c0_18 = arith.constant 0 : index
    %30 = vector.load %arg7[%c0_17, %c0_18] : memref<256x256xbf16, #tpu.memory_space<vmem>>, vector<256x256xbf16>
    %cst_19 = arith.constant dense<0.000000e+00> : vector<8x256xf32>
    %31 = tpu.matmul %29, %30, %cst_19 {dimension_numbers = #tpu.dot_dimension_numbers<[1], [0], [0], [1], [0, 0, 1, 1], [], []>} : vector<8x256xbf16>, vector<256x256xbf16>, vector<8x256xf32> -> vector<8x256xf32>
    %c0_20 = arith.constant 0 : index
    %c0_21 = arith.constant 0 : index
    %32 = vector.load %arg8[%c0_20, %c0_21] : memref<1x256xf32, #tpu.memory_space<vmem>>, vector<1x256xf32>
    %33 = vector.broadcast %32 : vector<1x256xf32> to vector<8x256xf32>
    %34 = arith.addf %31, %33 : vector<8x256xf32>
    %cst_22 = arith.constant 0.000000e+00 : f32
    %35 = vector.broadcast %cst_22 : f32 to vector<10x256xf32>
    %c0_23 = arith.constant 0 : index
    %c0_24 = arith.constant 0 : index
    %36 = vector.load %arg10[%c0_23, %c0_24] : memref<10x256xf32, #tpu.memory_space<vmem>>, vector<10x256xf32>
    tpu.vector_store %arg10[%c0_23, %c0_24], %35 {strides = array<i32>} : memref<10x256xf32, #tpu.memory_space<vmem>>, vector<10x256xf32>,
    %c1_25 = arith.constant 1 : index
    %c0_26 = arith.constant 0 : index
    %37 = vector.load %arg10[%c1_25, %c0_26] : memref<10x256xf32, #tpu.memory_space<vmem>>, vector<8x256xf32>
    tpu.vector_store %arg10[%c1_25, %c0_26], %27 {strides = array<i32>} : memref<10x256xf32, #tpu.memory_space<vmem>>, vector<8x256xf32>,
    %c0_27 = arith.constant 0 : index
    %c0_28 = arith.constant 0 : index
    %38 = vector.load %arg10[%c0_27, %c0_28] : memref<10x256xf32, #tpu.memory_space<vmem>>, vector<10x256xf32>
    %39 = vector.extract_strided_slice %38 {offsets = [0, 0], sizes = [8, 256], strides = [1, 1]} : vector<10x256xf32> to vector<8x256xf32>
    %40 = arith.truncf %39 : vector<8x256xf32> to vector<8x256xbf16>
    %c0_29 = arith.constant 0 : index
    %c0_30 = arith.constant 0 : index
    %c0_31 = arith.constant 0 : index
    %41 = vector.load %arg5[%c0_29, %c0_30, %c0_31] : memref<3x256x256xbf16, #tpu.memory_space<vmem>>, vector<1x256x256xbf16>
    %42 = vector.shape_cast %41 : vector<1x256x256xbf16> to vector<256x256xbf16>
    %cst_32 = arith.constant dense<0.000000e+00> : vector<8x256xf32>
    %43 = tpu.matmul %40, %42, %cst_32 {dimension_numbers = #tpu.dot_dimension_numbers<[1], [0], [0], [1], [0, 0, 1, 1], [], []>} : vector<8x256xbf16>, vector<256x256xbf16>, vector<8x256xf32> -> vector<8x256xf32>
    %44 = vector.extract_strided_slice %38 {offsets = [1, 0], sizes = [8, 256], strides = [1, 1]} : vector<10x256xf32> to vector<8x256xf32>
    %45 = arith.truncf %44 : vector<8x256xf32> to vector<8x256xbf16>
    %c1_33 = arith.constant 1 : index
    %c0_34 = arith.constant 0 : index
    %c0_35 = arith.constant 0 : index
    %46 = vector.load %arg5[%c1_33, %c0_34, %c0_35] : memref<3x256x256xbf16, #tpu.memory_space<vmem>>, vector<1x256x256xbf16>
    %47 = vector.shape_cast %46 : vector<1x256x256xbf16> to vector<256x256xbf16>
    %cst_36 = arith.constant dense<0.000000e+00> : vector<8x256xf32>
    %48 = tpu.matmul %45, %47, %cst_36 {dimension_numbers = #tpu.dot_dimension_numbers<[1], [0], [0], [1], [0, 0, 1, 1], [], []>} : vector<8x256xbf16>, vector<256x256xbf16>, vector<8x256xf32> -> vector<8x256xf32>
    %49 = arith.addf %43, %48 : vector<8x256xf32>
    %50 = vector.extract_strided_slice %38 {offsets = [2, 0], sizes = [8, 256], strides = [1, 1]} : vector<10x256xf32> to vector<8x256xf32>
    %51 = arith.truncf %50 : vector<8x256xf32> to vector<8x256xbf16>
    %c2_37 = arith.constant 2 : index
    %c0_38 = arith.constant 0 : index
    %c0_39 = arith.constant 0 : index
    %52 = vector.load %arg5[%c2_37, %c0_38, %c0_39] : memref<3x256x256xbf16, #tpu.memory_space<vmem>>, vector<1x256x256xbf16>
    %53 = vector.shape_cast %52 : vector<1x256x256xbf16> to vector<256x256xbf16>
    %cst_40 = arith.constant dense<0.000000e+00> : vector<8x256xf32>
    %54 = tpu.matmul %51, %53, %cst_40 {dimension_numbers = #tpu.dot_dimension_numbers<[1], [0], [0], [1], [0, 0, 1, 1], [], []>} : vector<8x256xbf16>, vector<256x256xbf16>, vector<8x256xf32> -> vector<8x256xf32>
    %55 = arith.addf %49, %54 : vector<8x256xf32>
    %c0_41 = arith.constant 0 : index
    %c0_42 = arith.constant 0 : index
    %56 = vector.load %arg6[%c0_41, %c0_42] : memref<1x256xf32, #tpu.memory_space<vmem>>, vector<1x256xf32>
    %57 = vector.broadcast %56 : vector<1x256xf32> to vector<8x256xf32>
    %58 = arith.addf %55, %57 : vector<8x256xf32>
    %59 = arith.addf %58, %34 : vector<8x256xf32>
    %cst_43 = arith.constant 0.000000e+00 : f32
    %60 = vector.broadcast %cst_43 : f32 to vector<8x256xf32>
    %61 = arith.maximumf %59, %60 : vector<8x256xf32>
    %62 = arith.truncf %61 : vector<8x256xf32> to vector<8x256xbf16>
    %c0_44 = arith.constant 0 : index
    %c0_45 = arith.constant 0 : index
    %c0_46 = arith.constant 0 : index
    %63 = vector.load %arg9[%c0_44, %c0_45, %c0_46] : memref<1x8x256xbf16, #tpu.memory_space<vmem>>, vector<1x8x256xbf16>
    %64 = vector.shape_cast %63 : vector<1x8x256xbf16> to vector<8x256xbf16>
    %65 = vector.shape_cast %62 : vector<8x256xbf16> to vector<1x8x256xbf16>
    tpu.vector_store %arg9[%c0_44, %c0_45, %c0_46], %65 {strides = array<i32>} : memref<1x8x256xbf16, #tpu.memory_space<vmem>>, vector<1x8x256xbf16>,
    return
  }
  func.func @transform_0(%arg0: i32) -> (i32, i32, i32) {
    %c0_i32 = arith.constant 0 : i32
    %c0_i32_0 = arith.constant 0 : i32
    %c0_i32_1 = arith.constant 0 : i32
    return %arg0, %c0_i32, %c0_i32_0 : i32, i32, i32
  }
  func.func @transform_1(%arg0: i32) -> (i32, i32, i32) {
    %c0_i32 = arith.constant 0 : i32
    %c0_i32_0 = arith.constant 0 : i32
    %c0_i32_1 = arith.constant 0 : i32
    return %arg0, %c0_i32, %c0_i32_0 : i32, i32, i32
  }
  func.func @transform_2(%arg0: i32) -> (i32, i32, i32) {
    %c0_i32 = arith.constant 0 : i32
    %c0_i32_0 = arith.constant 0 : i32
    %c0_i32_1 = arith.constant 0 : i32
    %c0_i32_2 = arith.constant 0 : i32
    return %c0_i32, %c0_i32_0, %c0_i32_1 : i32, i32, i32
  }
  func.func @transform_3(%arg0: i32) -> (i32, i32) {
    %c0_i32 = arith.constant 0 : i32
    %c0_i32_0 = arith.constant 0 : i32
    %c0_i32_1 = arith.constant 0 : i32
    return %c0_i32, %c0_i32_0 : i32, i32
  }
  func.func @transform_4(%arg0: i32) -> (i32, i32, i32) {
    %c0_i32 = arith.constant 0 : i32
    %c0_i32_0 = arith.constant 0 : i32
    %c0_i32_1 = arith.constant 0 : i32
    %c0_i32_2 = arith.constant 0 : i32
    return %c0_i32, %c0_i32_0, %c0_i32_1 : i32, i32, i32
  }
  func.func @transform_5(%arg0: i32) -> (i32, i32) {
    %c0_i32 = arith.constant 0 : i32
    %c0_i32_0 = arith.constant 0 : i32
    %c0_i32_1 = arith.constant 0 : i32
    return %c0_i32, %c0_i32_0 : i32, i32
  }
  func.func @transform_6(%arg0: i32) -> (i32, i32) {
    %c0_i32 = arith.constant 0 : i32
    %c0_i32_0 = arith.constant 0 : i32
    %c0_i32_1 = arith.constant 0 : i32
    return %c0_i32, %c0_i32_0 : i32, i32
  }
  func.func @transform_7(%arg0: i32) -> (i32, i32) {
    %c0_i32 = arith.constant 0 : i32
    %c0_i32_0 = arith.constant 0 : i32
    %c0_i32_1 = arith.constant 0 : i32
    return %c0_i32, %c0_i32_0 : i32, i32
  }
  func.func @transform_8(%arg0: i32) -> (i32, i32, i32) {
    %c0_i32 = arith.constant 0 : i32
    %c0_i32_0 = arith.constant 0 : i32
    %c0_i32_1 = arith.constant 0 : i32
    return %arg0, %c0_i32, %c0_i32_0 : i32, i32, i32
  }
}

module attributes {stable_mosaic.version = 11 : i64} {
  func.func @kernel(%arg0: i32, %arg1: memref<1x10x256xbf16, #tpu.memory_space<vmem>>, %arg2: memref<3x256x256xbf16, #tpu.memory_space<vmem>>, %arg3: memref<1x256xf32, #tpu.memory_space<vmem>>, %arg4: memref<3x256x256xbf16, #tpu.memory_space<vmem>>, %arg5: memref<1x256xf32, #tpu.memory_space<vmem>>, %arg6: memref<1x8x256xbf16, #tpu.memory_space<vmem>>, %arg7: memref<10x256xf32, #tpu.memory_space<vmem>>) attributes {dimension_semantics = [#tpu.dimension_semantics<parallel>], iteration_bounds = array<i64: 2>, scalar_prefetch = 0 : i64, scratch_operands = 1 : i64, tpu.core_type = #tpu.core_type<tc>, window_params = [{transform_indices = @transform_0, window_bounds = array<i64: 1, 10, 256>}, {pipeline_mode = #tpu.pipeline_mode<synchronous>, transform_indices = @transform_1, window_bounds = array<i64: 3, 256, 256>}, {pipeline_mode = #tpu.pipeline_mode<synchronous>, transform_indices = @transform_2, window_bounds = array<i64: 1, 256>}, {pipeline_mode = #tpu.pipeline_mode<synchronous>, transform_indices = @transform_3, window_bounds = array<i64: 3, 256, 256>}, {pipeline_mode = #tpu.pipeline_mode<synchronous>, transform_indices = @transform_4, window_bounds = array<i64: 1, 256>}, {transform_indices = @transform_5, window_bounds = array<i64: 1, 8, 256>}]} {
    %c0 = arith.constant 0 : index
    %c0_0 = arith.constant 0 : index
    %c0_1 = arith.constant 0 : index
    %0 = vector.load %arg1[%c0, %c0_0, %c0_1] : memref<1x10x256xbf16, #tpu.memory_space<vmem>>, vector<1x10x256xbf16>
    %1 = vector.shape_cast %0 : vector<1x10x256xbf16> to vector<10x256xbf16>
    %2 = arith.extf %1 : vector<10x256xbf16> to vector<10x256xf32>
    %3 = vector.extract_strided_slice %2 {offsets = [0, 0], sizes = [8, 256], strides = [1, 1]} : vector<10x256xf32> to vector<8x256xf32>
    %4 = arith.truncf %3 : vector<8x256xf32> to vector<8x256xbf16>
    %c0_2 = arith.constant 0 : index
    %c0_3 = arith.constant 0 : index
    %c0_4 = arith.constant 0 : index
    %5 = vector.load %arg2[%c0_2, %c0_3, %c0_4] : memref<3x256x256xbf16, #tpu.memory_space<vmem>>, vector<1x256x256xbf16>
    %6 = vector.shape_cast %5 : vector<1x256x256xbf16> to vector<256x256xbf16>
    %cst = arith.constant dense<0.000000e+00> : vector<8x256xf32>
    %7 = tpu.matmul %4, %6, %cst {dimension_numbers = #tpu.dot_dimension_numbers<[1], [0], [0], [1], [0, 0, 1, 1], [], []>} : vector<8x256xbf16>, vector<256x256xbf16>, vector<8x256xf32> -> vector<8x256xf32>
    %8 = vector.extract_strided_slice %2 {offsets = [1, 0], sizes = [8, 256], strides = [1, 1]} : vector<10x256xf32> to vector<8x256xf32>
    %9 = arith.truncf %8 : vector<8x256xf32> to vector<8x256xbf16>
    %c1 = arith.constant 1 : index
    %c0_5 = arith.constant 0 : index
    %c0_6 = arith.constant 0 : index
    %10 = vector.load %arg2[%c1, %c0_5, %c0_6] : memref<3x256x256xbf16, #tpu.memory_space<vmem>>, vector<1x256x256xbf16>
    %11 = vector.shape_cast %10 : vector<1x256x256xbf16> to vector<256x256xbf16>
    %cst_7 = arith.constant dense<0.000000e+00> : vector<8x256xf32>
    %12 = tpu.matmul %9, %11, %cst_7 {dimension_numbers = #tpu.dot_dimension_numbers<[1], [0], [0], [1], [0, 0, 1, 1], [], []>} : vector<8x256xbf16>, vector<256x256xbf16>, vector<8x256xf32> -> vector<8x256xf32>
    %13 = arith.addf %7, %12 : vector<8x256xf32>
    %14 = vector.extract_strided_slice %2 {offsets = [2, 0], sizes = [8, 256], strides = [1, 1]} : vector<10x256xf32> to vector<8x256xf32>
    %15 = arith.truncf %14 : vector<8x256xf32> to vector<8x256xbf16>
    %c2 = arith.constant 2 : index
    %c0_8 = arith.constant 0 : index
    %c0_9 = arith.constant 0 : index
    %16 = vector.load %arg2[%c2, %c0_8, %c0_9] : memref<3x256x256xbf16, #tpu.memory_space<vmem>>, vector<1x256x256xbf16>
    %17 = vector.shape_cast %16 : vector<1x256x256xbf16> to vector<256x256xbf16>
    %cst_10 = arith.constant dense<0.000000e+00> : vector<8x256xf32>
    %18 = tpu.matmul %15, %17, %cst_10 {dimension_numbers = #tpu.dot_dimension_numbers<[1], [0], [0], [1], [0, 0, 1, 1], [], []>} : vector<8x256xbf16>, vector<256x256xbf16>, vector<8x256xf32> -> vector<8x256xf32>
    %19 = arith.addf %13, %18 : vector<8x256xf32>
    %c0_11 = arith.constant 0 : index
    %c0_12 = arith.constant 0 : index
    %20 = vector.load %arg3[%c0_11, %c0_12] : memref<1x256xf32, #tpu.memory_space<vmem>>, vector<1x256xf32>
    %21 = vector.broadcast %20 : vector<1x256xf32> to vector<8x256xf32>
    %22 = arith.addf %19, %21 : vector<8x256xf32>
    %cst_13 = arith.constant 0.000000e+00 : f32
    %23 = vector.broadcast %cst_13 : f32 to vector<8x256xf32>
    %24 = arith.maximumf %22, %23 : vector<8x256xf32>
    %cst_14 = arith.constant 0.000000e+00 : f32
    %25 = vector.broadcast %cst_14 : f32 to vector<10x256xf32>
    %c0_15 = arith.constant 0 : index
    %c0_16 = arith.constant 0 : index
    %26 = vector.load %arg7[%c0_15, %c0_16] : memref<10x256xf32, #tpu.memory_space<vmem>>, vector<10x256xf32>
    tpu.vector_store %arg7[%c0_15, %c0_16], %25 {strides = array<i32>} : memref<10x256xf32, #tpu.memory_space<vmem>>, vector<10x256xf32>,
    %c1_17 = arith.constant 1 : index
    %c0_18 = arith.constant 0 : index
    %27 = vector.load %arg7[%c1_17, %c0_18] : memref<10x256xf32, #tpu.memory_space<vmem>>, vector<8x256xf32>
    tpu.vector_store %arg7[%c1_17, %c0_18], %24 {strides = array<i32>} : memref<10x256xf32, #tpu.memory_space<vmem>>, vector<8x256xf32>,
    %c0_19 = arith.constant 0 : index
    %c0_20 = arith.constant 0 : index
    %28 = vector.load %arg7[%c0_19, %c0_20] : memref<10x256xf32, #tpu.memory_space<vmem>>, vector<10x256xf32>
    %29 = vector.extract_strided_slice %28 {offsets = [0, 0], sizes = [8, 256], strides = [1, 1]} : vector<10x256xf32> to vector<8x256xf32>
    %30 = arith.truncf %29 : vector<8x256xf32> to vector<8x256xbf16>
    %c0_21 = arith.constant 0 : index
    %c0_22 = arith.constant 0 : index
    %c0_23 = arith.constant 0 : index
    %31 = vector.load %arg4[%c0_21, %c0_22, %c0_23] : memref<3x256x256xbf16, #tpu.memory_space<vmem>>, vector<1x256x256xbf16>
    %32 = vector.shape_cast %31 : vector<1x256x256xbf16> to vector<256x256xbf16>
    %cst_24 = arith.constant dense<0.000000e+00> : vector<8x256xf32>
    %33 = tpu.matmul %30, %32, %cst_24 {dimension_numbers = #tpu.dot_dimension_numbers<[1], [0], [0], [1], [0, 0, 1, 1], [], []>} : vector<8x256xbf16>, vector<256x256xbf16>, vector<8x256xf32> -> vector<8x256xf32>
    %34 = vector.extract_strided_slice %28 {offsets = [1, 0], sizes = [8, 256], strides = [1, 1]} : vector<10x256xf32> to vector<8x256xf32>
    %35 = arith.truncf %34 : vector<8x256xf32> to vector<8x256xbf16>
    %c1_25 = arith.constant 1 : index
    %c0_26 = arith.constant 0 : index
    %c0_27 = arith.constant 0 : index
    %36 = vector.load %arg4[%c1_25, %c0_26, %c0_27] : memref<3x256x256xbf16, #tpu.memory_space<vmem>>, vector<1x256x256xbf16>
    %37 = vector.shape_cast %36 : vector<1x256x256xbf16> to vector<256x256xbf16>
    %cst_28 = arith.constant dense<0.000000e+00> : vector<8x256xf32>
    %38 = tpu.matmul %35, %37, %cst_28 {dimension_numbers = #tpu.dot_dimension_numbers<[1], [0], [0], [1], [0, 0, 1, 1], [], []>} : vector<8x256xbf16>, vector<256x256xbf16>, vector<8x256xf32> -> vector<8x256xf32>
    %39 = arith.addf %33, %38 : vector<8x256xf32>
    %40 = vector.extract_strided_slice %28 {offsets = [2, 0], sizes = [8, 256], strides = [1, 1]} : vector<10x256xf32> to vector<8x256xf32>
    %41 = arith.truncf %40 : vector<8x256xf32> to vector<8x256xbf16>
    %c2_29 = arith.constant 2 : index
    %c0_30 = arith.constant 0 : index
    %c0_31 = arith.constant 0 : index
    %42 = vector.load %arg4[%c2_29, %c0_30, %c0_31] : memref<3x256x256xbf16, #tpu.memory_space<vmem>>, vector<1x256x256xbf16>
    %43 = vector.shape_cast %42 : vector<1x256x256xbf16> to vector<256x256xbf16>
    %cst_32 = arith.constant dense<0.000000e+00> : vector<8x256xf32>
    %44 = tpu.matmul %41, %43, %cst_32 {dimension_numbers = #tpu.dot_dimension_numbers<[1], [0], [0], [1], [0, 0, 1, 1], [], []>} : vector<8x256xbf16>, vector<256x256xbf16>, vector<8x256xf32> -> vector<8x256xf32>
    %45 = arith.addf %39, %44 : vector<8x256xf32>
    %c0_33 = arith.constant 0 : index
    %c0_34 = arith.constant 0 : index
    %46 = vector.load %arg5[%c0_33, %c0_34] : memref<1x256xf32, #tpu.memory_space<vmem>>, vector<1x256xf32>
    %47 = vector.broadcast %46 : vector<1x256xf32> to vector<8x256xf32>
    %48 = arith.addf %45, %47 : vector<8x256xf32>
    %49 = vector.extract_strided_slice %2 {offsets = [1, 0], sizes = [8, 256], strides = [1, 1]} : vector<10x256xf32> to vector<8x256xf32>
    %50 = arith.addf %48, %49 : vector<8x256xf32>
    %cst_35 = arith.constant 0.000000e+00 : f32
    %51 = vector.broadcast %cst_35 : f32 to vector<8x256xf32>
    %52 = arith.maximumf %50, %51 : vector<8x256xf32>
    %53 = arith.truncf %52 : vector<8x256xf32> to vector<8x256xbf16>
    %c0_36 = arith.constant 0 : index
    %c0_37 = arith.constant 0 : index
    %c0_38 = arith.constant 0 : index
    %54 = vector.load %arg6[%c0_36, %c0_37, %c0_38] : memref<1x8x256xbf16, #tpu.memory_space<vmem>>, vector<1x8x256xbf16>
    %55 = vector.shape_cast %54 : vector<1x8x256xbf16> to vector<8x256xbf16>
    %56 = vector.shape_cast %53 : vector<8x256xbf16> to vector<1x8x256xbf16>
    tpu.vector_store %arg6[%c0_36, %c0_37, %c0_38], %56 {strides = array<i32>} : memref<1x8x256xbf16, #tpu.memory_space<vmem>>, vector<1x8x256xbf16>,
    return
  }
  func.func @transform_0(%arg0: i32) -> (i32, i32, i32) {
    %c0_i32 = arith.constant 0 : i32
    %c0_i32_0 = arith.constant 0 : i32
    %c0_i32_1 = arith.constant 0 : i32
    return %arg0, %c0_i32, %c0_i32_0 : i32, i32, i32
  }
  func.func @transform_1(%arg0: i32) -> (i32, i32, i32) {
    %c0_i32 = arith.constant 0 : i32
    %c0_i32_0 = arith.constant 0 : i32
    %c0_i32_1 = arith.constant 0 : i32
    %c0_i32_2 = arith.constant 0 : i32
    return %c0_i32, %c0_i32_0, %c0_i32_1 : i32, i32, i32
  }
  func.func @transform_2(%arg0: i32) -> (i32, i32) {
    %c0_i32 = arith.constant 0 : i32
    %c0_i32_0 = arith.constant 0 : i32
    %c0_i32_1 = arith.constant 0 : i32
    return %c0_i32, %c0_i32_0 : i32, i32
  }
  func.func @transform_3(%arg0: i32) -> (i32, i32, i32) {
    %c0_i32 = arith.constant 0 : i32
    %c0_i32_0 = arith.constant 0 : i32
    %c0_i32_1 = arith.constant 0 : i32
    %c0_i32_2 = arith.constant 0 : i32
    return %c0_i32, %c0_i32_0, %c0_i32_1 : i32, i32, i32
  }
  func.func @transform_4(%arg0: i32) -> (i32, i32) {
    %c0_i32 = arith.constant 0 : i32
    %c0_i32_0 = arith.constant 0 : i32
    %c0_i32_1 = arith.constant 0 : i32
    return %c0_i32, %c0_i32_0 : i32, i32
  }
  func.func @transform_5(%arg0: i32) -> (i32, i32, i32) {
    %c0_i32 = arith.constant 0 : i32
    %c0_i32_0 = arith.constant 0 : i32
    %c0_i32_1 = arith.constant 0 : i32
    return %arg0, %c0_i32, %c0_i32_0 : i32, i32, i32
  }
}

module attributes {stable_mosaic.version = 11 : i64} {
  func.func @kernel(%arg0: i32, %arg1: memref<1x5x256xbf16, #tpu.memory_space<vmem>>, %arg2: memref<1x5x256xbf16, #tpu.memory_space<vmem>>, %arg3: memref<3x256x256xbf16, #tpu.memory_space<vmem>>, %arg4: memref<1x256xf32, #tpu.memory_space<vmem>>, %arg5: memref<3x256x256xbf16, #tpu.memory_space<vmem>>, %arg6: memref<1x256xf32, #tpu.memory_space<vmem>>, %arg7: memref<256x256xbf16, #tpu.memory_space<vmem>>, %arg8: memref<1x256xf32, #tpu.memory_space<vmem>>, %arg9: memref<1x4x256xbf16, #tpu.memory_space<vmem>>, %arg10: memref<6x256xf32, #tpu.memory_space<vmem>>) attributes {dimension_semantics = [#tpu.dimension_semantics<parallel>], iteration_bounds = array<i64: 2>, scalar_prefetch = 0 : i64, scratch_operands = 1 : i64, tpu.core_type = #tpu.core_type<tc>, window_params = [{transform_indices = @transform_0, window_bounds = array<i64: 1, 5, 256>}, {transform_indices = @transform_1, window_bounds = array<i64: 1, 5, 256>}, {pipeline_mode = #tpu.pipeline_mode<synchronous>, transform_indices = @transform_2, window_bounds = array<i64: 3, 256, 256>}, {pipeline_mode = #tpu.pipeline_mode<synchronous>, transform_indices = @transform_3, window_bounds = array<i64: 1, 256>}, {pipeline_mode = #tpu.pipeline_mode<synchronous>, transform_indices = @transform_4, window_bounds = array<i64: 3, 256, 256>}, {pipeline_mode = #tpu.pipeline_mode<synchronous>, transform_indices = @transform_5, window_bounds = array<i64: 1, 256>}, {pipeline_mode = #tpu.pipeline_mode<synchronous>, transform_indices = @transform_6, window_bounds = array<i64: 256, 256>}, {pipeline_mode = #tpu.pipeline_mode<synchronous>, transform_indices = @transform_7, window_bounds = array<i64: 1, 256>}, {transform_indices = @transform_8, window_bounds = array<i64: 1, 4, 256>}]} {
    %c0 = arith.constant 0 : index
    %c0_0 = arith.constant 0 : index
    %c0_1 = arith.constant 0 : index
    %0 = vector.load %arg1[%c0, %c0_0, %c0_1] : memref<1x5x256xbf16, #tpu.memory_space<vmem>>, vector<1x5x256xbf16>
    %1 = vector.shape_cast %0 : vector<1x5x256xbf16> to vector<5x256xbf16>
    %2 = arith.extf %1 : vector<5x256xbf16> to vector<5x256xf32>
    %c0_2 = arith.constant 0 : index
    %c0_3 = arith.constant 0 : index
    %c0_4 = arith.constant 0 : index
    %3 = vector.load %arg2[%c0_2, %c0_3, %c0_4] : memref<1x5x256xbf16, #tpu.memory_space<vmem>>, vector<1x5x256xbf16>
    %4 = vector.shape_cast %3 : vector<1x5x256xbf16> to vector<5x256xbf16>
    %5 = arith.extf %4 : vector<5x256xbf16> to vector<5x256xf32>
    %6 = vector.extract_strided_slice %2 {offsets = [0, 0], sizes = [4, 256], strides = [1, 1]} : vector<5x256xf32> to vector<4x256xf32>
    %7 = arith.truncf %6 : vector<4x256xf32> to vector<4x256xbf16>
    %c0_5 = arith.constant 0 : index
    %c0_6 = arith.constant 0 : index
    %c0_7 = arith.constant 0 : index
    %8 = vector.load %arg3[%c0_5, %c0_6, %c0_7] : memref<3x256x256xbf16, #tpu.memory_space<vmem>>, vector<1x256x256xbf16>
    %9 = vector.shape_cast %8 : vector<1x256x256xbf16> to vector<256x256xbf16>
    %cst = arith.constant dense<0.000000e+00> : vector<4x256xf32>
    %10 = tpu.matmul %7, %9, %cst {dimension_numbers = #tpu.dot_dimension_numbers<[1], [0], [0], [1], [0, 0, 1, 1], [], []>} : vector<4x256xbf16>, vector<256x256xbf16>, vector<4x256xf32> -> vector<4x256xf32>
    %11 = vector.extract_strided_slice %5 {offsets = [0, 0], sizes = [4, 256], strides = [1, 1]} : vector<5x256xf32> to vector<4x256xf32>
    %12 = arith.truncf %11 : vector<4x256xf32> to vector<4x256xbf16>
    %c1 = arith.constant 1 : index
    %c0_8 = arith.constant 0 : index
    %c0_9 = arith.constant 0 : index
    %13 = vector.load %arg3[%c1, %c0_8, %c0_9] : memref<3x256x256xbf16, #tpu.memory_space<vmem>>, vector<1x256x256xbf16>
    %14 = vector.shape_cast %13 : vector<1x256x256xbf16> to vector<256x256xbf16>
    %cst_10 = arith.constant dense<0.000000e+00> : vector<4x256xf32>
    %15 = tpu.matmul %12, %14, %cst_10 {dimension_numbers = #tpu.dot_dimension_numbers<[1], [0], [0], [1], [0, 0, 1, 1], [], []>} : vector<4x256xbf16>, vector<256x256xbf16>, vector<4x256xf32> -> vector<4x256xf32>
    %16 = arith.addf %10, %15 : vector<4x256xf32>
    %17 = vector.extract_strided_slice %2 {offsets = [1, 0], sizes = [4, 256], strides = [1, 1]} : vector<5x256xf32> to vector<4x256xf32>
    %18 = arith.truncf %17 : vector<4x256xf32> to vector<4x256xbf16>
    %c2 = arith.constant 2 : index
    %c0_11 = arith.constant 0 : index
    %c0_12 = arith.constant 0 : index
    %19 = vector.load %arg3[%c2, %c0_11, %c0_12] : memref<3x256x256xbf16, #tpu.memory_space<vmem>>, vector<1x256x256xbf16>
    %20 = vector.shape_cast %19 : vector<1x256x256xbf16> to vector<256x256xbf16>
    %cst_13 = arith.constant dense<0.000000e+00> : vector<4x256xf32>
    %21 = tpu.matmul %18, %20, %cst_13 {dimension_numbers = #tpu.dot_dimension_numbers<[1], [0], [0], [1], [0, 0, 1, 1], [], []>} : vector<4x256xbf16>, vector<256x256xbf16>, vector<4x256xf32> -> vector<4x256xf32>
    %22 = arith.addf %16, %21 : vector<4x256xf32>
    %c0_14 = arith.constant 0 : index
    %c0_15 = arith.constant 0 : index
    %23 = vector.load %arg4[%c0_14, %c0_15] : memref<1x256xf32, #tpu.memory_space<vmem>>, vector<1x256xf32>
    %24 = vector.broadcast %23 : vector<1x256xf32> to vector<4x256xf32>
    %25 = arith.addf %22, %24 : vector<4x256xf32>
    %cst_16 = arith.constant 0.000000e+00 : f32
    %26 = vector.broadcast %cst_16 : f32 to vector<4x256xf32>
    %27 = arith.maximumf %25, %26 : vector<4x256xf32>
    %28 = vector.extract_strided_slice %5 {offsets = [0, 0], sizes = [4, 256], strides = [1, 1]} : vector<5x256xf32> to vector<4x256xf32>
    %29 = arith.truncf %28 : vector<4x256xf32> to vector<4x256xbf16>
    %c0_17 = arith.constant 0 : index
    %c0_18 = arith.constant 0 : index
    %30 = vector.load %arg7[%c0_17, %c0_18] : memref<256x256xbf16, #tpu.memory_space<vmem>>, vector<256x256xbf16>
    %cst_19 = arith.constant dense<0.000000e+00> : vector<4x256xf32>
    %31 = tpu.matmul %29, %30, %cst_19 {dimension_numbers = #tpu.dot_dimension_numbers<[1], [0], [0], [1], [0, 0, 1, 1], [], []>} : vector<4x256xbf16>, vector<256x256xbf16>, vector<4x256xf32> -> vector<4x256xf32>
    %c0_20 = arith.constant 0 : index
    %c0_21 = arith.constant 0 : index
    %32 = vector.load %arg8[%c0_20, %c0_21] : memref<1x256xf32, #tpu.memory_space<vmem>>, vector<1x256xf32>
    %33 = vector.broadcast %32 : vector<1x256xf32> to vector<4x256xf32>
    %34 = arith.addf %31, %33 : vector<4x256xf32>
    %cst_22 = arith.constant 0.000000e+00 : f32
    %35 = vector.broadcast %cst_22 : f32 to vector<6x256xf32>
    %c0_23 = arith.constant 0 : index
    %c0_24 = arith.constant 0 : index
    %36 = vector.load %arg10[%c0_23, %c0_24] : memref<6x256xf32, #tpu.memory_space<vmem>>, vector<6x256xf32>
    tpu.vector_store %arg10[%c0_23, %c0_24], %35 {strides = array<i32>} : memref<6x256xf32, #tpu.memory_space<vmem>>, vector<6x256xf32>,
    %c1_25 = arith.constant 1 : index
    %c0_26 = arith.constant 0 : index
    %37 = vector.load %arg10[%c1_25, %c0_26] : memref<6x256xf32, #tpu.memory_space<vmem>>, vector<4x256xf32>
    tpu.vector_store %arg10[%c1_25, %c0_26], %27 {strides = array<i32>} : memref<6x256xf32, #tpu.memory_space<vmem>>, vector<4x256xf32>,
    %c0_27 = arith.constant 0 : index
    %c0_28 = arith.constant 0 : index
    %38 = vector.load %arg10[%c0_27, %c0_28] : memref<6x256xf32, #tpu.memory_space<vmem>>, vector<6x256xf32>
    %39 = vector.extract_strided_slice %38 {offsets = [0, 0], sizes = [4, 256], strides = [1, 1]} : vector<6x256xf32> to vector<4x256xf32>
    %40 = arith.truncf %39 : vector<4x256xf32> to vector<4x256xbf16>
    %c0_29 = arith.constant 0 : index
    %c0_30 = arith.constant 0 : index
    %c0_31 = arith.constant 0 : index
    %41 = vector.load %arg5[%c0_29, %c0_30, %c0_31] : memref<3x256x256xbf16, #tpu.memory_space<vmem>>, vector<1x256x256xbf16>
    %42 = vector.shape_cast %41 : vector<1x256x256xbf16> to vector<256x256xbf16>
    %cst_32 = arith.constant dense<0.000000e+00> : vector<4x256xf32>
    %43 = tpu.matmul %40, %42, %cst_32 {dimension_numbers = #tpu.dot_dimension_numbers<[1], [0], [0], [1], [0, 0, 1, 1], [], []>} : vector<4x256xbf16>, vector<256x256xbf16>, vector<4x256xf32> -> vector<4x256xf32>
    %44 = vector.extract_strided_slice %38 {offsets = [1, 0], sizes = [4, 256], strides = [1, 1]} : vector<6x256xf32> to vector<4x256xf32>
    %45 = arith.truncf %44 : vector<4x256xf32> to vector<4x256xbf16>
    %c1_33 = arith.constant 1 : index
    %c0_34 = arith.constant 0 : index
    %c0_35 = arith.constant 0 : index
    %46 = vector.load %arg5[%c1_33, %c0_34, %c0_35] : memref<3x256x256xbf16, #tpu.memory_space<vmem>>, vector<1x256x256xbf16>
    %47 = vector.shape_cast %46 : vector<1x256x256xbf16> to vector<256x256xbf16>
    %cst_36 = arith.constant dense<0.000000e+00> : vector<4x256xf32>
    %48 = tpu.matmul %45, %47, %cst_36 {dimension_numbers = #tpu.dot_dimension_numbers<[1], [0], [0], [1], [0, 0, 1, 1], [], []>} : vector<4x256xbf16>, vector<256x256xbf16>, vector<4x256xf32> -> vector<4x256xf32>
    %49 = arith.addf %43, %48 : vector<4x256xf32>
    %50 = vector.extract_strided_slice %38 {offsets = [2, 0], sizes = [4, 256], strides = [1, 1]} : vector<6x256xf32> to vector<4x256xf32>
    %51 = arith.truncf %50 : vector<4x256xf32> to vector<4x256xbf16>
    %c2_37 = arith.constant 2 : index
    %c0_38 = arith.constant 0 : index
    %c0_39 = arith.constant 0 : index
    %52 = vector.load %arg5[%c2_37, %c0_38, %c0_39] : memref<3x256x256xbf16, #tpu.memory_space<vmem>>, vector<1x256x256xbf16>
    %53 = vector.shape_cast %52 : vector<1x256x256xbf16> to vector<256x256xbf16>
    %cst_40 = arith.constant dense<0.000000e+00> : vector<4x256xf32>
    %54 = tpu.matmul %51, %53, %cst_40 {dimension_numbers = #tpu.dot_dimension_numbers<[1], [0], [0], [1], [0, 0, 1, 1], [], []>} : vector<4x256xbf16>, vector<256x256xbf16>, vector<4x256xf32> -> vector<4x256xf32>
    %55 = arith.addf %49, %54 : vector<4x256xf32>
    %c0_41 = arith.constant 0 : index
    %c0_42 = arith.constant 0 : index
    %56 = vector.load %arg6[%c0_41, %c0_42] : memref<1x256xf32, #tpu.memory_space<vmem>>, vector<1x256xf32>
    %57 = vector.broadcast %56 : vector<1x256xf32> to vector<4x256xf32>
    %58 = arith.addf %55, %57 : vector<4x256xf32>
    %59 = arith.addf %58, %34 : vector<4x256xf32>
    %cst_43 = arith.constant 0.000000e+00 : f32
    %60 = vector.broadcast %cst_43 : f32 to vector<4x256xf32>
    %61 = arith.maximumf %59, %60 : vector<4x256xf32>
    %62 = arith.truncf %61 : vector<4x256xf32> to vector<4x256xbf16>
    %c0_44 = arith.constant 0 : index
    %c0_45 = arith.constant 0 : index
    %c0_46 = arith.constant 0 : index
    %63 = vector.load %arg9[%c0_44, %c0_45, %c0_46] : memref<1x4x256xbf16, #tpu.memory_space<vmem>>, vector<1x4x256xbf16>
    %64 = vector.shape_cast %63 : vector<1x4x256xbf16> to vector<4x256xbf16>
    %65 = vector.shape_cast %62 : vector<4x256xbf16> to vector<1x4x256xbf16>
    tpu.vector_store %arg9[%c0_44, %c0_45, %c0_46], %65 {strides = array<i32>} : memref<1x4x256xbf16, #tpu.memory_space<vmem>>, vector<1x4x256xbf16>,
    return
  }
  func.func @transform_0(%arg0: i32) -> (i32, i32, i32) {
    %c0_i32 = arith.constant 0 : i32
    %c0_i32_0 = arith.constant 0 : i32
    %c0_i32_1 = arith.constant 0 : i32
    return %arg0, %c0_i32, %c0_i32_0 : i32, i32, i32
  }
  func.func @transform_1(%arg0: i32) -> (i32, i32, i32) {
    %c0_i32 = arith.constant 0 : i32
    %c0_i32_0 = arith.constant 0 : i32
    %c0_i32_1 = arith.constant 0 : i32
    return %arg0, %c0_i32, %c0_i32_0 : i32, i32, i32
  }
  func.func @transform_2(%arg0: i32) -> (i32, i32, i32) {
    %c0_i32 = arith.constant 0 : i32
    %c0_i32_0 = arith.constant 0 : i32
    %c0_i32_1 = arith.constant 0 : i32
    %c0_i32_2 = arith.constant 0 : i32
    return %c0_i32, %c0_i32_0, %c0_i32_1 : i32, i32, i32
  }
  func.func @transform_3(%arg0: i32) -> (i32, i32) {
    %c0_i32 = arith.constant 0 : i32
    %c0_i32_0 = arith.constant 0 : i32
    %c0_i32_1 = arith.constant 0 : i32
    return %c0_i32, %c0_i32_0 : i32, i32
  }
  func.func @transform_4(%arg0: i32) -> (i32, i32, i32) {
    %c0_i32 = arith.constant 0 : i32
    %c0_i32_0 = arith.constant 0 : i32
    %c0_i32_1 = arith.constant 0 : i32
    %c0_i32_2 = arith.constant 0 : i32
    return %c0_i32, %c0_i32_0, %c0_i32_1 : i32, i32, i32
  }
  func.func @transform_5(%arg0: i32) -> (i32, i32) {
    %c0_i32 = arith.constant 0 : i32
    %c0_i32_0 = arith.constant 0 : i32
    %c0_i32_1 = arith.constant 0 : i32
    return %c0_i32, %c0_i32_0 : i32, i32
  }
  func.func @transform_6(%arg0: i32) -> (i32, i32) {
    %c0_i32 = arith.constant 0 : i32
    %c0_i32_0 = arith.constant 0 : i32
    %c0_i32_1 = arith.constant 0 : i32
    return %c0_i32, %c0_i32_0 : i32, i32
  }
  func.func @transform_7(%arg0: i32) -> (i32, i32) {
    %c0_i32 = arith.constant 0 : i32
    %c0_i32_0 = arith.constant 0 : i32
    %c0_i32_1 = arith.constant 0 : i32
    return %c0_i32, %c0_i32_0 : i32, i32
  }
  func.func @transform_8(%arg0: i32) -> (i32, i32, i32) {
    %c0_i32 = arith.constant 0 : i32
    %c0_i32_0 = arith.constant 0 : i32
    %c0_i32_1 = arith.constant 0 : i32
    return %arg0, %c0_i32, %c0_i32_0 : i32, i32, i32
  }
}

module attributes {stable_mosaic.version = 11 : i64} {
  func.func @kernel(%arg0: i32, %arg1: memref<1x6x256xbf16, #tpu.memory_space<vmem>>, %arg2: memref<3x256x256xbf16, #tpu.memory_space<vmem>>, %arg3: memref<1x256xf32, #tpu.memory_space<vmem>>, %arg4: memref<3x256x256xbf16, #tpu.memory_space<vmem>>, %arg5: memref<1x256xf32, #tpu.memory_space<vmem>>, %arg6: memref<1x4x256xbf16, #tpu.memory_space<vmem>>, %arg7: memref<6x256xf32, #tpu.memory_space<vmem>>) attributes {dimension_semantics = [#tpu.dimension_semantics<parallel>], iteration_bounds = array<i64: 2>, scalar_prefetch = 0 : i64, scratch_operands = 1 : i64, tpu.core_type = #tpu.core_type<tc>, window_params = [{transform_indices = @transform_0, window_bounds = array<i64: 1, 6, 256>}, {pipeline_mode = #tpu.pipeline_mode<synchronous>, transform_indices = @transform_1, window_bounds = array<i64: 3, 256, 256>}, {pipeline_mode = #tpu.pipeline_mode<synchronous>, transform_indices = @transform_2, window_bounds = array<i64: 1, 256>}, {pipeline_mode = #tpu.pipeline_mode<synchronous>, transform_indices = @transform_3, window_bounds = array<i64: 3, 256, 256>}, {pipeline_mode = #tpu.pipeline_mode<synchronous>, transform_indices = @transform_4, window_bounds = array<i64: 1, 256>}, {transform_indices = @transform_5, window_bounds = array<i64: 1, 4, 256>}]} {
    %c0 = arith.constant 0 : index
    %c0_0 = arith.constant 0 : index
    %c0_1 = arith.constant 0 : index
    %0 = vector.load %arg1[%c0, %c0_0, %c0_1] : memref<1x6x256xbf16, #tpu.memory_space<vmem>>, vector<1x6x256xbf16>
    %1 = vector.shape_cast %0 : vector<1x6x256xbf16> to vector<6x256xbf16>
    %2 = arith.extf %1 : vector<6x256xbf16> to vector<6x256xf32>
    %3 = vector.extract_strided_slice %2 {offsets = [0, 0], sizes = [4, 256], strides = [1, 1]} : vector<6x256xf32> to vector<4x256xf32>
    %4 = arith.truncf %3 : vector<4x256xf32> to vector<4x256xbf16>
    %c0_2 = arith.constant 0 : index
    %c0_3 = arith.constant 0 : index
    %c0_4 = arith.constant 0 : index
    %5 = vector.load %arg2[%c0_2, %c0_3, %c0_4] : memref<3x256x256xbf16, #tpu.memory_space<vmem>>, vector<1x256x256xbf16>
    %6 = vector.shape_cast %5 : vector<1x256x256xbf16> to vector<256x256xbf16>
    %cst = arith.constant dense<0.000000e+00> : vector<4x256xf32>
    %7 = tpu.matmul %4, %6, %cst {dimension_numbers = #tpu.dot_dimension_numbers<[1], [0], [0], [1], [0, 0, 1, 1], [], []>} : vector<4x256xbf16>, vector<256x256xbf16>, vector<4x256xf32> -> vector<4x256xf32>
    %8 = vector.extract_strided_slice %2 {offsets = [1, 0], sizes = [4, 256], strides = [1, 1]} : vector<6x256xf32> to vector<4x256xf32>
    %9 = arith.truncf %8 : vector<4x256xf32> to vector<4x256xbf16>
    %c1 = arith.constant 1 : index
    %c0_5 = arith.constant 0 : index
    %c0_6 = arith.constant 0 : index
    %10 = vector.load %arg2[%c1, %c0_5, %c0_6] : memref<3x256x256xbf16, #tpu.memory_space<vmem>>, vector<1x256x256xbf16>
    %11 = vector.shape_cast %10 : vector<1x256x256xbf16> to vector<256x256xbf16>
    %cst_7 = arith.constant dense<0.000000e+00> : vector<4x256xf32>
    %12 = tpu.matmul %9, %11, %cst_7 {dimension_numbers = #tpu.dot_dimension_numbers<[1], [0], [0], [1], [0, 0, 1, 1], [], []>} : vector<4x256xbf16>, vector<256x256xbf16>, vector<4x256xf32> -> vector<4x256xf32>
    %13 = arith.addf %7, %12 : vector<4x256xf32>
    %14 = vector.extract_strided_slice %2 {offsets = [2, 0], sizes = [4, 256], strides = [1, 1]} : vector<6x256xf32> to vector<4x256xf32>
    %15 = arith.truncf %14 : vector<4x256xf32> to vector<4x256xbf16>
    %c2 = arith.constant 2 : index
    %c0_8 = arith.constant 0 : index
    %c0_9 = arith.constant 0 : index
    %16 = vector.load %arg2[%c2, %c0_8, %c0_9] : memref<3x256x256xbf16, #tpu.memory_space<vmem>>, vector<1x256x256xbf16>
    %17 = vector.shape_cast %16 : vector<1x256x256xbf16> to vector<256x256xbf16>
    %cst_10 = arith.constant dense<0.000000e+00> : vector<4x256xf32>
    %18 = tpu.matmul %15, %17, %cst_10 {dimension_numbers = #tpu.dot_dimension_numbers<[1], [0], [0], [1], [0, 0, 1, 1], [], []>} : vector<4x256xbf16>, vector<256x256xbf16>, vector<4x256xf32> -> vector<4x256xf32>
    %19 = arith.addf %13, %18 : vector<4x256xf32>
    %c0_11 = arith.constant 0 : index
    %c0_12 = arith.constant 0 : index
    %20 = vector.load %arg3[%c0_11, %c0_12] : memref<1x256xf32, #tpu.memory_space<vmem>>, vector<1x256xf32>
    %21 = vector.broadcast %20 : vector<1x256xf32> to vector<4x256xf32>
    %22 = arith.addf %19, %21 : vector<4x256xf32>
    %cst_13 = arith.constant 0.000000e+00 : f32
    %23 = vector.broadcast %cst_13 : f32 to vector<4x256xf32>
    %24 = arith.maximumf %22, %23 : vector<4x256xf32>
    %cst_14 = arith.constant 0.000000e+00 : f32
    %25 = vector.broadcast %cst_14 : f32 to vector<6x256xf32>
    %c0_15 = arith.constant 0 : index
    %c0_16 = arith.constant 0 : index
    %26 = vector.load %arg7[%c0_15, %c0_16] : memref<6x256xf32, #tpu.memory_space<vmem>>, vector<6x256xf32>
    tpu.vector_store %arg7[%c0_15, %c0_16], %25 {strides = array<i32>} : memref<6x256xf32, #tpu.memory_space<vmem>>, vector<6x256xf32>,
    %c1_17 = arith.constant 1 : index
    %c0_18 = arith.constant 0 : index
    %27 = vector.load %arg7[%c1_17, %c0_18] : memref<6x256xf32, #tpu.memory_space<vmem>>, vector<4x256xf32>
    tpu.vector_store %arg7[%c1_17, %c0_18], %24 {strides = array<i32>} : memref<6x256xf32, #tpu.memory_space<vmem>>, vector<4x256xf32>,
    %c0_19 = arith.constant 0 : index
    %c0_20 = arith.constant 0 : index
    %28 = vector.load %arg7[%c0_19, %c0_20] : memref<6x256xf32, #tpu.memory_space<vmem>>, vector<6x256xf32>
    %29 = vector.extract_strided_slice %28 {offsets = [0, 0], sizes = [4, 256], strides = [1, 1]} : vector<6x256xf32> to vector<4x256xf32>
    %30 = arith.truncf %29 : vector<4x256xf32> to vector<4x256xbf16>
    %c0_21 = arith.constant 0 : index
    %c0_22 = arith.constant 0 : index
    %c0_23 = arith.constant 0 : index
    %31 = vector.load %arg4[%c0_21, %c0_22, %c0_23] : memref<3x256x256xbf16, #tpu.memory_space<vmem>>, vector<1x256x256xbf16>
    %32 = vector.shape_cast %31 : vector<1x256x256xbf16> to vector<256x256xbf16>
    %cst_24 = arith.constant dense<0.000000e+00> : vector<4x256xf32>
    %33 = tpu.matmul %30, %32, %cst_24 {dimension_numbers = #tpu.dot_dimension_numbers<[1], [0], [0], [1], [0, 0, 1, 1], [], []>} : vector<4x256xbf16>, vector<256x256xbf16>, vector<4x256xf32> -> vector<4x256xf32>
    %34 = vector.extract_strided_slice %28 {offsets = [1, 0], sizes = [4, 256], strides = [1, 1]} : vector<6x256xf32> to vector<4x256xf32>
    %35 = arith.truncf %34 : vector<4x256xf32> to vector<4x256xbf16>
    %c1_25 = arith.constant 1 : index
    %c0_26 = arith.constant 0 : index
    %c0_27 = arith.constant 0 : index
    %36 = vector.load %arg4[%c1_25, %c0_26, %c0_27] : memref<3x256x256xbf16, #tpu.memory_space<vmem>>, vector<1x256x256xbf16>
    %37 = vector.shape_cast %36 : vector<1x256x256xbf16> to vector<256x256xbf16>
    %cst_28 = arith.constant dense<0.000000e+00> : vector<4x256xf32>
    %38 = tpu.matmul %35, %37, %cst_28 {dimension_numbers = #tpu.dot_dimension_numbers<[1], [0], [0], [1], [0, 0, 1, 1], [], []>} : vector<4x256xbf16>, vector<256x256xbf16>, vector<4x256xf32> -> vector<4x256xf32>
    %39 = arith.addf %33, %38 : vector<4x256xf32>
    %40 = vector.extract_strided_slice %28 {offsets = [2, 0], sizes = [4, 256], strides = [1, 1]} : vector<6x256xf32> to vector<4x256xf32>
    %41 = arith.truncf %40 : vector<4x256xf32> to vector<4x256xbf16>
    %c2_29 = arith.constant 2 : index
    %c0_30 = arith.constant 0 : index
    %c0_31 = arith.constant 0 : index
    %42 = vector.load %arg4[%c2_29, %c0_30, %c0_31] : memref<3x256x256xbf16, #tpu.memory_space<vmem>>, vector<1x256x256xbf16>
    %43 = vector.shape_cast %42 : vector<1x256x256xbf16> to vector<256x256xbf16>
    %cst_32 = arith.constant dense<0.000000e+00> : vector<4x256xf32>
    %44 = tpu.matmul %41, %43, %cst_32 {dimension_numbers = #tpu.dot_dimension_numbers<[1], [0], [0], [1], [0, 0, 1, 1], [], []>} : vector<4x256xbf16>, vector<256x256xbf16>, vector<4x256xf32> -> vector<4x256xf32>
    %45 = arith.addf %39, %44 : vector<4x256xf32>
    %c0_33 = arith.constant 0 : index
    %c0_34 = arith.constant 0 : index
    %46 = vector.load %arg5[%c0_33, %c0_34] : memref<1x256xf32, #tpu.memory_space<vmem>>, vector<1x256xf32>
    %47 = vector.broadcast %46 : vector<1x256xf32> to vector<4x256xf32>
    %48 = arith.addf %45, %47 : vector<4x256xf32>
    %49 = vector.extract_strided_slice %2 {offsets = [1, 0], sizes = [4, 256], strides = [1, 1]} : vector<6x256xf32> to vector<4x256xf32>
    %50 = arith.addf %48, %49 : vector<4x256xf32>
    %cst_35 = arith.constant 0.000000e+00 : f32
    %51 = vector.broadcast %cst_35 : f32 to vector<4x256xf32>
    %52 = arith.maximumf %50, %51 : vector<4x256xf32>
    %53 = arith.truncf %52 : vector<4x256xf32> to vector<4x256xbf16>
    %c0_36 = arith.constant 0 : index
    %c0_37 = arith.constant 0 : index
    %c0_38 = arith.constant 0 : index
    %54 = vector.load %arg6[%c0_36, %c0_37, %c0_38] : memref<1x4x256xbf16, #tpu.memory_space<vmem>>, vector<1x4x256xbf16>
    %55 = vector.shape_cast %54 : vector<1x4x256xbf16> to vector<4x256xbf16>
    %56 = vector.shape_cast %53 : vector<4x256xbf16> to vector<1x4x256xbf16>
    tpu.vector_store %arg6[%c0_36, %c0_37, %c0_38], %56 {strides = array<i32>} : memref<1x4x256xbf16, #tpu.memory_space<vmem>>, vector<1x4x256xbf16>,
    return
  }
  func.func @transform_0(%arg0: i32) -> (i32, i32, i32) {
    %c0_i32 = arith.constant 0 : i32
    %c0_i32_0 = arith.constant 0 : i32
    %c0_i32_1 = arith.constant 0 : i32
    return %arg0, %c0_i32, %c0_i32_0 : i32, i32, i32
  }
  func.func @transform_1(%arg0: i32) -> (i32, i32, i32) {
    %c0_i32 = arith.constant 0 : i32
    %c0_i32_0 = arith.constant 0 : i32
    %c0_i32_1 = arith.constant 0 : i32
    %c0_i32_2 = arith.constant 0 : i32
    return %c0_i32, %c0_i32_0, %c0_i32_1 : i32, i32, i32
  }
  func.func @transform_2(%arg0: i32) -> (i32, i32) {
    %c0_i32 = arith.constant 0 : i32
    %c0_i32_0 = arith.constant 0 : i32
    %c0_i32_1 = arith.constant 0 : i32
    return %c0_i32, %c0_i32_0 : i32, i32
  }
  func.func @transform_3(%arg0: i32) -> (i32, i32, i32) {
    %c0_i32 = arith.constant 0 : i32
    %c0_i32_0 = arith.constant 0 : i32
    %c0_i32_1 = arith.constant 0 : i32
    %c0_i32_2 = arith.constant 0 : i32
    return %c0_i32, %c0_i32_0, %c0_i32_1 : i32, i32, i32
  }
  func.func @transform_4(%arg0: i32) -> (i32, i32) {
    %c0_i32 = arith.constant 0 : i32
    %c0_i32_0 = arith.constant 0 : i32
    %c0_i32_1 = arith.constant 0 : i32
    return %c0_i32, %c0_i32_0 : i32, i32
  }
  func.func @transform_5(%arg0: i32) -> (i32, i32, i32) {
    %c0_i32 = arith.constant 0 : i32
    %c0_i32_0 = arith.constant 0 : i32
    %c0_i32_1 = arith.constant 0 : i32
    return %arg0, %c0_i32, %c0_i32_0 : i32, i32, i32
  }
}

module attributes {stable_mosaic.version = 11 : i64} {
  func.func @_pool_fc_kernel(%arg0: i32, %arg1: memref<1x4x256xbf16, #tpu.memory_space<vmem>>, %arg2: memref<256x128xbf16, #tpu.memory_space<vmem>>, %arg3: memref<1x128xf32, #tpu.memory_space<vmem>>, %arg4: memref<1x1x128xf32, #tpu.memory_space<vmem>>) attributes {dimension_semantics = [#tpu.dimension_semantics<parallel>], iteration_bounds = array<i64: 2>, scalar_prefetch = 0 : i64, scratch_operands = 0 : i64, tpu.core_type = #tpu.core_type<tc>, window_params = [{transform_indices = @transform_0, window_bounds = array<i64: 1, 4, 256>}, {pipeline_mode = #tpu.pipeline_mode<synchronous>, transform_indices = @transform_1, window_bounds = array<i64: 256, 128>}, {pipeline_mode = #tpu.pipeline_mode<synchronous>, transform_indices = @transform_2, window_bounds = array<i64: 1, 128>}, {transform_indices = @transform_3, window_bounds = array<i64: 1, 1, 128>}]} {
    %c0 = arith.constant 0 : index
    %c0_0 = arith.constant 0 : index
    %c0_1 = arith.constant 0 : index
    %0 = vector.load %arg1[%c0, %c0_0, %c0_1] : memref<1x4x256xbf16, #tpu.memory_space<vmem>>, vector<1x4x256xbf16>
    %1 = vector.shape_cast %0 : vector<1x4x256xbf16> to vector<4x256xbf16>
    %c0_2 = arith.constant 0 : index
    %c0_3 = arith.constant 0 : index
    %2 = vector.load %arg2[%c0_2, %c0_3] : memref<256x128xbf16, #tpu.memory_space<vmem>>, vector<256x128xbf16>
    %cst = arith.constant dense<0.000000e+00> : vector<4x128xf32>
    %3 = tpu.matmul %1, %2, %cst {dimension_numbers = #tpu.dot_dimension_numbers<[1], [0], [0], [1], [0, 0, 1, 1], [], []>} : vector<4x256xbf16>, vector<256x128xbf16>, vector<4x128xf32> -> vector<4x128xf32>
    %cst_4 = arith.constant dense<0.000000e+00> : vector<128xf32>
    %4 = vector.multi_reduction <add>, %3, %cst_4 [0] : vector<4x128xf32> to vector<128xf32>
    %5 = vector.shape_cast %4 : vector<128xf32> to vector<1x128xf32>
    %c0_5 = arith.constant 0 : index
    %c0_6 = arith.constant 0 : index
    %6 = vector.load %arg3[%c0_5, %c0_6] : memref<1x128xf32, #tpu.memory_space<vmem>>, vector<1x128xf32>
    %7 = arith.addf %5, %6 : vector<1x128xf32>
    %c0_7 = arith.constant 0 : index
    %c0_8 = arith.constant 0 : index
    %c0_9 = arith.constant 0 : index
    %8 = vector.load %arg4[%c0_7, %c0_8, %c0_9] : memref<1x1x128xf32, #tpu.memory_space<vmem>>, vector<1x1x128xf32>
    %9 = vector.shape_cast %8 : vector<1x1x128xf32> to vector<1x128xf32>
    %10 = vector.shape_cast %7 : vector<1x128xf32> to vector<1x1x128xf32>
    tpu.vector_store %arg4[%c0_7, %c0_8, %c0_9], %10 {strides = array<i32>} : memref<1x1x128xf32, #tpu.memory_space<vmem>>, vector<1x1x128xf32>,
    return
  }
  func.func @transform_0(%arg0: i32) -> (i32, i32, i32) {
    %c0_i32 = arith.constant 0 : i32
    %c0_i32_0 = arith.constant 0 : i32
    %c0_i32_1 = arith.constant 0 : i32
    return %arg0, %c0_i32, %c0_i32_0 : i32, i32, i32
  }
  func.func @transform_1(%arg0: i32) -> (i32, i32) {
    %c0_i32 = arith.constant 0 : i32
    %c0_i32_0 = arith.constant 0 : i32
    %c0_i32_1 = arith.constant 0 : i32
    return %c0_i32, %c0_i32_0 : i32, i32
  }
  func.func @transform_2(%arg0: i32) -> (i32, i32) {
    %c0_i32 = arith.constant 0 : i32
    %c0_i32_0 = arith.constant 0 : i32
    %c0_i32_1 = arith.constant 0 : i32
    return %c0_i32, %c0_i32_0 : i32, i32
  }
  func.func @transform_3(%arg0: i32) -> (i32, i32, i32) {
    %c0_i32 = arith.constant 0 : i32
    %c0_i32_0 = arith.constant 0 : i32
    %c0_i32_1 = arith.constant 0 : i32
    return %arg0, %c0_i32, %c0_i32_0 : i32, i32, i32
  }
}

</mosaic_0001>

<bundles_post_ra>
// kernel: _lambda_.11
= control target key start
LH: loop header
LB: loop body
LE: loop exit
PB: predicated region body
PF: predicated region fallthrough
CT: control target
= control target key end

     0   :  { %s548_s12 = smov 0   ;;  %s593_s0 = inlined_call_operand.vmem [shape: bf16[2,18,16], index: 0, kind: input, shape index: {}]   ;;  %s594_s1 = inlined_call_operand.vmem [shape: bf16[3,16,256], index: 1, kind: input, shape index: {}]   ;;  %s595_s2 = inlined_call_operand.vmem [shape: f32[1,256], index: 2, kind: input, shape index: {}]   ;;  %s596_s3 = inlined_call_operand.vmem [shape: bf16[2,16,256], index: 3, kind: output, shape index: {}]  }
   0x1 LB: > { %s468_s13 = sadd.s32 4294967295, %s525_s12   ;;  %p472_p0 = scmp.ge.s32.totalorder %s525_s12, 1  ;;  %s525_s12 = sphi %s548_s12, %s13_s12  }
   0x2   : > { %p137_p1 = scmp.lt.s32.totalorder %s525_s12, 3 }
   0x4   : > { %p138_p2 = pnand %p472_p0, %p137_p1 }
   0x5   : > { %p161_p3 = scmp.lt.s32.totalorder (!%p138_p2), %s468_s13, 1 }
   0x6   : > { %141 = sbr.rel (%p138_p2) target bundleno = 239 (0xef), region = 32 }
   0xb   : > { %v508_v0 = vld [vmem:[%s594_s1 + $0x14] ss:$8 sps:$4 sm:$0xff]   ;;  %v510_v1 = vld [vmem:[%s594_s1 + $0x10] ss:$8 sps:$4 sm:$0xff]   ;;  %v527_v2 = vmov 0   ;;  %s598_s13 = smov (!%p161_p3, %s468_s13), 1  ;;  %v381_v19 = vlaneseq }
   0xc   : > { %244 = vmatprep.mubr.bf16.mxu0 %v527_v2  ;;  %299 = vmatprep.mubr.bf16.mxu1 %v527_v2  ;;  %v511_v3 = vld [vmem:[%s594_s1 + $0x4] ss:$8 sps:$4 sm:$0xff]   ;;  %v513_v4 = vld [vmem:[%s594_s1] ss:$8 sps:$4 sm:$0xff]   ;;  %s498_s24 = smul.u32 12, %s598_s13  ;;  %vm208_vm0 = vcmask 130048  }
   0xd   : > { %226 = vmatprep.subr.bf16.mxu0 %v508_v0  ;;  %v516_v5 = vld [vmem:[%s594_s1 + $0x24] ss:$8 sps:$4 sm:$0xff]   ;;  %281 = vmatprep.subr.bf16.mxu1 %v511_v3  ;;  %vm185_vm1 = vsmask.f32 7424  ;;  %v514_v13 = vld [vmem:[%s594_s1 + $0x20] ss:$8 sps:$4 sm:$0xff]  }
   0xe   : > { %227 = vmatpush1.bf16.msra.mxu0 %v510_v1  ;;  %282 = vmatpush1.bf16.msra.mxu1 %v513_v4  ;;  %s165_s27 = scalar_lea.vmem %s593_s0, %s498_s24  ;;  %vm315_vm2 = vcmask 1046528   ;;  %v382_v21 = vshrl.u32 %v381_v19, 7  ;;  %v379_v27 = vld [vmem:[%s595_s2] sm:$0x3]  ;;  %s495_s5 = sshll.u32 %s598_s13, 4 }
   0xf   : > { %346 = vmatprep.subr.bf16.mxu0 %v516_v5  ;;  %v517_v6 = vld [vmem:[%s165_s27] sm:$0xff]   ;;  %v518_v7 = vld [vmem:[%s165_s27 + $0x8] ss:$0 sps:$4 sm:$0x11]   ;;  %s170_s8 = scalar_lea.vmem %s596_s3, %s495_s5 }
  0x10   : > { %v187_v8 = vshrl.u32 %v517_v6, 16  ;;  %v189_v9 = vshll.u32 %v517_v6, 16  ;;  %v194_v10 = vshll.u32 %v518_v7, 16  ;;  %v316_v16 = vrot.slane %v517_v6, 1 }
  0x11   : > { %485 = vmatmul.mubr.msk.bf16.vlgmr.msra.gmra.mxu1 %vm208_vm0, %v517_v6  ;;  %v317_v17 = vrot.slane %v518_v7, 1  ;;  %v383_v25 = vsub.s32 0, %v382_v21  ;;  %v387_v28 = vsub.s32 1, %v382_v21 }
  0x12   : > { %v191_v11 = vrot.slane %v189_v9, 1  ;;  %v196_v12 = vrot.slane %v194_v10, 1 }
  0x13   : > { %v318_v18 = vsel %vm315_vm2, %v316_v16, %v317_v17  ;;  %v384_v32 = vrot.slane %v379_v27, %v383_v25  ;;  %v388_v36 = vrot.slane %v379_v27, %v387_v28 }
  0x14   : > { %v192_v14 = vor.u32 %v191_v11, %v187_v8 }
  0x16   : > { %v197_v15 = vsel %vm185_vm1, %v192_v14, %v196_v12 }
  0x17   : > { %482 = vmatmul.mubr.msk.bf16.vlgmr.msra.gmra.mxu0 %vm208_vm0, %v197_v15 }
  0x18   : > { %347 = vmatpush1.bf16.msra.mxu0 %v514_v13  ;;  %364 = vmatprep.mubr.bf16.mxu0 %v527_v2 }
  0x1f   : > { %490 = vmatmul.mubr.msk.bf16.vlgmr.msra.gmra.mxu0 %vm208_vm0, %v318_v18 }
  0xd1   : > { %v301_v20 = vpop.f32.mrf.mxu1 }
  0xd3   : > { %v303_v24 = vpop.f32.mrf.mxu1 }
  0xd5   : > { %v305_v29 = vpop.f32.mrf.mxu1 }
  0xd7   : > { %v246_v22 = vpop.f32.mrf.mxu0  ;;  %v307_v37 = vpop.f32.mrf.mxu1 }
  0xd8   : > { %v302_v31 = vadd.f32 %v301_v20, %v246_v22 }
  0xd9   : > { %v248_v23 = vpop.f32.mrf.mxu0 }
  0xda   : > { %v304_v34 = vadd.f32 %v303_v24, %v248_v23 }
  0xdb   : > { %v250_v26 = vpop.f32.mrf.mxu0 }
  0xdc   : > { %v306_v39 = vadd.f32 %v305_v29, %v250_v26 }
  0xdd   : > { %v252_v30 = vpop.f32.mrf.mxu0 }
  0xde   : > { %v308_v43 = vadd.f32 %v307_v37, %v252_v30 }
  0xdf   : > { %v366_v33 = vpop.f32.mrf.mxu0 }
  0xe0   : > { %v375_v35 = vadd.f32 %v366_v33, %v302_v31 }
  0xe1   : > { %v368_v38 = vpop.f32.mrf.mxu0 }
  0xe2   : > { %v391_v40 = vadd.f32 %v384_v32, %v375_v35  ;;  %v376_v41 = vadd.f32 %v368_v38, %v304_v34 }
  0xe3   : > { %v370_v42 = vpop.f32.mrf.mxu0 }
  0xe4   : > { %v392_v44 = vadd.f32 %v388_v36, %v376_v41  ;;  %v377_v45 = vadd.f32 %v370_v42, %v306_v39  ;;  %v395_v47 = vmax.f32 %v391_v40, 0.0 }
  0xe5   : > { %v372_v46 = vpop.f32.mrf.mxu0 }
  0xe6   : > { %v396_v48 = vmax.f32 %v392_v44, 0.0  ;;  %v393_v49 = vadd.f32 %v384_v32, %v377_v45  ;;  %v378_v50 = vadd.f32 %v372_v46, %v308_v43 }
  0xe8   : > { %v496_v51 = vpack.c.bf16 %v396_v48, %v395_v47  ;;  %v394_v52 = vadd.f32 %v388_v36, %v378_v50  ;;  %v397_v53 = vmax.f32 %v393_v49, 0.0 }
  0xea   : > { %411 = vst [vmem:[%s170_s8] sm:$0xff] %v496_v51  ;;  %v398_v54 = vmax.f32 %v394_v52, 0.0 }
  0xec   : > { %v497_v55 = vpack.c.bf16 %v398_v54, %v397_v53 }
  0xee   : > { %412 = vst [vmem:[%s170_s8 + $0x8] sm:$0xff] %v497_v55 }
  0xef PF: > { %s13_s12 = sadd.s32 1, %s525_s12  }
  0xf0   : > { %p10_p4 = scmp.ge.s32.totalorder %s13_s12, 4  }
  0xf2   :  { %12 = sbr.rel (!%p10_p4) target bundleno = 1 (0x1), region = 64 }

// kernel: _lambda_.13
= control target key start
LH: loop header
LB: loop body
LE: loop exit
PB: predicated region body
PF: predicated region fallthrough
CT: control target
= control target key end

     0   :  { %s2594_s18 = smov 0   ;;  %s3249_s0 = inlined_call_operand.vmem [shape: bf16[2,18,256], index: 0, kind: input, shape index: {}]   ;;  %s3250_s1 = inlined_call_operand.vmem [shape: bf16[3,256,256], index: 1, kind: input, shape index: {}]   ;;  %s3251_s2 = inlined_call_operand.vmem [shape: f32[1,256], index: 2, kind: input, shape index: {}]   ;;  %s3252_s3 = inlined_call_operand.vmem [shape: bf16[3,256,256], index: 3, kind: input, shape index: {}]   ;;  %s3253_s4 = inlined_call_operand.vmem [shape: f32[1,256], index: 4, kind: input, shape index: {}]   ;;  %s3254_s5 = inlined_call_operand.vmem [shape: bf16[2,16,256], index: 5, kind: output, shape index: {}]  }
   0x1 LB: > { %s1911_s19 = sadd.s32 4294967295, %s2561_s18   ;;  %p1915_p0 = scmp.ge.s32.totalorder %s2561_s18, 1  ;;  %s2561_s18 = sphi %s2594_s18, %s15_s18  }
   0x2   : > { %p187_p1 = scmp.lt.s32.totalorder %s2561_s18, 3 }
   0x4   : > { %p188_p2 = pnand %p1915_p0, %p187_p1 }
   0x5   : > { %p215_p3 = scmp.lt.s32.totalorder (!%p188_p2), %s1911_s19, 1 }
   0x6   : > { %191 = sbr.rel (%p188_p2) target bundleno = 637 (0x27d), region = 40 }
   0xb   : > { %v2260_v0 = vld [vmem:[%s3250_s1 + $0x174] ss:$8 sps:$4 sm:$0xff]   ;;  %v2264_v2 = vld [vmem:[%s3250_s1 + $0x170] ss:$8 sps:$4 sm:$0xff]   ;;  %v2266_v4 = vld [vmem:[%s3250_s1 + $0x164] ss:$8 sps:$4 sm:$0xff]  }
   0xc   : > { %v2262_v1 = vld [vmem:[%s3250_s1 + $0x74] ss:$8 sps:$4 sm:$0xff]   ;;  %490 = vmatprep.subr.bf16.mxu0 %v2260_v0  ;;  %v2265_v3 = vld [vmem:[%s3250_s1 + $0x70] ss:$8 sps:$4 sm:$0xff]   ;;  %v2268_v5 = vld [vmem:[%s3250_s1 + $0x64] ss:$8 sps:$4 sm:$0xff]  }
   0xd   : > { %693 = vmatprep.subr.bf16.mxu1 %v2262_v1  ;;  %491 = vmatpush1.bf16.msra.mxu0 %v2264_v2  ;;  %v2270_v6 = vld [vmem:[%s3250_s1 + $0x160] ss:$8 sps:$4 sm:$0xff]   ;;  %v2272_v8 = vld [vmem:[%s3250_s1 + $0x154] ss:$8 sps:$4 sm:$0xff]   ;;  %v2276_v10 = vld [vmem:[%s3250_s1 + $0x150] ss:$8 sps:$4 sm:$0xff]  }
   0xe   : > { %694 = vmatpush1.bf16.msra.mxu1 %v2265_v3  ;;  %492 = vmatprep.subr.bf16.mxu0 %v2266_v4  ;;  %v2271_v7 = vld [vmem:[%s3250_s1 + $0x60] ss:$8 sps:$4 sm:$0xff]   ;;  %v2274_v9 = vld [vmem:[%s3250_s1 + $0x54] ss:$8 sps:$4 sm:$0xff]   ;;  %v2277_v11 = vld [vmem:[%s3250_s1 + $0x50] ss:$8 sps:$4 sm:$0xff]  }
   0xf   : > { %695 = vmatprep.subr.bf16.mxu1 %v2268_v5  ;;  %v2278_v12 = vld [vmem:[%s3250_s1 + $0x144] ss:$8 sps:$4 sm:$0xff]   ;;  %v2282_v14 = vld [vmem:[%s3250_s1 + $0x140] ss:$8 sps:$4 sm:$0xff]   ;;  %v2284_v16 = vld [vmem:[%s3250_s1 + $0x134] ss:$8 sps:$4 sm:$0xff]  }
  0x10   : > { %v2280_v13 = vld [vmem:[%s3250_s1 + $0x44] ss:$8 sps:$4 sm:$0xff]   ;;  %v2283_v15 = vld [vmem:[%s3250_s1 + $0x40] ss:$8 sps:$4 sm:$0xff]   ;;  %v2286_v17 = vld [vmem:[%s3250_s1 + $0x34] ss:$8 sps:$4 sm:$0xff]  }
  0x11   : > { %493 = vmatpush1.bf16.msra.mxu0 %v2270_v6  ;;  %v2288_v18 = vld [vmem:[%s3250_s1 + $0x130] ss:$8 sps:$4 sm:$0xff]   ;;  %v2290_v20 = vld [vmem:[%s3250_s1 + $0x124] ss:$8 sps:$4 sm:$0xff]   ;;  %v2294_v22 = vld [vmem:[%s3250_s1 + $0x120] ss:$8 sps:$4 sm:$0xff]  }
  0x12   : > { %696 = vmatpush1.bf16.msra.mxu1 %v2271_v7  ;;  %494 = vmatprep.subr.bf16.mxu0 %v2272_v8  ;;  %v2289_v19 = vld [vmem:[%s3250_s1 + $0x30] ss:$8 sps:$4 sm:$0xff]   ;;  %v2292_v21 = vld [vmem:[%s3250_s1 + $0x24] ss:$8 sps:$4 sm:$0xff]   ;;  %v2295_v23 = vld [vmem:[%s3250_s1 + $0x20] ss:$8 sps:$4 sm:$0xff]  }
  0x13   : > { %697 = vmatprep.subr.bf16.mxu1 %v2274_v9  ;;  %v2296_v24 = vld [vmem:[%s3250_s1 + $0x114] ss:$8 sps:$4 sm:$0xff]   ;;  %v2300_v26 = vld [vmem:[%s3250_s1 + $0x110] ss:$8 sps:$4 sm:$0xff]   ;;  %v2302_v28 = vld [vmem:[%s3250_s1 + $0x104] ss:$8 sps:$4 sm:$0xff]  }
  0x14   : > { %v2298_v25 = vld [vmem:[%s3250_s1 + $0x14] ss:$8 sps:$4 sm:$0xff]   ;;  %v2301_v27 = vld [vmem:[%s3250_s1 + $0x10] ss:$8 sps:$4 sm:$0xff]   ;;  %v2304_v29 = vld [vmem:[%s3250_s1 + $0x4] ss:$8 sps:$4 sm:$0xff]  }
  0x15   : > { %495 = vmatpush1.bf16.msra.mxu0 %v2276_v10  ;;  %v2306_v30 = vld [vmem:[%s3250_s1 + $0x100] ss:$8 sps:$4 sm:$0xff]   ;;  %v2308_v32 = vld [vmem:[%s3250_s1 + $0x1f4] ss:$8 sps:$4 sm:$0xff]   ;;  %v2312_v34 = vld [vmem:[%s3250_s1 + $0x1f0] ss:$8 sps:$4 sm:$0xff]  }
  0x16   : > { %698 = vmatpush1.bf16.msra.mxu1 %v2277_v11  ;;  %496 = vmatprep.subr.bf16.mxu0 %v2278_v12  ;;  %v2307_v31 = vld [vmem:[%s3250_s1] ss:$8 sps:$4 sm:$0xff]   ;;  %v2310_v33 = vld [vmem:[%s3250_s1 + $0xf4] ss:$8 sps:$4 sm:$0xff]   ;;  %v2313_v35 = vld [vmem:[%s3250_s1 + $0xf0] ss:$8 sps:$4 sm:$0xff]  }
  0x17   : > { %699 = vmatprep.subr.bf16.mxu1 %v2280_v13  ;;  %s3256_s19 = smov (!%p215_p3, %s1911_s19), 1  ;;  %v2314_v36 = vld [vmem:[%s3250_s1 + $0x1e4] ss:$8 sps:$4 sm:$0xff]   ;;  %v2318_v38 = vld [vmem:[%s3250_s1 + $0x1e0] ss:$8 sps:$4 sm:$0xff]   ;;  %vm773_vm1 = vcmask 1046528  }
  0x18   : > { %v2316_v37 = vld [vmem:[%s3250_s1 + $0xe4] ss:$8 sps:$4 sm:$0xff]   ;;  %s2250_s29 = smul.u32 24, %s3256_s19  ;;  %v2319_v39 = vld [vmem:[%s3250_s1 + $0xe0] ss:$8 sps:$4 sm:$0xff]   ;;  %vm1019_vm2 = vcmask 1040384  }
  0x19   : > { %497 = vmatpush1.bf16.msra.mxu0 %v2282_v14  ;;  %v2320_v40 = vld [vmem:[%s3250_s1 + $0x1d4] ss:$8 sps:$4 sm:$0xff]   ;;  %v2324_v42 = vld [vmem:[%s3250_s1 + $0x1d0] ss:$8 sps:$4 sm:$0xff]   ;;  %v2326_v44 = vld [vmem:[%s3250_s1 + $0x1c4] ss:$8 sps:$4 sm:$0xff]  }
  0x1a   : > { %700 = vmatpush1.bf16.msra.mxu1 %v2283_v15  ;;  %498 = vmatprep.subr.bf16.mxu0 %v2284_v16  ;;  %v2322_v41 = vld [vmem:[%s3250_s1 + $0xd4] ss:$8 sps:$4 sm:$0xff]   ;;  %v2325_v43 = vld [vmem:[%s3250_s1 + $0xd0] ss:$8 sps:$4 sm:$0xff]   ;;  %s2744_s17 = scalar_lea.vmem %s3249_s0, %s2250_s29  ;;  %v2328_v45 = vld [vmem:[%s3250_s1 + $0xc4] ss:$8 sps:$4 sm:$0xff]  }
  0x1b   : > { %701 = vmatprep.subr.bf16.mxu1 %v2286_v17  ;;  %v2330_v46 = vld [vmem:[%s3250_s1 + $0x1c0] ss:$8 sps:$4 sm:$0xff]   ;;  %v227_v49 = vld [vmem:[%s2744_s17 + $0x10] sm:$0x11]  ;;  %v2338_v63 = vld [vmem:[%s3250_s1 + $0x1a4] ss:$8 sps:$4 sm:$0xff]  }
  0x1c   : > { %v225_v47 = vld [vmem:[%s2744_s17] sm:$0xff]  ;;  %v226_v48 = vld [vmem:[%s2744_s17 + $0x8] sm:$0xff]  ;;  %v2332_v51 = vld [vmem:[%s3250_s1 + $0x1b4] ss:$8 sps:$4 sm:$0xff]   ;;  %v2766_v53 = vcombine.high %v227_v49, %v227_v49  ;;  %vm303_vm0 = vsmask.f32 7424  ;;  %v1921_v1 = vcombine.low %v227_v49, %v227_v49 }
  0x1d   : > { %499 = vmatpush1.bf16.msra.mxu0 %v2288_v18  ;;  %v2331_v50 = vld [vmem:[%s3250_s1 + $0xc0] ss:$8 sps:$4 sm:$0xff]   ;;  %v2764_v52 = vcombine.high %v225_v47, %v226_v48  ;;  %v2334_v54 = vld [vmem:[%s3250_s1 + $0xb4] ss:$8 sps:$4 sm:$0xff]   ;;  %v2336_v58 = vld [vmem:[%s3250_s1 + $0x1b0] ss:$8 sps:$4 sm:$0xff]   ;;  %v1919_v62 = vcombine.low %v225_v47, %v226_v48 }
  0x1e   : > { %702 = vmatpush1.bf16.msra.mxu1 %v2289_v19  ;;  %500 = vmatprep.subr.bf16.mxu0 %v2290_v20  ;;  %v324_v57 = vshll.u32 %v2766_v53, 16  ;;  %v2337_v59 = vld [vmem:[%s3250_s1 + $0xb0] ss:$8 sps:$4 sm:$0xff]   ;;  %v2340_v0 = vld [vmem:[%s3250_s1 + $0xa4] ss:$8 sps:$4 sm:$0xff]   ;;  %v775_v4 = vrot.slane %v1921_v1, 1 }
  0x1f   : > { %703 = vmatprep.subr.bf16.mxu1 %v2292_v21  ;;  %v317_v55 = vshrl.u32 %v2764_v52, 16  ;;  %v319_v56 = vshll.u32 %v2764_v52, 16  ;;  %725 = vmatprep.mubr.bf16.mxu1 %v2764_v52  ;;  %v774_v3 = vrot.slane %v1919_v62, 1  ;;  %v2342_v5 = vld [vmem:[%s3250_s1 + $0x1a0] ss:$8 sps:$4 sm:$0xff]   ;;  %v307_v8 = vshll.u32 %v1919_v62, 16 }
  0x20   : > { %v326_v61 = vrot.slane %v324_v57, 1  ;;  %v2343_v6 = vld [vmem:[%s3250_s1 + $0xa0] ss:$8 sps:$4 sm:$0xff]   ;;  %v2344_v9 = vld [vmem:[%s3250_s1 + $0x194] ss:$8 sps:$4 sm:$0xff]   ;;  %v305_v14 = vshrl.u32 %v1919_v62, 16 }
  0x21   : > { %501 = vmatpush1.bf16.msra.mxu0 %v2294_v22  ;;  %v321_v60 = vrot.slane %v319_v56, 1  ;;  %v2346_v10 = vld [vmem:[%s3250_s1 + $0x94] ss:$8 sps:$4 sm:$0xff]   ;;  %v2801_v11 = vsel %vm773_vm1, %v774_v3, %v775_v4  ;;  %v2348_v12 = vld [vmem:[%s3250_s1 + $0x190] ss:$8 sps:$4 sm:$0xff]   ;;  %v309_v15 = vrot.slane %v307_v8, 1 }
  0x22   : > { %704 = vmatpush1.bf16.msra.mxu1 %v2295_v23  ;;  %502 = vmatprep.subr.bf16.mxu0 %v2296_v24  ;;  %v2349_v13 = vld [vmem:[%s3250_s1 + $0x90] ss:$8 sps:$4 sm:$0xff]   ;;  %v312_v16 = vshll.u32 %v1921_v1, 16  ;;  %v2350_v17 = vld [vmem:[%s3250_s1 + $0x184] ss:$8 sps:$4 sm:$0xff]   ;;  %v777_v24 = vrot.slane %v2764_v52, 1 }
  0x23   : > { %705 = vmatprep.subr.bf16.mxu1 %v2298_v25  ;;  %v322_v2 = vor.u32 %v321_v60, %v317_v55  ;;  %v2352_v18 = vld [vmem:[%s3250_s1 + $0x84] ss:$8 sps:$4 sm:$0xff]   ;;  %v2354_v19 = vld [vmem:[%s3250_s1 + $0x180] ss:$8 sps:$4 sm:$0xff]   ;;  %v310_v21 = vor.u32 %v309_v15, %v305_v14  ;;  %v2362_v23 = vld [vmem:[%s3250_s1 + $0x274] ss:$8 sps:$4 sm:$0xff]  }
  0x24   : > { %v2355_v20 = vld [vmem:[%s3250_s1 + $0x80] ss:$8 sps:$4 sm:$0xff]   ;;  %v314_v22 = vrot.slane %v312_v16, 1  ;;  %v778_v25 = vrot.slane %v2766_v53, 1  ;;  %v2392_v47 = vld [vmem:[%s3250_s1 + $0x2d4] ss:$8 sps:$4 sm:$0xff]  }
  0x25   : > { %503 = vmatpush1.bf16.msra.mxu0 %v2300_v26  ;;  %v327_v7 = vsel %vm303_vm0, %v322_v2, %v326_v61  ;;  %v2390_v48 = vld [vmem:[%s3250_s1 + $0x2d0] ss:$8 sps:$4 sm:$0xff]   ;;  %v2395_v49 = vld [vmem:[%s3250_s1 + $0x2c4] ss:$8 sps:$4 sm:$0xff]   ;;  %v2404_v55 = vld [vmem:[%s3250_s1 + $0x294] ss:$8 sps:$4 sm:$0xff]  }
  0x26   : > { %706 = vmatpush1.bf16.msra.mxu1 %v2301_v27  ;;  %504 = vmatprep.subr.bf16.mxu0 %v2302_v28  ;;  %v315_v26 = vsel %vm303_vm0, %v310_v21, %v314_v22  ;;  %v2360_v27 = vld [vmem:[%s3250_s1 + $0x270] ss:$8 sps:$4 sm:$0xff]   ;;  %v2365_v28 = vld [vmem:[%s3250_s1 + $0x264] ss:$8 sps:$4 sm:$0xff]   ;;  %v2410_v60 = vld [vmem:[%s3252_s3 + $0x74] ss:$8 sps:$4 sm:$0xff]  }
  0x27   : > { %707 = vmatprep.subr.bf16.mxu1 %v2304_v29  ;;  %522 = vmatprep.mubr.bf16.mxu0 %v327_v7  ;;  %v779_v29 = vsel %vm773_vm1, %v777_v24, %v778_v25  ;;  %v2396_v52 = vld [vmem:[%s3250_s1 + $0x2b0] ss:$8 sps:$4 sm:$0xff]   ;;  %v2401_v53 = vld [vmem:[%s3250_s1 + $0x2a4] ss:$8 sps:$4 sm:$0xff]   ;;  %v2419_v2 = vld [vmem:[%s3252_s3 + $0x54] ss:$8 sps:$4 sm:$0xff]  }
  0x28   : > { %v2402_v56 = vld [vmem:[%s3250_s1 + $0x290] ss:$8 sps:$4 sm:$0xff]   ;;  %v2407_v57 = vld [vmem:[%s3250_s1 + $0x284] ss:$8 sps:$4 sm:$0xff]   ;;  %v2420_v3 = vld [vmem:[%s3252_s3 + $0x160] ss:$8 sps:$4 sm:$0xff]  }
  0x29   : > { %505 = vmatpush1.bf16.msra.mxu0 %v2306_v30  ;;  %v2363_v30 = vld [vmem:[%s3250_s1 + $0x260] ss:$8 sps:$4 sm:$0xff]   ;;  %v2413_v61 = vld [vmem:[%s3252_s3 + $0x64] ss:$8 sps:$4 sm:$0xff]   ;;  %v2428_v4 = vld [vmem:[%s3252_s3 + $0x154] ss:$8 sps:$4 sm:$0xff]  }
  0x2a   : > { %708 = vmatpush1.bf16.msra.mxu1 %v2307_v31  ;;  %506 = vmatprep.subr.bf16.mxu0 %v2308_v32  ;;  %v2368_v31 = vld [vmem:[%s3250_s1 + $0x254] ss:$8 sps:$4 sm:$0xff]   ;;  %v2366_v32 = vld [vmem:[%s3250_s1 + $0x250] ss:$8 sps:$4 sm:$0xff]   ;;  %v2422_v1 = vld [vmem:[%s3252_s3 + $0x164] ss:$8 sps:$4 sm:$0xff]  }
  0x2b   : > { %709 = vmatprep.subr.bf16.mxu1 %v2310_v33  ;;  %v2371_v33 = vld [vmem:[%s3250_s1 + $0x244] ss:$8 sps:$4 sm:$0xff]   ;;  %v2426_v7 = vld [vmem:[%s3252_s3 + $0x150] ss:$8 sps:$4 sm:$0xff]   ;;  %v2447_v25 = vld [vmem:[%s3252_s3] ss:$8 sps:$4 sm:$0xff]  }
  0x2c   : > { %v2434_v8 = vld [vmem:[%s3252_s3 + $0x144] ss:$8 sps:$4 sm:$0xff]   ;;  %v2438_v15 = vld [vmem:[%s3252_s3 + $0x130] ss:$8 sps:$4 sm:$0xff]  }
  0x2d   : > { %507 = vmatpush2.bf16.msra.mxu0 %v2312_v34  ;;  %v2369_v34 = vld [vmem:[%s3250_s1 + $0x240] ss:$8 sps:$4 sm:$0xff]   ;;  %v2437_v14 = vld [vmem:[%s3252_s3 + $0x24] ss:$8 sps:$4 sm:$0xff]   ;;  %v2441_v21 = vld [vmem:[%s3252_s3 + $0x10] ss:$8 sps:$4 sm:$0xff]  }
  0x2e   : > { %710 = vmatpush2.bf16.msra.mxu1 %v2313_v35  ;;  %508 = vmatprep.subr.bf16.mxu0 %v2314_v36  ;;  %v2374_v35 = vld [vmem:[%s3250_s1 + $0x234] ss:$8 sps:$4 sm:$0xff]   ;;  %v2372_v36 = vld [vmem:[%s3250_s1 + $0x230] ss:$8 sps:$4 sm:$0xff]   ;;  %v2446_v16 = vld [vmem:[%s3252_s3 + $0x124] ss:$8 sps:$4 sm:$0xff]  }
  0x2f   : > { %711 = vmatprep.subr.bf16.mxu1 %v2316_v37  ;;  %v2377_v37 = vld [vmem:[%s3250_s1 + $0x224] ss:$8 sps:$4 sm:$0xff]  }
  0x30   : > { %v2449_v22 = vld [vmem:[%s3252_s3 + $0x4] ss:$8 sps:$4 sm:$0xff]  }
  0x31   : > { %509 = vmatpush2.bf16.msra.mxu0 %v2318_v38  ;;  %v2375_v38 = vld [vmem:[%s3250_s1 + $0x220] ss:$8 sps:$4 sm:$0xff]   ;;  %v2458_v24 = vld [vmem:[%s3252_s3 + $0x104] ss:$8 sps:$4 sm:$0xff]  }
  0x32   : > { %712 = vmatpush2.bf16.msra.mxu1 %v2319_v39  ;;  %510 = vmatprep.subr.bf16.mxu0 %v2320_v40  ;;  %v2380_v39 = vld [vmem:[%s3250_s1 + $0x214] ss:$8 sps:$4 sm:$0xff]   ;;  %v2378_v40 = vld [vmem:[%s3250_s1 + $0x210] ss:$8 sps:$4 sm:$0xff]  }
  0x33   : > { %713 = vmatprep.subr.bf16.mxu1 %v2322_v41  ;;  %v2383_v41 = vld [vmem:[%s3250_s1 + $0x204] ss:$8 sps:$4 sm:$0xff]  }
  0x35   : > { %511 = vmatpush2.bf16.msra.mxu0 %v2324_v42  ;;  %v2381_v42 = vld [vmem:[%s3250_s1 + $0x200] ss:$8 sps:$4 sm:$0xff]  }
  0x36   : > { %714 = vmatpush2.bf16.msra.mxu1 %v2325_v43  ;;  %512 = vmatprep.subr.bf16.mxu0 %v2326_v44  ;;  %v2386_v43 = vld [vmem:[%s3250_s1 + $0x2f4] ss:$8 sps:$4 sm:$0xff]   ;;  %v2384_v44 = vld [vmem:[%s3250_s1 + $0x2f0] ss:$8 sps:$4 sm:$0xff]  }
  0x37   : > { %715 = vmatprep.subr.bf16.mxu1 %v2328_v45  ;;  %v2389_v45 = vld [vmem:[%s3250_s1 + $0x2e4] ss:$8 sps:$4 sm:$0xff]  }
  0x39   : > { %513 = vmatpush2.bf16.msra.mxu0 %v2330_v46  ;;  %v2387_v46 = vld [vmem:[%s3250_s1 + $0x2e0] ss:$8 sps:$4 sm:$0xff]  }
  0x3a   : > { %716 = vmatpush2.bf16.msra.mxu1 %v2331_v50  ;;  %514 = vmatprep.subr.bf16.mxu0 %v2332_v51  ;;  %v2393_v50 = vld [vmem:[%s3250_s1 + $0x2c0] ss:$8 sps:$4 sm:$0xff]   ;;  %v2398_v51 = vld [vmem:[%s3250_s1 + $0x2b4] ss:$8 sps:$4 sm:$0xff]  }
  0x3b   : > { %717 = vmatprep.subr.bf16.mxu1 %v2334_v54  ;;  %v2399_v54 = vld [vmem:[%s3250_s1 + $0x2a0] ss:$8 sps:$4 sm:$0xff]  }
  0x3d   : > { %515 = vmatpush2.bf16.msra.mxu0 %v2336_v58  ;;  %v2405_v58 = vld [vmem:[%s3250_s1 + $0x280] ss:$8 sps:$4 sm:$0xff]  }
  0x3e   : > { %718 = vmatpush2.bf16.msra.mxu1 %v2337_v59  ;;  %516 = vmatprep.subr.bf16.mxu0 %v2338_v63  ;;  %v2408_v59 = vld [vmem:[%s3252_s3 + $0x70] ss:$8 sps:$4 sm:$0xff]   ;;  %v2416_v63 = vld [vmem:[%s3252_s3 + $0x174] ss:$8 sps:$4 sm:$0xff]  }
  0x3f   : > { %719 = vmatprep.subr.bf16.mxu1 %v2340_v0  ;;  %v2411_v0 = vld [vmem:[%s3252_s3 + $0x60] ss:$8 sps:$4 sm:$0xff]  }
  0x41   : > { %517 = vmatpush2.bf16.msra.mxu0 %v2342_v5  ;;  %v2417_v5 = vld [vmem:[%s3252_s3 + $0x50] ss:$8 sps:$4 sm:$0xff]  }
  0x42   : > { %720 = vmatpush2.bf16.msra.mxu1 %v2343_v6  ;;  %518 = vmatprep.subr.bf16.mxu0 %v2344_v9  ;;  %v2425_v6 = vld [vmem:[%s3252_s3 + $0x44] ss:$8 sps:$4 sm:$0xff]   ;;  %v2423_v9 = vld [vmem:[%s3252_s3 + $0x40] ss:$8 sps:$4 sm:$0xff]  }
  0x43   : > { %721 = vmatprep.subr.bf16.mxu1 %v2346_v10  ;;  %v2431_v10 = vld [vmem:[%s3252_s3 + $0x34] ss:$8 sps:$4 sm:$0xff]  }
  0x45   : > { %519 = vmatpush2.bf16.msra.mxu0 %v2348_v12  ;;  %v2440_v12 = vld [vmem:[%s3252_s3 + $0x134] ss:$8 sps:$4 sm:$0xff]  }
  0x46   : > { %722 = vmatpush2.bf16.msra.mxu1 %v2349_v13  ;;  %520 = vmatprep.subr.bf16.mxu0 %v2350_v17  ;;  %v2429_v13 = vld [vmem:[%s3252_s3 + $0x30] ss:$8 sps:$4 sm:$0xff]   ;;  %v2435_v17 = vld [vmem:[%s3252_s3 + $0x20] ss:$8 sps:$4 sm:$0xff]  }
  0x47   : > { %723 = vmatprep.subr.bf16.mxu1 %v2352_v18  ;;  %v2443_v18 = vld [vmem:[%s3252_s3 + $0x14] ss:$8 sps:$4 sm:$0xff]  }
  0x49   : > { %521 = vmatpush2.bf16.msra.mxu0 %v2354_v19  ;;  %v2444_v19 = vld [vmem:[%s3252_s3 + $0x120] ss:$8 sps:$4 sm:$0xff]  }
  0x4a   : > { %724 = vmatpush2.bf16.msra.mxu1 %v2355_v20  ;;  %942 = vmatprep.subr.bf16.mxu0 %v2362_v23  ;;  %v2452_v20 = vld [vmem:[%s3252_s3 + $0x114] ss:$8 sps:$4 sm:$0xff]   ;;  %v2450_v23 = vld [vmem:[%s3252_s3 + $0x110] ss:$8 sps:$4 sm:$0xff]  }
  0x4b   : > { %1299 = vmatprep.subr.bf16.mxu1 %v2416_v63 }
  0x4c   : > { %523 = vmatmul.mubr.bf16.vlgmr.msra.gmra.mxu0 %v315_v26  ;;  %v2455_v26 = vld [vmem:[%s3252_s3 + $0xf4] ss:$8 sps:$4 sm:$0xff]  }
  0x4d   : > { %726 = vmatmul.mubr.bf16.vlgmr.msra.gmra.mxu1 %v1919_v62  ;;  %943 = vmatpush1.bf16.msra.mxu0 %v2360_v27  ;;  %v2414_v62 = vld [vmem:[%s3252_s3 + $0x170] ss:$8 sps:$4 sm:$0xff]   ;;  %v2456_v27 = vld [vmem:[%s3252_s3 + $0x100] ss:$8 sps:$4 sm:$0xff]  }
  0x4e   : > { %974 = vmatprep.mubr.bf16.mxu0 %v779_v29  ;;  %944 = vmatprep.subr.bf16.mxu0 %v2365_v28  ;;  %v2453_v28 = vld [vmem:[%s3252_s3 + $0xf0] ss:$8 sps:$4 sm:$0xff]   ;;  %v2461_v29 = vld [vmem:[%s3252_s3 + $0xe4] ss:$8 sps:$4 sm:$0xff]  }
  0x4f   : > { %1300 = vmatpush1.bf16.msra.mxu1 %v2414_v62  ;;  %v991_v62 = vlaneseq }
  0x50   : > { %1301 = vmatprep.subr.bf16.mxu1 %v2422_v1 }
  0x51   : > { %945 = vmatpush1.bf16.msra.mxu0 %v2363_v30  ;;  %v2459_v30 = vld [vmem:[%s3252_s3 + $0xe0] ss:$8 sps:$4 sm:$0xff]   ;;  %v3117_v1 = vshrl.u32 %v991_v62, 7 }
  0x52   : > { %946 = vmatprep.subr.bf16.mxu0 %v2368_v31  ;;  %v2464_v31 = vld [vmem:[%s3252_s3 + $0x1f4] ss:$8 sps:$4 sm:$0xff]  }
  0x53   : > { %1302 = vmatpush1.bf16.msra.mxu1 %v2420_v3 }
  0x54   : > { %1303 = vmatprep.subr.bf16.mxu1 %v2428_v4  ;;  %v993_v4 = vsub.s32 0, %v3117_v1 }
  0x55   : > { %947 = vmatpush1.bf16.msra.mxu0 %v2366_v32  ;;  %v2467_v32 = vld [vmem:[%s3252_s3 + $0xd4] ss:$8 sps:$4 sm:$0xff]  }
  0x56   : > { %948 = vmatprep.subr.bf16.mxu0 %v2371_v33  ;;  %v2462_v33 = vld [vmem:[%s3252_s3 + $0x1f0] ss:$8 sps:$4 sm:$0xff]  }
  0x57   : > { %1304 = vmatpush1.bf16.msra.mxu1 %v2426_v7 }
  0x58   : > { %1305 = vmatprep.subr.bf16.mxu1 %v2434_v8 }
  0x59   : > { %949 = vmatpush1.bf16.msra.mxu0 %v2369_v34  ;;  %v2465_v34 = vld [vmem:[%s3252_s3 + $0xd0] ss:$8 sps:$4 sm:$0xff]  }
  0x5a   : > { %950 = vmatprep.subr.bf16.mxu0 %v2374_v35  ;;  %v2470_v35 = vld [vmem:[%s3252_s3 + $0x1e4] ss:$8 sps:$4 sm:$0xff]  }
  0x5d   : > { %951 = vmatpush1.bf16.msra.mxu0 %v2372_v36  ;;  %v2473_v36 = vld [vmem:[%s3252_s3 + $0xc4] ss:$8 sps:$4 sm:$0xff]  }
  0x5e   : > { %952 = vmatprep.subr.bf16.mxu0 %v2377_v37  ;;  %v2468_v37 = vld [vmem:[%s3252_s3 + $0x1e0] ss:$8 sps:$4 sm:$0xff]  }
  0x61   : > { %953 = vmatpush1.bf16.msra.mxu0 %v2375_v38  ;;  %v2471_v38 = vld [vmem:[%s3252_s3 + $0xc0] ss:$8 sps:$4 sm:$0xff]  }
  0x62   : > { %954 = vmatprep.subr.bf16.mxu0 %v2380_v39  ;;  %v2476_v39 = vld [vmem:[%s3252_s3 + $0x1d4] ss:$8 sps:$4 sm:$0xff]  }
  0x65   : > { %955 = vmatpush1.bf16.msra.mxu0 %v2378_v40  ;;  %v2479_v40 = vld [vmem:[%s3252_s3 + $0xb4] ss:$8 sps:$4 sm:$0xff]  }
  0x66   : > { %956 = vmatprep.subr.bf16.mxu0 %v2383_v41  ;;  %v2474_v41 = vld [vmem:[%s3252_s3 + $0x1d0] ss:$8 sps:$4 sm:$0xff]  }
  0x69   : > { %957 = vmatpush1.bf16.msra.mxu0 %v2381_v42  ;;  %v2477_v42 = vld [vmem:[%s3252_s3 + $0xb0] ss:$8 sps:$4 sm:$0xff]  }
  0x6a   : > { %958 = vmatprep.subr.bf16.mxu0 %v2386_v43  ;;  %v2563_v43 = vmov 0.0  }
  0x6b   : > { %1009 = vst [vmem:[#allocation2 + $0x28] sm:$0xff] %v2563_v43  ;;  %1010 = vst [vmem:[#allocation2 + $0x10] sm:$0xff] %v2563_v43 }
  0x6c   : > { %1013 = vst [vmem:[#allocation2 + $0x18] sm:$0x3] %v2563_v43  ;;  %1014 = vst [vmem:[#allocation2 + $0x20] sm:$0x3] %v2563_v43 }
  0x6d   : > { %959 = vmatpush2.bf16.msra.mxu0 %v2384_v44  ;;  %v2482_v44 = vld [vmem:[%s3252_s3 + $0x1c4] ss:$8 sps:$4 sm:$0xff]  }
  0x6e   : > { %960 = vmatprep.subr.bf16.mxu0 %v2389_v45  ;;  %v2485_v45 = vld [vmem:[%s3252_s3 + $0xa4] ss:$8 sps:$4 sm:$0xff]  }
  0x71   : > { %961 = vmatpush2.bf16.msra.mxu0 %v2387_v46  ;;  %v2480_v46 = vld [vmem:[%s3252_s3 + $0x1c0] ss:$8 sps:$4 sm:$0xff]  }
  0x72   : > { %962 = vmatprep.subr.bf16.mxu0 %v2392_v47  ;;  %v2483_v47 = vld [vmem:[%s3252_s3 + $0xa0] ss:$8 sps:$4 sm:$0xff]  }
  0x75   : > { %963 = vmatpush2.bf16.msra.mxu0 %v2390_v48  ;;  %v2488_v48 = vld [vmem:[%s3252_s3 + $0x1b4] ss:$8 sps:$4 sm:$0xff]  }
  0x76   : > { %964 = vmatprep.subr.bf16.mxu0 %v2395_v49  ;;  %v2491_v49 = vld [vmem:[%s3252_s3 + $0x94] ss:$8 sps:$4 sm:$0xff]  }
  0x79   : > { %965 = vmatpush2.bf16.msra.mxu0 %v2393_v50  ;;  %v2486_v50 = vld [vmem:[%s3252_s3 + $0x1b0] ss:$8 sps:$4 sm:$0xff]  }
  0x7a   : > { %966 = vmatprep.subr.bf16.mxu0 %v2398_v51  ;;  %v2489_v51 = vld [vmem:[%s3252_s3 + $0x90] ss:$8 sps:$4 sm:$0xff]  }
  0x7d   : > { %967 = vmatpush2.bf16.msra.mxu0 %v2396_v52  ;;  %v2492_v52 = vld [vmem:[%s3252_s3 + $0x1a0] ss:$8 sps:$4 sm:$0xff]  }
  0x7e   : > { %968 = vmatprep.subr.bf16.mxu0 %v2401_v53  ;;  %v2494_v53 = vld [vmem:[%s3252_s3 + $0x1a4] ss:$8 sps:$4 sm:$0xff]  }
  0x81   : > { %969 = vmatpush2.bf16.msra.mxu0 %v2399_v54  ;;  %v2495_v54 = vld [vmem:[%s3252_s3 + $0x80] ss:$8 sps:$4 sm:$0xff]  }
  0x82   : > { %970 = vmatprep.subr.bf16.mxu0 %v2404_v55  ;;  %v2497_v55 = vld [vmem:[%s3252_s3 + $0x84] ss:$8 sps:$4 sm:$0xff]  }
  0x85   : > { %971 = vmatpush2.bf16.msra.mxu0 %v2402_v56  ;;  %v2500_v56 = vld [vmem:[%s3252_s3 + $0x194] ss:$8 sps:$4 sm:$0xff]  }
  0x86   : > { %972 = vmatprep.subr.bf16.mxu0 %v2407_v57  ;;  %v2498_v57 = vld [vmem:[%s3252_s3 + $0x190] ss:$8 sps:$4 sm:$0xff]  }
  0x89   : > { %973 = vmatpush2.bf16.msra.mxu0 %v2405_v58  ;;  %v2503_v58 = vld [vmem:[%s3252_s3 + $0x184] ss:$8 sps:$4 sm:$0xff]  }
  0x8a   : > { %1502 = vmatprep.subr.bf16.mxu0 %v2410_v60  ;;  %v2506_v60 = vld [vmem:[%s3252_s3 + $0x274] ss:$8 sps:$4 sm:$0xff]  }
  0x8c   : > { %975 = vmatmul.mubr.bf16.vlgmr.msra.gmra.mxu0 %v2801_v11  ;;  %v2432_v11 = vld [vmem:[%s3252_s3 + $0x140] ss:$8 sps:$4 sm:$0xff]  }
  0x8d   : > { %1503 = vmatpush1.bf16.msra.mxu0 %v2408_v59  ;;  %1306 = vmatpush1.bf16.msra.mxu1 %v2432_v11  ;;  %v2501_v59 = vld [vmem:[%s3252_s3 + $0x180] ss:$8 sps:$4 sm:$0xff]  }
  0x8e   : > { %1504 = vmatprep.subr.bf16.mxu0 %v2413_v61  ;;  %1307 = vmatprep.subr.bf16.mxu1 %v2440_v12 }
  0x91   : > { %1505 = vmatpush1.bf16.msra.mxu0 %v2411_v0  ;;  %1308 = vmatpush1.bf16.msra.mxu1 %v2438_v15 }
  0x92   : > { %1506 = vmatprep.subr.bf16.mxu0 %v2419_v2  ;;  %1309 = vmatprep.subr.bf16.mxu1 %v2446_v16 }
  0x95   : > { %1507 = vmatpush1.bf16.msra.mxu0 %v2417_v5  ;;  %1310 = vmatpush1.bf16.msra.mxu1 %v2444_v19  ;;  %v989_v5 = vld [vmem:[%s3251_s2] sm:$0x3] }
  0x96   : > { %1508 = vmatprep.subr.bf16.mxu0 %v2425_v6  ;;  %1311 = vmatprep.subr.bf16.mxu1 %v2452_v20  ;;  %v997_v6 = vsub.s32 1, %v3117_v1 }
  0x99   : > { %1509 = vmatpush1.bf16.msra.mxu0 %v2423_v9  ;;  %1312 = vmatpush1.bf16.msra.mxu1 %v2450_v23 }
  0x9a   : > { %1510 = vmatprep.subr.bf16.mxu0 %v2431_v10  ;;  %1313 = vmatprep.subr.bf16.mxu1 %v2458_v24  ;;  %v994_v10 = vrot.slane %v989_v5, %v993_v4 }
  0x9d   : > { %1511 = vmatpush1.bf16.msra.mxu0 %v2429_v13  ;;  %1314 = vmatpush1.bf16.msra.mxu1 %v2456_v27 }
  0x9e   : > { %1512 = vmatprep.subr.bf16.mxu0 %v2437_v14  ;;  %1315 = vmatprep.subr.bf16.mxu1 %v2464_v31  ;;  %v998_v14 = vrot.slane %v989_v5, %v997_v6 }
  0xa1   : > { %1513 = vmatpush1.bf16.msra.mxu0 %v2435_v17  ;;  %1316 = vmatpush2.bf16.msra.mxu1 %v2462_v33 }
  0xa2   : > { %1514 = vmatprep.subr.bf16.mxu0 %v2443_v18  ;;  %1317 = vmatprep.subr.bf16.mxu1 %v2470_v35 }
  0xa5   : > { %1515 = vmatpush1.bf16.msra.mxu0 %v2441_v21  ;;  %1318 = vmatpush2.bf16.msra.mxu1 %v2468_v37 }
  0xa6   : > { %1516 = vmatprep.subr.bf16.mxu0 %v2449_v22  ;;  %1319 = vmatprep.subr.bf16.mxu1 %v2476_v39 }
  0xa9   : > { %1517 = vmatpush1.bf16.msra.mxu0 %v2447_v25  ;;  %1320 = vmatpush2.bf16.msra.mxu1 %v2474_v41 }
  0xaa   : > { %1518 = vmatprep.subr.bf16.mxu0 %v2455_v26  ;;  %1321 = vmatprep.subr.bf16.mxu1 %v2482_v44 }
  0xad   : > { %1519 = vmatpush2.bf16.msra.mxu0 %v2453_v28  ;;  %1322 = vmatpush2.bf16.msra.mxu1 %v2480_v46 }
  0xae   : > { %1520 = vmatprep.subr.bf16.mxu0 %v2461_v29  ;;  %1323 = vmatprep.subr.bf16.mxu1 %v2488_v48 }
  0xb1   : > { %1521 = vmatpush2.bf16.msra.mxu0 %v2459_v30  ;;  %1324 = vmatpush2.bf16.msra.mxu1 %v2486_v50 }
  0xb2   : > { %1522 = vmatprep.subr.bf16.mxu0 %v2467_v32  ;;  %1325 = vmatprep.subr.bf16.mxu1 %v2494_v53 }
  0xb5   : > { %1523 = vmatpush2.bf16.msra.mxu0 %v2465_v34  ;;  %1326 = vmatpush2.bf16.msra.mxu1 %v2492_v52 }
  0xb6   : > { %1524 = vmatprep.subr.bf16.mxu0 %v2473_v36  ;;  %1327 = vmatprep.subr.bf16.mxu1 %v2500_v56 }
  0xb9   : > { %1525 = vmatpush2.bf16.msra.mxu0 %v2471_v38  ;;  %1328 = vmatpush2.bf16.msra.mxu1 %v2498_v57 }
  0xba   : > { %1526 = vmatprep.subr.bf16.mxu0 %v2479_v40  ;;  %1329 = vmatprep.subr.bf16.mxu1 %v2503_v58 }
  0xbd   : > { %1527 = vmatpush2.bf16.msra.mxu0 %v2477_v42  ;;  %1330 = vmatpush2.bf16.msra.mxu1 %v2501_v59 }
  0xbe   : > { %1528 = vmatprep.subr.bf16.mxu0 %v2485_v45  ;;  %1750 = vmatprep.subr.bf16.mxu1 %v2506_v60 }
  0xc1   : > { %1529 = vmatpush2.bf16.msra.mxu0 %v2483_v47 }
  0xc2   : > { %1530 = vmatprep.subr.bf16.mxu0 %v2491_v49 }
  0xc5   : > { %1531 = vmatpush2.bf16.msra.mxu0 %v2489_v51 }
  0xc6   : > { %1532 = vmatprep.subr.bf16.mxu0 %v2497_v55 }
  0xc9   : > { %1533 = vmatpush2.bf16.msra.mxu0 %v2495_v54 }
 0x10c   : > { %v524_v61 = vpop.f32.mrf.mxu0 }
 0x10d   : > { %v727_v63 = vpop.f32.mrf.mxu1 }
 0x10e   : > { %v526_v0 = vpop.f32.mrf.mxu0  ;;  %v728_v9 = vadd.f32 %v727_v63, %v524_v61  ;;  %v2504_v61 = vld [vmem:[%s3252_s3 + $0x270] ss:$8 sps:$4 sm:$0xff]  }
 0x10f   : > { %v729_v2 = vpop.f32.mrf.mxu1 }
 0x110   : > { %v528_v3 = vpop.f32.mrf.mxu0  ;;  %v730_v12 = vadd.f32 %v729_v2, %v526_v0  ;;  %v2509_v2 = vld [vmem:[%s3252_s3 + $0x264] ss:$8 sps:$4 sm:$0xff]  }
 0x111   : > { %v731_v7 = vpop.f32.mrf.mxu1 }
 0x112   : > { %v530_v8 = vpop.f32.mrf.mxu0  ;;  %v732_v17 = vadd.f32 %v731_v7, %v528_v3  ;;  %v2507_v7 = vld [vmem:[%s3252_s3 + $0x260] ss:$8 sps:$4 sm:$0xff]  }
 0x113   : > { %v733_v15 = vpop.f32.mrf.mxu1 }
 0x114   : > { %v734_v21 = vadd.f32 %v733_v15, %v530_v8  ;;  %v2512_v8 = vld [vmem:[%s3252_s3 + $0x254] ss:$8 sps:$4 sm:$0xff]   ;;  %v2519_v15 = vld [vmem:[%s3252_s3 + $0x220] ss:$8 sps:$4 sm:$0xff]  }
 0x14c   : > { %v976_v11 = vpop.f32.mrf.mxu0 }
 0x14d   : > { %v985_v13 = vadd.f32 %v976_v11, %v728_v9  ;;  %v2510_v9 = vld [vmem:[%s3252_s3 + $0x250] ss:$8 sps:$4 sm:$0xff]   ;;  %v2513_v11 = vld [vmem:[%s3252_s3 + $0x240] ss:$8 sps:$4 sm:$0xff]  }
 0x14e   : > { %v978_v16 = vpop.f32.mrf.mxu0 }
 0x14f   : > { %v1001_v18 = vadd.f32 %v994_v10, %v985_v13  ;;  %v986_v19 = vadd.f32 %v978_v16, %v730_v12  ;;  %v2518_v12 = vld [vmem:[%s3252_s3 + $0x234] ss:$8 sps:$4 sm:$0xff]   ;;  %v2516_v13 = vld [vmem:[%s3252_s3 + $0x230] ss:$8 sps:$4 sm:$0xff]  }
 0x150   : > { %v980_v20 = vpop.f32.mrf.mxu0  ;;  %v2524_v16 = vld [vmem:[%s3252_s3 + $0x214] ss:$8 sps:$4 sm:$0xff]  }
 0x151   : > { %v1005_v22 = vmax.f32 %v1001_v18, 0.0  ;;  %v1002_v23 = vadd.f32 %v998_v14, %v986_v19  ;;  %v987_v24 = vadd.f32 %v980_v20, %v732_v17  ;;  %v2522_v17 = vld [vmem:[%s3252_s3 + $0x210] ss:$8 sps:$4 sm:$0xff]   ;;  %v2527_v18 = vld [vmem:[%s3252_s3 + $0x204] ss:$8 sps:$4 sm:$0xff]  }
 0x152   : > { %v982_v25 = vpop.f32.mrf.mxu0  ;;  %v2525_v19 = vld [vmem:[%s3252_s3 + $0x200] ss:$8 sps:$4 sm:$0xff]   ;;  %v2530_v20 = vld [vmem:[%s3252_s3 + $0x2f4] ss:$8 sps:$4 sm:$0xff]  }
 0x153   : > { %v1020_v26 = vrot.slane %v1005_v22, 7  ;;  %v1006_v27 = vmax.f32 %v1002_v23, 0.0  ;;  %v1003_v28 = vadd.f32 %v994_v10, %v987_v24  ;;  %v988_v29 = vadd.f32 %v982_v25, %v734_v21  ;;  %v2515_v10 = vld [vmem:[%s3252_s3 + $0x244] ss:$8 sps:$4 sm:$0xff]   ;;  %v2528_v21 = vld [vmem:[%s3252_s3 + $0x2f0] ss:$8 sps:$4 sm:$0xff]  }
 0x154   : > { %v2533_v22 = vld [vmem:[%s3252_s3 + $0x2e4] ss:$8 sps:$4 sm:$0xff]   ;;  %v2531_v23 = vld [vmem:[%s3252_s3 + $0x2e0] ss:$8 sps:$4 sm:$0xff]   ;;  %v2536_v24 = vld [vmem:[%s3252_s3 + $0x2d4] ss:$8 sps:$4 sm:$0xff]  }
 0x155   : > { %1032 = vst [vmem:[#allocation2 + $0x28] sm:$0xfe] %v1020_v26  ;;  %v1021_v30 = vrot.slane %v1006_v27, 7  ;;  %v1007_v31 = vmax.f32 %v1003_v28, 0.0  ;;  %v1004_v32 = vadd.f32 %v998_v14, %v988_v29  ;;  %v2521_v14 = vld [vmem:[%s3252_s3 + $0x224] ss:$8 sps:$4 sm:$0xff]  }
 0x156   : > { %v2534_v25 = vld [vmem:[%s3252_s3 + $0x2d0] ss:$8 sps:$4 sm:$0xff]   ;;  %v2537_v27 = vld [vmem:[%s3252_s3 + $0x2c0] ss:$8 sps:$4 sm:$0xff]   ;;  %v2542_v28 = vld [vmem:[%s3252_s3 + $0x2b4] ss:$8 sps:$4 sm:$0xff]  }
 0x157   : > { %1033 = vst [vmem:[#allocation2 + $0x10] sm:$0xfe] %v1021_v30  ;;  %v1022_v33 = vrot.slane %v1007_v31, 7  ;;  %v1008_v34 = vmax.f32 %v1004_v32, 0.0  ;;  %v2540_v29 = vld [vmem:[%s3252_s3 + $0x2b0] ss:$8 sps:$4 sm:$0xff]  }
 0x158   : > { %v2543_v31 = vld [vmem:[%s3252_s3 + $0x2a0] ss:$8 sps:$4 sm:$0xff]   ;;  %v2548_v32 = vld [vmem:[%s3252_s3 + $0x294] ss:$8 sps:$4 sm:$0xff]  }
 0x159   : > { %v1023_v35 = vsel %vm1019_vm2, %v1020_v26, %v1022_v33  ;;  %1036 = vst [vmem:[#allocation2 + $0x18] sm:$0x1] %v1022_v33  ;;  %v1024_v36 = vrot.slane %v1008_v34, 7  ;;  %v2539_v26 = vld [vmem:[%s3252_s3 + $0x2c4] ss:$8 sps:$4 sm:$0xff]  }
 0x15a   : > { %v2546_v33 = vld [vmem:[%s3252_s3 + $0x290] ss:$8 sps:$4 sm:$0xff]   ;;  %v2551_v34 = vld [vmem:[%s3252_s3 + $0x284] ss:$8 sps:$4 sm:$0xff]  }
 0x15b   : > { %v1025_v37 = vsel %vm1019_vm2, %v1021_v30, %v1024_v36  ;;  %1037 = vst [vmem:[#allocation2 + $0x20] sm:$0x1] %v1024_v36  ;;  %v2545_v30 = vld [vmem:[%s3252_s3 + $0x2a4] ss:$8 sps:$4 sm:$0xff]  }
 0x15c   : > { %v1038_v38 = vld [vmem:[#allocation2 + $0x28] sm:$0xff] }
 0x15d   : > { %v1044_v39 = vpack.c.bf16 %v1023_v35, %v1038_v38  ;;  %v2549_v35 = vld [vmem:[%s3252_s3 + $0x280] ss:$8 sps:$4 sm:$0xff]  }
 0x15e   : > { %v1039_v40 = vld [vmem:[#allocation2 + $0x10] sm:$0xff] }
 0x15f   : > { %v1045_v41 = vpack.c.bf16 %v1025_v37, %v1039_v40  ;;  %v1116_v43 = vshll.u32 %v1044_v39, 16  ;;  %v1582_v51 = vrot.slane %v1044_v39, 1  ;;  %v1114_v55 = vshrl.u32 %v1044_v39, 16  ;;  %v2552_v40 = vld [vmem:[%s2744_s17] sm:$0xff] }
 0x160   : > { %v1042_v42 = vld [vmem:[#allocation2 + $0x18] sm:$0x3] }
 0x161   : > { %1534 = vmatprep.mubr.bf16.mxu0 %v1045_v41  ;;  %v1128_v44 = vshll.u32 %v1045_v41, 16  ;;  %v1078_v45 = vpack.c.bf16 %v1042_v42, %v1042_v42  ;;  %v1118_v50 = vrot.slane %v1116_v43, 1  ;;  %v1126_v53 = vshrl.u32 %v1045_v41, 16  ;;  %v2553_v42 = vld [vmem:[%s2744_s17 + $0x8] sm:$0xff] }
 0x162   : > { %1535 = vmatmul.mubr.bf16.vlgmr.msra.gmra.mxu0 %v1044_v39  ;;  %v1043_v46 = vld [vmem:[#allocation2 + $0x20] sm:$0x3]  ;;  %v1585_v0 = vrot.slane %v1045_v41, 1  ;;  %v228_v41 = vunpack.c.l.bf16 %v2552_v40  ;;  %v230_v43 = vunpack.c.l.bf16 %v2553_v42 }
 0x163   : > { %v1079_v47 = vpack.c.bf16 %v1043_v46, %v1043_v46  ;;  %v1130_v48 = vrot.slane %v1128_v44, 1  ;;  %v1121_v49 = vshll.u32 %v1078_v45, 16  ;;  %v1583_v52 = vrot.slane %v1078_v45, 1  ;;  %v1797_v45 = vld [vmem:[%s3253_s4] sm:$0x3] }
 0x164   : > { %v1119_v62 = vor.u32 %v1118_v50, %v1114_v55  ;;  %v229_v46 = vunpack.c.h.bf16 %v2552_v40  ;;  %v1821_v50 = vrot.slane %v230_v43, 1 }
 0x165   : > { %v1133_v54 = vshll.u32 %v1079_v47, 16  ;;  %v1123_v56 = vrot.slane %v1121_v49, 1  ;;  %v3129_v57 = vsel %vm773_vm1, %v1582_v51, %v1583_v52  ;;  %v1131_v58 = vor.u32 %v1130_v48, %v1126_v53  ;;  %v2554_v51 = vld [vmem:[%s2744_s17 + $0x10] sm:$0x11]  ;;  %s2247_s17 = sshll.u32 %s3256_s19, 4 }
 0x166   : > { %v1586_v60 = vrot.slane %v1079_v47, 1  ;;  %v231_v47 = vunpack.c.h.bf16 %v2553_v42  ;;  %v1820_v49 = vrot.slane %v228_v41, 1  ;;  %v232_v52 = vunpack.c.l.bf16 %v2554_v51  ;;  %s224_s11 = scalar_lea.vmem %s3254_s5, %s2247_s17 }
 0x167   : > { %v1135_v59 = vrot.slane %v1133_v54, 1  ;;  %v1124_v3 = vsel %vm303_vm0, %v1119_v62, %v1123_v56  ;;  %v1802_v54 = vrot.slane %v1797_v45, %v993_v4  ;;  %v1806_v62 = vrot.slane %v1797_v45, %v997_v6 }
 0x168   : > { %v1587_v5 = vsel %vm773_vm1, %v1585_v0, %v1586_v60 }
 0x169   : > { %v1136_v63 = vsel %vm303_vm0, %v1131_v58, %v1135_v59  ;;  %v1824_v58 = vrot.slane %v231_v47, 1  ;;  %v233_v59 = vunpack.c.h.bf16 %v2554_v51 }
 0x16a   : > { %1331 = vmatprep.mubr.bf16.mxu1 %v1136_v63  ;;  %v1822_v63 = vsel %vm773_vm1, %v1820_v49, %v1821_v50 }
 0x16b   : > { %1332 = vmatmul.mubr.bf16.vlgmr.msra.gmra.mxu1 %v1124_v3 }
 0x16c   : > { %1751 = vmatpush1.bf16.msra.mxu1 %v2504_v61  ;;  %1782 = vmatprep.mubr.bf16.mxu1 %v1587_v5 }
 0x16d   : > { %1752 = vmatprep.subr.bf16.mxu1 %v2509_v2  ;;  %v1826_v2 = vrot.slane %v232_v52, 1 }
 0x16f   : > { %v1827_v1 = vsel %vm773_vm1, %v1821_v50, %v1826_v2 }
 0x170   : > { %1753 = vmatpush1.bf16.msra.mxu1 %v2507_v7 }
 0x171   : > { %1754 = vmatprep.subr.bf16.mxu1 %v2512_v8 }
 0x174   : > { %1755 = vmatpush1.bf16.msra.mxu1 %v2510_v9 }
 0x175   : > { %1756 = vmatprep.subr.bf16.mxu1 %v2515_v10  ;;  %v1828_v10 = vrot.slane %v233_v59, 1 }
 0x178   : > { %1757 = vmatpush1.bf16.msra.mxu1 %v2513_v11 }
 0x179   : > { %1758 = vmatprep.subr.bf16.mxu1 %v2518_v12 }
 0x17c   : > { %1759 = vmatpush1.bf16.msra.mxu1 %v2516_v13 }
 0x17d   : > { %1760 = vmatprep.subr.bf16.mxu1 %v2521_v14 }
 0x180   : > { %1761 = vmatpush1.bf16.msra.mxu1 %v2519_v15 }
 0x181   : > { %1762 = vmatprep.subr.bf16.mxu1 %v2524_v16 }
 0x184   : > { %1763 = vmatpush1.bf16.msra.mxu1 %v2522_v17 }
 0x185   : > { %1764 = vmatprep.subr.bf16.mxu1 %v2527_v18  ;;  %v1829_v18 = vsel %vm773_vm1, %v1824_v58, %v1828_v10 }
 0x188   : > { %1765 = vmatpush1.bf16.msra.mxu1 %v2525_v19 }
 0x189   : > { %1766 = vmatprep.subr.bf16.mxu1 %v2530_v20 }
 0x18c   : > { %1767 = vmatpush2.bf16.msra.mxu1 %v2528_v21 }
 0x18d   : > { %1768 = vmatprep.subr.bf16.mxu1 %v2533_v22 }
 0x190   : > { %1769 = vmatpush2.bf16.msra.mxu1 %v2531_v23 }
 0x191   : > { %1770 = vmatprep.subr.bf16.mxu1 %v2536_v24 }
 0x194   : > { %1771 = vmatpush2.bf16.msra.mxu1 %v2534_v25 }
 0x195   : > { %1772 = vmatprep.subr.bf16.mxu1 %v2539_v26 }
 0x198   : > { %1773 = vmatpush2.bf16.msra.mxu1 %v2537_v27 }
 0x199   : > { %1774 = vmatprep.subr.bf16.mxu1 %v2542_v28 }
 0x19c   : > { %1775 = vmatpush2.bf16.msra.mxu1 %v2540_v29 }
 0x19d   : > { %1776 = vmatprep.subr.bf16.mxu1 %v2545_v30 }
 0x1a0   : > { %1777 = vmatpush2.bf16.msra.mxu1 %v2543_v31 }
 0x1a1   : > { %1778 = vmatprep.subr.bf16.mxu1 %v2548_v32 }
 0x1a4   : > { %1779 = vmatpush2.bf16.msra.mxu1 %v2546_v33 }
 0x1a5   : > { %1780 = vmatprep.subr.bf16.mxu1 %v2551_v34 }
 0x1a8   : > { %1781 = vmatpush2.bf16.msra.mxu1 %v2549_v35 }
 0x1ab   : > { %1783 = vmatmul.mubr.bf16.vlgmr.msra.gmra.mxu1 %v3129_v57  ;;  %v1823_v57 = vrot.slane %v229_v46, 1 }
 0x1ad   : > { %v1825_v4 = vsel %vm773_vm1, %v1823_v57, %v1824_v58 }
 0x222   : > { %v1536_v38 = vpop.f32.mrf.mxu0 }
 0x224   : > { %v1538_v44 = vpop.f32.mrf.mxu0 }
 0x226   : > { %v1540_v55 = vpop.f32.mrf.mxu0 }
 0x228   : > { %v1542_v8 = vpop.f32.mrf.mxu0 }
 0x22b   : > { %v1333_v36 = vpop.f32.mrf.mxu1 }
 0x22c   : > { %v1537_v53 = vadd.f32 %v1536_v38, %v1333_v36 }
 0x22d   : > { %v1335_v37 = vpop.f32.mrf.mxu1 }
 0x22e   : > { %v1539_v60 = vadd.f32 %v1538_v44, %v1335_v37 }
 0x22f   : > { %v1337_v39 = vpop.f32.mrf.mxu1 }
 0x230   : > { %v1541_v3 = vadd.f32 %v1540_v55, %v1337_v39 }
 0x231   : > { %v1339_v48 = vpop.f32.mrf.mxu1 }
 0x232   : > { %v1543_v11 = vadd.f32 %v1542_v8, %v1339_v48 }
 0x26b   : > { %v1784_v56 = vpop.f32.mrf.mxu1 }
 0x26c   : > { %v1793_v61 = vadd.f32 %v1784_v56, %v1537_v53 }
 0x26d   : > { %v1786_v0 = vpop.f32.mrf.mxu1 }
 0x26e   : > { %v1809_v5 = vadd.f32 %v1802_v54, %v1793_v61  ;;  %v1794_v7 = vadd.f32 %v1786_v0, %v1539_v60 }
 0x26f   : > { %v1788_v9 = vpop.f32.mrf.mxu1 }
 0x270   : > { %v1834_v12 = vadd.f32 %v1822_v63, %v1809_v5  ;;  %v1810_v13 = vadd.f32 %v1806_v62, %v1794_v7  ;;  %v1795_v14 = vadd.f32 %v1788_v9, %v1541_v3 }
 0x271   : > { %v1790_v6 = vpop.f32.mrf.mxu1 }
 0x272   : > { %v1835_v15 = vadd.f32 %v1825_v4, %v1810_v13  ;;  %v1811_v16 = vadd.f32 %v1802_v54, %v1795_v14  ;;  %v1796_v17 = vadd.f32 %v1790_v6, %v1543_v11  ;;  %v1838_v19 = vmax.f32 %v1834_v12, 0.0 }
 0x274   : > { %v1839_v20 = vmax.f32 %v1835_v15, 0.0  ;;  %v1836_v21 = vadd.f32 %v1827_v1, %v1811_v16  ;;  %v1812_v22 = vadd.f32 %v1806_v62, %v1796_v17 }
 0x276   : > { %v2248_v23 = vpack.c.bf16 %v1839_v20, %v1838_v19  ;;  %v1837_v24 = vadd.f32 %v1829_v18, %v1812_v22  ;;  %v1840_v25 = vmax.f32 %v1836_v21, 0.0 }
 0x278   : > { %1854 = vst [vmem:[%s224_s11] sm:$0xff] %v2248_v23  ;;  %v1841_v26 = vmax.f32 %v1837_v24, 0.0 }
 0x27a   : > { %v2249_v27 = vpack.c.bf16 %v1841_v26, %v1840_v25 }
 0x27c   : > { %1855 = vst [vmem:[%s224_s11 + $0x8] sm:$0xff] %v2249_v27 }
 0x27d PF: > { %s15_s18 = sadd.s32 1, %s2561_s18  }
 0x27e   : > { %p12_p4 = scmp.ge.s32.totalorder %s15_s18, 4  }
 0x280   :  { %14 = sbr.rel (!%p12_p4) target bundleno = 1 (0x1), region = 74 }

// kernel: _lambda_.12
= control target key start
LH: loop header
LB: loop body
LE: loop exit
PB: predicated region body
PF: predicated region fallthrough
CT: control target
= control target key end

     0   :  { %10 = vsyncpa [#allocation4], 0  ;;  %s2729_s0 = inlined_call_operand.vmem [shape: bf16[2,18,256], index: 0, kind: input, shape index: {}]   ;;  %s2730_s1 = inlined_call_operand.hbm [shape: bf16[3,256,256], index: 1, kind: input, shape index: {}]   ;;  %s2731_s2 = inlined_call_operand.vmem [shape: f32[1,256], index: 2, kind: input, shape index: {}]   ;;  %s2732_s3 = inlined_call_operand.hbm [shape: bf16[3,256,256], index: 3, kind: input, shape index: {}]   ;;  %s2733_s4 = inlined_call_operand.vmem [shape: f32[1,256], index: 4, kind: input, shape index: {}]   ;;  %s2734_s5 = inlined_call_operand.vmem [shape: bf16[2,16,256], index: 5, kind: output, shape index: {}]  }
   0x1   :  { %11 = vsyncpa [#allocation6], 0  ;;  %s2609_s18 = smov 0  }
   0x2 LB: > { %s2615_s19 = sadd.s32 4294967295, %s2572_s18   ;;  %p1965_p0 = scmp.ge.s32.totalorder %s2572_s18, 1  ;;  %s2572_s18 = sphi %s2609_s18, %s17_s18  }
   0x3   : > { %p158_p1 = scmp.lt.s32.totalorder %s2572_s18, 3  ;;  %s2574_s20 = smov [#allocation3]  }
   0x4   : > { %s170_s21 = sshll.u32 %s2574_s20, 4  ;;  %p2194_p3 = scmp.eq.s32.totalorder %s2615_s19, 0  ;;  %s171_s21 = int_to_ptr.vmem [resolvable:$true] %s170_s21 }
   0x5   : > { %p2619_p2 = pnand %p1965_p0, %p158_p1  ;;  %s2575_s23 = smov [#allocation5]  }
   0x6   : > { %s186_s24 = sshll.u32 %s2575_s23, 4  ;;  %s2517_s26 = scalar_lea.vmem %s171_s21, 12288  ;;  %s187_s24 = int_to_ptr.vmem [resolvable:$true] %s186_s24 }
   0x7   : > { %p2187_p4 = pneg %p2619_p2  ;;  %p2518_p7 = scmp.ne.s32.totalorder %s171_s21, %s2517_s26 }
   0x8   : > { %p2525_p10 = scmp.lt.s32.totalorder %s171_s21, %s171_s21  ;;  %p2526_p11 = scmp.lt.s32.totalorder %s2517_s26, %s2517_s26 }
   0x9   : > { %p2628_p5 = pnand %p2194_p3, %p2187_p4 }
   0xa   : > { %p2527_p12 = por %p2526_p11, %p2525_p10 }
   0xb   : > { %p2508_p6 = pneg %p2628_p5 }
   0xd   : > { %p2520_p8 = pnand %p2518_p7, %p2508_p6 }
   0xf   : > { %p2521_p9 = pneg %p2520_p8 }
  0x11   : > { %p2528_p13 = pnand %p2527_p12, %p2521_p9 }
  0x13   : > { %2531 = shalt.err (!%p2528_p13)
}
  0x14   : > { %s2576_s27 = smov 128   ;;  %s2577_s28 = smov 8  }
  0x15   : > { %2190 = dma.hbm_to_vmem [thread:$0]  (!%p2628_p5), %s2730_s1, 12288, %s171_s21, [#allocation4], %s2576_s27, %s2576_s27, %s2577_s28  }
  0x16   : > { %s2543_s6 = scalar_lea.vmem %s187_s24, 12288  ;;  %p2551_p7 = scmp.lt.s32.totalorder %s187_s24, %s187_s24 }
  0x17   : > { %p2544_p0 = scmp.ne.s32.totalorder %s187_s24, %s2543_s6  ;;  %p2552_p8 = scmp.lt.s32.totalorder %s2543_s6, %s2543_s6 }
  0x19   : > { %p2546_p1 = pnand %p2544_p0, %p2508_p6  ;;  %p2553_p10 = por %p2552_p8, %p2551_p7 }
  0x1b   : > { %p2547_p4 = pneg %p2546_p1 }
  0x1d   : > { %p2554_p9 = pnand %p2553_p10, %p2547_p4 }
  0x1f   : > { %2557 = shalt.err (!%p2554_p9)
}
  0x20   : > { %2193 = dma.hbm_to_vmem [thread:$0]  (!%p2628_p5), %s2732_s3, 12288, %s187_s24, [#allocation6], %s2576_s27, %s2576_s27, %s2577_s28  }
  0x21   : > { %213 = sbr.rel (%p2619_p2) target bundleno = 667 (0x29b), region = 40 }
  0x26   : > { %2563 = dma.done.wait (%p2194_p3), [#allocation4], 12288  }
  0x27   : > { %2565 = vsyncadd (%p2194_p3), [#allocation4], 4294955008 }
  0x28   : > { %2567 = dma.done.wait (%p2194_p3), [#allocation6], 12288  }
  0x29   : > { %2569 = vsyncadd (%p2194_p3), [#allocation6], 4294955008  ;;  %v2211_v0 = vld [vmem:[#allocation3 + $0x174] ss:$8 sps:$4 sm:$0xff]   ;;  %v2215_v2 = vld [vmem:[#allocation3 + $0x170] ss:$8 sps:$4 sm:$0xff]  }
  0x2a   : > { %v2213_v1 = vld [vmem:[#allocation3 + $0x74] ss:$8 sps:$4 sm:$0xff]   ;;  %520 = vmatprep.subr.bf16.mxu0 %v2211_v0  ;;  %v2216_v3 = vld [vmem:[#allocation3 + $0x70] ss:$8 sps:$4 sm:$0xff]   ;;  %v2217_v4 = vld [vmem:[#allocation3 + $0x164] ss:$8 sps:$4 sm:$0xff]  }
  0x2b   : > { %723 = vmatprep.subr.bf16.mxu1 %v2213_v1  ;;  %521 = vmatpush1.bf16.msra.mxu0 %v2215_v2  ;;  %v2219_v5 = vld [vmem:[#allocation3 + $0x64] ss:$8 sps:$4 sm:$0xff]   ;;  %v2221_v6 = vld [vmem:[#allocation3 + $0x160] ss:$8 sps:$4 sm:$0xff]   ;;  %v2223_v8 = vld [vmem:[#allocation3 + $0x154] ss:$8 sps:$4 sm:$0xff]  }
  0x2c   : > { %724 = vmatpush1.bf16.msra.mxu1 %v2216_v3  ;;  %522 = vmatprep.subr.bf16.mxu0 %v2217_v4  ;;  %v2222_v7 = vld [vmem:[#allocation3 + $0x60] ss:$8 sps:$4 sm:$0xff]   ;;  %v2225_v9 = vld [vmem:[#allocation3 + $0x54] ss:$8 sps:$4 sm:$0xff]   ;;  %v2227_v10 = vld [vmem:[#allocation3 + $0x150] ss:$8 sps:$4 sm:$0xff]  }
  0x2d   : > { %725 = vmatprep.subr.bf16.mxu1 %v2219_v5  ;;  %v2228_v11 = vld [vmem:[#allocation3 + $0x50] ss:$8 sps:$4 sm:$0xff]   ;;  %v2229_v12 = vld [vmem:[#allocation3 + $0x144] ss:$8 sps:$4 sm:$0xff]   ;;  %v2233_v14 = vld [vmem:[#allocation3 + $0x140] ss:$8 sps:$4 sm:$0xff]  }
  0x2e   : > { %v2231_v13 = vld [vmem:[#allocation3 + $0x44] ss:$8 sps:$4 sm:$0xff]   ;;  %v2234_v15 = vld [vmem:[#allocation3 + $0x40] ss:$8 sps:$4 sm:$0xff]   ;;  %v2235_v16 = vld [vmem:[#allocation3 + $0x134] ss:$8 sps:$4 sm:$0xff]  }
  0x2f   : > { %523 = vmatpush1.bf16.msra.mxu0 %v2221_v6  ;;  %v2237_v17 = vld [vmem:[#allocation3 + $0x34] ss:$8 sps:$4 sm:$0xff]   ;;  %v2239_v18 = vld [vmem:[#allocation3 + $0x130] ss:$8 sps:$4 sm:$0xff]   ;;  %v2241_v20 = vld [vmem:[#allocation3 + $0x124] ss:$8 sps:$4 sm:$0xff]  }
  0x30   : > { %726 = vmatpush1.bf16.msra.mxu1 %v2222_v7  ;;  %524 = vmatprep.subr.bf16.mxu0 %v2223_v8  ;;  %v2240_v19 = vld [vmem:[#allocation3 + $0x30] ss:$8 sps:$4 sm:$0xff]   ;;  %v2243_v21 = vld [vmem:[#allocation3 + $0x24] ss:$8 sps:$4 sm:$0xff]   ;;  %v2245_v22 = vld [vmem:[#allocation3 + $0x120] ss:$8 sps:$4 sm:$0xff]  }
  0x31   : > { %727 = vmatprep.subr.bf16.mxu1 %v2225_v9  ;;  %v2246_v23 = vld [vmem:[#allocation3 + $0x20] ss:$8 sps:$4 sm:$0xff]   ;;  %v2247_v24 = vld [vmem:[#allocation3 + $0x114] ss:$8 sps:$4 sm:$0xff]   ;;  %v2251_v26 = vld [vmem:[#allocation3 + $0x110] ss:$8 sps:$4 sm:$0xff]  }
  0x32   : > { %v2249_v25 = vld [vmem:[#allocation3 + $0x14] ss:$8 sps:$4 sm:$0xff]   ;;  %v2252_v27 = vld [vmem:[#allocation3 + $0x10] ss:$8 sps:$4 sm:$0xff]   ;;  %v2253_v28 = vld [vmem:[#allocation3 + $0x104] ss:$8 sps:$4 sm:$0xff]  }
  0x33   : > { %525 = vmatpush1.bf16.msra.mxu0 %v2227_v10  ;;  %v2255_v29 = vld [vmem:[#allocation3 + $0x4] ss:$8 sps:$4 sm:$0xff]   ;;  %v2257_v30 = vld [vmem:[#allocation3 + $0x100] ss:$8 sps:$4 sm:$0xff]   ;;  %p245_p2 = scmp.lt.s32.totalorder %s2615_s19, 1  ;;  %vm803_vm1 = vcmask 1046528  }
  0x34   : > { %728 = vmatpush1.bf16.msra.mxu1 %v2228_v11  ;;  %526 = vmatprep.subr.bf16.mxu0 %v2229_v12  ;;  %v2258_v31 = vld [vmem:[#allocation3] ss:$8 sps:$4 sm:$0xff]   ;;  %v2259_v32 = vld [vmem:[#allocation3 + $0x1f4] ss:$8 sps:$4 sm:$0xff]   ;;  %v2263_v34 = vld [vmem:[#allocation3 + $0x1f0] ss:$8 sps:$4 sm:$0xff]  }
  0x35   : > { %729 = vmatprep.subr.bf16.mxu1 %v2231_v13  ;;  %v2261_v33 = vld [vmem:[#allocation3 + $0xf4] ss:$8 sps:$4 sm:$0xff]   ;;  %v2264_v35 = vld [vmem:[#allocation3 + $0xf0] ss:$8 sps:$4 sm:$0xff]   ;;  %s2738_s19 = smov (!%p245_p2, %s2615_s19), 1  ;;  %vm1049_vm2 = vcmask 1040384  }
  0x36   : > { %v2265_v36 = vld [vmem:[#allocation3 + $0x1e4] ss:$8 sps:$4 sm:$0xff]   ;;  %v2269_v38 = vld [vmem:[#allocation3 + $0x1e0] ss:$8 sps:$4 sm:$0xff]   ;;  %s2178_s9 = smul.u32 24, %s2738_s19  ;;  %s2175_s17 = sshll.u32 %s2738_s19, 4 }
  0x37   : > { %527 = vmatpush1.bf16.msra.mxu0 %v2233_v14  ;;  %v2267_v37 = vld [vmem:[#allocation3 + $0xe4] ss:$8 sps:$4 sm:$0xff]   ;;  %v2270_v39 = vld [vmem:[#allocation3 + $0xe0] ss:$8 sps:$4 sm:$0xff]   ;;  %v2271_v40 = vld [vmem:[#allocation3 + $0x1d4] ss:$8 sps:$4 sm:$0xff]   ;;  %s254_s22 = scalar_lea.vmem %s2734_s5, %s2175_s17 }
  0x38   : > { %730 = vmatpush1.bf16.msra.mxu1 %v2234_v15  ;;  %528 = vmatprep.subr.bf16.mxu0 %v2235_v16  ;;  %v2273_v41 = vld [vmem:[#allocation3 + $0xd4] ss:$8 sps:$4 sm:$0xff]   ;;  %v2275_v42 = vld [vmem:[#allocation3 + $0x1d0] ss:$8 sps:$4 sm:$0xff]   ;;  %s2668_s12 = scalar_lea.vmem %s2729_s0, %s2178_s9  ;;  %v2277_v44 = vld [vmem:[#allocation3 + $0x1c4] ss:$8 sps:$4 sm:$0xff]  }
  0x39   : > { %731 = vmatprep.subr.bf16.mxu1 %v2237_v17  ;;  %v2276_v43 = vld [vmem:[#allocation3 + $0xd0] ss:$8 sps:$4 sm:$0xff]   ;;  %v2279_v45 = vld [vmem:[#allocation3 + $0xc4] ss:$8 sps:$4 sm:$0xff]   ;;  %v2281_v46 = vld [vmem:[#allocation3 + $0x1c0] ss:$8 sps:$4 sm:$0xff]  }
  0x3a   : > { %v255_v47 = vld [vmem:[%s2668_s12] sm:$0xff]  ;;  %v256_v48 = vld [vmem:[%s2668_s12 + $0x8] sm:$0xff]  ;;  %v257_v49 = vld [vmem:[%s2668_s12 + $0x10] sm:$0x11]  ;;  %vm333_vm0 = vsmask.f32 7424 }
  0x3b   : > { %529 = vmatpush1.bf16.msra.mxu0 %v2239_v18  ;;  %v2282_v50 = vld [vmem:[#allocation3 + $0xc0] ss:$8 sps:$4 sm:$0xff]   ;;  %v2283_v51 = vld [vmem:[#allocation3 + $0x1b4] ss:$8 sps:$4 sm:$0xff]   ;;  %v2673_v52 = vcombine.high %v255_v47, %v256_v48  ;;  %v2675_v53 = vcombine.high %v257_v49, %v257_v49  ;;  %v2287_v58 = vld [vmem:[#allocation3 + $0x1b0] ss:$8 sps:$4 sm:$0xff]   ;;  %v1975_v62 = vcombine.low %v255_v47, %v256_v48  ;;  %v1977_v1 = vcombine.low %v257_v49, %v257_v49 }
  0x3c   : > { %732 = vmatpush1.bf16.msra.mxu1 %v2240_v19  ;;  %530 = vmatprep.subr.bf16.mxu0 %v2241_v20  ;;  %v2285_v54 = vld [vmem:[#allocation3 + $0xb4] ss:$8 sps:$4 sm:$0xff]   ;;  %v2288_v59 = vld [vmem:[#allocation3 + $0xb0] ss:$8 sps:$4 sm:$0xff]   ;;  %v2289_v63 = vld [vmem:[#allocation3 + $0x1a4] ss:$8 sps:$4 sm:$0xff]  }
  0x3d   : > { %733 = vmatprep.subr.bf16.mxu1 %v2243_v21  ;;  %v347_v55 = vshrl.u32 %v2673_v52, 16  ;;  %v349_v56 = vshll.u32 %v2673_v52, 16  ;;  %v354_v57 = vshll.u32 %v2675_v53, 16  ;;  %755 = vmatprep.mubr.bf16.mxu1 %v2673_v52  ;;  %v2291_v0 = vld [vmem:[#allocation3 + $0xa4] ss:$8 sps:$4 sm:$0xff]   ;;  %v804_v3 = vrot.slane %v1975_v62, 1 }
  0x3e   : > { %v805_v4 = vrot.slane %v1977_v1, 1  ;;  %v2293_v5 = vld [vmem:[#allocation3 + $0x1a0] ss:$8 sps:$4 sm:$0xff]   ;;  %v337_v8 = vshll.u32 %v1975_v62, 16  ;;  %v2295_v9 = vld [vmem:[#allocation3 + $0x194] ss:$8 sps:$4 sm:$0xff]  }
  0x3f   : > { %531 = vmatpush1.bf16.msra.mxu0 %v2245_v22  ;;  %v351_v60 = vrot.slane %v349_v56, 1  ;;  %v356_v61 = vrot.slane %v354_v57, 1  ;;  %v2294_v6 = vld [vmem:[#allocation3 + $0xa0] ss:$8 sps:$4 sm:$0xff]   ;;  %v2297_v10 = vld [vmem:[#allocation3 + $0x94] ss:$8 sps:$4 sm:$0xff]  }
  0x40   : > { %734 = vmatpush1.bf16.msra.mxu1 %v2246_v23  ;;  %532 = vmatprep.subr.bf16.mxu0 %v2247_v24  ;;  %v2683_v11 = vsel %vm803_vm1, %v804_v3, %v805_v4  ;;  %v2299_v12 = vld [vmem:[#allocation3 + $0x190] ss:$8 sps:$4 sm:$0xff]   ;;  %v335_v14 = vshrl.u32 %v1975_v62, 16  ;;  %v339_v15 = vrot.slane %v337_v8, 1  ;;  %v342_v16 = vshll.u32 %v1977_v1, 16 }
  0x41   : > { %735 = vmatprep.subr.bf16.mxu1 %v2249_v25  ;;  %v352_v2 = vor.u32 %v351_v60, %v347_v55  ;;  %v2300_v13 = vld [vmem:[#allocation3 + $0x90] ss:$8 sps:$4 sm:$0xff]   ;;  %v2301_v17 = vld [vmem:[#allocation3 + $0x184] ss:$8 sps:$4 sm:$0xff]   ;;  %v2305_v19 = vld [vmem:[#allocation3 + $0x180] ss:$8 sps:$4 sm:$0xff]  }
  0x42   : > { %v2303_v18 = vld [vmem:[#allocation3 + $0x84] ss:$8 sps:$4 sm:$0xff]   ;;  %v2306_v20 = vld [vmem:[#allocation3 + $0x80] ss:$8 sps:$4 sm:$0xff]   ;;  %v340_v21 = vor.u32 %v339_v15, %v335_v14  ;;  %v344_v22 = vrot.slane %v342_v16, 1  ;;  %v807_v24 = vrot.slane %v2673_v52, 1 }
  0x43   : > { %533 = vmatpush1.bf16.msra.mxu0 %v2251_v26  ;;  %v357_v7 = vsel %vm333_vm0, %v352_v2, %v356_v61  ;;  %v2313_v23 = vld [vmem:[#allocation3 + $0x274] ss:$8 sps:$4 sm:$0xff]   ;;  %v808_v25 = vrot.slane %v2675_v53, 1  ;;  %v2341_v48 = vld [vmem:[#allocation3 + $0x2d0] ss:$8 sps:$4 sm:$0xff]  }
  0x44   : > { %736 = vmatpush1.bf16.msra.mxu1 %v2252_v27  ;;  %534 = vmatprep.subr.bf16.mxu0 %v2253_v28  ;;  %v345_v26 = vsel %vm333_vm0, %v340_v21, %v344_v22  ;;  %v2311_v27 = vld [vmem:[#allocation3 + $0x270] ss:$8 sps:$4 sm:$0xff]   ;;  %v2316_v28 = vld [vmem:[#allocation3 + $0x264] ss:$8 sps:$4 sm:$0xff]   ;;  %v2343_v47 = vld [vmem:[#allocation3 + $0x2d4] ss:$8 sps:$4 sm:$0xff]  }
  0x45   : > { %737 = vmatprep.subr.bf16.mxu1 %v2255_v29  ;;  %552 = vmatprep.mubr.bf16.mxu0 %v357_v7  ;;  %v809_v29 = vsel %vm803_vm1, %v807_v24, %v808_v25  ;;  %v2346_v49 = vld [vmem:[#allocation3 + $0x2c4] ss:$8 sps:$4 sm:$0xff]   ;;  %v2347_v52 = vld [vmem:[#allocation3 + $0x2b0] ss:$8 sps:$4 sm:$0xff]   ;;  %v2355_v55 = vld [vmem:[#allocation3 + $0x294] ss:$8 sps:$4 sm:$0xff]  }
  0x46   : > { %v2352_v53 = vld [vmem:[#allocation3 + $0x2a4] ss:$8 sps:$4 sm:$0xff]   ;;  %v2353_v56 = vld [vmem:[#allocation3 + $0x290] ss:$8 sps:$4 sm:$0xff]   ;;  %v2361_v60 = vld [vmem:[#allocation5 + $0x74] ss:$8 sps:$4 sm:$0xff]  }
  0x47   : > { %535 = vmatpush1.bf16.msra.mxu0 %v2257_v30  ;;  %v2314_v30 = vld [vmem:[#allocation3 + $0x260] ss:$8 sps:$4 sm:$0xff]   ;;  %v2358_v57 = vld [vmem:[#allocation3 + $0x284] ss:$8 sps:$4 sm:$0xff]   ;;  %v2370_v2 = vld [vmem:[#allocation5 + $0x54] ss:$8 sps:$4 sm:$0xff]  }
  0x48   : > { %738 = vmatpush1.bf16.msra.mxu1 %v2258_v31  ;;  %536 = vmatprep.subr.bf16.mxu0 %v2259_v32  ;;  %v2319_v31 = vld [vmem:[#allocation3 + $0x254] ss:$8 sps:$4 sm:$0xff]   ;;  %v2317_v32 = vld [vmem:[#allocation3 + $0x250] ss:$8 sps:$4 sm:$0xff]   ;;  %v2364_v61 = vld [vmem:[#allocation5 + $0x64] ss:$8 sps:$4 sm:$0xff]  }
  0x49   : > { %739 = vmatprep.subr.bf16.mxu1 %v2261_v33  ;;  %v2322_v33 = vld [vmem:[#allocation3 + $0x244] ss:$8 sps:$4 sm:$0xff]   ;;  %v2371_v3 = vld [vmem:[#allocation5 + $0x160] ss:$8 sps:$4 sm:$0xff]   ;;  %v2379_v4 = vld [vmem:[#allocation5 + $0x154] ss:$8 sps:$4 sm:$0xff]  }
  0x4a   : > { %v2373_v1 = vld [vmem:[#allocation5 + $0x164] ss:$8 sps:$4 sm:$0xff]   ;;  %v2377_v7 = vld [vmem:[#allocation5 + $0x150] ss:$8 sps:$4 sm:$0xff]   ;;  %v2398_v25 = vld [vmem:[#allocation5] ss:$8 sps:$4 sm:$0xff]  }
  0x4b   : > { %537 = vmatpush2.bf16.msra.mxu0 %v2263_v34  ;;  %v2320_v34 = vld [vmem:[#allocation3 + $0x240] ss:$8 sps:$4 sm:$0xff]   ;;  %v2385_v8 = vld [vmem:[#allocation5 + $0x144] ss:$8 sps:$4 sm:$0xff]   ;;  %v2389_v15 = vld [vmem:[#allocation5 + $0x130] ss:$8 sps:$4 sm:$0xff]  }
  0x4c   : > { %740 = vmatpush2.bf16.msra.mxu1 %v2264_v35  ;;  %538 = vmatprep.subr.bf16.mxu0 %v2265_v36  ;;  %v2325_v35 = vld [vmem:[#allocation3 + $0x234] ss:$8 sps:$4 sm:$0xff]   ;;  %v2323_v36 = vld [vmem:[#allocation3 + $0x230] ss:$8 sps:$4 sm:$0xff]   ;;  %v2388_v14 = vld [vmem:[#allocation5 + $0x24] ss:$8 sps:$4 sm:$0xff]  }
  0x4d   : > { %741 = vmatprep.subr.bf16.mxu1 %v2267_v37  ;;  %v2328_v37 = vld [vmem:[#allocation3 + $0x224] ss:$8 sps:$4 sm:$0xff]   ;;  %v2392_v21 = vld [vmem:[#allocation5 + $0x10] ss:$8 sps:$4 sm:$0xff]  }
  0x4e   : > { %v2397_v16 = vld [vmem:[#allocation5 + $0x124] ss:$8 sps:$4 sm:$0xff]  }
  0x4f   : > { %539 = vmatpush2.bf16.msra.mxu0 %v2269_v38  ;;  %v2326_v38 = vld [vmem:[#allocation3 + $0x220] ss:$8 sps:$4 sm:$0xff]   ;;  %v2400_v22 = vld [vmem:[#allocation5 + $0x4] ss:$8 sps:$4 sm:$0xff]  }
  0x50   : > { %742 = vmatpush2.bf16.msra.mxu1 %v2270_v39  ;;  %540 = vmatprep.subr.bf16.mxu0 %v2271_v40  ;;  %v2331_v39 = vld [vmem:[#allocation3 + $0x214] ss:$8 sps:$4 sm:$0xff]   ;;  %v2329_v40 = vld [vmem:[#allocation3 + $0x210] ss:$8 sps:$4 sm:$0xff]   ;;  %v2409_v24 = vld [vmem:[#allocation5 + $0x104] ss:$8 sps:$4 sm:$0xff]  }
  0x51   : > { %743 = vmatprep.subr.bf16.mxu1 %v2273_v41  ;;  %v2334_v41 = vld [vmem:[#allocation3 + $0x204] ss:$8 sps:$4 sm:$0xff]  }
  0x53   : > { %541 = vmatpush2.bf16.msra.mxu0 %v2275_v42  ;;  %v2332_v42 = vld [vmem:[#allocation3 + $0x200] ss:$8 sps:$4 sm:$0xff]  }
  0x54   : > { %744 = vmatpush2.bf16.msra.mxu1 %v2276_v43  ;;  %542 = vmatprep.subr.bf16.mxu0 %v2277_v44  ;;  %v2337_v43 = vld [vmem:[#allocation3 + $0x2f4] ss:$8 sps:$4 sm:$0xff]   ;;  %v2335_v44 = vld [vmem:[#allocation3 + $0x2f0] ss:$8 sps:$4 sm:$0xff]  }
  0x55   : > { %745 = vmatprep.subr.bf16.mxu1 %v2279_v45  ;;  %v2340_v45 = vld [vmem:[#allocation3 + $0x2e4] ss:$8 sps:$4 sm:$0xff]  }
  0x57   : > { %543 = vmatpush2.bf16.msra.mxu0 %v2281_v46  ;;  %v2338_v46 = vld [vmem:[#allocation3 + $0x2e0] ss:$8 sps:$4 sm:$0xff]  }
  0x58   : > { %746 = vmatpush2.bf16.msra.mxu1 %v2282_v50  ;;  %544 = vmatprep.subr.bf16.mxu0 %v2283_v51  ;;  %v2344_v50 = vld [vmem:[#allocation3 + $0x2c0] ss:$8 sps:$4 sm:$0xff]   ;;  %v2349_v51 = vld [vmem:[#allocation3 + $0x2b4] ss:$8 sps:$4 sm:$0xff]  }
  0x59   : > { %747 = vmatprep.subr.bf16.mxu1 %v2285_v54  ;;  %v2350_v54 = vld [vmem:[#allocation3 + $0x2a0] ss:$8 sps:$4 sm:$0xff]  }
  0x5b   : > { %545 = vmatpush2.bf16.msra.mxu0 %v2287_v58  ;;  %v2356_v58 = vld [vmem:[#allocation3 + $0x280] ss:$8 sps:$4 sm:$0xff]  }
  0x5c   : > { %748 = vmatpush2.bf16.msra.mxu1 %v2288_v59  ;;  %546 = vmatprep.subr.bf16.mxu0 %v2289_v63  ;;  %v2359_v59 = vld [vmem:[#allocation5 + $0x70] ss:$8 sps:$4 sm:$0xff]   ;;  %v2367_v63 = vld [vmem:[#allocation5 + $0x174] ss:$8 sps:$4 sm:$0xff]  }
  0x5d   : > { %749 = vmatprep.subr.bf16.mxu1 %v2291_v0  ;;  %v2362_v0 = vld [vmem:[#allocation5 + $0x60] ss:$8 sps:$4 sm:$0xff]  }
  0x5f   : > { %547 = vmatpush2.bf16.msra.mxu0 %v2293_v5  ;;  %v2368_v5 = vld [vmem:[#allocation5 + $0x50] ss:$8 sps:$4 sm:$0xff]  }
  0x60   : > { %750 = vmatpush2.bf16.msra.mxu1 %v2294_v6  ;;  %548 = vmatprep.subr.bf16.mxu0 %v2295_v9  ;;  %v2376_v6 = vld [vmem:[#allocation5 + $0x44] ss:$8 sps:$4 sm:$0xff]   ;;  %v2374_v9 = vld [vmem:[#allocation5 + $0x40] ss:$8 sps:$4 sm:$0xff]  }
  0x61   : > { %751 = vmatprep.subr.bf16.mxu1 %v2297_v10  ;;  %v2382_v10 = vld [vmem:[#allocation5 + $0x34] ss:$8 sps:$4 sm:$0xff]  }
  0x63   : > { %549 = vmatpush2.bf16.msra.mxu0 %v2299_v12  ;;  %v2391_v12 = vld [vmem:[#allocation5 + $0x134] ss:$8 sps:$4 sm:$0xff]  }
  0x64   : > { %752 = vmatpush2.bf16.msra.mxu1 %v2300_v13  ;;  %550 = vmatprep.subr.bf16.mxu0 %v2301_v17  ;;  %v2380_v13 = vld [vmem:[#allocation5 + $0x30] ss:$8 sps:$4 sm:$0xff]   ;;  %v2386_v17 = vld [vmem:[#allocation5 + $0x20] ss:$8 sps:$4 sm:$0xff]  }
  0x65   : > { %753 = vmatprep.subr.bf16.mxu1 %v2303_v18  ;;  %v2394_v18 = vld [vmem:[#allocation5 + $0x14] ss:$8 sps:$4 sm:$0xff]  }
  0x67   : > { %551 = vmatpush2.bf16.msra.mxu0 %v2305_v19  ;;  %v2395_v19 = vld [vmem:[#allocation5 + $0x120] ss:$8 sps:$4 sm:$0xff]  }
  0x68   : > { %754 = vmatpush2.bf16.msra.mxu1 %v2306_v20  ;;  %972 = vmatprep.subr.bf16.mxu0 %v2313_v23  ;;  %v2403_v20 = vld [vmem:[#allocation5 + $0x114] ss:$8 sps:$4 sm:$0xff]   ;;  %v2401_v23 = vld [vmem:[#allocation5 + $0x110] ss:$8 sps:$4 sm:$0xff]  }
  0x69   : > { %1329 = vmatprep.subr.bf16.mxu1 %v2367_v63 }
  0x6a   : > { %553 = vmatmul.mubr.bf16.vlgmr.msra.gmra.mxu0 %v345_v26  ;;  %v2406_v26 = vld [vmem:[#allocation5 + $0xf4] ss:$8 sps:$4 sm:$0xff]  }
  0x6b   : > { %756 = vmatmul.mubr.bf16.vlgmr.msra.gmra.mxu1 %v1975_v62  ;;  %973 = vmatpush1.bf16.msra.mxu0 %v2311_v27  ;;  %v2365_v62 = vld [vmem:[#allocation5 + $0x170] ss:$8 sps:$4 sm:$0xff]   ;;  %v2407_v27 = vld [vmem:[#allocation5 + $0x100] ss:$8 sps:$4 sm:$0xff]  }
  0x6c   : > { %1004 = vmatprep.mubr.bf16.mxu0 %v809_v29  ;;  %974 = vmatprep.subr.bf16.mxu0 %v2316_v28  ;;  %v2404_v28 = vld [vmem:[#allocation5 + $0xf0] ss:$8 sps:$4 sm:$0xff]   ;;  %v2412_v29 = vld [vmem:[#allocation5 + $0xe4] ss:$8 sps:$4 sm:$0xff]  }
  0x6d   : > { %1330 = vmatpush1.bf16.msra.mxu1 %v2365_v62  ;;  %v1021_v62 = vlaneseq }
  0x6e   : > { %1331 = vmatprep.subr.bf16.mxu1 %v2373_v1 }
  0x6f   : > { %975 = vmatpush1.bf16.msra.mxu0 %v2314_v30  ;;  %v2410_v30 = vld [vmem:[#allocation5 + $0xe0] ss:$8 sps:$4 sm:$0xff]   ;;  %v2690_v1 = vshrl.u32 %v1021_v62, 7 }
  0x70   : > { %976 = vmatprep.subr.bf16.mxu0 %v2319_v31  ;;  %v2415_v31 = vld [vmem:[#allocation5 + $0x1f4] ss:$8 sps:$4 sm:$0xff]  }
  0x71   : > { %1332 = vmatpush1.bf16.msra.mxu1 %v2371_v3 }
  0x72   : > { %1333 = vmatprep.subr.bf16.mxu1 %v2379_v4  ;;  %v1023_v4 = vsub.s32 0, %v2690_v1 }
  0x73   : > { %977 = vmatpush1.bf16.msra.mxu0 %v2317_v32  ;;  %v2418_v32 = vld [vmem:[#allocation5 + $0xd4] ss:$8 sps:$4 sm:$0xff]  }
  0x74   : > { %978 = vmatprep.subr.bf16.mxu0 %v2322_v33  ;;  %v2413_v33 = vld [vmem:[#allocation5 + $0x1f0] ss:$8 sps:$4 sm:$0xff]  }
  0x75   : > { %1334 = vmatpush1.bf16.msra.mxu1 %v2377_v7 }
  0x76   : > { %1335 = vmatprep.subr.bf16.mxu1 %v2385_v8 }
  0x77   : > { %979 = vmatpush1.bf16.msra.mxu0 %v2320_v34  ;;  %v2416_v34 = vld [vmem:[#allocation5 + $0xd0] ss:$8 sps:$4 sm:$0xff]  }
  0x78   : > { %980 = vmatprep.subr.bf16.mxu0 %v2325_v35  ;;  %v2421_v35 = vld [vmem:[#allocation5 + $0x1e4] ss:$8 sps:$4 sm:$0xff]  }
  0x7b   : > { %981 = vmatpush1.bf16.msra.mxu0 %v2323_v36  ;;  %v2424_v36 = vld [vmem:[#allocation5 + $0xc4] ss:$8 sps:$4 sm:$0xff]  }
  0x7c   : > { %982 = vmatprep.subr.bf16.mxu0 %v2328_v37  ;;  %v2419_v37 = vld [vmem:[#allocation5 + $0x1e0] ss:$8 sps:$4 sm:$0xff]  }
  0x7f   : > { %983 = vmatpush1.bf16.msra.mxu0 %v2326_v38  ;;  %v2422_v38 = vld [vmem:[#allocation5 + $0xc0] ss:$8 sps:$4 sm:$0xff]  }
  0x80   : > { %984 = vmatprep.subr.bf16.mxu0 %v2331_v39  ;;  %v2427_v39 = vld [vmem:[#allocation5 + $0x1d4] ss:$8 sps:$4 sm:$0xff]  }
  0x83   : > { %985 = vmatpush1.bf16.msra.mxu0 %v2329_v40  ;;  %v2430_v40 = vld [vmem:[#allocation5 + $0xb4] ss:$8 sps:$4 sm:$0xff]  }
  0x84   : > { %986 = vmatprep.subr.bf16.mxu0 %v2334_v41  ;;  %v2425_v41 = vld [vmem:[#allocation5 + $0x1d0] ss:$8 sps:$4 sm:$0xff]  }
  0x87   : > { %987 = vmatpush1.bf16.msra.mxu0 %v2332_v42  ;;  %v2428_v42 = vld [vmem:[#allocation5 + $0xb0] ss:$8 sps:$4 sm:$0xff]  }
  0x88   : > { %988 = vmatprep.subr.bf16.mxu0 %v2337_v43  ;;  %v2578_v43 = vmov 0.0  }
  0x89   : > { %1039 = vst [vmem:[#allocation2 + $0x28] sm:$0xff] %v2578_v43  ;;  %1040 = vst [vmem:[#allocation2 + $0x10] sm:$0xff] %v2578_v43 }
  0x8a   : > { %1043 = vst [vmem:[#allocation2 + $0x18] sm:$0x3] %v2578_v43  ;;  %1044 = vst [vmem:[#allocation2 + $0x20] sm:$0x3] %v2578_v43 }
  0x8b   : > { %989 = vmatpush2.bf16.msra.mxu0 %v2335_v44  ;;  %v2433_v44 = vld [vmem:[#allocation5 + $0x1c4] ss:$8 sps:$4 sm:$0xff]  }
  0x8c   : > { %990 = vmatprep.subr.bf16.mxu0 %v2340_v45  ;;  %v2436_v45 = vld [vmem:[#allocation5 + $0xa4] ss:$8 sps:$4 sm:$0xff]  }
  0x8f   : > { %991 = vmatpush2.bf16.msra.mxu0 %v2338_v46  ;;  %v2431_v46 = vld [vmem:[#allocation5 + $0x1c0] ss:$8 sps:$4 sm:$0xff]  }
  0x90   : > { %992 = vmatprep.subr.bf16.mxu0 %v2343_v47  ;;  %v2434_v47 = vld [vmem:[#allocation5 + $0xa0] ss:$8 sps:$4 sm:$0xff]  }
  0x93   : > { %993 = vmatpush2.bf16.msra.mxu0 %v2341_v48  ;;  %v2439_v48 = vld [vmem:[#allocation5 + $0x1b4] ss:$8 sps:$4 sm:$0xff]  }
  0x94   : > { %994 = vmatprep.subr.bf16.mxu0 %v2346_v49  ;;  %v2442_v49 = vld [vmem:[#allocation5 + $0x94] ss:$8 sps:$4 sm:$0xff]  }
  0x97   : > { %995 = vmatpush2.bf16.msra.mxu0 %v2344_v50  ;;  %v2437_v50 = vld [vmem:[#allocation5 + $0x1b0] ss:$8 sps:$4 sm:$0xff]  }
  0x98   : > { %996 = vmatprep.subr.bf16.mxu0 %v2349_v51  ;;  %v2440_v51 = vld [vmem:[#allocation5 + $0x90] ss:$8 sps:$4 sm:$0xff]  }
  0x9b   : > { %997 = vmatpush2.bf16.msra.mxu0 %v2347_v52  ;;  %v2443_v52 = vld [vmem:[#allocation5 + $0x1a0] ss:$8 sps:$4 sm:$0xff]  }
  0x9c   : > { %998 = vmatprep.subr.bf16.mxu0 %v2352_v53  ;;  %v2445_v53 = vld [vmem:[#allocation5 + $0x1a4] ss:$8 sps:$4 sm:$0xff]  }
  0x9f   : > { %999 = vmatpush2.bf16.msra.mxu0 %v2350_v54  ;;  %v2446_v54 = vld [vmem:[#allocation5 + $0x80] ss:$8 sps:$4 sm:$0xff]  }
  0xa0   : > { %1000 = vmatprep.subr.bf16.mxu0 %v2355_v55  ;;  %v2448_v55 = vld [vmem:[#allocation5 + $0x84] ss:$8 sps:$4 sm:$0xff]  }
  0xa3   : > { %1001 = vmatpush2.bf16.msra.mxu0 %v2353_v56  ;;  %v2451_v56 = vld [vmem:[#allocation5 + $0x194] ss:$8 sps:$4 sm:$0xff]  }
  0xa4   : > { %1002 = vmatprep.subr.bf16.mxu0 %v2358_v57  ;;  %v2449_v57 = vld [vmem:[#allocation5 + $0x190] ss:$8 sps:$4 sm:$0xff]  }
  0xa7   : > { %1003 = vmatpush2.bf16.msra.mxu0 %v2356_v58  ;;  %v2454_v58 = vld [vmem:[#allocation5 + $0x184] ss:$8 sps:$4 sm:$0xff]  }
  0xa8   : > { %1532 = vmatprep.subr.bf16.mxu0 %v2361_v60  ;;  %v2457_v60 = vld [vmem:[#allocation5 + $0x274] ss:$8 sps:$4 sm:$0xff]  }
  0xaa   : > { %1005 = vmatmul.mubr.bf16.vlgmr.msra.gmra.mxu0 %v2683_v11  ;;  %v2383_v11 = vld [vmem:[#allocation5 + $0x140] ss:$8 sps:$4 sm:$0xff]  }
  0xab   : > { %1533 = vmatpush1.bf16.msra.mxu0 %v2359_v59  ;;  %1336 = vmatpush1.bf16.msra.mxu1 %v2383_v11  ;;  %v2452_v59 = vld [vmem:[#allocation5 + $0x180] ss:$8 sps:$4 sm:$0xff]  }
  0xac   : > { %1534 = vmatprep.subr.bf16.mxu0 %v2364_v61  ;;  %1337 = vmatprep.subr.bf16.mxu1 %v2391_v12 }
  0xaf   : > { %1535 = vmatpush1.bf16.msra.mxu0 %v2362_v0  ;;  %1338 = vmatpush1.bf16.msra.mxu1 %v2389_v15 }
  0xb0   : > { %1536 = vmatprep.subr.bf16.mxu0 %v2370_v2  ;;  %1339 = vmatprep.subr.bf16.mxu1 %v2397_v16 }
  0xb3   : > { %1537 = vmatpush1.bf16.msra.mxu0 %v2368_v5  ;;  %1340 = vmatpush1.bf16.msra.mxu1 %v2395_v19  ;;  %v1019_v5 = vld [vmem:[%s2731_s2] sm:$0x3] }
  0xb4   : > { %1538 = vmatprep.subr.bf16.mxu0 %v2376_v6  ;;  %1341 = vmatprep.subr.bf16.mxu1 %v2403_v20  ;;  %v1027_v6 = vsub.s32 1, %v2690_v1 }
  0xb7   : > { %1539 = vmatpush1.bf16.msra.mxu0 %v2374_v9  ;;  %1342 = vmatpush1.bf16.msra.mxu1 %v2401_v23 }
  0xb8   : > { %1540 = vmatprep.subr.bf16.mxu0 %v2382_v10  ;;  %1343 = vmatprep.subr.bf16.mxu1 %v2409_v24  ;;  %v1024_v10 = vrot.slane %v1019_v5, %v1023_v4 }
  0xbb   : > { %1541 = vmatpush1.bf16.msra.mxu0 %v2380_v13  ;;  %1344 = vmatpush1.bf16.msra.mxu1 %v2407_v27 }
  0xbc   : > { %1542 = vmatprep.subr.bf16.mxu0 %v2388_v14  ;;  %1345 = vmatprep.subr.bf16.mxu1 %v2415_v31  ;;  %v1028_v14 = vrot.slane %v1019_v5, %v1027_v6 }
  0xbf   : > { %1543 = vmatpush1.bf16.msra.mxu0 %v2386_v17  ;;  %1346 = vmatpush2.bf16.msra.mxu1 %v2413_v33 }
  0xc0   : > { %1544 = vmatprep.subr.bf16.mxu0 %v2394_v18  ;;  %1347 = vmatprep.subr.bf16.mxu1 %v2421_v35 }
  0xc3   : > { %1545 = vmatpush1.bf16.msra.mxu0 %v2392_v21  ;;  %1348 = vmatpush2.bf16.msra.mxu1 %v2419_v37 }
  0xc4   : > { %1546 = vmatprep.subr.bf16.mxu0 %v2400_v22  ;;  %1349 = vmatprep.subr.bf16.mxu1 %v2427_v39 }
  0xc7   : > { %1547 = vmatpush1.bf16.msra.mxu0 %v2398_v25  ;;  %1350 = vmatpush2.bf16.msra.mxu1 %v2425_v41 }
  0xc8   : > { %1548 = vmatprep.subr.bf16.mxu0 %v2406_v26  ;;  %1351 = vmatprep.subr.bf16.mxu1 %v2433_v44 }
  0xcb   : > { %1549 = vmatpush2.bf16.msra.mxu0 %v2404_v28  ;;  %1352 = vmatpush2.bf16.msra.mxu1 %v2431_v46 }
  0xcc   : > { %1550 = vmatprep.subr.bf16.mxu0 %v2412_v29  ;;  %1353 = vmatprep.subr.bf16.mxu1 %v2439_v48 }
  0xcf   : > { %1551 = vmatpush2.bf16.msra.mxu0 %v2410_v30  ;;  %1354 = vmatpush2.bf16.msra.mxu1 %v2437_v50 }
  0xd0   : > { %1552 = vmatprep.subr.bf16.mxu0 %v2418_v32  ;;  %1355 = vmatprep.subr.bf16.mxu1 %v2445_v53 }
  0xd3   : > { %1553 = vmatpush2.bf16.msra.mxu0 %v2416_v34  ;;  %1356 = vmatpush2.bf16.msra.mxu1 %v2443_v52 }
  0xd4   : > { %1554 = vmatprep.subr.bf16.mxu0 %v2424_v36  ;;  %1357 = vmatprep.subr.bf16.mxu1 %v2451_v56 }
  0xd7   : > { %1555 = vmatpush2.bf16.msra.mxu0 %v2422_v38  ;;  %1358 = vmatpush2.bf16.msra.mxu1 %v2449_v57 }
  0xd8   : > { %1556 = vmatprep.subr.bf16.mxu0 %v2430_v40  ;;  %1359 = vmatprep.subr.bf16.mxu1 %v2454_v58 }
  0xdb   : > { %1557 = vmatpush2.bf16.msra.mxu0 %v2428_v42  ;;  %1360 = vmatpush2.bf16.msra.mxu1 %v2452_v59 }
  0xdc   : > { %1558 = vmatprep.subr.bf16.mxu0 %v2436_v45  ;;  %1780 = vmatprep.subr.bf16.mxu1 %v2457_v60 }
  0xdf   : > { %1559 = vmatpush2.bf16.msra.mxu0 %v2434_v47 }
  0xe0   : > { %1560 = vmatprep.subr.bf16.mxu0 %v2442_v49 }
  0xe3   : > { %1561 = vmatpush2.bf16.msra.mxu0 %v2440_v51 }
  0xe4   : > { %1562 = vmatprep.subr.bf16.mxu0 %v2448_v55 }
  0xe7   : > { %1563 = vmatpush2.bf16.msra.mxu0 %v2446_v54 }
 0x12a   : > { %v554_v61 = vpop.f32.mrf.mxu0 }
 0x12b   : > { %v757_v63 = vpop.f32.mrf.mxu1 }
 0x12c   : > { %v556_v0 = vpop.f32.mrf.mxu0  ;;  %v758_v9 = vadd.f32 %v757_v63, %v554_v61  ;;  %v2455_v61 = vld [vmem:[#allocation5 + $0x270] ss:$8 sps:$4 sm:$0xff]  }
 0x12d   : > { %v759_v2 = vpop.f32.mrf.mxu1 }
 0x12e   : > { %v558_v3 = vpop.f32.mrf.mxu0  ;;  %v760_v12 = vadd.f32 %v759_v2, %v556_v0  ;;  %v2460_v2 = vld [vmem:[#allocation5 + $0x264] ss:$8 sps:$4 sm:$0xff]  }
 0x12f   : > { %v761_v7 = vpop.f32.mrf.mxu1 }
 0x130   : > { %v560_v8 = vpop.f32.mrf.mxu0  ;;  %v762_v17 = vadd.f32 %v761_v7, %v558_v3  ;;  %v2458_v7 = vld [vmem:[#allocation5 + $0x260] ss:$8 sps:$4 sm:$0xff]  }
 0x131   : > { %v763_v15 = vpop.f32.mrf.mxu1 }
 0x132   : > { %v764_v21 = vadd.f32 %v763_v15, %v560_v8  ;;  %v2463_v8 = vld [vmem:[#allocation5 + $0x254] ss:$8 sps:$4 sm:$0xff]   ;;  %v2470_v15 = vld [vmem:[#allocation5 + $0x220] ss:$8 sps:$4 sm:$0xff]  }
 0x16a   : > { %v1006_v11 = vpop.f32.mrf.mxu0 }
 0x16b   : > { %v1015_v13 = vadd.f32 %v1006_v11, %v758_v9  ;;  %v2461_v9 = vld [vmem:[#allocation5 + $0x250] ss:$8 sps:$4 sm:$0xff]   ;;  %v2464_v11 = vld [vmem:[#allocation5 + $0x240] ss:$8 sps:$4 sm:$0xff]  }
 0x16c   : > { %v1008_v16 = vpop.f32.mrf.mxu0 }
 0x16d   : > { %v1031_v18 = vadd.f32 %v1024_v10, %v1015_v13  ;;  %v1016_v19 = vadd.f32 %v1008_v16, %v760_v12  ;;  %v2469_v12 = vld [vmem:[#allocation5 + $0x234] ss:$8 sps:$4 sm:$0xff]   ;;  %v2467_v13 = vld [vmem:[#allocation5 + $0x230] ss:$8 sps:$4 sm:$0xff]  }
 0x16e   : > { %v1010_v20 = vpop.f32.mrf.mxu0  ;;  %v2475_v16 = vld [vmem:[#allocation5 + $0x214] ss:$8 sps:$4 sm:$0xff]  }
 0x16f   : > { %v1035_v22 = vmax.f32 %v1031_v18, 0.0  ;;  %v1032_v23 = vadd.f32 %v1028_v14, %v1016_v19  ;;  %v1017_v24 = vadd.f32 %v1010_v20, %v762_v17  ;;  %v2473_v17 = vld [vmem:[#allocation5 + $0x210] ss:$8 sps:$4 sm:$0xff]   ;;  %v2478_v18 = vld [vmem:[#allocation5 + $0x204] ss:$8 sps:$4 sm:$0xff]  }
 0x170   : > { %v1012_v25 = vpop.f32.mrf.mxu0  ;;  %v2476_v19 = vld [vmem:[#allocation5 + $0x200] ss:$8 sps:$4 sm:$0xff]   ;;  %v2481_v20 = vld [vmem:[#allocation5 + $0x2f4] ss:$8 sps:$4 sm:$0xff]  }
 0x171   : > { %v1050_v26 = vrot.slane %v1035_v22, 7  ;;  %v1036_v27 = vmax.f32 %v1032_v23, 0.0  ;;  %v1033_v28 = vadd.f32 %v1024_v10, %v1017_v24  ;;  %v1018_v29 = vadd.f32 %v1012_v25, %v764_v21  ;;  %v2466_v10 = vld [vmem:[#allocation5 + $0x244] ss:$8 sps:$4 sm:$0xff]   ;;  %v2479_v21 = vld [vmem:[#allocation5 + $0x2f0] ss:$8 sps:$4 sm:$0xff]  }
 0x172   : > { %v2484_v22 = vld [vmem:[#allocation5 + $0x2e4] ss:$8 sps:$4 sm:$0xff]   ;;  %v2482_v23 = vld [vmem:[#allocation5 + $0x2e0] ss:$8 sps:$4 sm:$0xff]   ;;  %v2487_v24 = vld [vmem:[#allocation5 + $0x2d4] ss:$8 sps:$4 sm:$0xff]  }
 0x173   : > { %1062 = vst [vmem:[#allocation2 + $0x28] sm:$0xfe] %v1050_v26  ;;  %v1051_v30 = vrot.slane %v1036_v27, 7  ;;  %v1037_v31 = vmax.f32 %v1033_v28, 0.0  ;;  %v1034_v32 = vadd.f32 %v1028_v14, %v1018_v29  ;;  %v2472_v14 = vld [vmem:[#allocation5 + $0x224] ss:$8 sps:$4 sm:$0xff]  }
 0x174   : > { %v2485_v25 = vld [vmem:[#allocation5 + $0x2d0] ss:$8 sps:$4 sm:$0xff]   ;;  %v2488_v27 = vld [vmem:[#allocation5 + $0x2c0] ss:$8 sps:$4 sm:$0xff]   ;;  %v2493_v28 = vld [vmem:[#allocation5 + $0x2b4] ss:$8 sps:$4 sm:$0xff]  }
 0x175   : > { %1063 = vst [vmem:[#allocation2 + $0x10] sm:$0xfe] %v1051_v30  ;;  %v1052_v33 = vrot.slane %v1037_v31, 7  ;;  %v1038_v34 = vmax.f32 %v1034_v32, 0.0  ;;  %v2491_v29 = vld [vmem:[#allocation5 + $0x2b0] ss:$8 sps:$4 sm:$0xff]  }
 0x176   : > { %v2494_v31 = vld [vmem:[#allocation5 + $0x2a0] ss:$8 sps:$4 sm:$0xff]   ;;  %v2499_v32 = vld [vmem:[#allocation5 + $0x294] ss:$8 sps:$4 sm:$0xff]  }
 0x177   : > { %v1053_v35 = vsel %vm1049_vm2, %v1050_v26, %v1052_v33  ;;  %1066 = vst [vmem:[#allocation2 + $0x18] sm:$0x1] %v1052_v33  ;;  %v1054_v36 = vrot.slane %v1038_v34, 7  ;;  %v2490_v26 = vld [vmem:[#allocation5 + $0x2c4] ss:$8 sps:$4 sm:$0xff]  }
 0x178   : > { %v2497_v33 = vld [vmem:[#allocation5 + $0x290] ss:$8 sps:$4 sm:$0xff]   ;;  %v2502_v34 = vld [vmem:[#allocation5 + $0x284] ss:$8 sps:$4 sm:$0xff]  }
 0x179   : > { %v1055_v37 = vsel %vm1049_vm2, %v1051_v30, %v1054_v36  ;;  %1067 = vst [vmem:[#allocation2 + $0x20] sm:$0x1] %v1054_v36  ;;  %v2496_v30 = vld [vmem:[#allocation5 + $0x2a4] ss:$8 sps:$4 sm:$0xff]  }
 0x17a   : > { %v1068_v38 = vld [vmem:[#allocation2 + $0x28] sm:$0xff] }
 0x17b   : > { %v1074_v39 = vpack.c.bf16 %v1053_v35, %v1068_v38  ;;  %v2500_v35 = vld [vmem:[#allocation5 + $0x280] ss:$8 sps:$4 sm:$0xff]  }
 0x17c   : > { %v1069_v40 = vld [vmem:[#allocation2 + $0x10] sm:$0xff] }
 0x17d   : > { %v1075_v41 = vpack.c.bf16 %v1055_v37, %v1069_v40  ;;  %v1146_v43 = vshll.u32 %v1074_v39, 16  ;;  %v1612_v51 = vrot.slane %v1074_v39, 1  ;;  %v1144_v55 = vshrl.u32 %v1074_v39, 16  ;;  %v2503_v40 = vld [vmem:[%s2668_s12] sm:$0xff] }
 0x17e   : > { %v1072_v42 = vld [vmem:[#allocation2 + $0x18] sm:$0x3] }
 0x17f   : > { %1564 = vmatprep.mubr.bf16.mxu0 %v1075_v41  ;;  %v1158_v44 = vshll.u32 %v1075_v41, 16  ;;  %v1108_v45 = vpack.c.bf16 %v1072_v42, %v1072_v42  ;;  %v1148_v50 = vrot.slane %v1146_v43, 1  ;;  %v1156_v53 = vshrl.u32 %v1075_v41, 16  ;;  %v2504_v42 = vld [vmem:[%s2668_s12 + $0x8] sm:$0xff] }
 0x180   : > { %1565 = vmatmul.mubr.bf16.vlgmr.msra.gmra.mxu0 %v1074_v39  ;;  %v1073_v46 = vld [vmem:[#allocation2 + $0x20] sm:$0x3]  ;;  %v1615_v0 = vrot.slane %v1075_v41, 1  ;;  %v258_v41 = vunpack.c.l.bf16 %v2503_v40  ;;  %v260_v43 = vunpack.c.l.bf16 %v2504_v42 }
 0x181   : > { %v1109_v47 = vpack.c.bf16 %v1073_v46, %v1073_v46  ;;  %v1160_v48 = vrot.slane %v1158_v44, 1  ;;  %v1151_v49 = vshll.u32 %v1108_v45, 16  ;;  %v1613_v52 = vrot.slane %v1108_v45, 1  ;;  %v1827_v45 = vld [vmem:[%s2733_s4] sm:$0x3] }
 0x182   : > { %v1149_v62 = vor.u32 %v1148_v50, %v1144_v55  ;;  %v259_v46 = vunpack.c.h.bf16 %v2503_v40  ;;  %v1851_v50 = vrot.slane %v260_v43, 1 }
 0x183   : > { %v1163_v54 = vshll.u32 %v1109_v47, 16  ;;  %v1153_v56 = vrot.slane %v1151_v49, 1  ;;  %v2702_v57 = vsel %vm803_vm1, %v1612_v51, %v1613_v52  ;;  %v1161_v58 = vor.u32 %v1160_v48, %v1156_v53  ;;  %v2505_v51 = vld [vmem:[%s2668_s12 + $0x10] sm:$0x11] }
 0x184   : > { %v1616_v60 = vrot.slane %v1109_v47, 1  ;;  %v261_v47 = vunpack.c.h.bf16 %v2504_v42  ;;  %v1850_v49 = vrot.slane %v258_v41, 1  ;;  %v262_v52 = vunpack.c.l.bf16 %v2505_v51 }
 0x185   : > { %v1165_v59 = vrot.slane %v1163_v54, 1  ;;  %v1154_v3 = vsel %vm333_vm0, %v1149_v62, %v1153_v56  ;;  %v1832_v54 = vrot.slane %v1827_v45, %v1023_v4  ;;  %v1836_v62 = vrot.slane %v1827_v45, %v1027_v6 }
 0x186   : > { %v1617_v5 = vsel %vm803_vm1, %v1615_v0, %v1616_v60 }
 0x187   : > { %v1166_v63 = vsel %vm333_vm0, %v1161_v58, %v1165_v59  ;;  %v1854_v58 = vrot.slane %v261_v47, 1  ;;  %v263_v59 = vunpack.c.h.bf16 %v2505_v51 }
 0x188   : > { %1361 = vmatprep.mubr.bf16.mxu1 %v1166_v63  ;;  %v1852_v63 = vsel %vm803_vm1, %v1850_v49, %v1851_v50 }
 0x189   : > { %1362 = vmatmul.mubr.bf16.vlgmr.msra.gmra.mxu1 %v1154_v3 }
 0x18a   : > { %1781 = vmatpush1.bf16.msra.mxu1 %v2455_v61  ;;  %1812 = vmatprep.mubr.bf16.mxu1 %v1617_v5 }
 0x18b   : > { %1782 = vmatprep.subr.bf16.mxu1 %v2460_v2  ;;  %v1856_v2 = vrot.slane %v262_v52, 1 }
 0x18d   : > { %v1857_v1 = vsel %vm803_vm1, %v1851_v50, %v1856_v2 }
 0x18e   : > { %1783 = vmatpush1.bf16.msra.mxu1 %v2458_v7 }
 0x18f   : > { %1784 = vmatprep.subr.bf16.mxu1 %v2463_v8 }
 0x192   : > { %1785 = vmatpush1.bf16.msra.mxu1 %v2461_v9 }
 0x193   : > { %1786 = vmatprep.subr.bf16.mxu1 %v2466_v10  ;;  %v1858_v10 = vrot.slane %v263_v59, 1 }
 0x196   : > { %1787 = vmatpush1.bf16.msra.mxu1 %v2464_v11 }
 0x197   : > { %1788 = vmatprep.subr.bf16.mxu1 %v2469_v12 }
 0x19a   : > { %1789 = vmatpush1.bf16.msra.mxu1 %v2467_v13 }
 0x19b   : > { %1790 = vmatprep.subr.bf16.mxu1 %v2472_v14 }
 0x19e   : > { %1791 = vmatpush1.bf16.msra.mxu1 %v2470_v15 }
 0x19f   : > { %1792 = vmatprep.subr.bf16.mxu1 %v2475_v16 }
 0x1a2   : > { %1793 = vmatpush1.bf16.msra.mxu1 %v2473_v17 }
 0x1a3   : > { %1794 = vmatprep.subr.bf16.mxu1 %v2478_v18  ;;  %v1859_v18 = vsel %vm803_vm1, %v1854_v58, %v1858_v10 }
 0x1a6   : > { %1795 = vmatpush1.bf16.msra.mxu1 %v2476_v19 }
 0x1a7   : > { %1796 = vmatprep.subr.bf16.mxu1 %v2481_v20 }
 0x1aa   : > { %1797 = vmatpush2.bf16.msra.mxu1 %v2479_v21 }
 0x1ab   : > { %1798 = vmatprep.subr.bf16.mxu1 %v2484_v22 }
 0x1ae   : > { %1799 = vmatpush2.bf16.msra.mxu1 %v2482_v23 }
 0x1af   : > { %1800 = vmatprep.subr.bf16.mxu1 %v2487_v24 }
 0x1b2   : > { %1801 = vmatpush2.bf16.msra.mxu1 %v2485_v25 }
 0x1b3   : > { %1802 = vmatprep.subr.bf16.mxu1 %v2490_v26 }
 0x1b6   : > { %1803 = vmatpush2.bf16.msra.mxu1 %v2488_v27 }
 0x1b7   : > { %1804 = vmatprep.subr.bf16.mxu1 %v2493_v28 }
 0x1ba   : > { %1805 = vmatpush2.bf16.msra.mxu1 %v2491_v29 }
 0x1bb   : > { %1806 = vmatprep.subr.bf16.mxu1 %v2496_v30 }
 0x1be   : > { %1807 = vmatpush2.bf16.msra.mxu1 %v2494_v31 }
 0x1bf   : > { %1808 = vmatprep.subr.bf16.mxu1 %v2499_v32 }
 0x1c2   : > { %1809 = vmatpush2.bf16.msra.mxu1 %v2497_v33 }
 0x1c3   : > { %1810 = vmatprep.subr.bf16.mxu1 %v2502_v34 }
 0x1c6   : > { %1811 = vmatpush2.bf16.msra.mxu1 %v2500_v35 }
 0x1c9   : > { %1813 = vmatmul.mubr.bf16.vlgmr.msra.gmra.mxu1 %v2702_v57  ;;  %v1853_v57 = vrot.slane %v259_v46, 1 }
 0x1cb   : > { %v1855_v4 = vsel %vm803_vm1, %v1853_v57, %v1854_v58 }
 0x240   : > { %v1566_v38 = vpop.f32.mrf.mxu0 }
 0x242   : > { %v1568_v44 = vpop.f32.mrf.mxu0 }
 0x244   : > { %v1570_v55 = vpop.f32.mrf.mxu0 }
 0x246   : > { %v1572_v8 = vpop.f32.mrf.mxu0 }
 0x249   : > { %v1363_v36 = vpop.f32.mrf.mxu1 }
 0x24a   : > { %v1567_v53 = vadd.f32 %v1566_v38, %v1363_v36 }
 0x24b   : > { %v1365_v37 = vpop.f32.mrf.mxu1 }
 0x24c   : > { %v1569_v60 = vadd.f32 %v1568_v44, %v1365_v37 }
 0x24d   : > { %v1367_v39 = vpop.f32.mrf.mxu1 }
 0x24e   : > { %v1571_v3 = vadd.f32 %v1570_v55, %v1367_v39 }
 0x24f   : > { %v1369_v48 = vpop.f32.mrf.mxu1 }
 0x250   : > { %v1573_v11 = vadd.f32 %v1572_v8, %v1369_v48 }
 0x289   : > { %v1814_v56 = vpop.f32.mrf.mxu1 }
 0x28a   : > { %v1823_v61 = vadd.f32 %v1814_v56, %v1567_v53 }
 0x28b   : > { %v1816_v0 = vpop.f32.mrf.mxu1 }
 0x28c   : > { %v1839_v5 = vadd.f32 %v1832_v54, %v1823_v61  ;;  %v1824_v7 = vadd.f32 %v1816_v0, %v1569_v60 }
 0x28d   : > { %v1818_v9 = vpop.f32.mrf.mxu1 }
 0x28e   : > { %v1864_v12 = vadd.f32 %v1852_v63, %v1839_v5  ;;  %v1840_v13 = vadd.f32 %v1836_v62, %v1824_v7  ;;  %v1825_v14 = vadd.f32 %v1818_v9, %v1571_v3 }
 0x28f   : > { %v1820_v6 = vpop.f32.mrf.mxu1 }
 0x290   : > { %v1865_v15 = vadd.f32 %v1855_v4, %v1840_v13  ;;  %v1841_v16 = vadd.f32 %v1832_v54, %v1825_v14  ;;  %v1826_v17 = vadd.f32 %v1820_v6, %v1573_v11  ;;  %v1868_v19 = vmax.f32 %v1864_v12, 0.0 }
 0x292   : > { %v1869_v20 = vmax.f32 %v1865_v15, 0.0  ;;  %v1866_v21 = vadd.f32 %v1857_v1, %v1841_v16  ;;  %v1842_v22 = vadd.f32 %v1836_v62, %v1826_v17 }
 0x294   : > { %v2176_v23 = vpack.c.bf16 %v1869_v20, %v1868_v19  ;;  %v1867_v24 = vadd.f32 %v1859_v18, %v1842_v22  ;;  %v1870_v25 = vmax.f32 %v1866_v21, 0.0 }
 0x296   : > { %1884 = vst [vmem:[%s254_s22] sm:$0xff] %v2176_v23  ;;  %v1871_v26 = vmax.f32 %v1867_v24, 0.0 }
 0x298   : > { %v2177_v27 = vpack.c.bf16 %v1871_v26, %v1870_v25 }
 0x29a   : > { %1885 = vst [vmem:[%s254_s22 + $0x8] sm:$0xff] %v2177_v27 }
 0x29b PF: > { %s17_s18 = sadd.s32 1, %s2572_s18  }
 0x29c   : > { %p14_p3 = scmp.ge.s32.totalorder %s17_s18, 4  }
 0x29e   :  { %16 = sbr.rel (!%p14_p3) target bundleno = 2 (0x2), region = 83 }
 0x2a3   :  { %1907 = vsyncpa [#allocation4], 1 }
 0x2a4   :  { %1909 = vsyncpa [#allocation4 + $0x1], 1 }
 0x2a5   :  { %1910 = vsyncpa [#allocation6], 1 }

// kernel: _lambda_.15
= control target key start
LH: loop header
LB: loop body
LE: loop exit
PB: predicated region body
PF: predicated region fallthrough
CT: control target
= control target key end

     0   :  { %s2943_s27 = smov 0   ;;  %s3693_s0 = inlined_call_operand.vmem [shape: bf16[2,9,256], index: 0, kind: input, shape index: {}]   ;;  %s3694_s1 = inlined_call_operand.vmem [shape: bf16[2,9,256], index: 1, kind: input, shape index: {}]   ;;  %s3695_s2 = inlined_call_operand.vmem [shape: bf16[3,256,256], index: 2, kind: input, shape index: {}]   ;;  %s3696_s3 = inlined_call_operand.vmem [shape: f32[1,256], index: 3, kind: input, shape index: {}]   ;;  %s3697_s4 = inlined_call_operand.vmem [shape: bf16[3,256,256], index: 4, kind: input, shape index: {}]   ;;  %s3698_s5 = inlined_call_operand.vmem [shape: f32[1,256], index: 5, kind: input, shape index: {}]   ;;  %s3699_s6 = inlined_call_operand.vmem [shape: bf16[256,256], index: 6, kind: input, shape index: {}]   ;;  %s3700_s7 = inlined_call_operand.vmem [shape: f32[1,256], index: 7, kind: input, shape index: {}]   ;;  %s3701_s8 = inlined_call_operand.vmem [shape: bf16[2,8,256], index: 8, kind: output, shape index: {}]  }
   0x1 LB: > { %s2162_s28 = sadd.s32 4294967295, %s2895_s27   ;;  %p2166_p0 = scmp.ge.s32.totalorder %s2895_s27, 1  ;;  %s2895_s27 = sphi %s2943_s27, %s18_s27  }
   0x2   : > { %p272_p1 = scmp.lt.s32.totalorder %s2895_s27, 3 }
   0x4   : > { %p273_p2 = pnand %p2166_p0, %p272_p1 }
   0x5   : > { %p311_p3 = scmp.lt.s32.totalorder (!%p273_p2), %s2162_s28, 1 }
   0x6   : > { %276 = sbr.rel (%p273_p2) target bundleno = 630 (0x276), region = 52 }
   0xb   : > { %v2547_v0 = vld [vmem:[%s3695_s2 + $0x174] ss:$8 sps:$4 sm:$0xff]   ;;  %v2551_v2 = vld [vmem:[%s3695_s2 + $0x170] ss:$8 sps:$4 sm:$0xff]   ;;  %v2553_v4 = vld [vmem:[%s3695_s2 + $0x164] ss:$8 sps:$4 sm:$0xff]  }
   0xc   : > { %v2549_v1 = vld [vmem:[%s3695_s2 + $0x74] ss:$8 sps:$4 sm:$0xff]   ;;  %564 = vmatprep.subr.bf16.mxu0 %v2547_v0  ;;  %v2552_v3 = vld [vmem:[%s3695_s2 + $0x70] ss:$8 sps:$4 sm:$0xff]   ;;  %v2555_v5 = vld [vmem:[%s3695_s2 + $0x64] ss:$8 sps:$4 sm:$0xff]  }
   0xd   : > { %765 = vmatprep.subr.bf16.mxu1 %v2549_v1  ;;  %565 = vmatpush1.bf16.msra.mxu0 %v2551_v2  ;;  %v2557_v6 = vld [vmem:[%s3695_s2 + $0x160] ss:$8 sps:$4 sm:$0xff]   ;;  %v2559_v8 = vld [vmem:[%s3695_s2 + $0x154] ss:$8 sps:$4 sm:$0xff]   ;;  %v2563_v10 = vld [vmem:[%s3695_s2 + $0x150] ss:$8 sps:$4 sm:$0xff]  }
   0xe   : > { %766 = vmatpush1.bf16.msra.mxu1 %v2552_v3  ;;  %566 = vmatprep.subr.bf16.mxu0 %v2553_v4  ;;  %v2558_v7 = vld [vmem:[%s3695_s2 + $0x60] ss:$8 sps:$4 sm:$0xff]   ;;  %v2561_v9 = vld [vmem:[%s3695_s2 + $0x54] ss:$8 sps:$4 sm:$0xff]   ;;  %v2564_v11 = vld [vmem:[%s3695_s2 + $0x50] ss:$8 sps:$4 sm:$0xff]  }
   0xf   : > { %767 = vmatprep.subr.bf16.mxu1 %v2555_v5  ;;  %v2565_v12 = vld [vmem:[%s3695_s2 + $0x144] ss:$8 sps:$4 sm:$0xff]   ;;  %v2569_v14 = vld [vmem:[%s3695_s2 + $0x140] ss:$8 sps:$4 sm:$0xff]   ;;  %v2571_v16 = vld [vmem:[%s3695_s2 + $0x134] ss:$8 sps:$4 sm:$0xff]  }
  0x10   : > { %v2567_v13 = vld [vmem:[%s3695_s2 + $0x44] ss:$8 sps:$4 sm:$0xff]   ;;  %v2570_v15 = vld [vmem:[%s3695_s2 + $0x40] ss:$8 sps:$4 sm:$0xff]   ;;  %v2573_v17 = vld [vmem:[%s3695_s2 + $0x34] ss:$8 sps:$4 sm:$0xff]  }
  0x11   : > { %567 = vmatpush1.bf16.msra.mxu0 %v2557_v6  ;;  %v2575_v18 = vld [vmem:[%s3695_s2 + $0x130] ss:$8 sps:$4 sm:$0xff]   ;;  %v2577_v20 = vld [vmem:[%s3695_s2 + $0x124] ss:$8 sps:$4 sm:$0xff]   ;;  %v2581_v22 = vld [vmem:[%s3695_s2 + $0x120] ss:$8 sps:$4 sm:$0xff]  }
  0x12   : > { %768 = vmatpush1.bf16.msra.mxu1 %v2558_v7  ;;  %568 = vmatprep.subr.bf16.mxu0 %v2559_v8  ;;  %v2576_v19 = vld [vmem:[%s3695_s2 + $0x30] ss:$8 sps:$4 sm:$0xff]   ;;  %v2579_v21 = vld [vmem:[%s3695_s2 + $0x24] ss:$8 sps:$4 sm:$0xff]   ;;  %v2582_v23 = vld [vmem:[%s3695_s2 + $0x20] ss:$8 sps:$4 sm:$0xff]  }
  0x13   : > { %769 = vmatprep.subr.bf16.mxu1 %v2561_v9  ;;  %v2583_v24 = vld [vmem:[%s3695_s2 + $0x114] ss:$8 sps:$4 sm:$0xff]   ;;  %v2587_v26 = vld [vmem:[%s3695_s2 + $0x110] ss:$8 sps:$4 sm:$0xff]   ;;  %v2589_v28 = vld [vmem:[%s3695_s2 + $0x104] ss:$8 sps:$4 sm:$0xff]  }
  0x14   : > { %v2585_v25 = vld [vmem:[%s3695_s2 + $0x14] ss:$8 sps:$4 sm:$0xff]   ;;  %v2588_v27 = vld [vmem:[%s3695_s2 + $0x10] ss:$8 sps:$4 sm:$0xff]   ;;  %v2591_v29 = vld [vmem:[%s3695_s2 + $0x4] ss:$8 sps:$4 sm:$0xff]  }
  0x15   : > { %569 = vmatpush1.bf16.msra.mxu0 %v2563_v10  ;;  %v2593_v30 = vld [vmem:[%s3695_s2 + $0x100] ss:$8 sps:$4 sm:$0xff]   ;;  %v2595_v32 = vld [vmem:[%s3695_s2 + $0x1f4] ss:$8 sps:$4 sm:$0xff]   ;;  %v2599_v34 = vld [vmem:[%s3695_s2 + $0x1f0] ss:$8 sps:$4 sm:$0xff]  }
  0x16   : > { %770 = vmatpush1.bf16.msra.mxu1 %v2564_v11  ;;  %570 = vmatprep.subr.bf16.mxu0 %v2565_v12  ;;  %v2594_v31 = vld [vmem:[%s3695_s2] ss:$8 sps:$4 sm:$0xff]   ;;  %v2597_v33 = vld [vmem:[%s3695_s2 + $0xf4] ss:$8 sps:$4 sm:$0xff]   ;;  %v2600_v35 = vld [vmem:[%s3695_s2 + $0xf0] ss:$8 sps:$4 sm:$0xff]  }
  0x17   : > { %771 = vmatprep.subr.bf16.mxu1 %v2567_v13  ;;  %v2601_v36 = vld [vmem:[%s3695_s2 + $0x1e4] ss:$8 sps:$4 sm:$0xff]   ;;  %s3703_s28 = smov (!%p311_p3, %s2162_s28), 1  ;;  %v2605_v38 = vld [vmem:[%s3695_s2 + $0x1e0] ss:$8 sps:$4 sm:$0xff]  }
  0x18   : > { %v2603_v37 = vld [vmem:[%s3695_s2 + $0xe4] ss:$8 sps:$4 sm:$0xff]   ;;  %v2606_v39 = vld [vmem:[%s3695_s2 + $0xe0] ss:$8 sps:$4 sm:$0xff]   ;;  %v2607_v40 = vld [vmem:[%s3695_s2 + $0x1d4] ss:$8 sps:$4 sm:$0xff]  }
  0x19   : > { %571 = vmatpush1.bf16.msra.mxu0 %v2569_v14  ;;  %v2609_v41 = vld [vmem:[%s3695_s2 + $0xd4] ss:$8 sps:$4 sm:$0xff]   ;;  %s2534_s11 = sshll.u32 %s3703_s28, 4  ;;  %v2611_v42 = vld [vmem:[%s3695_s2 + $0x1d0] ss:$8 sps:$4 sm:$0xff]  }
  0x1a   : > { %772 = vmatpush1.bf16.msra.mxu1 %v2570_v15  ;;  %572 = vmatprep.subr.bf16.mxu0 %v2571_v16  ;;  %v2612_v43 = vld [vmem:[%s3695_s2 + $0xd0] ss:$8 sps:$4 sm:$0xff]   ;;  %v2613_v44 = vld [vmem:[%s3695_s2 + $0x1c4] ss:$8 sps:$4 sm:$0xff]   ;;  %s315_s20 = scalar_lea.vmem %s3693_s0, %s2534_s11  ;;  %s320_s23 = scalar_lea.vmem %s3694_s1, %s2534_s11  ;;  %v2617_v46 = vld [vmem:[%s3695_s2 + $0x1c0] ss:$8 sps:$4 sm:$0xff]  }
  0x1b   : > { %773 = vmatprep.subr.bf16.mxu1 %v2573_v17  ;;  %v2615_v45 = vld [vmem:[%s3695_s2 + $0xc4] ss:$8 sps:$4 sm:$0xff]   ;;  %v2618_v49 = vld [vmem:[%s3695_s2 + $0xc0] ss:$8 sps:$4 sm:$0xff]   ;;  %v2619_v50 = vld [vmem:[%s3695_s2 + $0x1b4] ss:$8 sps:$4 sm:$0xff]  }
  0x1c   : > { %v332_v47 = vld [vmem:[%s320_s23] sm:$0xff]  ;;  %v2621_v53 = vld [vmem:[%s3695_s2 + $0xb4] ss:$8 sps:$4 sm:$0xff]   ;;  %v2623_v54 = vld [vmem:[%s3695_s2 + $0x1b0] ss:$8 sps:$4 sm:$0xff]  }
  0x1d   : > { %573 = vmatpush1.bf16.msra.mxu0 %v2575_v18  ;;  %v3105_v48 = vld [vmem:[%s315_s20] sm:$0xff]  ;;  %v3113_v51 = vcombine.high %v332_v47, %v332_v47  ;;  %v2624_v55 = vld [vmem:[%s3695_s2 + $0xb0] ss:$8 sps:$4 sm:$0xff]   ;;  %v3133_v58 = vld [vmem:[%s315_s20 + $0x8] sm:$0x11]  ;;  %v3170_v10 = vcombine.low %v332_v47, %v332_v47  ;;  %s2536_s20 = sshll.u32 %s3703_s28, 3 }
  0x1e   : > { %774 = vmatpush1.bf16.msra.mxu1 %v2576_v19  ;;  %574 = vmatprep.subr.bf16.mxu0 %v2577_v20  ;;  %v2174_v52 = vcombine.high %v3105_v48, %v3105_v48  ;;  %v2625_v56 = vld [vmem:[%s3695_s2 + $0x1a4] ss:$8 sps:$4 sm:$0xff]   ;;  %v2629_v59 = vld [vmem:[%s3695_s2 + $0x1a0] ss:$8 sps:$4 sm:$0xff]   ;;  %v2631_v61 = vld [vmem:[%s3695_s2 + $0x194] ss:$8 sps:$4 sm:$0xff]   ;;  %v2274_v62 = vcombine.high %v3105_v48, %v3133_v58  ;;  %v2173_v11 = vcombine.low %v3105_v48, %v3105_v48  ;;  %s325_s11 = scalar_lea.vmem %s3701_s8, %s2536_s20 }
  0x1f   : > { %775 = vmatprep.subr.bf16.mxu1 %v2579_v21  ;;  %596 = vmatprep.mubr.bf16.mxu0 %v3113_v51  ;;  %v2627_v57 = vld [vmem:[%s3695_s2 + $0xa4] ss:$8 sps:$4 sm:$0xff]   ;;  %v2630_v60 = vld [vmem:[%s3695_s2 + $0xa0] ss:$8 sps:$4 sm:$0xff]   ;;  %v2633_v63 = vld [vmem:[%s3695_s2 + $0x94] ss:$8 sps:$4 sm:$0xff]  }
  0x20   : > { %797 = vmatprep.mubr.bf16.mxu1 %v2174_v52  ;;  %v2635_v0 = vld [vmem:[%s3695_s2 + $0x190] ss:$8 sps:$4 sm:$0xff]   ;;  %v2637_v2 = vld [vmem:[%s3695_s2 + $0x184] ss:$8 sps:$4 sm:$0xff]   ;;  %v851_v3 = vshll.u32 %v2274_v62, 16  ;;  %v849_v7 = vshrl.u32 %v2274_v62, 16 }
  0x21   : > { %575 = vmatpush1.bf16.msra.mxu0 %v2581_v22  ;;  %v2636_v1 = vld [vmem:[%s3695_s2 + $0x90] ss:$8 sps:$4 sm:$0xff]   ;;  %v2639_v4 = vld [vmem:[%s3695_s2 + $0x84] ss:$8 sps:$4 sm:$0xff]   ;;  %v2641_v5 = vld [vmem:[%s3695_s2 + $0x180] ss:$8 sps:$4 sm:$0xff]  }
  0x22   : > { %776 = vmatpush1.bf16.msra.mxu1 %v2582_v23  ;;  %576 = vmatprep.subr.bf16.mxu0 %v2583_v24  ;;  %v2642_v6 = vld [vmem:[%s3695_s2 + $0x80] ss:$8 sps:$4 sm:$0xff]   ;;  %v853_v8 = vrot.slane %v851_v3, 1  ;;  %v2650_v9 = vld [vmem:[%s3695_s2 + $0x274] ss:$8 sps:$4 sm:$0xff]  }
  0x23   : > { %777 = vmatprep.subr.bf16.mxu1 %v2585_v25  ;;  %v2648_v12 = vld [vmem:[%s3695_s2 + $0x270] ss:$8 sps:$4 sm:$0xff]   ;;  %v2653_v13 = vld [vmem:[%s3695_s2 + $0x264] ss:$8 sps:$4 sm:$0xff]   ;;  %v2699_v16 = vld [vmem:[%s3699_s6 + $0x74] ss:$8 sps:$4 sm:$0xff]  }
  0x24   : > { %v854_v14 = vor.u32 %v853_v8, %v849_v7  ;;  %v2697_v15 = vld [vmem:[%s3699_s6 + $0x70] ss:$8 sps:$4 sm:$0xff]   ;;  %v2702_v17 = vld [vmem:[%s3699_s6 + $0x64] ss:$8 sps:$4 sm:$0xff]   ;;  %v2651_v18 = vld [vmem:[%s3695_s2 + $0x260] ss:$8 sps:$4 sm:$0xff]  }
  0x25   : > { %577 = vmatpush1.bf16.msra.mxu0 %v2587_v26  ;;  %v2656_v19 = vld [vmem:[%s3695_s2 + $0x254] ss:$8 sps:$4 sm:$0xff]   ;;  %v2700_v20 = vld [vmem:[%s3699_s6 + $0x60] ss:$8 sps:$4 sm:$0xff]   ;;  %v2654_v22 = vld [vmem:[%s3695_s2 + $0x250] ss:$8 sps:$4 sm:$0xff]  }
  0x26   : > { %778 = vmatpush1.bf16.msra.mxu1 %v2588_v27  ;;  %578 = vmatprep.subr.bf16.mxu0 %v2589_v28  ;;  %v2705_v21 = vld [vmem:[%s3699_s6 + $0x54] ss:$8 sps:$4 sm:$0xff]   ;;  %v2659_v23 = vld [vmem:[%s3695_s2 + $0x244] ss:$8 sps:$4 sm:$0xff]   ;;  %v2703_v24 = vld [vmem:[%s3699_s6 + $0x50] ss:$8 sps:$4 sm:$0xff]  }
  0x27   : > { %779 = vmatprep.subr.bf16.mxu1 %v2591_v29  ;;  %v2708_v25 = vld [vmem:[%s3699_s6 + $0x44] ss:$8 sps:$4 sm:$0xff]   ;;  %v2657_v26 = vld [vmem:[%s3695_s2 + $0x240] ss:$8 sps:$4 sm:$0xff]   ;;  %v2662_v27 = vld [vmem:[%s3695_s2 + $0x234] ss:$8 sps:$4 sm:$0xff]  }
  0x28   : > { %v2660_v28 = vld [vmem:[%s3695_s2 + $0x230] ss:$8 sps:$4 sm:$0xff]   ;;  %v2706_v29 = vld [vmem:[%s3699_s6 + $0x40] ss:$8 sps:$4 sm:$0xff]   ;;  %v2677_v47 = vld [vmem:[%s3695_s2 + $0x2e4] ss:$8 sps:$4 sm:$0xff]  }
  0x29   : > { %579 = vmatpush1.bf16.msra.mxu0 %v2593_v30  ;;  %v2665_v30 = vld [vmem:[%s3695_s2 + $0x224] ss:$8 sps:$4 sm:$0xff]   ;;  %v2680_v52 = vld [vmem:[%s3695_s2 + $0x2d4] ss:$8 sps:$4 sm:$0xff]   ;;  %v2690_v3 = vld [vmem:[%s3695_s2 + $0x290] ss:$8 sps:$4 sm:$0xff]  }
  0x2a   : > { %780 = vmatpush1.bf16.msra.mxu1 %v2594_v31  ;;  %580 = vmatprep.subr.bf16.mxu0 %v2595_v32  ;;  %v2711_v31 = vld [vmem:[%s3699_s6 + $0x34] ss:$8 sps:$4 sm:$0xff]   ;;  %v2709_v32 = vld [vmem:[%s3699_s6 + $0x30] ss:$8 sps:$4 sm:$0xff]   ;;  %v2689_v62 = vld [vmem:[%s3695_s2 + $0x2a4] ss:$8 sps:$4 sm:$0xff]  }
  0x2b   : > { %781 = vmatprep.subr.bf16.mxu1 %v2597_v33  ;;  %v2714_v33 = vld [vmem:[%s3699_s6 + $0x24] ss:$8 sps:$4 sm:$0xff]   ;;  %v2730_v8 = vld [vmem:[%s3699_s6 + $0xc0] ss:$8 sps:$4 sm:$0xff]  }
  0x2c   : > { %v2732_v7 = vld [vmem:[%s3699_s6 + $0xc4] ss:$8 sps:$4 sm:$0xff]  }
  0x2d   : > { %581 = vmatpush2.bf16.msra.mxu0 %v2599_v34  ;;  %v2663_v34 = vld [vmem:[%s3695_s2 + $0x220] ss:$8 sps:$4 sm:$0xff]  }
  0x2e   : > { %782 = vmatpush2.bf16.msra.mxu1 %v2600_v35  ;;  %582 = vmatprep.subr.bf16.mxu0 %v2601_v36  ;;  %v2668_v35 = vld [vmem:[%s3695_s2 + $0x214] ss:$8 sps:$4 sm:$0xff]   ;;  %v2712_v36 = vld [vmem:[%s3699_s6 + $0x20] ss:$8 sps:$4 sm:$0xff]  }
  0x2f   : > { %783 = vmatprep.subr.bf16.mxu1 %v2603_v37  ;;  %v2717_v37 = vld [vmem:[%s3699_s6 + $0x14] ss:$8 sps:$4 sm:$0xff]  }
  0x31   : > { %583 = vmatpush2.bf16.msra.mxu0 %v2605_v38  ;;  %v2666_v38 = vld [vmem:[%s3695_s2 + $0x210] ss:$8 sps:$4 sm:$0xff]  }
  0x32   : > { %784 = vmatpush2.bf16.msra.mxu1 %v2606_v39  ;;  %584 = vmatprep.subr.bf16.mxu0 %v2607_v40  ;;  %v2671_v39 = vld [vmem:[%s3695_s2 + $0x204] ss:$8 sps:$4 sm:$0xff]   ;;  %v2715_v40 = vld [vmem:[%s3699_s6 + $0x10] ss:$8 sps:$4 sm:$0xff]  }
  0x33   : > { %785 = vmatprep.subr.bf16.mxu1 %v2609_v41  ;;  %v2720_v41 = vld [vmem:[%s3699_s6 + $0x4] ss:$8 sps:$4 sm:$0xff]  }
  0x35   : > { %585 = vmatpush2.bf16.msra.mxu0 %v2611_v42  ;;  %v2669_v42 = vld [vmem:[%s3695_s2 + $0x200] ss:$8 sps:$4 sm:$0xff]  }
  0x36   : > { %786 = vmatpush2.bf16.msra.mxu1 %v2612_v43  ;;  %586 = vmatprep.subr.bf16.mxu0 %v2613_v44  ;;  %v2674_v43 = vld [vmem:[%s3695_s2 + $0x2f4] ss:$8 sps:$4 sm:$0xff]   ;;  %v2718_v44 = vld [vmem:[%s3699_s6] ss:$8 sps:$4 sm:$0xff]  }
  0x37   : > { %787 = vmatprep.subr.bf16.mxu1 %v2615_v45  ;;  %v2723_v45 = vld [vmem:[%s3699_s6 + $0xf4] ss:$8 sps:$4 sm:$0xff]  }
  0x39   : > { %587 = vmatpush2.bf16.msra.mxu0 %v2617_v46  ;;  %v2672_v46 = vld [vmem:[%s3695_s2 + $0x2f0] ss:$8 sps:$4 sm:$0xff]  }
  0x3a   : > { %788 = vmatpush2.bf16.msra.mxu1 %v2618_v49  ;;  %588 = vmatprep.subr.bf16.mxu0 %v2619_v50  ;;  %v2721_v49 = vld [vmem:[%s3699_s6 + $0xf0] ss:$8 sps:$4 sm:$0xff]   ;;  %v2726_v50 = vld [vmem:[%s3699_s6 + $0xe4] ss:$8 sps:$4 sm:$0xff]  }
  0x3b   : > { %789 = vmatprep.subr.bf16.mxu1 %v2621_v53  ;;  %v2724_v53 = vld [vmem:[%s3699_s6 + $0xe0] ss:$8 sps:$4 sm:$0xff]  }
  0x3d   : > { %589 = vmatpush2.bf16.msra.mxu0 %v2623_v54  ;;  %v2729_v54 = vld [vmem:[%s3699_s6 + $0xd4] ss:$8 sps:$4 sm:$0xff]  }
  0x3e   : > { %790 = vmatpush2.bf16.msra.mxu1 %v2624_v55  ;;  %590 = vmatprep.subr.bf16.mxu0 %v2625_v56  ;;  %v2678_v55 = vld [vmem:[%s3695_s2 + $0x2d0] ss:$8 sps:$4 sm:$0xff]   ;;  %v2683_v56 = vld [vmem:[%s3695_s2 + $0x2c4] ss:$8 sps:$4 sm:$0xff]  }
  0x3f   : > { %791 = vmatprep.subr.bf16.mxu1 %v2627_v57  ;;  %v2727_v57 = vld [vmem:[%s3699_s6 + $0xd0] ss:$8 sps:$4 sm:$0xff]  }
  0x41   : > { %591 = vmatpush2.bf16.msra.mxu0 %v2629_v59  ;;  %v2681_v59 = vld [vmem:[%s3695_s2 + $0x2c0] ss:$8 sps:$4 sm:$0xff]  }
  0x42   : > { %792 = vmatpush2.bf16.msra.mxu1 %v2630_v60  ;;  %592 = vmatprep.subr.bf16.mxu0 %v2631_v61  ;;  %v2686_v60 = vld [vmem:[%s3695_s2 + $0x2b4] ss:$8 sps:$4 sm:$0xff]   ;;  %v2684_v61 = vld [vmem:[%s3695_s2 + $0x2b0] ss:$8 sps:$4 sm:$0xff]  }
  0x43   : > { %793 = vmatprep.subr.bf16.mxu1 %v2633_v63  ;;  %v2273_v63 = vcombine.low %v3105_v48, %v3133_v58  ;;  %v2695_v48 = vld [vmem:[%s3695_s2 + $0x284] ss:$8 sps:$4 sm:$0xff]  }
  0x45   : > { %593 = vmatpush2.bf16.msra.mxu0 %v2635_v0  ;;  %v2687_v0 = vld [vmem:[%s3695_s2 + $0x2a0] ss:$8 sps:$4 sm:$0xff]   ;;  %v842_v58 = vshrl.u32 %v2273_v63, 16 }
  0x46   : > { %794 = vmatpush2.bf16.msra.mxu1 %v2636_v1  ;;  %594 = vmatprep.subr.bf16.mxu0 %v2637_v2  ;;  %v2692_v1 = vld [vmem:[%s3695_s2 + $0x294] ss:$8 sps:$4 sm:$0xff]   ;;  %v844_v2 = vshll.u32 %v2273_v63, 16 }
  0x47   : > { %795 = vmatprep.subr.bf16.mxu1 %v2639_v4  ;;  %v2813_v63 = vld [vmem:[%s3697_s4 + $0x1d4] ss:$8 sps:$4 sm:$0xff]  }
  0x48   : > { %v846_v4 = vrot.slane %v844_v2, 1  ;;  %v2814_v2 = vld [vmem:[%s3697_s4 + $0xb0] ss:$8 sps:$4 sm:$0xff]  }
  0x49   : > { %595 = vmatpush2.bf16.msra.mxu0 %v2641_v5  ;;  %v2693_v5 = vld [vmem:[%s3695_s2 + $0x280] ss:$8 sps:$4 sm:$0xff]  }
  0x4a   : > { %796 = vmatpush2.bf16.msra.mxu1 %v2642_v6  ;;  %1017 = vmatprep.subr.bf16.mxu0 %v2650_v9  ;;  %v847_v6 = vor.u32 %v846_v4, %v842_v58  ;;  %v2735_v9 = vld [vmem:[%s3699_s6 + $0xb4] ss:$8 sps:$4 sm:$0xff]   ;;  %v2817_v58 = vld [vmem:[%s3697_s4 + $0x1c0] ss:$8 sps:$4 sm:$0xff]   ;;  %v2822_v4 = vld [vmem:[%s3697_s4 + $0xa4] ss:$8 sps:$4 sm:$0xff]  }
  0x4b   : > { %1280 = vmatprep.subr.bf16.mxu1 %v2699_v16  ;;  %v2753_v16 = vld [vmem:[%s3697_s4 + $0x174] ss:$8 sps:$4 sm:$0xff]  }
  0x4c   : > { %597 = vmatmul.mubr.bf16.vlgmr.msra.gmra.mxu0 %v3170_v10 }
  0x4d   : > { %798 = vmatmul.mubr.bf16.vlgmr.msra.gmra.mxu1 %v2173_v11  ;;  %1018 = vmatpush1.bf16.msra.mxu0 %v2648_v12  ;;  %v2733_v11 = vld [vmem:[%s3699_s6 + $0xb0] ss:$8 sps:$4 sm:$0xff]   ;;  %v2738_v12 = vld [vmem:[%s3699_s6 + $0xa4] ss:$8 sps:$4 sm:$0xff]  }
  0x4e   : > { %1049 = vmatprep.mubr.bf16.mxu0 %v854_v14  ;;  %1019 = vmatprep.subr.bf16.mxu0 %v2653_v13  ;;  %v2736_v13 = vld [vmem:[%s3699_s6 + $0xa0] ss:$8 sps:$4 sm:$0xff]   ;;  %v2741_v14 = vld [vmem:[%s3699_s6 + $0x94] ss:$8 sps:$4 sm:$0xff]  }
  0x4f   : > { %1281 = vmatpush1.bf16.msra.mxu1 %v2697_v15  ;;  %1312 = vmatprep.mubr.bf16.mxu1 %v3113_v51  ;;  %v2675_v51 = vld [vmem:[%s3695_s2 + $0x2e0] ss:$8 sps:$4 sm:$0xff]   ;;  %v2751_v15 = vld [vmem:[%s3697_s4 + $0x170] ss:$8 sps:$4 sm:$0xff]  }
  0x50   : > { %1282 = vmatprep.subr.bf16.mxu1 %v2702_v17  ;;  %v2739_v17 = vld [vmem:[%s3699_s6 + $0x90] ss:$8 sps:$4 sm:$0xff]  }
  0x51   : > { %1020 = vmatpush1.bf16.msra.mxu0 %v2651_v18  ;;  %v2759_v18 = vld [vmem:[%s3697_s4 + $0x164] ss:$8 sps:$4 sm:$0xff]  }
  0x52   : > { %1021 = vmatprep.subr.bf16.mxu0 %v2656_v19  ;;  %v2744_v19 = vld [vmem:[%s3699_s6 + $0x84] ss:$8 sps:$4 sm:$0xff]  }
  0x53   : > { %1283 = vmatpush1.bf16.msra.mxu1 %v2700_v20  ;;  %v2757_v20 = vld [vmem:[%s3697_s4 + $0x160] ss:$8 sps:$4 sm:$0xff]  }
  0x54   : > { %1284 = vmatprep.subr.bf16.mxu1 %v2705_v21  ;;  %v2765_v21 = vld [vmem:[%s3697_s4 + $0x154] ss:$8 sps:$4 sm:$0xff]  }
  0x55   : > { %1022 = vmatpush1.bf16.msra.mxu0 %v2654_v22  ;;  %v2742_v22 = vld [vmem:[%s3699_s6 + $0x80] ss:$8 sps:$4 sm:$0xff]  }
  0x56   : > { %1023 = vmatprep.subr.bf16.mxu0 %v2659_v23  ;;  %v2747_v23 = vld [vmem:[%s3697_s4 + $0x74] ss:$8 sps:$4 sm:$0xff]  }
  0x57   : > { %1285 = vmatpush1.bf16.msra.mxu1 %v2703_v24  ;;  %v2763_v24 = vld [vmem:[%s3697_s4 + $0x150] ss:$8 sps:$4 sm:$0xff]  }
  0x58   : > { %1286 = vmatprep.subr.bf16.mxu1 %v2708_v25  ;;  %v2771_v25 = vld [vmem:[%s3697_s4 + $0x144] ss:$8 sps:$4 sm:$0xff]  }
  0x59   : > { %1024 = vmatpush1.bf16.msra.mxu0 %v2657_v26  ;;  %v2745_v26 = vld [vmem:[%s3697_s4 + $0x70] ss:$8 sps:$4 sm:$0xff]  }
  0x5a   : > { %1025 = vmatprep.subr.bf16.mxu0 %v2662_v27  ;;  %v2750_v27 = vld [vmem:[%s3697_s4 + $0x64] ss:$8 sps:$4 sm:$0xff]  }
  0x5b   : > { %1287 = vmatpush1.bf16.msra.mxu1 %v2706_v29  ;;  %v2777_v29 = vld [vmem:[%s3697_s4 + $0x134] ss:$8 sps:$4 sm:$0xff]  }
  0x5c   : > { %1288 = vmatprep.subr.bf16.mxu1 %v2711_v31  ;;  %v2756_v31 = vld [vmem:[%s3697_s4 + $0x54] ss:$8 sps:$4 sm:$0xff]  }
  0x5d   : > { %1026 = vmatpush1.bf16.msra.mxu0 %v2660_v28  ;;  %v2769_v28 = vld [vmem:[%s3697_s4 + $0x140] ss:$8 sps:$4 sm:$0xff]  }
  0x5e   : > { %1027 = vmatprep.subr.bf16.mxu0 %v2665_v30  ;;  %v2748_v30 = vld [vmem:[%s3697_s4 + $0x60] ss:$8 sps:$4 sm:$0xff]  }
  0x5f   : > { %1289 = vmatpush1.bf16.msra.mxu1 %v2709_v32  ;;  %v2775_v32 = vld [vmem:[%s3697_s4 + $0x130] ss:$8 sps:$4 sm:$0xff]  }
  0x60   : > { %1290 = vmatprep.subr.bf16.mxu1 %v2714_v33  ;;  %v2754_v33 = vld [vmem:[%s3697_s4 + $0x50] ss:$8 sps:$4 sm:$0xff]  }
  0x61   : > { %1028 = vmatpush1.bf16.msra.mxu0 %v2663_v34  ;;  %v2762_v34 = vld [vmem:[%s3697_s4 + $0x44] ss:$8 sps:$4 sm:$0xff]  }
  0x62   : > { %1029 = vmatprep.subr.bf16.mxu0 %v2668_v35  ;;  %v2781_v35 = vld [vmem:[%s3697_s4 + $0x120] ss:$8 sps:$4 sm:$0xff]  }
  0x63   : > { %1291 = vmatpush1.bf16.msra.mxu1 %v2712_v36  ;;  %v2789_v36 = vld [vmem:[%s3697_s4 + $0x114] ss:$8 sps:$4 sm:$0xff]  }
  0x64   : > { %1292 = vmatprep.subr.bf16.mxu1 %v2717_v37  ;;  %v2760_v37 = vld [vmem:[%s3697_s4 + $0x40] ss:$8 sps:$4 sm:$0xff]  }
  0x65   : > { %1030 = vmatpush1.bf16.msra.mxu0 %v2666_v38  ;;  %v2768_v38 = vld [vmem:[%s3697_s4 + $0x34] ss:$8 sps:$4 sm:$0xff]  }
  0x66   : > { %1031 = vmatprep.subr.bf16.mxu0 %v2671_v39  ;;  %v2787_v39 = vld [vmem:[%s3697_s4 + $0x110] ss:$8 sps:$4 sm:$0xff]  }
  0x67   : > { %1293 = vmatpush1.bf16.msra.mxu1 %v2715_v40  ;;  %v2795_v40 = vld [vmem:[%s3697_s4 + $0x104] ss:$8 sps:$4 sm:$0xff]  }
  0x68   : > { %1294 = vmatprep.subr.bf16.mxu1 %v2720_v41  ;;  %v2766_v41 = vld [vmem:[%s3697_s4 + $0x30] ss:$8 sps:$4 sm:$0xff]  }
  0x69   : > { %1032 = vmatpush1.bf16.msra.mxu0 %v2669_v42  ;;  %v2774_v42 = vld [vmem:[%s3697_s4 + $0x24] ss:$8 sps:$4 sm:$0xff]  }
  0x6a   : > { %1033 = vmatprep.subr.bf16.mxu0 %v2674_v43  ;;  %v2793_v43 = vld [vmem:[%s3697_s4 + $0x100] ss:$8 sps:$4 sm:$0xff]  }
  0x6b   : > { %1295 = vmatpush1.bf16.msra.mxu1 %v2718_v44  ;;  %v2801_v44 = vld [vmem:[%s3697_s4 + $0x1f4] ss:$8 sps:$4 sm:$0xff]  }
  0x6c   : > { %1296 = vmatprep.subr.bf16.mxu1 %v2723_v45  ;;  %v2772_v45 = vld [vmem:[%s3697_s4 + $0x20] ss:$8 sps:$4 sm:$0xff]  }
  0x6d   : > { %1034 = vmatpush2.bf16.msra.mxu0 %v2672_v46  ;;  %v2780_v46 = vld [vmem:[%s3697_s4 + $0x14] ss:$8 sps:$4 sm:$0xff]  }
  0x6e   : > { %1035 = vmatprep.subr.bf16.mxu0 %v2677_v47  ;;  %v2799_v47 = vld [vmem:[%s3697_s4 + $0x1f0] ss:$8 sps:$4 sm:$0xff]  }
  0x6f   : > { %1297 = vmatpush2.bf16.msra.mxu1 %v2721_v49  ;;  %v2807_v49 = vld [vmem:[%s3697_s4 + $0x1e4] ss:$8 sps:$4 sm:$0xff]  }
  0x70   : > { %1298 = vmatprep.subr.bf16.mxu1 %v2726_v50  ;;  %v2778_v50 = vld [vmem:[%s3697_s4 + $0x10] ss:$8 sps:$4 sm:$0xff]  }
  0x71   : > { %1036 = vmatpush2.bf16.msra.mxu0 %v2675_v51  ;;  %v2786_v51 = vld [vmem:[%s3697_s4 + $0x4] ss:$8 sps:$4 sm:$0xff]  }
  0x72   : > { %1037 = vmatprep.subr.bf16.mxu0 %v2680_v52  ;;  %v2805_v52 = vld [vmem:[%s3697_s4 + $0x1e0] ss:$8 sps:$4 sm:$0xff]  }
  0x73   : > { %1299 = vmatpush2.bf16.msra.mxu1 %v2724_v53  ;;  %v2784_v53 = vld [vmem:[%s3697_s4] ss:$8 sps:$4 sm:$0xff]  }
  0x74   : > { %1300 = vmatprep.subr.bf16.mxu1 %v2729_v54  ;;  %v2792_v54 = vld [vmem:[%s3697_s4 + $0xf4] ss:$8 sps:$4 sm:$0xff]  }
  0x75   : > { %1038 = vmatpush2.bf16.msra.mxu0 %v2678_v55  ;;  %v2790_v55 = vld [vmem:[%s3697_s4 + $0xf0] ss:$8 sps:$4 sm:$0xff]  }
  0x76   : > { %1039 = vmatprep.subr.bf16.mxu0 %v2683_v56  ;;  %v2798_v56 = vld [vmem:[%s3697_s4 + $0xe4] ss:$8 sps:$4 sm:$0xff]  }
  0x77   : > { %1301 = vmatpush2.bf16.msra.mxu1 %v2727_v57  ;;  %v2796_v57 = vld [vmem:[%s3697_s4 + $0xe0] ss:$8 sps:$4 sm:$0xff]  }
  0x78   : > { %1302 = vmatprep.subr.bf16.mxu1 %v2732_v7  ;;  %v2823_v7 = vld [vmem:[%s3697_s4 + $0x1b0] ss:$8 sps:$4 sm:$0xff]  }
  0x79   : > { %1040 = vmatpush2.bf16.msra.mxu0 %v2681_v59  ;;  %v2804_v59 = vld [vmem:[%s3697_s4 + $0xd4] ss:$8 sps:$4 sm:$0xff]  }
  0x7a   : > { %1041 = vmatprep.subr.bf16.mxu0 %v2686_v60  ;;  %v2802_v60 = vld [vmem:[%s3697_s4 + $0xd0] ss:$8 sps:$4 sm:$0xff]  }
  0x7b   : > { %1303 = vmatpush2.bf16.msra.mxu1 %v2730_v8  ;;  %v2826_v8 = vld [vmem:[%s3697_s4 + $0x90] ss:$8 sps:$4 sm:$0xff]  }
  0x7c   : > { %1304 = vmatprep.subr.bf16.mxu1 %v2735_v9  ;;  %v2828_v9 = vld [vmem:[%s3697_s4 + $0x94] ss:$8 sps:$4 sm:$0xff]  }
  0x7d   : > { %1042 = vmatpush2.bf16.msra.mxu0 %v2684_v61  ;;  %v2810_v61 = vld [vmem:[%s3697_s4 + $0xc4] ss:$8 sps:$4 sm:$0xff]  }
  0x7e   : > { %1043 = vmatprep.subr.bf16.mxu0 %v2689_v62  ;;  %v2808_v62 = vld [vmem:[%s3697_s4 + $0xc0] ss:$8 sps:$4 sm:$0xff]  }
  0x7f   : > { %1305 = vmatpush2.bf16.msra.mxu1 %v2733_v11  ;;  %v2829_v11 = vld [vmem:[%s3697_s4 + $0x1a0] ss:$8 sps:$4 sm:$0xff]  }
  0x80   : > { %1306 = vmatprep.subr.bf16.mxu1 %v2738_v12  ;;  %v2831_v12 = vld [vmem:[%s3697_s4 + $0x1a4] ss:$8 sps:$4 sm:$0xff]  }
  0x81   : > { %1044 = vmatpush2.bf16.msra.mxu0 %v2687_v0  ;;  %v2811_v0 = vld [vmem:[%s3697_s4 + $0x1d0] ss:$8 sps:$4 sm:$0xff]  }
  0x82   : > { %1045 = vmatprep.subr.bf16.mxu0 %v2692_v1  ;;  %v2816_v1 = vld [vmem:[%s3697_s4 + $0xb4] ss:$8 sps:$4 sm:$0xff]  }
  0x83   : > { %1307 = vmatpush2.bf16.msra.mxu1 %v2736_v13  ;;  %v2834_v13 = vld [vmem:[%s3697_s4 + $0x84] ss:$8 sps:$4 sm:$0xff]  }
  0x84   : > { %1308 = vmatprep.subr.bf16.mxu1 %v2741_v14  ;;  %v2837_v14 = vld [vmem:[%s3697_s4 + $0x194] ss:$8 sps:$4 sm:$0xff]  }
  0x85   : > { %1046 = vmatpush2.bf16.msra.mxu0 %v2690_v3  ;;  %v2819_v3 = vld [vmem:[%s3697_s4 + $0x1c4] ss:$8 sps:$4 sm:$0xff]  }
  0x86   : > { %1047 = vmatprep.subr.bf16.mxu0 %v2695_v48  ;;  %v2897_v48 = vmov 0.0  }
  0x87   : > { %1309 = vmatpush2.bf16.msra.mxu1 %v2739_v17  ;;  %1321 = vst [vmem:[#allocation2 + $0x10] sm:$0xff] %v2897_v48  ;;  %1323 = vst [vmem:[#allocation2 + $0x18] sm:$0x3] %v2897_v48  ;;  %v2840_v17 = vld [vmem:[%s3697_s4 + $0x184] ss:$8 sps:$4 sm:$0xff]  }
  0x88   : > { %1310 = vmatprep.subr.bf16.mxu1 %v2744_v19  ;;  %1322 = vst [vmem:[#allocation2] sm:$0xff] %v2897_v48  ;;  %1324 = vst [vmem:[#allocation2 + $0x8] sm:$0x3] %v2897_v48  ;;  %v2843_v19 = vld [vmem:[%s3697_s4 + $0x274] ss:$8 sps:$4 sm:$0xff]  }
  0x89   : > { %1048 = vmatpush2.bf16.msra.mxu0 %v2693_v5  ;;  %v2820_v5 = vld [vmem:[%s3697_s4 + $0xa0] ss:$8 sps:$4 sm:$0xff]  }
  0x8a   : > { %1584 = vmatprep.subr.bf16.mxu0 %v2753_v16  ;;  %v2835_v16 = vld [vmem:[%s3697_s4 + $0x190] ss:$8 sps:$4 sm:$0xff]  }
  0x8b   : > { %1311 = vmatpush2.bf16.msra.mxu1 %v2742_v22 }
  0x8c   : > { %1050 = vmatmul.mubr.bf16.vlgmr.msra.gmra.mxu0 %v847_v6  ;;  %1785 = vmatprep.subr.bf16.mxu1 %v2747_v23  ;;  %v2825_v6 = vld [vmem:[%s3697_s4 + $0x1b4] ss:$8 sps:$4 sm:$0xff]  }
  0x8d   : > { %1585 = vmatpush1.bf16.msra.mxu0 %v2751_v15  ;;  %v2832_v15 = vld [vmem:[%s3697_s4 + $0x80] ss:$8 sps:$4 sm:$0xff]  }
  0x8e   : > { %1586 = vmatprep.subr.bf16.mxu0 %v2759_v18  ;;  %1313 = vmatmul.mubr.bf16.vlgmr.msra.gmra.mxu1 %v3170_v10  ;;  %v2783_v10 = vld [vmem:[%s3697_s4 + $0x124] ss:$8 sps:$4 sm:$0xff]   ;;  %v2838_v18 = vld [vmem:[%s3697_s4 + $0x180] ss:$8 sps:$4 sm:$0xff]  }
  0x8f   : > { %1786 = vmatpush1.bf16.msra.mxu1 %v2745_v26 }
  0x90   : > { %1787 = vmatprep.subr.bf16.mxu1 %v2750_v27 }
  0x91   : > { %1587 = vmatpush1.bf16.msra.mxu0 %v2757_v20 }
  0x92   : > { %1588 = vmatprep.subr.bf16.mxu0 %v2765_v21 }
  0x93   : > { %1788 = vmatpush1.bf16.msra.mxu1 %v2748_v30 }
  0x94   : > { %1789 = vmatprep.subr.bf16.mxu1 %v2756_v31  ;;  %v1060_v31 = vld [vmem:[%s3696_s3] sm:$0x3] }
  0x95   : > { %1589 = vmatpush1.bf16.msra.mxu0 %v2763_v24 }
  0x96   : > { %1590 = vmatprep.subr.bf16.mxu0 %v2771_v25 }
  0x97   : > { %1790 = vmatpush1.bf16.msra.mxu1 %v2754_v33 }
  0x98   : > { %1791 = vmatprep.subr.bf16.mxu1 %v2762_v34 }
  0x99   : > { %1591 = vmatpush1.bf16.msra.mxu0 %v2769_v28  ;;  %v1062_v28 = vlaneseq }
  0x9a   : > { %1592 = vmatprep.subr.bf16.mxu0 %v2777_v29 }
  0x9b   : > { %1792 = vmatpush1.bf16.msra.mxu1 %v2760_v37  ;;  %v1063_v29 = vshrl.u32 %v1062_v28, 7  ;;  %v2874_v28 = vld [vmem:[%s3697_s4 + $0x2c0] ss:$8 sps:$4 sm:$0xff]  }
  0x9c   : > { %1793 = vmatprep.subr.bf16.mxu1 %v2768_v38 }
  0x9d   : > { %1593 = vmatpush1.bf16.msra.mxu0 %v2775_v32  ;;  %v3563_v30 = vsub.s32 0, %v1063_v29  ;;  %v3568_v32 = vsub.s32 1, %v1063_v29  ;;  %v2879_v29 = vld [vmem:[%s3697_s4 + $0x2b4] ss:$8 sps:$4 sm:$0xff]  }
  0x9e   : > { %1594 = vmatprep.subr.bf16.mxu0 %v2783_v10 }
  0x9f   : > { %1794 = vmatpush1.bf16.msra.mxu1 %v2766_v41  ;;  %v1065_v33 = vrot.slane %v1060_v31, %v3563_v30  ;;  %v1069_v37 = vrot.slane %v1060_v31, %v3568_v32  ;;  %v2877_v31 = vld [vmem:[%s3697_s4 + $0x2b0] ss:$8 sps:$4 sm:$0xff]  }
  0xa0   : > { %1795 = vmatprep.subr.bf16.mxu1 %v2774_v42 }
  0xa1   : > { %1595 = vmatpush1.bf16.msra.mxu0 %v2781_v35 }
  0xa2   : > { %1596 = vmatprep.subr.bf16.mxu0 %v2789_v36 }
  0xa3   : > { %1796 = vmatpush1.bf16.msra.mxu1 %v2772_v45 }
  0xa4   : > { %1797 = vmatprep.subr.bf16.mxu1 %v2780_v46 }
  0xa5   : > { %1597 = vmatpush1.bf16.msra.mxu0 %v2787_v39 }
  0xa6   : > { %1598 = vmatprep.subr.bf16.mxu0 %v2795_v40 }
  0xa7   : > { %1798 = vmatpush1.bf16.msra.mxu1 %v2778_v50 }
  0xa8   : > { %1799 = vmatprep.subr.bf16.mxu1 %v2786_v51 }
  0xa9   : > { %1599 = vmatpush1.bf16.msra.mxu0 %v2793_v43 }
  0xaa   : > { %1600 = vmatprep.subr.bf16.mxu0 %v2801_v44 }
  0xab   : > { %1800 = vmatpush1.bf16.msra.mxu1 %v2784_v53 }
  0xac   : > { %1801 = vmatprep.subr.bf16.mxu1 %v2792_v54 }
  0xad   : > { %1601 = vmatpush2.bf16.msra.mxu0 %v2799_v47 }
  0xae   : > { %1602 = vmatprep.subr.bf16.mxu0 %v2807_v49 }
  0xaf   : > { %1802 = vmatpush2.bf16.msra.mxu1 %v2790_v55 }
  0xb0   : > { %1803 = vmatprep.subr.bf16.mxu1 %v2798_v56 }
  0xb1   : > { %1603 = vmatpush2.bf16.msra.mxu0 %v2805_v52 }
  0xb2   : > { %1604 = vmatprep.subr.bf16.mxu0 %v2813_v63 }
  0xb3   : > { %1804 = vmatpush2.bf16.msra.mxu1 %v2796_v57 }
  0xb4   : > { %1805 = vmatprep.subr.bf16.mxu1 %v2804_v59 }
  0xb5   : > { %1605 = vmatpush2.bf16.msra.mxu0 %v2811_v0 }
  0xb6   : > { %1606 = vmatprep.subr.bf16.mxu0 %v2819_v3  ;;  %v2841_v3 = vld [vmem:[%s3697_s4 + $0x270] ss:$8 sps:$4 sm:$0xff]  }
  0xb7   : > { %1806 = vmatpush2.bf16.msra.mxu1 %v2802_v60 }
  0xb8   : > { %1807 = vmatprep.subr.bf16.mxu1 %v2810_v61 }
  0xb9   : > { %1607 = vmatpush2.bf16.msra.mxu0 %v2817_v58  ;;  %v2846_v58 = vld [vmem:[%s3697_s4 + $0x264] ss:$8 sps:$4 sm:$0xff]  }
  0xba   : > { %1608 = vmatprep.subr.bf16.mxu0 %v2825_v6 }
  0xbb   : > { %1808 = vmatpush2.bf16.msra.mxu1 %v2808_v62 }
  0xbc   : > { %1809 = vmatprep.subr.bf16.mxu1 %v2816_v1 }
  0xbd   : > { %1609 = vmatpush2.bf16.msra.mxu0 %v2823_v7  ;;  %v2844_v7 = vld [vmem:[%s3697_s4 + $0x260] ss:$8 sps:$4 sm:$0xff]  }
  0xbe   : > { %1610 = vmatprep.subr.bf16.mxu0 %v2831_v12  ;;  %v2850_v12 = vld [vmem:[%s3697_s4 + $0x240] ss:$8 sps:$4 sm:$0xff]  }
  0xbf   : > { %1810 = vmatpush2.bf16.msra.mxu1 %v2814_v2 }
  0xc0   : > { %1811 = vmatprep.subr.bf16.mxu1 %v2822_v4 }
  0xc1   : > { %1611 = vmatpush2.bf16.msra.mxu0 %v2829_v11  ;;  %v2852_v11 = vld [vmem:[%s3697_s4 + $0x244] ss:$8 sps:$4 sm:$0xff]  }
  0xc2   : > { %1612 = vmatprep.subr.bf16.mxu0 %v2837_v14  ;;  %v2853_v14 = vld [vmem:[%s3697_s4 + $0x230] ss:$8 sps:$4 sm:$0xff]  }
  0xc3   : > { %1812 = vmatpush2.bf16.msra.mxu1 %v2820_v5 }
  0xc4   : > { %1813 = vmatprep.subr.bf16.mxu1 %v2828_v9  ;;  %v2847_v9 = vld [vmem:[%s3697_s4 + $0x250] ss:$8 sps:$4 sm:$0xff]  }
  0xc5   : > { %1613 = vmatpush2.bf16.msra.mxu0 %v2835_v16  ;;  %v2856_v16 = vld [vmem:[%s3697_s4 + $0x220] ss:$8 sps:$4 sm:$0xff]  }
  0xc6   : > { %1614 = vmatprep.subr.bf16.mxu0 %v2840_v17  ;;  %v2861_v17 = vld [vmem:[%s3697_s4 + $0x214] ss:$8 sps:$4 sm:$0xff]  }
  0xc7   : > { %1814 = vmatpush2.bf16.msra.mxu1 %v2826_v8  ;;  %v2849_v8 = vld [vmem:[%s3697_s4 + $0x254] ss:$8 sps:$4 sm:$0xff]  }
  0xc8   : > { %1815 = vmatprep.subr.bf16.mxu1 %v2834_v13  ;;  %v2855_v13 = vld [vmem:[%s3697_s4 + $0x234] ss:$8 sps:$4 sm:$0xff]  }
  0xc9   : > { %1615 = vmatpush2.bf16.msra.mxu0 %v2838_v18  ;;  %v2859_v18 = vld [vmem:[%s3697_s4 + $0x210] ss:$8 sps:$4 sm:$0xff]  }
  0xca   : > { %2025 = vmatprep.subr.bf16.mxu0 %v2843_v19  ;;  %v2864_v19 = vld [vmem:[%s3697_s4 + $0x204] ss:$8 sps:$4 sm:$0xff]  }
  0xcb   : > { %1816 = vmatpush2.bf16.msra.mxu1 %v2832_v15  ;;  %v2858_v15 = vld [vmem:[%s3697_s4 + $0x224] ss:$8 sps:$4 sm:$0xff]  }
 0x10c   : > { %v598_v20 = vpop.f32.mrf.mxu0 }
 0x10d   : > { %v799_v21 = vpop.f32.mrf.mxu1 }
 0x10e   : > { %v600_v22 = vpop.f32.mrf.mxu0  ;;  %v800_v10 = vadd.f32 %v799_v21, %v598_v20  ;;  %v2862_v20 = vld [vmem:[%s3697_s4 + $0x200] ss:$8 sps:$4 sm:$0xff]   ;;  %v2867_v21 = vld [vmem:[%s3697_s4 + $0x2f4] ss:$8 sps:$4 sm:$0xff]  }
 0x10f   : > { %v801_v23 = vpop.f32.mrf.mxu1 }
 0x110   : > { %v602_v24 = vpop.f32.mrf.mxu0  ;;  %v802_v35 = vadd.f32 %v801_v23, %v600_v22  ;;  %v2865_v22 = vld [vmem:[%s3697_s4 + $0x2f0] ss:$8 sps:$4 sm:$0xff]   ;;  %v2870_v23 = vld [vmem:[%s3697_s4 + $0x2e4] ss:$8 sps:$4 sm:$0xff]  }
 0x111   : > { %v803_v25 = vpop.f32.mrf.mxu1  ;;  %v2868_v24 = vld [vmem:[%s3697_s4 + $0x2e0] ss:$8 sps:$4 sm:$0xff]  }
 0x112   : > { %v603_v26 = vpop.f32.mrf.mxu0  ;;  %v2873_v25 = vld [vmem:[%s3697_s4 + $0x2d4] ss:$8 sps:$4 sm:$0xff]  }
 0x113   : > { %v804_v27 = vpop.f32.mrf.mxu1  ;;  %v2871_v26 = vld [vmem:[%s3697_s4 + $0x2d0] ss:$8 sps:$4 sm:$0xff]  }
 0x114   : > { %v2876_v27 = vld [vmem:[%s3697_s4 + $0x2c4] ss:$8 sps:$4 sm:$0xff]  }
 0x14c   : > { %v1051_v34 = vpop.f32.mrf.mxu0 }
 0x14d   : > { %v1058_v36 = vadd.f32 %v1051_v34, %v800_v10  ;;  %v2882_v10 = vld [vmem:[%s3697_s4 + $0x2a4] ss:$8 sps:$4 sm:$0xff]   ;;  %v2885_v34 = vld [vmem:[%s3697_s4 + $0x294] ss:$8 sps:$4 sm:$0xff]  }
 0x14e   : > { %v1053_v38 = vpop.f32.mrf.mxu0  ;;  %v3575_v61 = vpop.f32.mrf.mxu1 }
 0x14f   : > { %v1072_v39 = vadd.f32 %v1065_v33, %v1058_v36  ;;  %v1059_v40 = vadd.f32 %v1053_v38, %v802_v35  ;;  %v2880_v33 = vld [vmem:[%s3697_s4 + $0x2a0] ss:$8 sps:$4 sm:$0xff]   ;;  %v2883_v35 = vld [vmem:[%s3697_s4 + $0x290] ss:$8 sps:$4 sm:$0xff]   ;;  %v2888_v36 = vld [vmem:[%s3697_s4 + $0x284] ss:$8 sps:$4 sm:$0xff]  }
 0x150   : > { %v1055_v41 = vpop.f32.mrf.mxu0  ;;  %v3578_v1 = vpop.f32.mrf.mxu1 }
 0x151   : > { %v1074_v42 = vmax.f32 %v1072_v39, 0.0  ;;  %v1073_v43 = vadd.f32 %v1069_v37, %v1059_v40  ;;  %v2886_v37 = vld [vmem:[%s3697_s4 + $0x280] ss:$8 sps:$4 sm:$0xff]  }
 0x152   : > { %v1056_v44 = vpop.f32.mrf.mxu0  ;;  %v1318_v4 = vpop.f32.mrf.mxu1 }
 0x153   : > { %v1327_v45 = vrot.slane %v1074_v42, 7  ;;  %v1075_v46 = vmax.f32 %v1073_v43, 0.0 }
 0x154   : > { %v1319_v6 = vpop.f32.mrf.mxu1 }
 0x155   : > { %1331 = vst [vmem:[#allocation2 + $0x10] sm:$0xfe] %v1327_v45  ;;  %1333 = vst [vmem:[#allocation2 + $0x18] sm:$0x1] %v1327_v45  ;;  %v1328_v47 = vrot.slane %v1075_v46, 7 }
 0x157   : > { %1332 = vst [vmem:[#allocation2] sm:$0xfe] %v1328_v47  ;;  %1334 = vst [vmem:[#allocation2 + $0x8] sm:$0x1] %v1328_v47 }
 0x15c   : > { %v1335_v49 = vld [vmem:[#allocation2 + $0x10] sm:$0xff]  ;;  %v1337_v50 = vld [vmem:[#allocation2 + $0x18] sm:$0x3] }
 0x15d   : > { %v3572_v51 = vpack.c.bf16 %v1337_v50, %v1335_v49  ;;  %v1339_v57 = vpack.c.bf16 %v1335_v49, %v1335_v49  ;;  %v1108_v49 = vld [vmem:[%s3700_s7] sm:$0x3] }
 0x15e   : > { %v1336_v52 = vld [vmem:[#allocation2] sm:$0xff]  ;;  %v1338_v53 = vld [vmem:[#allocation2 + $0x8] sm:$0x3] }
 0x15f   : > { %v1340_v54 = vpack.c.bf16 %v1336_v52, %v1336_v52  ;;  %v1374_v55 = vpack.c.bf16 %v1338_v53, %v1336_v52  ;;  %v1411_v56 = vshll.u32 %v3572_v51, 16  ;;  %v1409_v0 = vshrl.u32 %v3572_v51, 16  ;;  %v2068_v50 = vld [vmem:[%s3698_s5] sm:$0x3] }
 0x160   : > { %v1861_v38 = vrot.slane %v3572_v51, 1  ;;  %v1113_v51 = vrot.slane %v1108_v49, %v3563_v30  ;;  %v2073_v52 = vrot.slane %v2068_v50, %v3563_v30 }
 0x161   : > { %1817 = vmatprep.mubr.bf16.mxu1 %v1340_v54  ;;  %v1418_v59 = vshll.u32 %v1374_v55, 16  ;;  %v1413_v60 = vrot.slane %v1411_v56, 1  ;;  %v1416_v62 = vshrl.u32 %v1374_v55, 16  ;;  %v1862_v5 = vrot.slane %v1374_v55, 1 }
 0x162   : > { %1818 = vmatmul.mubr.bf16.vlgmr.msra.gmra.mxu1 %v1339_v57  ;;  %v1117_v54 = vrot.slane %v1108_v49, %v3568_v32  ;;  %v2077_v57 = vrot.slane %v2068_v50, %v3568_v32 }
 0x163   : > { %v1420_v63 = vrot.slane %v1418_v59, 1  ;;  %v1414_v48 = vor.u32 %v1413_v60, %v1409_v0  ;;  %v1315_v60 = vadd.f32 %v3575_v61, %v1113_v51 }
 0x165   : > { %v1421_v2 = vor.u32 %v1420_v63, %v1416_v62 }
 0x167   : > { %1616 = vmatprep.mubr.bf16.mxu0 %v1421_v2  ;;  %v1317_v2 = vadd.f32 %v3578_v1, %v1117_v54 }
 0x168   : > { %1617 = vmatmul.mubr.bf16.vlgmr.msra.gmra.mxu0 %v1414_v48 }
 0x169   : > { %2026 = vmatpush1.bf16.msra.mxu0 %v2841_v3  ;;  %2057 = vmatprep.mubr.bf16.mxu0 %v1862_v5 }
 0x16a   : > { %2027 = vmatprep.subr.bf16.mxu0 %v2846_v58 }
 0x16d   : > { %2028 = vmatpush1.bf16.msra.mxu0 %v2844_v7 }
 0x16e   : > { %2029 = vmatprep.subr.bf16.mxu0 %v2849_v8 }
 0x171   : > { %2030 = vmatpush1.bf16.msra.mxu0 %v2847_v9 }
 0x172   : > { %2031 = vmatprep.subr.bf16.mxu0 %v2852_v11 }
 0x175   : > { %2032 = vmatpush1.bf16.msra.mxu0 %v2850_v12 }
 0x176   : > { %2033 = vmatprep.subr.bf16.mxu0 %v2855_v13 }
 0x179   : > { %2034 = vmatpush1.bf16.msra.mxu0 %v2853_v14 }
 0x17a   : > { %2035 = vmatprep.subr.bf16.mxu0 %v2858_v15 }
 0x17d   : > { %2036 = vmatpush1.bf16.msra.mxu0 %v2856_v16 }
 0x17e   : > { %2037 = vmatprep.subr.bf16.mxu0 %v2861_v17 }
 0x181   : > { %2038 = vmatpush1.bf16.msra.mxu0 %v2859_v18 }
 0x182   : > { %2039 = vmatprep.subr.bf16.mxu0 %v2864_v19 }
 0x185   : > { %2040 = vmatpush1.bf16.msra.mxu0 %v2862_v20 }
 0x186   : > { %2041 = vmatprep.subr.bf16.mxu0 %v2867_v21 }
 0x189   : > { %2042 = vmatpush2.bf16.msra.mxu0 %v2865_v22 }
 0x18a   : > { %2043 = vmatprep.subr.bf16.mxu0 %v2870_v23 }
 0x18d   : > { %2044 = vmatpush2.bf16.msra.mxu0 %v2868_v24 }
 0x18e   : > { %2045 = vmatprep.subr.bf16.mxu0 %v2873_v25 }
 0x191   : > { %2046 = vmatpush2.bf16.msra.mxu0 %v2871_v26 }
 0x192   : > { %2047 = vmatprep.subr.bf16.mxu0 %v2876_v27 }
 0x195   : > { %2048 = vmatpush2.bf16.msra.mxu0 %v2874_v28 }
 0x196   : > { %2049 = vmatprep.subr.bf16.mxu0 %v2879_v29 }
 0x199   : > { %2050 = vmatpush2.bf16.msra.mxu0 %v2877_v31 }
 0x19a   : > { %2051 = vmatprep.subr.bf16.mxu0 %v2882_v10 }
 0x19d   : > { %2052 = vmatpush2.bf16.msra.mxu0 %v2880_v33 }
 0x19e   : > { %2053 = vmatprep.subr.bf16.mxu0 %v2885_v34 }
 0x1a1   : > { %2054 = vmatpush2.bf16.msra.mxu0 %v2883_v35 }
 0x1a2   : > { %2055 = vmatprep.subr.bf16.mxu0 %v2888_v36 }
 0x1a5   : > { %2056 = vmatpush2.bf16.msra.mxu0 %v2886_v37 }
 0x1a8   : > { %2058 = vmatmul.mubr.bf16.vlgmr.msra.gmra.mxu0 %v1861_v38 }
 0x222   : > { %v1819_v39 = vpop.f32.mrf.mxu1 }
 0x224   : > { %v1821_v40 = vpop.f32.mrf.mxu1 }
 0x226   : > { %v1823_v41 = vpop.f32.mrf.mxu1 }
 0x228   : > { %v1618_v42 = vpop.f32.mrf.mxu0  ;;  %v1824_v43 = vpop.f32.mrf.mxu1 }
 0x229   : > { %v1820_v44 = vadd.f32 %v1819_v39, %v1618_v42 }
 0x22a   : > { %v1620_v45 = vpop.f32.mrf.mxu0 }
 0x22b   : > { %v1822_v55 = vadd.f32 %v1821_v40, %v1620_v45 }
 0x22c   : > { %v1622_v46 = vpop.f32.mrf.mxu0 }
 0x22e   : > { %v1623_v47 = vpop.f32.mrf.mxu0 }
 0x268   : > { %v2059_v53 = vpop.f32.mrf.mxu0 }
 0x269   : > { %v2066_v56 = vadd.f32 %v2059_v53, %v1820_v44 }
 0x26a   : > { %v2061_v59 = vpop.f32.mrf.mxu0 }
 0x26b   : > { %v2080_v62 = vadd.f32 %v2073_v52, %v2066_v56  ;;  %v2067_v63 = vadd.f32 %v2061_v59, %v1822_v55 }
 0x26c   : > { %v2063_v0 = vpop.f32.mrf.mxu0 }
 0x26d   : > { %v2082_v3 = vadd.f32 %v2080_v62, %v1315_v60  ;;  %v2081_v48 = vadd.f32 %v2077_v57, %v2067_v63 }
 0x26e   : > { %v2064_v58 = vpop.f32.mrf.mxu0 }
 0x26f   : > { %v2083_v30 = vadd.f32 %v2081_v48, %v1317_v2  ;;  %v2084_v4 = vmax.f32 %v2082_v3, 0.0 }
 0x271   : > { %v2085_v5 = vmax.f32 %v2083_v30, 0.0 }
 0x273   : > { %v2537_v32 = vpack.c.bf16 %v2085_v5, %v2084_v4 }
 0x275   : > { %2094 = vst [vmem:[%s325_s11] sm:$0xff] %v2537_v32 }
 0x276 PF: > { %s18_s27 = sadd.s32 1, %s2895_s27  }
 0x277   : > { %p15_p4 = scmp.ge.s32.totalorder %s18_s27, 4  }
 0x279   :  { %17 = sbr.rel (!%p15_p4) target bundleno = 1 (0x1), region = 89 }

// kernel: _lambda_.16
= control target key start
LH: loop header
LB: loop body
LE: loop exit
PB: predicated region body
PF: predicated region fallthrough
CT: control target
= control target key end

     0   :  { %s2499_s18 = smov 0   ;;  %s3142_s0 = inlined_call_operand.vmem [shape: bf16[2,10,256], index: 0, kind: input, shape index: {}]   ;;  %s3143_s1 = inlined_call_operand.vmem [shape: bf16[3,256,256], index: 1, kind: input, shape index: {}]   ;;  %s3144_s2 = inlined_call_operand.vmem [shape: f32[1,256], index: 2, kind: input, shape index: {}]   ;;  %s3145_s3 = inlined_call_operand.vmem [shape: bf16[3,256,256], index: 3, kind: input, shape index: {}]   ;;  %s3146_s4 = inlined_call_operand.vmem [shape: f32[1,256], index: 4, kind: input, shape index: {}]   ;;  %s3147_s5 = inlined_call_operand.vmem [shape: bf16[2,8,256], index: 5, kind: output, shape index: {}]  }
   0x1 LB: > { %s1818_s19 = sadd.s32 4294967295, %s2466_s18   ;;  %p1822_p0 = scmp.ge.s32.totalorder %s2466_s18, 1  ;;  %s2466_s18 = sphi %s2499_s18, %s15_s18  }
   0x2   : > { %p187_p1 = scmp.lt.s32.totalorder %s2466_s18, 3 }
   0x4   : > { %p188_p2 = pnand %p1822_p0, %p187_p1 }
   0x5   : > { %p215_p3 = scmp.lt.s32.totalorder (!%p188_p2), %s1818_s19, 1 }
   0x6   : > { %191 = sbr.rel (%p188_p2) target bundleno = 630 (0x276), region = 40 }
   0xb   : > { %v2166_v0 = vld [vmem:[%s3143_s1 + $0x174] ss:$8 sps:$4 sm:$0xff]   ;;  %v2170_v2 = vld [vmem:[%s3143_s1 + $0x170] ss:$8 sps:$4 sm:$0xff]   ;;  %v2172_v4 = vld [vmem:[%s3143_s1 + $0x164] ss:$8 sps:$4 sm:$0xff]  }
   0xc   : > { %v2168_v1 = vld [vmem:[%s3143_s1 + $0x74] ss:$8 sps:$4 sm:$0xff]   ;;  %476 = vmatprep.subr.bf16.mxu0 %v2166_v0  ;;  %v2171_v3 = vld [vmem:[%s3143_s1 + $0x70] ss:$8 sps:$4 sm:$0xff]   ;;  %v2174_v5 = vld [vmem:[%s3143_s1 + $0x64] ss:$8 sps:$4 sm:$0xff]  }
   0xd   : > { %677 = vmatprep.subr.bf16.mxu1 %v2168_v1  ;;  %477 = vmatpush1.bf16.msra.mxu0 %v2170_v2  ;;  %v2176_v6 = vld [vmem:[%s3143_s1 + $0x160] ss:$8 sps:$4 sm:$0xff]   ;;  %v2178_v8 = vld [vmem:[%s3143_s1 + $0x154] ss:$8 sps:$4 sm:$0xff]   ;;  %v2182_v10 = vld [vmem:[%s3143_s1 + $0x150] ss:$8 sps:$4 sm:$0xff]  }
   0xe   : > { %678 = vmatpush1.bf16.msra.mxu1 %v2171_v3  ;;  %478 = vmatprep.subr.bf16.mxu0 %v2172_v4  ;;  %v2177_v7 = vld [vmem:[%s3143_s1 + $0x60] ss:$8 sps:$4 sm:$0xff]   ;;  %v2180_v9 = vld [vmem:[%s3143_s1 + $0x54] ss:$8 sps:$4 sm:$0xff]   ;;  %v2183_v11 = vld [vmem:[%s3143_s1 + $0x50] ss:$8 sps:$4 sm:$0xff]  }
   0xf   : > { %679 = vmatprep.subr.bf16.mxu1 %v2174_v5  ;;  %v2184_v12 = vld [vmem:[%s3143_s1 + $0x144] ss:$8 sps:$4 sm:$0xff]   ;;  %v2188_v14 = vld [vmem:[%s3143_s1 + $0x140] ss:$8 sps:$4 sm:$0xff]   ;;  %v2190_v16 = vld [vmem:[%s3143_s1 + $0x134] ss:$8 sps:$4 sm:$0xff]  }
  0x10   : > { %v2186_v13 = vld [vmem:[%s3143_s1 + $0x44] ss:$8 sps:$4 sm:$0xff]   ;;  %v2189_v15 = vld [vmem:[%s3143_s1 + $0x40] ss:$8 sps:$4 sm:$0xff]   ;;  %v2192_v17 = vld [vmem:[%s3143_s1 + $0x34] ss:$8 sps:$4 sm:$0xff]  }
  0x11   : > { %479 = vmatpush1.bf16.msra.mxu0 %v2176_v6  ;;  %v2194_v18 = vld [vmem:[%s3143_s1 + $0x130] ss:$8 sps:$4 sm:$0xff]   ;;  %v2196_v20 = vld [vmem:[%s3143_s1 + $0x124] ss:$8 sps:$4 sm:$0xff]   ;;  %v2200_v22 = vld [vmem:[%s3143_s1 + $0x120] ss:$8 sps:$4 sm:$0xff]  }
  0x12   : > { %680 = vmatpush1.bf16.msra.mxu1 %v2177_v7  ;;  %480 = vmatprep.subr.bf16.mxu0 %v2178_v8  ;;  %v2195_v19 = vld [vmem:[%s3143_s1 + $0x30] ss:$8 sps:$4 sm:$0xff]   ;;  %v2198_v21 = vld [vmem:[%s3143_s1 + $0x24] ss:$8 sps:$4 sm:$0xff]   ;;  %v2201_v23 = vld [vmem:[%s3143_s1 + $0x20] ss:$8 sps:$4 sm:$0xff]  }
  0x13   : > { %681 = vmatprep.subr.bf16.mxu1 %v2180_v9  ;;  %v2202_v24 = vld [vmem:[%s3143_s1 + $0x114] ss:$8 sps:$4 sm:$0xff]   ;;  %v2206_v26 = vld [vmem:[%s3143_s1 + $0x110] ss:$8 sps:$4 sm:$0xff]   ;;  %v2208_v28 = vld [vmem:[%s3143_s1 + $0x104] ss:$8 sps:$4 sm:$0xff]  }
  0x14   : > { %v2204_v25 = vld [vmem:[%s3143_s1 + $0x14] ss:$8 sps:$4 sm:$0xff]   ;;  %v2207_v27 = vld [vmem:[%s3143_s1 + $0x10] ss:$8 sps:$4 sm:$0xff]   ;;  %v2210_v29 = vld [vmem:[%s3143_s1 + $0x4] ss:$8 sps:$4 sm:$0xff]  }
  0x15   : > { %481 = vmatpush1.bf16.msra.mxu0 %v2182_v10  ;;  %v2212_v30 = vld [vmem:[%s3143_s1 + $0x100] ss:$8 sps:$4 sm:$0xff]   ;;  %v2214_v32 = vld [vmem:[%s3143_s1 + $0x1f4] ss:$8 sps:$4 sm:$0xff]   ;;  %v2218_v34 = vld [vmem:[%s3143_s1 + $0x1f0] ss:$8 sps:$4 sm:$0xff]  }
  0x16   : > { %682 = vmatpush1.bf16.msra.mxu1 %v2183_v11  ;;  %482 = vmatprep.subr.bf16.mxu0 %v2184_v12  ;;  %v2213_v31 = vld [vmem:[%s3143_s1] ss:$8 sps:$4 sm:$0xff]   ;;  %v2216_v33 = vld [vmem:[%s3143_s1 + $0xf4] ss:$8 sps:$4 sm:$0xff]   ;;  %v2219_v35 = vld [vmem:[%s3143_s1 + $0xf0] ss:$8 sps:$4 sm:$0xff]  }
  0x17   : > { %683 = vmatprep.subr.bf16.mxu1 %v2186_v13  ;;  %v2220_v36 = vld [vmem:[%s3143_s1 + $0x1e4] ss:$8 sps:$4 sm:$0xff]   ;;  %s3149_s19 = smov (!%p215_p3, %s1818_s19), 1  ;;  %v2224_v38 = vld [vmem:[%s3143_s1 + $0x1e0] ss:$8 sps:$4 sm:$0xff]   ;;  %vm1741_vm0 = vcmask 1046528  }
  0x18   : > { %v2222_v37 = vld [vmem:[%s3143_s1 + $0xe4] ss:$8 sps:$4 sm:$0xff]   ;;  %v2225_v39 = vld [vmem:[%s3143_s1 + $0xe0] ss:$8 sps:$4 sm:$0xff]   ;;  %v2226_v40 = vld [vmem:[%s3143_s1 + $0x1d4] ss:$8 sps:$4 sm:$0xff]  }
  0x19   : > { %483 = vmatpush1.bf16.msra.mxu0 %v2188_v14  ;;  %s2154_s8 = sshll.u32 %s3149_s19, 4  ;;  %v2228_v41 = vld [vmem:[%s3143_s1 + $0xd4] ss:$8 sps:$4 sm:$0xff]   ;;  %v2230_v42 = vld [vmem:[%s3143_s1 + $0x1d0] ss:$8 sps:$4 sm:$0xff]  }
  0x1a   : > { %684 = vmatpush1.bf16.msra.mxu1 %v2189_v15  ;;  %484 = vmatprep.subr.bf16.mxu0 %v2190_v16  ;;  %v2231_v43 = vld [vmem:[%s3143_s1 + $0xd0] ss:$8 sps:$4 sm:$0xff]   ;;  %s2649_s17 = scalar_lea.vmem %s3142_s0, %s2154_s8  ;;  %v2232_v44 = vld [vmem:[%s3143_s1 + $0x1c4] ss:$8 sps:$4 sm:$0xff]   ;;  %v2236_v49 = vld [vmem:[%s3143_s1 + $0x1c0] ss:$8 sps:$4 sm:$0xff]  }
  0x1b   : > { %685 = vmatprep.subr.bf16.mxu1 %v2192_v17  ;;  %v2234_v45 = vld [vmem:[%s3143_s1 + $0xc4] ss:$8 sps:$4 sm:$0xff]   ;;  %v2237_v50 = vld [vmem:[%s3143_s1 + $0xc0] ss:$8 sps:$4 sm:$0xff]   ;;  %v2238_v52 = vld [vmem:[%s3143_s1 + $0x1b4] ss:$8 sps:$4 sm:$0xff]  }
  0x1c   : > { %v2658_v46 = vld [vmem:[%s2649_s17] sm:$0xff]  ;;  %v226_v47 = vld [vmem:[%s2649_s17 + $0x8] sm:$0x11]  ;;  %v2240_v53 = vld [vmem:[%s3143_s1 + $0xb4] ss:$8 sps:$4 sm:$0xff]  }
  0x1d   : > { %485 = vmatpush1.bf16.msra.mxu0 %v2194_v18  ;;  %v1828_v48 = vcombine.high %v2658_v46, %v2658_v46  ;;  %v1830_v51 = vcombine.high %v2658_v46, %v226_v47  ;;  %v2242_v56 = vld [vmem:[%s3143_s1 + $0x1b0] ss:$8 sps:$4 sm:$0xff]   ;;  %v2244_v59 = vld [vmem:[%s3143_s1 + $0x1a4] ss:$8 sps:$4 sm:$0xff]   ;;  %v2248_v62 = vld [vmem:[%s3143_s1 + $0x1a0] ss:$8 sps:$4 sm:$0xff]   ;;  %v2692_v63 = vcombine.low %v2658_v46, %v226_v47  ;;  %v1827_v14 = vcombine.low %v2658_v46, %v2658_v46 }
  0x1e   : > { %686 = vmatpush1.bf16.msra.mxu1 %v2195_v19  ;;  %486 = vmatprep.subr.bf16.mxu0 %v2196_v20  ;;  %v2243_v57 = vld [vmem:[%s3143_s1 + $0xb0] ss:$8 sps:$4 sm:$0xff]   ;;  %v2246_v60 = vld [vmem:[%s3143_s1 + $0xa4] ss:$8 sps:$4 sm:$0xff]   ;;  %v2249_v0 = vld [vmem:[%s3143_s1 + $0xa0] ss:$8 sps:$4 sm:$0xff]  }
  0x1f   : > { %687 = vmatprep.subr.bf16.mxu1 %v2198_v21  ;;  %v308_v54 = vshrl.u32 %v1830_v51, 16  ;;  %v310_v55 = vshll.u32 %v1830_v51, 16  ;;  %709 = vmatprep.mubr.bf16.mxu1 %v1828_v48  ;;  %v2250_v1 = vld [vmem:[%s3143_s1 + $0x194] ss:$8 sps:$4 sm:$0xff]   ;;  %v2254_v3 = vld [vmem:[%s3143_s1 + $0x190] ss:$8 sps:$4 sm:$0xff]  }
  0x20   : > { %v2252_v2 = vld [vmem:[%s3143_s1 + $0x94] ss:$8 sps:$4 sm:$0xff]   ;;  %v303_v4 = vshll.u32 %v2692_v63, 16  ;;  %v2255_v5 = vld [vmem:[%s3143_s1 + $0x90] ss:$8 sps:$4 sm:$0xff]   ;;  %v301_v8 = vshrl.u32 %v2692_v63, 16 }
  0x21   : > { %487 = vmatpush1.bf16.msra.mxu0 %v2200_v22  ;;  %v312_v58 = vrot.slane %v310_v55, 1  ;;  %v2256_v6 = vld [vmem:[%s3143_s1 + $0x184] ss:$8 sps:$4 sm:$0xff]   ;;  %v2260_v10 = vld [vmem:[%s3143_s1 + $0x180] ss:$8 sps:$4 sm:$0xff]   ;;  %v754_v17 = vrot.slane %v1830_v51, 1 }
  0x22   : > { %688 = vmatpush1.bf16.msra.mxu1 %v2201_v23  ;;  %488 = vmatprep.subr.bf16.mxu0 %v2202_v24  ;;  %v2258_v7 = vld [vmem:[%s3143_s1 + $0x84] ss:$8 sps:$4 sm:$0xff]   ;;  %v305_v9 = vrot.slane %v303_v4, 1  ;;  %v2261_v11 = vld [vmem:[%s3143_s1 + $0x80] ss:$8 sps:$4 sm:$0xff]   ;;  %v753_v47 = vrot.slane %v2692_v63, 1 }
  0x23   : > { %689 = vmatprep.subr.bf16.mxu1 %v2204_v25  ;;  %v313_v61 = vor.u32 %v312_v58, %v308_v54  ;;  %v2268_v12 = vld [vmem:[%s3143_s1 + $0x274] ss:$8 sps:$4 sm:$0xff]   ;;  %v2266_v15 = vld [vmem:[%s3143_s1 + $0x270] ss:$8 sps:$4 sm:$0xff]   ;;  %v2271_v16 = vld [vmem:[%s3143_s1 + $0x264] ss:$8 sps:$4 sm:$0xff]  }
  0x24   : > { %v306_v13 = vor.u32 %v305_v9, %v301_v8  ;;  %v2269_v18 = vld [vmem:[%s3143_s1 + $0x260] ss:$8 sps:$4 sm:$0xff]   ;;  %v2274_v19 = vld [vmem:[%s3143_s1 + $0x254] ss:$8 sps:$4 sm:$0xff]   ;;  %v2272_v20 = vld [vmem:[%s3143_s1 + $0x250] ss:$8 sps:$4 sm:$0xff]  }
  0x25   : > { %489 = vmatpush1.bf16.msra.mxu0 %v2206_v26  ;;  %508 = vmatprep.mubr.bf16.mxu0 %v313_v61  ;;  %v2277_v21 = vld [vmem:[%s3143_s1 + $0x244] ss:$8 sps:$4 sm:$0xff]   ;;  %v2275_v22 = vld [vmem:[%s3143_s1 + $0x240] ss:$8 sps:$4 sm:$0xff]   ;;  %v2280_v23 = vld [vmem:[%s3143_s1 + $0x234] ss:$8 sps:$4 sm:$0xff]  }
  0x26   : > { %690 = vmatpush1.bf16.msra.mxu1 %v2207_v27  ;;  %490 = vmatprep.subr.bf16.mxu0 %v2208_v28  ;;  %v2278_v24 = vld [vmem:[%s3143_s1 + $0x230] ss:$8 sps:$4 sm:$0xff]   ;;  %v2283_v25 = vld [vmem:[%s3143_s1 + $0x224] ss:$8 sps:$4 sm:$0xff]   ;;  %v2281_v26 = vld [vmem:[%s3143_s1 + $0x220] ss:$8 sps:$4 sm:$0xff]  }
  0x27   : > { %691 = vmatprep.subr.bf16.mxu1 %v2210_v29  ;;  %v2286_v27 = vld [vmem:[%s3143_s1 + $0x214] ss:$8 sps:$4 sm:$0xff]   ;;  %v2284_v28 = vld [vmem:[%s3143_s1 + $0x210] ss:$8 sps:$4 sm:$0xff]   ;;  %v2289_v29 = vld [vmem:[%s3143_s1 + $0x204] ss:$8 sps:$4 sm:$0xff]  }
  0x28   : > { %v2311_v46 = vld [vmem:[%s3143_s1 + $0x280] ss:$8 sps:$4 sm:$0xff]   ;;  %v2314_v48 = vld [vmem:[%s3145_s3 + $0x70] ss:$8 sps:$4 sm:$0xff]   ;;  %v2328_v54 = vld [vmem:[%s3145_s3 + $0x164] ss:$8 sps:$4 sm:$0xff]  }
  0x29   : > { %491 = vmatpush1.bf16.msra.mxu0 %v2212_v30  ;;  %v2287_v30 = vld [vmem:[%s3143_s1 + $0x200] ss:$8 sps:$4 sm:$0xff]   ;;  %v2320_v51 = vld [vmem:[%s3145_s3 + $0x170] ss:$8 sps:$4 sm:$0xff]   ;;  %v2325_v55 = vld [vmem:[%s3145_s3 + $0x54] ss:$8 sps:$4 sm:$0xff]  }
  0x2a   : > { %692 = vmatpush1.bf16.msra.mxu1 %v2213_v31  ;;  %492 = vmatprep.subr.bf16.mxu0 %v2214_v32  ;;  %v2292_v31 = vld [vmem:[%s3143_s1 + $0x2f4] ss:$8 sps:$4 sm:$0xff]   ;;  %v2290_v32 = vld [vmem:[%s3143_s1 + $0x2f0] ss:$8 sps:$4 sm:$0xff]   ;;  %v2340_v61 = vld [vmem:[%s3145_s3 + $0x144] ss:$8 sps:$4 sm:$0xff]  }
  0x2b   : > { %693 = vmatprep.subr.bf16.mxu1 %v2216_v33  ;;  %v2295_v33 = vld [vmem:[%s3143_s1 + $0x2e4] ss:$8 sps:$4 sm:$0xff]   ;;  %v2323_v58 = vld [vmem:[%s3145_s3 + $0x50] ss:$8 sps:$4 sm:$0xff]   ;;  %v2337_v63 = vld [vmem:[%s3145_s3 + $0x34] ss:$8 sps:$4 sm:$0xff]  }
  0x2c   : > { %v2344_v4 = vld [vmem:[%s3145_s3 + $0x130] ss:$8 sps:$4 sm:$0xff]   ;;  %v2350_v8 = vld [vmem:[%s3145_s3 + $0x120] ss:$8 sps:$4 sm:$0xff]   ;;  %v2358_v9 = vld [vmem:[%s3145_s3 + $0x114] ss:$8 sps:$4 sm:$0xff]  }
  0x2d   : > { %493 = vmatpush2.bf16.msra.mxu0 %v2218_v34  ;;  %v2293_v34 = vld [vmem:[%s3143_s1 + $0x2e0] ss:$8 sps:$4 sm:$0xff]  }
  0x2e   : > { %694 = vmatpush2.bf16.msra.mxu1 %v2219_v35  ;;  %494 = vmatprep.subr.bf16.mxu0 %v2220_v36  ;;  %v2298_v35 = vld [vmem:[%s3143_s1 + $0x2d4] ss:$8 sps:$4 sm:$0xff]   ;;  %v2296_v36 = vld [vmem:[%s3143_s1 + $0x2d0] ss:$8 sps:$4 sm:$0xff]  }
  0x2f   : > { %695 = vmatprep.subr.bf16.mxu1 %v2222_v37  ;;  %v2301_v37 = vld [vmem:[%s3143_s1 + $0x2c4] ss:$8 sps:$4 sm:$0xff]  }
  0x31   : > { %495 = vmatpush2.bf16.msra.mxu0 %v2224_v38  ;;  %v2299_v38 = vld [vmem:[%s3143_s1 + $0x2c0] ss:$8 sps:$4 sm:$0xff]  }
  0x32   : > { %696 = vmatpush2.bf16.msra.mxu1 %v2225_v39  ;;  %496 = vmatprep.subr.bf16.mxu0 %v2226_v40  ;;  %v2304_v39 = vld [vmem:[%s3143_s1 + $0x2b4] ss:$8 sps:$4 sm:$0xff]   ;;  %v2302_v40 = vld [vmem:[%s3143_s1 + $0x2b0] ss:$8 sps:$4 sm:$0xff]  }
  0x33   : > { %697 = vmatprep.subr.bf16.mxu1 %v2228_v41  ;;  %v2307_v41 = vld [vmem:[%s3143_s1 + $0x2a4] ss:$8 sps:$4 sm:$0xff]  }
  0x35   : > { %497 = vmatpush2.bf16.msra.mxu0 %v2230_v42  ;;  %v2305_v42 = vld [vmem:[%s3143_s1 + $0x2a0] ss:$8 sps:$4 sm:$0xff]  }
  0x36   : > { %698 = vmatpush2.bf16.msra.mxu1 %v2231_v43  ;;  %498 = vmatprep.subr.bf16.mxu0 %v2232_v44  ;;  %v2310_v43 = vld [vmem:[%s3143_s1 + $0x294] ss:$8 sps:$4 sm:$0xff]   ;;  %v2308_v44 = vld [vmem:[%s3143_s1 + $0x290] ss:$8 sps:$4 sm:$0xff]  }
  0x37   : > { %699 = vmatprep.subr.bf16.mxu1 %v2234_v45  ;;  %v2313_v45 = vld [vmem:[%s3143_s1 + $0x284] ss:$8 sps:$4 sm:$0xff]  }
  0x39   : > { %499 = vmatpush2.bf16.msra.mxu0 %v2236_v49  ;;  %v2316_v49 = vld [vmem:[%s3145_s3 + $0x74] ss:$8 sps:$4 sm:$0xff]  }
  0x3a   : > { %700 = vmatpush2.bf16.msra.mxu1 %v2237_v50  ;;  %500 = vmatprep.subr.bf16.mxu0 %v2238_v52  ;;  %v2319_v50 = vld [vmem:[%s3145_s3 + $0x64] ss:$8 sps:$4 sm:$0xff]   ;;  %v2322_v52 = vld [vmem:[%s3145_s3 + $0x174] ss:$8 sps:$4 sm:$0xff]  }
  0x3b   : > { %701 = vmatprep.subr.bf16.mxu1 %v2240_v53  ;;  %v2317_v53 = vld [vmem:[%s3145_s3 + $0x60] ss:$8 sps:$4 sm:$0xff]  }
  0x3d   : > { %501 = vmatpush2.bf16.msra.mxu0 %v2242_v56  ;;  %v2326_v56 = vld [vmem:[%s3145_s3 + $0x160] ss:$8 sps:$4 sm:$0xff]  }
  0x3e   : > { %702 = vmatpush2.bf16.msra.mxu1 %v2243_v57  ;;  %502 = vmatprep.subr.bf16.mxu0 %v2244_v59  ;;  %v2334_v57 = vld [vmem:[%s3145_s3 + $0x154] ss:$8 sps:$4 sm:$0xff]   ;;  %v2331_v59 = vld [vmem:[%s3145_s3 + $0x44] ss:$8 sps:$4 sm:$0xff]  }
  0x3f   : > { %703 = vmatprep.subr.bf16.mxu1 %v2246_v60  ;;  %v2332_v60 = vld [vmem:[%s3145_s3 + $0x150] ss:$8 sps:$4 sm:$0xff]  }
  0x41   : > { %503 = vmatpush2.bf16.msra.mxu0 %v2248_v62  ;;  %v2329_v62 = vld [vmem:[%s3145_s3 + $0x40] ss:$8 sps:$4 sm:$0xff]  }
  0x42   : > { %704 = vmatpush2.bf16.msra.mxu1 %v2249_v0  ;;  %504 = vmatprep.subr.bf16.mxu0 %v2250_v1  ;;  %v2338_v0 = vld [vmem:[%s3145_s3 + $0x140] ss:$8 sps:$4 sm:$0xff]   ;;  %v2346_v1 = vld [vmem:[%s3145_s3 + $0x134] ss:$8 sps:$4 sm:$0xff]  }
  0x43   : > { %705 = vmatprep.subr.bf16.mxu1 %v2252_v2  ;;  %v2335_v2 = vld [vmem:[%s3145_s3 + $0x30] ss:$8 sps:$4 sm:$0xff]  }
  0x45   : > { %505 = vmatpush2.bf16.msra.mxu0 %v2254_v3  ;;  %v2343_v3 = vld [vmem:[%s3145_s3 + $0x24] ss:$8 sps:$4 sm:$0xff]  }
  0x46   : > { %706 = vmatpush2.bf16.msra.mxu1 %v2255_v5  ;;  %506 = vmatprep.subr.bf16.mxu0 %v2256_v6  ;;  %v2352_v5 = vld [vmem:[%s3145_s3 + $0x124] ss:$8 sps:$4 sm:$0xff]   ;;  %v2341_v6 = vld [vmem:[%s3145_s3 + $0x20] ss:$8 sps:$4 sm:$0xff]  }
  0x47   : > { %707 = vmatprep.subr.bf16.mxu1 %v2258_v7  ;;  %v2349_v7 = vld [vmem:[%s3145_s3 + $0x14] ss:$8 sps:$4 sm:$0xff]  }
  0x49   : > { %507 = vmatpush2.bf16.msra.mxu0 %v2260_v10  ;;  %v2347_v10 = vld [vmem:[%s3145_s3 + $0x10] ss:$8 sps:$4 sm:$0xff]  }
  0x4a   : > { %708 = vmatpush2.bf16.msra.mxu1 %v2261_v11  ;;  %917 = vmatprep.subr.bf16.mxu0 %v2268_v12  ;;  %v2355_v11 = vld [vmem:[%s3145_s3 + $0x4] ss:$8 sps:$4 sm:$0xff]   ;;  %v2356_v12 = vld [vmem:[%s3145_s3 + $0x110] ss:$8 sps:$4 sm:$0xff]  }
  0x4b   : > { %1239 = vmatprep.subr.bf16.mxu1 %v2322_v52 }
  0x4c   : > { %509 = vmatmul.mubr.bf16.vlgmr.msra.gmra.mxu0 %v306_v13  ;;  %v2364_v13 = vld [vmem:[%s3145_s3 + $0x104] ss:$8 sps:$4 sm:$0xff]  }
  0x4d   : > { %710 = vmatmul.mubr.bf16.vlgmr.msra.gmra.mxu1 %v1827_v14  ;;  %918 = vmatpush1.bf16.msra.mxu0 %v2266_v15  ;;  %v2353_v14 = vld [vmem:[%s3145_s3] ss:$8 sps:$4 sm:$0xff]   ;;  %v2361_v15 = vld [vmem:[%s3145_s3 + $0xf4] ss:$8 sps:$4 sm:$0xff]  }
  0x4e   : > { %949 = vmatprep.mubr.bf16.mxu0 %v754_v17  ;;  %919 = vmatprep.subr.bf16.mxu0 %v2271_v16  ;;  %v2362_v16 = vld [vmem:[%s3145_s3 + $0x100] ss:$8 sps:$4 sm:$0xff]   ;;  %v2370_v17 = vld [vmem:[%s3145_s3 + $0x1f4] ss:$8 sps:$4 sm:$0xff]  }
  0x4f   : > { %1240 = vmatpush1.bf16.msra.mxu1 %v2320_v51 }
  0x50   : > { %1241 = vmatprep.subr.bf16.mxu1 %v2328_v54 }
  0x51   : > { %920 = vmatpush1.bf16.msra.mxu0 %v2269_v18  ;;  %v2359_v18 = vld [vmem:[%s3145_s3 + $0xf0] ss:$8 sps:$4 sm:$0xff]  }
  0x52   : > { %921 = vmatprep.subr.bf16.mxu0 %v2274_v19  ;;  %v2367_v19 = vld [vmem:[%s3145_s3 + $0xe4] ss:$8 sps:$4 sm:$0xff]  }
  0x53   : > { %1242 = vmatpush1.bf16.msra.mxu1 %v2326_v56 }
  0x54   : > { %1243 = vmatprep.subr.bf16.mxu1 %v2334_v57 }
  0x55   : > { %922 = vmatpush1.bf16.msra.mxu0 %v2272_v20  ;;  %v2368_v20 = vld [vmem:[%s3145_s3 + $0x1f0] ss:$8 sps:$4 sm:$0xff]  }
  0x56   : > { %923 = vmatprep.subr.bf16.mxu0 %v2277_v21  ;;  %v2376_v21 = vld [vmem:[%s3145_s3 + $0x1e4] ss:$8 sps:$4 sm:$0xff]  }
  0x57   : > { %1244 = vmatpush1.bf16.msra.mxu1 %v2332_v60 }
  0x58   : > { %1245 = vmatprep.subr.bf16.mxu1 %v2340_v61  ;;  %v960_v61 = vld [vmem:[%s3144_s2] sm:$0x3] }
  0x59   : > { %924 = vmatpush1.bf16.msra.mxu0 %v2275_v22  ;;  %v2365_v22 = vld [vmem:[%s3145_s3 + $0xe0] ss:$8 sps:$4 sm:$0xff]  }
  0x5a   : > { %925 = vmatprep.subr.bf16.mxu0 %v2280_v23  ;;  %v2373_v23 = vld [vmem:[%s3145_s3 + $0xd4] ss:$8 sps:$4 sm:$0xff]  }
  0x5b   : > { %1246 = vmatpush1.bf16.msra.mxu1 %v2338_v0 }
  0x5c   : > { %1247 = vmatprep.subr.bf16.mxu1 %v2346_v1 }
  0x5d   : > { %926 = vmatpush1.bf16.msra.mxu0 %v2278_v24  ;;  %v2374_v24 = vld [vmem:[%s3145_s3 + $0x1e0] ss:$8 sps:$4 sm:$0xff]  }
  0x5e   : > { %927 = vmatprep.subr.bf16.mxu0 %v2283_v25  ;;  %v2371_v25 = vld [vmem:[%s3145_s3 + $0xd0] ss:$8 sps:$4 sm:$0xff]  }
  0x5f   : > { %1248 = vmatpush1.bf16.msra.mxu1 %v2344_v4 }
  0x60   : > { %1249 = vmatprep.subr.bf16.mxu1 %v2352_v5 }
  0x61   : > { %928 = vmatpush1.bf16.msra.mxu0 %v2281_v26  ;;  %v2379_v26 = vld [vmem:[%s3145_s3 + $0xc4] ss:$8 sps:$4 sm:$0xff]  }
  0x62   : > { %929 = vmatprep.subr.bf16.mxu0 %v2286_v27  ;;  %v2377_v27 = vld [vmem:[%s3145_s3 + $0xc0] ss:$8 sps:$4 sm:$0xff]  }
  0x63   : > { %1250 = vmatpush1.bf16.msra.mxu1 %v2350_v8 }
  0x64   : > { %1251 = vmatprep.subr.bf16.mxu1 %v2358_v9 }
  0x65   : > { %930 = vmatpush1.bf16.msra.mxu0 %v2284_v28  ;;  %v2382_v28 = vld [vmem:[%s3145_s3 + $0x1d4] ss:$8 sps:$4 sm:$0xff]  }
  0x66   : > { %931 = vmatprep.subr.bf16.mxu0 %v2289_v29  ;;  %v2380_v29 = vld [vmem:[%s3145_s3 + $0x1d0] ss:$8 sps:$4 sm:$0xff]  }
  0x67   : > { %1252 = vmatpush1.bf16.msra.mxu1 %v2356_v12 }
  0x68   : > { %1253 = vmatprep.subr.bf16.mxu1 %v2364_v13 }
  0x69   : > { %932 = vmatpush1.bf16.msra.mxu0 %v2287_v30  ;;  %v2385_v30 = vld [vmem:[%s3145_s3 + $0xb4] ss:$8 sps:$4 sm:$0xff]  }
  0x6a   : > { %933 = vmatprep.subr.bf16.mxu0 %v2292_v31  ;;  %v2383_v31 = vld [vmem:[%s3145_s3 + $0xb0] ss:$8 sps:$4 sm:$0xff]  }
  0x6b   : > { %1254 = vmatpush1.bf16.msra.mxu1 %v2362_v16 }
  0x6c   : > { %1255 = vmatprep.subr.bf16.mxu1 %v2370_v17 }
  0x6d   : > { %934 = vmatpush2.bf16.msra.mxu0 %v2290_v32  ;;  %v2388_v32 = vld [vmem:[%s3145_s3 + $0x1c4] ss:$8 sps:$4 sm:$0xff]  }
  0x6e   : > { %935 = vmatprep.subr.bf16.mxu0 %v2295_v33  ;;  %v2468_v33 = vmov 0.0  }
  0x6f   : > { %1256 = vmatpush2.bf16.msra.mxu1 %v2368_v20  ;;  %976 = vst [vmem:[#allocation2 + $0x10] sm:$0xff] %v2468_v33  ;;  %978 = vst [vmem:[#allocation2 + $0x18] sm:$0x3] %v2468_v33 }
  0x70   : > { %1257 = vmatprep.subr.bf16.mxu1 %v2376_v21  ;;  %977 = vst [vmem:[#allocation2] sm:$0xff] %v2468_v33  ;;  %979 = vst [vmem:[#allocation2 + $0x8] sm:$0x3] %v2468_v33 }
  0x71   : > { %936 = vmatpush2.bf16.msra.mxu0 %v2293_v34  ;;  %v2386_v34 = vld [vmem:[%s3145_s3 + $0x1c0] ss:$8 sps:$4 sm:$0xff]  }
  0x72   : > { %937 = vmatprep.subr.bf16.mxu0 %v2298_v35  ;;  %v2391_v35 = vld [vmem:[%s3145_s3 + $0xa4] ss:$8 sps:$4 sm:$0xff]  }
  0x73   : > { %1258 = vmatpush2.bf16.msra.mxu1 %v2374_v24 }
  0x74   : > { %1259 = vmatprep.subr.bf16.mxu1 %v2382_v28 }
  0x75   : > { %938 = vmatpush2.bf16.msra.mxu0 %v2296_v36  ;;  %v2389_v36 = vld [vmem:[%s3145_s3 + $0xa0] ss:$8 sps:$4 sm:$0xff]  }
  0x76   : > { %939 = vmatprep.subr.bf16.mxu0 %v2301_v37  ;;  %v2394_v37 = vld [vmem:[%s3145_s3 + $0x1b4] ss:$8 sps:$4 sm:$0xff]  }
  0x77   : > { %1260 = vmatpush2.bf16.msra.mxu1 %v2380_v29 }
  0x78   : > { %1261 = vmatprep.subr.bf16.mxu1 %v2388_v32  ;;  %v2415_v32 = vld [vmem:[%s3145_s3 + $0x264] ss:$8 sps:$4 sm:$0xff]  }
  0x79   : > { %940 = vmatpush2.bf16.msra.mxu0 %v2299_v38  ;;  %v2392_v38 = vld [vmem:[%s3145_s3 + $0x1b0] ss:$8 sps:$4 sm:$0xff]  }
  0x7a   : > { %941 = vmatprep.subr.bf16.mxu0 %v2304_v39  ;;  %v2395_v39 = vld [vmem:[%s3145_s3 + $0x90] ss:$8 sps:$4 sm:$0xff]  }
  0x7b   : > { %1262 = vmatpush2.bf16.msra.mxu1 %v2386_v34  ;;  %v2413_v34 = vld [vmem:[%s3145_s3 + $0x260] ss:$8 sps:$4 sm:$0xff]  }
  0x7c   : > { %1263 = vmatprep.subr.bf16.mxu1 %v2394_v37  ;;  %v2421_v37 = vld [vmem:[%s3145_s3 + $0x244] ss:$8 sps:$4 sm:$0xff]  }
  0x7d   : > { %942 = vmatpush2.bf16.msra.mxu0 %v2302_v40  ;;  %v2397_v40 = vld [vmem:[%s3145_s3 + $0x94] ss:$8 sps:$4 sm:$0xff]  }
  0x7e   : > { %943 = vmatprep.subr.bf16.mxu0 %v2307_v41  ;;  %v2398_v41 = vld [vmem:[%s3145_s3 + $0x1a0] ss:$8 sps:$4 sm:$0xff]  }
  0x7f   : > { %1264 = vmatpush2.bf16.msra.mxu1 %v2392_v38  ;;  %v2419_v38 = vld [vmem:[%s3145_s3 + $0x240] ss:$8 sps:$4 sm:$0xff]  }
  0x81   : > { %944 = vmatpush2.bf16.msra.mxu0 %v2305_v42  ;;  %v2400_v42 = vld [vmem:[%s3145_s3 + $0x1a4] ss:$8 sps:$4 sm:$0xff]  }
  0x82   : > { %945 = vmatprep.subr.bf16.mxu0 %v2310_v43  ;;  %v2403_v43 = vld [vmem:[%s3145_s3 + $0x84] ss:$8 sps:$4 sm:$0xff]   ;;  %1265 = vmatprep.subr.bf16.mxu1 %v2400_v42  ;;  %v2425_v42 = vld [vmem:[%s3145_s3 + $0x220] ss:$8 sps:$4 sm:$0xff]  }
  0x83   : > { %1266 = vmatpush2.bf16.msra.mxu1 %v2398_v41  ;;  %v2427_v41 = vld [vmem:[%s3145_s3 + $0x224] ss:$8 sps:$4 sm:$0xff]  }
  0x85   : > { %946 = vmatpush2.bf16.msra.mxu0 %v2308_v44  ;;  %v2406_v44 = vld [vmem:[%s3145_s3 + $0x194] ss:$8 sps:$4 sm:$0xff]  }
  0x86   : > { %947 = vmatprep.subr.bf16.mxu0 %v2313_v45  ;;  %v2401_v45 = vld [vmem:[%s3145_s3 + $0x80] ss:$8 sps:$4 sm:$0xff]   ;;  %1267 = vmatprep.subr.bf16.mxu1 %v2406_v44  ;;  %v2428_v44 = vld [vmem:[%s3145_s3 + $0x210] ss:$8 sps:$4 sm:$0xff]  }
  0x89   : > { %948 = vmatpush2.bf16.msra.mxu0 %v2311_v46  ;;  %v2404_v46 = vld [vmem:[%s3145_s3 + $0x190] ss:$8 sps:$4 sm:$0xff]  }
  0x8a   : > { %1440 = vmatprep.subr.bf16.mxu0 %v2316_v49  ;;  %1268 = vmatpush2.bf16.msra.mxu1 %v2404_v46  ;;  %v2412_v49 = vld [vmem:[%s3145_s3 + $0x274] ss:$8 sps:$4 sm:$0xff]   ;;  %v2431_v46 = vld [vmem:[%s3145_s3 + $0x200] ss:$8 sps:$4 sm:$0xff]  }
  0x8c   : > { %950 = vmatmul.mubr.bf16.vlgmr.msra.gmra.mxu0 %v753_v47  ;;  %v2409_v47 = vld [vmem:[%s3145_s3 + $0x184] ss:$8 sps:$4 sm:$0xff]  }
  0x8d   : > { %1441 = vmatpush1.bf16.msra.mxu0 %v2314_v48  ;;  %v2407_v48 = vld [vmem:[%s3145_s3 + $0x180] ss:$8 sps:$4 sm:$0xff]   ;;  %1269 = vmatprep.subr.bf16.mxu1 %v2409_v47  ;;  %v2436_v47 = vld [vmem:[%s3145_s3 + $0x2f4] ss:$8 sps:$4 sm:$0xff]  }
  0x8e   : > { %1442 = vmatprep.subr.bf16.mxu0 %v2319_v50  ;;  %1270 = vmatpush2.bf16.msra.mxu1 %v2407_v48  ;;  %v2434_v48 = vld [vmem:[%s3145_s3 + $0x2f0] ss:$8 sps:$4 sm:$0xff]  }
  0x8f   : > { %1680 = vmatprep.subr.bf16.mxu1 %v2412_v49  ;;  %v2439_v49 = vld [vmem:[%s3145_s3 + $0x2e4] ss:$8 sps:$4 sm:$0xff]  }
  0x91   : > { %1443 = vmatpush1.bf16.msra.mxu0 %v2317_v53 }
  0x92   : > { %1444 = vmatprep.subr.bf16.mxu0 %v2325_v55 }
  0x95   : > { %1445 = vmatpush1.bf16.msra.mxu0 %v2323_v58  ;;  %v962_v58 = vlaneseq }
  0x96   : > { %1446 = vmatprep.subr.bf16.mxu0 %v2331_v59 }
  0x97   : > { %v3017_v59 = vshrl.u32 %v962_v58, 7  ;;  %v2449_v58 = vld [vmem:[%s3145_s3 + $0x2a0] ss:$8 sps:$4 sm:$0xff]  }
  0x99   : > { %1447 = vmatpush1.bf16.msra.mxu0 %v2329_v62  ;;  %v964_v60 = vsub.s32 0, %v3017_v59  ;;  %v968_v62 = vsub.s32 1, %v3017_v59 }
  0x9a   : > { %1448 = vmatprep.subr.bf16.mxu0 %v2337_v63 }
  0x9b   : > { %v965_v0 = vrot.slane %v960_v61, %v964_v60  ;;  %v969_v4 = vrot.slane %v960_v61, %v968_v62  ;;  %v2454_v61 = vld [vmem:[%s3145_s3 + $0x294] ss:$8 sps:$4 sm:$0xff]  }
  0x9d   : > { %1449 = vmatpush1.bf16.msra.mxu0 %v2335_v2 }
  0x9e   : > { %1450 = vmatprep.subr.bf16.mxu0 %v2343_v3 }
  0xa1   : > { %1451 = vmatpush1.bf16.msra.mxu0 %v2341_v6 }
  0xa2   : > { %1452 = vmatprep.subr.bf16.mxu0 %v2349_v7 }
  0xa5   : > { %1453 = vmatpush1.bf16.msra.mxu0 %v2347_v10 }
  0xa6   : > { %1454 = vmatprep.subr.bf16.mxu0 %v2355_v11 }
  0xa9   : > { %1455 = vmatpush1.bf16.msra.mxu0 %v2353_v14 }
  0xaa   : > { %1456 = vmatprep.subr.bf16.mxu0 %v2361_v15 }
  0xad   : > { %1457 = vmatpush2.bf16.msra.mxu0 %v2359_v18 }
  0xae   : > { %1458 = vmatprep.subr.bf16.mxu0 %v2367_v19 }
  0xb1   : > { %1459 = vmatpush2.bf16.msra.mxu0 %v2365_v22 }
  0xb2   : > { %1460 = vmatprep.subr.bf16.mxu0 %v2373_v23 }
  0xb5   : > { %1461 = vmatpush2.bf16.msra.mxu0 %v2371_v25 }
  0xb6   : > { %1462 = vmatprep.subr.bf16.mxu0 %v2379_v26 }
  0xb9   : > { %1463 = vmatpush2.bf16.msra.mxu0 %v2377_v27 }
  0xba   : > { %1464 = vmatprep.subr.bf16.mxu0 %v2385_v30  ;;  %v2410_v30 = vld [vmem:[%s3145_s3 + $0x270] ss:$8 sps:$4 sm:$0xff]  }
  0xbd   : > { %1465 = vmatpush2.bf16.msra.mxu0 %v2383_v31 }
  0xbe   : > { %1466 = vmatprep.subr.bf16.mxu0 %v2391_v35  ;;  %v2418_v35 = vld [vmem:[%s3145_s3 + $0x254] ss:$8 sps:$4 sm:$0xff]  }
  0xc1   : > { %1467 = vmatpush2.bf16.msra.mxu0 %v2389_v36  ;;  %v2416_v36 = vld [vmem:[%s3145_s3 + $0x250] ss:$8 sps:$4 sm:$0xff]  }
  0xc2   : > { %1468 = vmatprep.subr.bf16.mxu0 %v2397_v40  ;;  %v2422_v40 = vld [vmem:[%s3145_s3 + $0x230] ss:$8 sps:$4 sm:$0xff]  }
  0xc5   : > { %1469 = vmatpush2.bf16.msra.mxu0 %v2395_v39  ;;  %v2424_v39 = vld [vmem:[%s3145_s3 + $0x234] ss:$8 sps:$4 sm:$0xff]  }
  0xc6   : > { %1470 = vmatprep.subr.bf16.mxu0 %v2403_v43  ;;  %v2430_v43 = vld [vmem:[%s3145_s3 + $0x214] ss:$8 sps:$4 sm:$0xff]  }
  0xc9   : > { %1471 = vmatpush2.bf16.msra.mxu0 %v2401_v45  ;;  %v2433_v45 = vld [vmem:[%s3145_s3 + $0x204] ss:$8 sps:$4 sm:$0xff]  }
 0x10c   : > { %v510_v50 = vpop.f32.mrf.mxu0 }
 0x10d   : > { %v711_v51 = vpop.f32.mrf.mxu1 }
 0x10e   : > { %v512_v52 = vpop.f32.mrf.mxu0  ;;  %v712_v63 = vadd.f32 %v711_v51, %v510_v50  ;;  %v2437_v50 = vld [vmem:[%s3145_s3 + $0x2e0] ss:$8 sps:$4 sm:$0xff]   ;;  %v2442_v51 = vld [vmem:[%s3145_s3 + $0x2d4] ss:$8 sps:$4 sm:$0xff]  }
 0x10f   : > { %v713_v53 = vpop.f32.mrf.mxu1 }
 0x110   : > { %v514_v54 = vpop.f32.mrf.mxu0  ;;  %v714_v2 = vadd.f32 %v713_v53, %v512_v52  ;;  %v2440_v52 = vld [vmem:[%s3145_s3 + $0x2d0] ss:$8 sps:$4 sm:$0xff]   ;;  %v2445_v53 = vld [vmem:[%s3145_s3 + $0x2c4] ss:$8 sps:$4 sm:$0xff]  }
 0x111   : > { %v715_v55 = vpop.f32.mrf.mxu1  ;;  %v2443_v54 = vld [vmem:[%s3145_s3 + $0x2c0] ss:$8 sps:$4 sm:$0xff]  }
 0x112   : > { %v515_v56 = vpop.f32.mrf.mxu0  ;;  %v2448_v55 = vld [vmem:[%s3145_s3 + $0x2b4] ss:$8 sps:$4 sm:$0xff]  }
 0x113   : > { %v716_v57 = vpop.f32.mrf.mxu1  ;;  %v2446_v56 = vld [vmem:[%s3145_s3 + $0x2b0] ss:$8 sps:$4 sm:$0xff]  }
 0x114   : > { %v2451_v57 = vld [vmem:[%s3145_s3 + $0x2a4] ss:$8 sps:$4 sm:$0xff]  }
 0x14c   : > { %v951_v1 = vpop.f32.mrf.mxu0 }
 0x14d   : > { %v958_v3 = vadd.f32 %v951_v1, %v712_v63  ;;  %v2452_v63 = vld [vmem:[%s3145_s3 + $0x290] ss:$8 sps:$4 sm:$0xff]   ;;  %v2455_v1 = vld [vmem:[%s3145_s3 + $0x280] ss:$8 sps:$4 sm:$0xff]  }
 0x14e   : > { %v953_v5 = vpop.f32.mrf.mxu0 }
 0x14f   : > { %v972_v6 = vadd.f32 %v965_v0, %v958_v3  ;;  %v959_v7 = vadd.f32 %v953_v5, %v714_v2  ;;  %v2457_v0 = vld [vmem:[%s3145_s3 + $0x284] ss:$8 sps:$4 sm:$0xff]  }
 0x150   : > { %v955_v8 = vpop.f32.mrf.mxu0 }
 0x151   : > { %v974_v9 = vmax.f32 %v972_v6, 0.0  ;;  %v973_v10 = vadd.f32 %v969_v4, %v959_v7 }
 0x152   : > { %v956_v11 = vpop.f32.mrf.mxu0 }
 0x153   : > { %v982_v12 = vrot.slane %v974_v9, 7  ;;  %v975_v13 = vmax.f32 %v973_v10, 0.0 }
 0x155   : > { %986 = vst [vmem:[#allocation2 + $0x10] sm:$0xfe] %v982_v12  ;;  %988 = vst [vmem:[#allocation2 + $0x18] sm:$0x1] %v982_v12  ;;  %v983_v14 = vrot.slane %v975_v13, 7  ;;  %v2458_v12 = vld [vmem:[%s2649_s17] sm:$0xff] }
 0x156   : > { %v227_v13 = vunpack.c.l.bf16 %v2458_v12 }
 0x157   : > { %987 = vst [vmem:[#allocation2] sm:$0xfe] %v983_v14  ;;  %989 = vst [vmem:[#allocation2 + $0x8] sm:$0x1] %v983_v14  ;;  %v2459_v14 = vld [vmem:[%s2649_s17 + $0x8] sm:$0x11] }
 0x158   : > { %s2155_s17 = sshll.u32 %s3149_s19, 3 }
 0x159   : > { %s224_s11 = scalar_lea.vmem %s3147_s5, %s2155_s17 }
 0x15c   : > { %v990_v15 = vld [vmem:[#allocation2 + $0x10] sm:$0xff]  ;;  %v992_v16 = vld [vmem:[#allocation2 + $0x18] sm:$0x3] }
 0x15d   : > { %v3028_v17 = vpack.c.bf16 %v992_v16, %v990_v15  ;;  %v994_v23 = vpack.c.bf16 %v990_v15, %v990_v15  ;;  %v229_v15 = vunpack.c.l.bf16 %v2459_v14  ;;  %v1723_v16 = vld [vmem:[%s3146_s4] sm:$0x3] }
 0x15e   : > { %v991_v18 = vld [vmem:[#allocation2] sm:$0xff]  ;;  %v993_v19 = vld [vmem:[#allocation2 + $0x8] sm:$0x3] }
 0x15f   : > { %v995_v20 = vpack.c.bf16 %v991_v18, %v991_v18  ;;  %v1029_v21 = vpack.c.bf16 %v993_v19, %v991_v18  ;;  %v1066_v22 = vshll.u32 %v3028_v17, 16  ;;  %v1064_v28 = vshrl.u32 %v3028_v17, 16 }
 0x160   : > { %v1516_v2 = vrot.slane %v3028_v17, 1  ;;  %v228_v18 = vunpack.c.h.bf16 %v2458_v12  ;;  %v230_v17 = vunpack.c.h.bf16 %v2459_v14  ;;  %v1742_v19 = vrot.slane %v227_v13, 1 }
 0x161   : > { %1472 = vmatprep.mubr.bf16.mxu0 %v995_v20  ;;  %v1073_v24 = vshll.u32 %v1029_v21, 16  ;;  %v1068_v25 = vrot.slane %v1066_v22, 1  ;;  %v1071_v26 = vshrl.u32 %v1029_v21, 16  ;;  %v1517_v33 = vrot.slane %v1029_v21, 1 }
 0x162   : > { %1473 = vmatmul.mubr.bf16.vlgmr.msra.gmra.mxu0 %v994_v23  ;;  %v1743_v20 = vrot.slane %v229_v15, 1  ;;  %v1728_v21 = vrot.slane %v1723_v16, %v964_v60  ;;  %v1745_v23 = vrot.slane %v228_v18, 1 }
 0x163   : > { %v1075_v27 = vrot.slane %v1073_v24, 1  ;;  %v1069_v31 = vor.u32 %v1068_v25, %v1064_v28  ;;  %v1746_v24 = vrot.slane %v230_v17, 1 }
 0x164   : > { %v1744_v28 = vsel %vm1741_vm0, %v1742_v19, %v1743_v20 }
 0x165   : > { %v1076_v29 = vor.u32 %v1075_v27, %v1071_v26  ;;  %v1732_v27 = vrot.slane %v1723_v16, %v968_v62 }
 0x167   : > { %1271 = vmatprep.mubr.bf16.mxu1 %v1076_v29 }
 0x168   : > { %1272 = vmatmul.mubr.bf16.vlgmr.msra.gmra.mxu1 %v1069_v31 }
 0x169   : > { %1681 = vmatpush1.bf16.msra.mxu1 %v2410_v30  ;;  %1712 = vmatprep.mubr.bf16.mxu1 %v1517_v33 }
 0x16a   : > { %1682 = vmatprep.subr.bf16.mxu1 %v2415_v32  ;;  %v1747_v32 = vsel %vm1741_vm0, %v1745_v23, %v1746_v24 }
 0x16d   : > { %1683 = vmatpush1.bf16.msra.mxu1 %v2413_v34 }
 0x16e   : > { %1684 = vmatprep.subr.bf16.mxu1 %v2418_v35 }
 0x171   : > { %1685 = vmatpush1.bf16.msra.mxu1 %v2416_v36 }
 0x172   : > { %1686 = vmatprep.subr.bf16.mxu1 %v2421_v37 }
 0x175   : > { %1687 = vmatpush1.bf16.msra.mxu1 %v2419_v38 }
 0x176   : > { %1688 = vmatprep.subr.bf16.mxu1 %v2424_v39 }
 0x179   : > { %1689 = vmatpush1.bf16.msra.mxu1 %v2422_v40 }
 0x17a   : > { %1690 = vmatprep.subr.bf16.mxu1 %v2427_v41 }
 0x17d   : > { %1691 = vmatpush1.bf16.msra.mxu1 %v2425_v42 }
 0x17e   : > { %1692 = vmatprep.subr.bf16.mxu1 %v2430_v43 }
 0x181   : > { %1693 = vmatpush1.bf16.msra.mxu1 %v2428_v44 }
 0x182   : > { %1694 = vmatprep.subr.bf16.mxu1 %v2433_v45 }
 0x185   : > { %1695 = vmatpush1.bf16.msra.mxu1 %v2431_v46 }
 0x186   : > { %1696 = vmatprep.subr.bf16.mxu1 %v2436_v47 }
 0x189   : > { %1697 = vmatpush2.bf16.msra.mxu1 %v2434_v48 }
 0x18a   : > { %1698 = vmatprep.subr.bf16.mxu1 %v2439_v49 }
 0x18d   : > { %1699 = vmatpush2.bf16.msra.mxu1 %v2437_v50 }
 0x18e   : > { %1700 = vmatprep.subr.bf16.mxu1 %v2442_v51 }
 0x191   : > { %1701 = vmatpush2.bf16.msra.mxu1 %v2440_v52 }
 0x192   : > { %1702 = vmatprep.subr.bf16.mxu1 %v2445_v53 }
 0x195   : > { %1703 = vmatpush2.bf16.msra.mxu1 %v2443_v54 }
 0x196   : > { %1704 = vmatprep.subr.bf16.mxu1 %v2448_v55 }
 0x199   : > { %1705 = vmatpush2.bf16.msra.mxu1 %v2446_v56 }
 0x19a   : > { %1706 = vmatprep.subr.bf16.mxu1 %v2451_v57 }
 0x19d   : > { %1707 = vmatpush2.bf16.msra.mxu1 %v2449_v58 }
 0x19e   : > { %1708 = vmatprep.subr.bf16.mxu1 %v2454_v61 }
 0x1a1   : > { %1709 = vmatpush2.bf16.msra.mxu1 %v2452_v63 }
 0x1a2   : > { %1710 = vmatprep.subr.bf16.mxu1 %v2457_v0 }
 0x1a5   : > { %1711 = vmatpush2.bf16.msra.mxu1 %v2455_v1 }
 0x1a8   : > { %1713 = vmatmul.mubr.bf16.vlgmr.msra.gmra.mxu1 %v1516_v2 }
 0x222   : > { %v1474_v3 = vpop.f32.mrf.mxu0 }
 0x224   : > { %v1476_v4 = vpop.f32.mrf.mxu0 }
 0x226   : > { %v1478_v5 = vpop.f32.mrf.mxu0 }
 0x228   : > { %v1273_v6 = vpop.f32.mrf.mxu1  ;;  %v1479_v7 = vpop.f32.mrf.mxu0 }
 0x229   : > { %v1475_v8 = vadd.f32 %v1474_v3, %v1273_v6 }
 0x22a   : > { %v1275_v9 = vpop.f32.mrf.mxu1 }
 0x22b   : > { %v1477_v25 = vadd.f32 %v1476_v4, %v1275_v9 }
 0x22c   : > { %v1277_v10 = vpop.f32.mrf.mxu1 }
 0x22e   : > { %v1278_v11 = vpop.f32.mrf.mxu1 }
 0x268   : > { %v1714_v22 = vpop.f32.mrf.mxu1 }
 0x269   : > { %v1721_v26 = vadd.f32 %v1714_v22, %v1475_v8 }
 0x26a   : > { %v1716_v29 = vpop.f32.mrf.mxu1 }
 0x26b   : > { %v1735_v30 = vadd.f32 %v1728_v21, %v1721_v26  ;;  %v1722_v31 = vadd.f32 %v1716_v29, %v1477_v25 }
 0x26c   : > { %v1718_v33 = vpop.f32.mrf.mxu1 }
 0x26d   : > { %v1750_v34 = vadd.f32 %v1744_v28, %v1735_v30  ;;  %v1736_v35 = vadd.f32 %v1732_v27, %v1722_v31 }
 0x26e   : > { %v1719_v36 = vpop.f32.mrf.mxu1 }
 0x26f   : > { %v1751_v60 = vadd.f32 %v1747_v32, %v1736_v35  ;;  %v1752_v37 = vmax.f32 %v1750_v34, 0.0 }
 0x271   : > { %v1753_v38 = vmax.f32 %v1751_v60, 0.0 }
 0x273   : > { %v2156_v39 = vpack.c.bf16 %v1753_v38, %v1752_v37 }
 0x275   : > { %1762 = vst [vmem:[%s224_s11] sm:$0xff] %v2156_v39 }
 0x276 PF: > { %s15_s18 = sadd.s32 1, %s2466_s18  }
 0x277   : > { %p12_p4 = scmp.ge.s32.totalorder %s15_s18, 4  }
 0x279   :  { %14 = sbr.rel (!%p12_p4) target bundleno = 1 (0x1), region = 74 }

// kernel: _lambda_.21
= control target key start
LH: loop header
LB: loop body
LE: loop exit
PB: predicated region body
PF: predicated region fallthrough
CT: control target
= control target key end

     0   :  { %8 = vsyncpa [#allocation3], 0  ;;  %s753_s0 = inlined_call_operand.vmem [shape: bf16[2,4,256], index: 0, kind: input, shape index: {}]   ;;  %s754_s1 = inlined_call_operand.vmem [shape: bf16[256,128], index: 1, kind: input, shape index: {}]   ;;  %s755_s2 = inlined_call_operand.vmem [shape: f32[1,128], index: 2, kind: input, shape index: {}]   ;;  %s756_s3 = inlined_call_operand.hbm [shape: f32[2,1,128], index: 3, kind: output, shape index: {}]  }
   0x1   :  { %10 = vsyncpa [#allocation3 + $0x1], 0  ;;  %s615_s12 = smov 0   ;;  %s617_s13 = smov 0  }
   0x2   :  { %s619_s14 = smov 0   ;;  %s621_s15 = smov 0  }
   0x3 LB: > { %s636_s16 = sadd.s32 4294967295, %s592_s15   ;;  %s428_s17 = sadd.s32 4294967294, %s592_s15   ;;  %s592_s15 = sphi %s621_s15, %s762_s15   ;;  %s588_s14 = sphi %s619_s14, %s761_s14   ;;  %s584_s13 = sphi %s617_s13, %s760_s13   ;;  %s580_s12 = sphi %s615_s12, %s759_s12  }
   0x4   : > { %s640_s18 = sadd.s32 1, %s592_s15   ;;  %s91_s19 = sadd.s32 1, %s588_s14 }
   0x5   : > { %s88_s20 = ssub.s32 %s592_s15, %s640_s18  ;;  %p101_p0 = scmp.ne.s32.totalorder %s588_s14, %s584_s13 }
   0x6   : > { %p89_p1 = scmp.eq.s32.totalorder %s88_s20, 0  ;;  %p102_p2 = scmp.eq.s32.totalorder %s636_s16, 1 }
   0x7   : > { %p107_p3 = scmp.ne.s32.totalorder %s584_s13, %s580_s12  ;;  %p108_p4 = scmp.eq.s32.totalorder %s428_s17, 1 }
   0x8   : > { %s651_s21 = scalar_select %p89_p1, %s588_s14, %s91_s19  }
   0x9   : > { %p653_p5 = por %p102_p2, %p101_p0  ;;  %p657_p6 = por %p108_p4, %p107_p3 }
   0xa   : > { %p431_p7 = scmp.ge.s32.totalorder %s592_s15, 1  ;;  %p140_p8 = scmp.lt.s32.totalorder %s592_s15, 3 }
   0xc   : > { %p141_p9 = pnand %p431_p7, %p140_p8 }
   0xd   : > { %p163_p10 = scmp.lt.s32.totalorder (!%p141_p9), %s636_s16, 1  ;;  %s161_s25 = sand.u32 (!%p141_p9), 1, %s584_s13  }
   0xe   : > { %144 = sbr.rel (%p141_p9) target bundleno = 277 (0x115), region = 32  ;;  %s162_s29 = scalar_lea.vmem (!%p141_p9), [#allocation2], %s161_s25 }
   0xf   : > { %s373_s30 = sshll.u32 (!%p141_p9), %s162_s29, 4  ;;  %s594_s9 = smov (!%p141_p9), [#allocation2]   ;;  %s374_s30 = int_to_ptr.vmem [resolvable:$true] %s373_s30 }
  0x10   : > { %s532_s8 = scalar_lea.vmem (!%p141_p9), %s374_s30, 16  ;;  %s536_s10 = sshll.u32 (!%p141_p9), %s594_s9, 4  ;;  %s537_s10 = int_to_ptr.vmem [resolvable:$false] %s536_s10 }
  0x11   : > { %p533_p11 = scmp.ne.s32.totalorder (!%p141_p9), %s374_s30, %s532_s8  ;;  %p539_p0 = scmp.lt.s32.totalorder (!%p141_p9), %s374_s30, %s537_s10 }
  0x13   : > { %v516_v0 = vld [vmem:[%s754_s1 + $0x78] sm:$0xff]   ;;  %v518_v2 = vld [vmem:[%s754_s1 + $0x70] sm:$0xff]   ;;  %v520_v4 = vld [vmem:[%s754_s1 + $0x68] sm:$0xff]   ;;  %s164_s7 = scalar_select %p163_p10, %s636_s16, 1  ;;  %vm349_vm0 = vcmask 1043456  }
  0x14   : > { %v517_v1 = vld [vmem:[%s754_s1 + $0x38] sm:$0xff]   ;;  %455 = vmatprep.subr.bf16.mxu0 %v516_v0  ;;  %v519_v3 = vld [vmem:[%s754_s1 + $0x30] sm:$0xff]   ;;  %v521_v5 = vld [vmem:[%s754_s1 + $0x28] sm:$0xff]   ;;  %p534_p12 = pnand %p533_p11, %p653_p5 }
  0x15   : > { %456 = vmatpush3.bf16.msra.mxu0 %v517_v1  ;;  %v522_v6 = vld [vmem:[%s754_s1 + $0x60] sm:$0xff]   ;;  %s454_s17 = sshll.u32 %s164_s7, 2  ;;  %v524_v8 = vld [vmem:[%s754_s1 + $0x58] sm:$0xff]   ;;  %v526_v10 = vld [vmem:[%s754_s1 + $0x50] sm:$0xff]   ;;  %s361_s7 = scalar_lea.sflag [#allocation3], %s161_s25 }
  0x16   : > { %457 = vmatprep.subr.bf16.mxu0 %v518_v2  ;;  %v523_v7 = vld [vmem:[%s754_s1 + $0x20] sm:$0xff]   ;;  %s167_s28 = scalar_lea.vmem %s753_s0, %s454_s17  ;;  %v525_v9 = vld [vmem:[%s754_s1 + $0x18] sm:$0xff]   ;;  %v527_v13 = vld [vmem:[%s754_s1 + $0x10] sm:$0xff]   ;;  %p535_p13 = pneg %p534_p12 }
  0x17   : > { %v434_v11 = vld.sshfl [vmem:[%s167_s28] sm:$0x33 pattern:$0x76325410]  ;;  %v528_v14 = vld [vmem:[%s754_s1 + $0x48] sm:$0xff]   ;;  %s451_s28 = sshll.u32 %s636_s16, 4 }
  0x18   : > { %v210_v12 = vcombine.high %v434_v11, %v434_v11  ;;  %v529_v15 = vld [vmem:[%s754_s1 + $0x8] sm:$0xff]   ;;  %v530_v16 = vld [vmem:[%s754_s1 + $0x40] sm:$0xff]   ;;  %s371_s6 = scalar_lea.hbm %s756_s3, %s451_s28  ;;  %s538_s16 = scalar_lea.vmem %s537_s10, 32 }
  0x19   : > { %458 = vmatpush3.bf16.msra.mxu0 %v519_v3  ;;  %v531_v17 = vld [vmem:[%s754_s1] sm:$0xff]   ;;  %p540_p1 = scmp.lt.s32.totalorder %s538_s16, %s532_s8 }
  0x1a   : > { %459 = vmatprep.subr.bf16.mxu0 %v520_v4  ;;  %341 = vmatprep.mubr.bf16.mxu0 %v210_v12  ;;  %v357_v29 = vld [vmem:[%s755_s2] sm:$0x1] }
  0x1b   : > { %p541_p2 = por %p540_p1, %p539_p0 }
  0x1d   : > { %460 = vmatpush3.bf16.msra.mxu0 %v521_v5  ;;  %p542_p3 = pnand %p541_p2, %p535_p13 }
  0x1e   : > { %461 = vmatprep.subr.bf16.mxu0 %v522_v6 }
  0x21   : > { %462 = vmatpush3.bf16.msra.mxu0 %v523_v7 }
  0x22   : > { %463 = vmatprep.subr.bf16.mxu0 %v524_v8 }
  0x25   : > { %464 = vmatpush3.bf16.msra.mxu0 %v525_v9 }
  0x26   : > { %465 = vmatprep.subr.bf16.mxu0 %v526_v10 }
  0x29   : > { %466 = vmatpush3.bf16.msra.mxu0 %v527_v13 }
  0x2a   : > { %467 = vmatprep.subr.bf16.mxu0 %v528_v14 }
  0x2d   : > { %468 = vmatpush3.bf16.msra.mxu0 %v529_v15 }
  0x2e   : > { %469 = vmatprep.subr.bf16.mxu0 %v530_v16 }
  0x31   : > { %470 = vmatpush3.bf16.msra.mxu0 %v531_v17 }
  0x34   : > { %342 = vmatmul.mubr.bf16.vlgmr.msra.gmra.mxu0 %v434_v11 }
  0xf4   : > { %v471_v18 = vpop.f32.mrf.mxu0 }
  0xf6   : > { %v472_v19 = vpop.f32.mrf.mxu0 }
  0xf7   : > { %v473_v20 = vadd.f32 %v472_v19, %v471_v18 }
  0xf8   : > { %v474_v21 = vpop.f32.mrf.mxu0 }
  0xf9   : > { %v350_v22 = vsel %vm349_vm0, %v473_v20, 0.0 }
  0xfa   : > { %v351_v23 = vrot.slane %v350_v22, 4  ;;  %v475_v24 = vpop.f32.mrf.mxu0 }
  0xfc   : > { %v352_v25 = vadd.f32 %v351_v23, %v350_v22 }
  0xfe   : > { %v353_v26 = vrot.slane %v352_v25, 2 }
 0x100   : > { %v354_v27 = vadd.f32 %v353_v26, %v352_v25 }
 0x102   : > { %v355_v28 = vrot.slane %v354_v27, 1 }
 0x104   : > { %v356_v30 = vadd.f32 %v355_v28, %v354_v27 }
 0x106   : > { %v358_v31 = vadd.f32 %v357_v29, %v356_v30 }
 0x108   : > { %359 = vst [vmem:[%s162_s29] sm:$0x1] %v358_v31 }
 0x109   : > { %545 = shalt.err (!%p542_p3)
}
 0x10a   : > { %s546_s11 = scalar_lea.hbm %s371_s6, 16  ;;  %s550_s20 = scalar_lea.hbm %s756_s3, 32 }
 0x10b   : > { %p547_p4 = scmp.ne.s32.totalorder %s371_s6, %s546_s11  ;;  %p551_p9 = scmp.lt.s32.totalorder %s371_s6, %s756_s3 }
 0x10c   : > { %p552_p10 = scmp.lt.s32.totalorder %s550_s20, %s546_s11 }
 0x10d   : > { %p548_p7 = pnand %p547_p4, %p653_p5 }
 0x10e   : > { %p553_p11 = por %p552_p10, %p551_p9 }
 0x10f   : > { %p549_p8 = pneg %p548_p7 }
 0x111   : > { %p554_p12 = pnand %p553_p11, %p549_p8 }
 0x113   : > { %557 = shalt.err (!%p554_p12)
}
 0x114   : > { %477 = dma.vmem_to_hbm [thread:$0]  (%p653_p5), %s374_s30, 16, %s371_s6, %s361_s7  }
 0x115 PF: > { %p483_p13 = scmp.ge.s32.totalorder %s592_s15, 2  ;;  %s385_s26 = sand.u32 1, %s580_s12  }
 0x116   : > { %s386_s27 = scalar_lea.sflag [#allocation3], %s385_s26 }
 0x117   : > { %p480_p0 = pnand %p483_p13, %p657_p6 }
 0x119   : > { %p481_p1 = pneg %p480_p0 }
 0x11b   : > { %575 = dma.done.wait (%p481_p1), %s386_s27, 16  }
 0x11c   : > { %577 = vsyncadd (%p481_p1), %s386_s27, 4294967280  ;;  %p13_p2 = scmp.ge.s32.totalorder %s640_s18, 4   ;;  %s759_s12 = smov %s584_s13 }
 0x11d   : > { %s760_s13 = smov %s588_s14  ;;  %s761_s14 = smov %s651_s21 }
 0x11e   : > { %s762_s15 = smov %s640_s18  ;;  %15 = sbr.rel (!%p13_p2) target bundleno = 3 (0x3), region = 67 }
 0x123   :  { %390 = vsyncpa [#allocation3], 1 }
 0x124   :  { %392 = vsyncpa [#allocation3 + $0x1], 1 }

// kernel: _lambda_.19
= control target key start
LH: loop header
LB: loop body
LE: loop exit
PB: predicated region body
PF: predicated region fallthrough
CT: control target
= control target key end

     0   :  { %s2478_s18 = smov 0   ;;  %s3117_s0 = inlined_call_operand.vmem [shape: bf16[2,6,256], index: 0, kind: input, shape index: {}]   ;;  %s3118_s1 = inlined_call_operand.vmem [shape: bf16[3,256,256], index: 1, kind: input, shape index: {}]   ;;  %s3119_s2 = inlined_call_operand.vmem [shape: f32[1,256], index: 2, kind: input, shape index: {}]   ;;  %s3120_s3 = inlined_call_operand.vmem [shape: bf16[3,256,256], index: 3, kind: input, shape index: {}]   ;;  %s3121_s4 = inlined_call_operand.vmem [shape: f32[1,256], index: 4, kind: input, shape index: {}]   ;;  %s3122_s5 = inlined_call_operand.vmem [shape: bf16[2,4,256], index: 5, kind: output, shape index: {}]  }
   0x1 LB: > { %s1803_s19 = sadd.s32 4294967295, %s2445_s18   ;;  %p1807_p0 = scmp.ge.s32.totalorder %s2445_s18, 1  ;;  %s2445_s18 = sphi %s2478_s18, %s15_s18  }
   0x2   : > { %p187_p1 = scmp.lt.s32.totalorder %s2445_s18, 3 }
   0x4   : > { %p188_p2 = pnand %p1807_p0, %p187_p1 }
   0x5   : > { %p215_p3 = scmp.lt.s32.totalorder (!%p188_p2), %s1803_s19, 1 }
   0x6   : > { %191 = sbr.rel (%p188_p2) target bundleno = 630 (0x276), region = 40 }
   0xb   : > { %v2149_v0 = vld [vmem:[%s3118_s1 + $0x174] ss:$8 sps:$4 sm:$0xff]   ;;  %v2153_v2 = vld [vmem:[%s3118_s1 + $0x170] ss:$8 sps:$4 sm:$0xff]   ;;  %v2155_v4 = vld [vmem:[%s3118_s1 + $0x164] ss:$8 sps:$4 sm:$0xff]  }
   0xc   : > { %v2151_v1 = vld [vmem:[%s3118_s1 + $0x74] ss:$8 sps:$4 sm:$0xff]   ;;  %471 = vmatprep.subr.bf16.mxu0 %v2149_v0  ;;  %v2154_v3 = vld [vmem:[%s3118_s1 + $0x70] ss:$8 sps:$4 sm:$0xff]   ;;  %v2157_v5 = vld [vmem:[%s3118_s1 + $0x64] ss:$8 sps:$4 sm:$0xff]  }
   0xd   : > { %672 = vmatprep.subr.bf16.mxu1 %v2151_v1  ;;  %472 = vmatpush1.bf16.msra.mxu0 %v2153_v2  ;;  %v2159_v6 = vld [vmem:[%s3118_s1 + $0x160] ss:$8 sps:$4 sm:$0xff]   ;;  %v2161_v8 = vld [vmem:[%s3118_s1 + $0x154] ss:$8 sps:$4 sm:$0xff]   ;;  %v2165_v10 = vld [vmem:[%s3118_s1 + $0x150] ss:$8 sps:$4 sm:$0xff]  }
   0xe   : > { %673 = vmatpush1.bf16.msra.mxu1 %v2154_v3  ;;  %473 = vmatprep.subr.bf16.mxu0 %v2155_v4  ;;  %v2160_v7 = vld [vmem:[%s3118_s1 + $0x60] ss:$8 sps:$4 sm:$0xff]   ;;  %v2163_v9 = vld [vmem:[%s3118_s1 + $0x54] ss:$8 sps:$4 sm:$0xff]   ;;  %v2166_v11 = vld [vmem:[%s3118_s1 + $0x50] ss:$8 sps:$4 sm:$0xff]  }
   0xf   : > { %674 = vmatprep.subr.bf16.mxu1 %v2157_v5  ;;  %v2167_v12 = vld [vmem:[%s3118_s1 + $0x144] ss:$8 sps:$4 sm:$0xff]   ;;  %v2171_v14 = vld [vmem:[%s3118_s1 + $0x140] ss:$8 sps:$4 sm:$0xff]   ;;  %v2173_v16 = vld [vmem:[%s3118_s1 + $0x134] ss:$8 sps:$4 sm:$0xff]  }
  0x10   : > { %v2169_v13 = vld [vmem:[%s3118_s1 + $0x44] ss:$8 sps:$4 sm:$0xff]   ;;  %v2172_v15 = vld [vmem:[%s3118_s1 + $0x40] ss:$8 sps:$4 sm:$0xff]   ;;  %v2175_v17 = vld [vmem:[%s3118_s1 + $0x34] ss:$8 sps:$4 sm:$0xff]  }
  0x11   : > { %474 = vmatpush1.bf16.msra.mxu0 %v2159_v6  ;;  %v2177_v18 = vld [vmem:[%s3118_s1 + $0x130] ss:$8 sps:$4 sm:$0xff]   ;;  %v2179_v20 = vld [vmem:[%s3118_s1 + $0x124] ss:$8 sps:$4 sm:$0xff]   ;;  %v2183_v22 = vld [vmem:[%s3118_s1 + $0x120] ss:$8 sps:$4 sm:$0xff]  }
  0x12   : > { %675 = vmatpush1.bf16.msra.mxu1 %v2160_v7  ;;  %475 = vmatprep.subr.bf16.mxu0 %v2161_v8  ;;  %v2178_v19 = vld [vmem:[%s3118_s1 + $0x30] ss:$8 sps:$4 sm:$0xff]   ;;  %v2181_v21 = vld [vmem:[%s3118_s1 + $0x24] ss:$8 sps:$4 sm:$0xff]   ;;  %v2184_v23 = vld [vmem:[%s3118_s1 + $0x20] ss:$8 sps:$4 sm:$0xff]  }
  0x13   : > { %676 = vmatprep.subr.bf16.mxu1 %v2163_v9  ;;  %v2185_v24 = vld [vmem:[%s3118_s1 + $0x114] ss:$8 sps:$4 sm:$0xff]   ;;  %v2189_v26 = vld [vmem:[%s3118_s1 + $0x110] ss:$8 sps:$4 sm:$0xff]   ;;  %v2191_v28 = vld [vmem:[%s3118_s1 + $0x104] ss:$8 sps:$4 sm:$0xff]  }
  0x14   : > { %v2187_v25 = vld [vmem:[%s3118_s1 + $0x14] ss:$8 sps:$4 sm:$0xff]   ;;  %v2190_v27 = vld [vmem:[%s3118_s1 + $0x10] ss:$8 sps:$4 sm:$0xff]   ;;  %v2193_v29 = vld [vmem:[%s3118_s1 + $0x4] ss:$8 sps:$4 sm:$0xff]  }
  0x15   : > { %476 = vmatpush1.bf16.msra.mxu0 %v2165_v10  ;;  %v2195_v30 = vld [vmem:[%s3118_s1 + $0x100] ss:$8 sps:$4 sm:$0xff]   ;;  %v2197_v32 = vld [vmem:[%s3118_s1 + $0x1f4] ss:$8 sps:$4 sm:$0xff]   ;;  %v2201_v34 = vld [vmem:[%s3118_s1 + $0x1f0] ss:$8 sps:$4 sm:$0xff]  }
  0x16   : > { %677 = vmatpush1.bf16.msra.mxu1 %v2166_v11  ;;  %477 = vmatprep.subr.bf16.mxu0 %v2167_v12  ;;  %v2196_v31 = vld [vmem:[%s3118_s1] ss:$8 sps:$4 sm:$0xff]   ;;  %v2199_v33 = vld [vmem:[%s3118_s1 + $0xf4] ss:$8 sps:$4 sm:$0xff]   ;;  %v2202_v35 = vld [vmem:[%s3118_s1 + $0xf0] ss:$8 sps:$4 sm:$0xff]  }
  0x17   : > { %678 = vmatprep.subr.bf16.mxu1 %v2169_v13  ;;  %v2203_v36 = vld [vmem:[%s3118_s1 + $0x1e4] ss:$8 sps:$4 sm:$0xff]   ;;  %s3124_s19 = smov (!%p215_p3, %s1803_s19), 1  ;;  %v2207_v38 = vld [vmem:[%s3118_s1 + $0x1e0] ss:$8 sps:$4 sm:$0xff]  }
  0x18   : > { %v2205_v37 = vld [vmem:[%s3118_s1 + $0xe4] ss:$8 sps:$4 sm:$0xff]   ;;  %v2208_v39 = vld [vmem:[%s3118_s1 + $0xe0] ss:$8 sps:$4 sm:$0xff]   ;;  %v2209_v40 = vld [vmem:[%s3118_s1 + $0x1d4] ss:$8 sps:$4 sm:$0xff]  }
  0x19   : > { %478 = vmatpush1.bf16.msra.mxu0 %v2171_v14  ;;  %s2138_s8 = sshll.u32 %s3124_s19, 3  ;;  %v2211_v41 = vld [vmem:[%s3118_s1 + $0xd4] ss:$8 sps:$4 sm:$0xff]   ;;  %v2213_v42 = vld [vmem:[%s3118_s1 + $0x1d0] ss:$8 sps:$4 sm:$0xff]   ;;  %s2139_s21 = sshll.u32 %s3124_s19, 2 }
  0x1a   : > { %679 = vmatpush1.bf16.msra.mxu1 %v2172_v15  ;;  %479 = vmatprep.subr.bf16.mxu0 %v2173_v16  ;;  %v2214_v43 = vld [vmem:[%s3118_s1 + $0xd0] ss:$8 sps:$4 sm:$0xff]   ;;  %s219_s17 = scalar_lea.vmem %s3117_s0, %s2138_s8  ;;  %v2215_v44 = vld [vmem:[%s3118_s1 + $0x1c4] ss:$8 sps:$4 sm:$0xff]   ;;  %v2219_v47 = vld [vmem:[%s3118_s1 + $0x1c0] ss:$8 sps:$4 sm:$0xff]   ;;  %s224_s24 = scalar_lea.vmem %s3122_s5, %s2139_s21 }
  0x1b   : > { %680 = vmatprep.subr.bf16.mxu1 %v2175_v17  ;;  %v2217_v45 = vld [vmem:[%s3118_s1 + $0xc4] ss:$8 sps:$4 sm:$0xff]   ;;  %v2220_v49 = vld [vmem:[%s3118_s1 + $0xc0] ss:$8 sps:$4 sm:$0xff]   ;;  %v2221_v50 = vld [vmem:[%s3118_s1 + $0x1b4] ss:$8 sps:$4 sm:$0xff]  }
  0x1c   : > { %v2634_v46 = vld [vmem:[%s219_s17] sm:$0x77]  ;;  %v2223_v51 = vld [vmem:[%s3118_s1 + $0xb4] ss:$8 sps:$4 sm:$0xff]   ;;  %v2225_v54 = vld [vmem:[%s3118_s1 + $0x1b0] ss:$8 sps:$4 sm:$0xff]  }
  0x1d   : > { %480 = vmatpush1.bf16.msra.mxu0 %v2177_v18  ;;  %v1813_v48 = vcombine.high %v2634_v46, %v2634_v46  ;;  %v2226_v55 = vld [vmem:[%s3118_s1 + $0xb0] ss:$8 sps:$4 sm:$0xff]   ;;  %v2227_v57 = vld [vmem:[%s3118_s1 + $0x1a4] ss:$8 sps:$4 sm:$0xff]   ;;  %v2231_v60 = vld [vmem:[%s3118_s1 + $0x1a0] ss:$8 sps:$4 sm:$0xff]   ;;  %v2670_v62 = vcombine.low %v2634_v46, %v2634_v46 }
  0x1e   : > { %681 = vmatpush1.bf16.msra.mxu1 %v2178_v19  ;;  %481 = vmatprep.subr.bf16.mxu0 %v2179_v20  ;;  %v2229_v58 = vld [vmem:[%s3118_s1 + $0xa4] ss:$8 sps:$4 sm:$0xff]   ;;  %v2232_v61 = vld [vmem:[%s3118_s1 + $0xa0] ss:$8 sps:$4 sm:$0xff]   ;;  %v2233_v63 = vld [vmem:[%s3118_s1 + $0x194] ss:$8 sps:$4 sm:$0xff]  }
  0x1f   : > { %682 = vmatprep.subr.bf16.mxu1 %v2181_v21  ;;  %v303_v52 = vshrl.u32 %v1813_v48, 16  ;;  %v305_v53 = vshll.u32 %v1813_v48, 16  ;;  %704 = vmatprep.mubr.bf16.mxu1 %v1813_v48  ;;  %v2235_v0 = vld [vmem:[%s3118_s1 + $0x94] ss:$8 sps:$4 sm:$0xff]   ;;  %v2237_v1 = vld [vmem:[%s3118_s1 + $0x190] ss:$8 sps:$4 sm:$0xff]  }
  0x20   : > { %v2238_v2 = vld [vmem:[%s3118_s1 + $0x90] ss:$8 sps:$4 sm:$0xff]   ;;  %v298_v3 = vshll.u32 %v2670_v62, 16  ;;  %v2239_v4 = vld [vmem:[%s3118_s1 + $0x184] ss:$8 sps:$4 sm:$0xff]   ;;  %v296_v7 = vshrl.u32 %v2670_v62, 16 }
  0x21   : > { %482 = vmatpush1.bf16.msra.mxu0 %v2183_v22  ;;  %v307_v56 = vrot.slane %v305_v53, 1  ;;  %v2241_v5 = vld [vmem:[%s3118_s1 + $0x84] ss:$8 sps:$4 sm:$0xff]   ;;  %v2243_v6 = vld [vmem:[%s3118_s1 + $0x180] ss:$8 sps:$4 sm:$0xff]   ;;  %v749_v13 = vrot.slane %v1813_v48, 1 }
  0x22   : > { %683 = vmatpush1.bf16.msra.mxu1 %v2184_v23  ;;  %483 = vmatprep.subr.bf16.mxu0 %v2185_v24  ;;  %v300_v8 = vrot.slane %v298_v3, 1  ;;  %v2244_v9 = vld [vmem:[%s3118_s1 + $0x80] ss:$8 sps:$4 sm:$0xff]   ;;  %v2249_v10 = vld [vmem:[%s3118_s1 + $0x274] ss:$8 sps:$4 sm:$0xff]  }
  0x23   : > { %684 = vmatprep.subr.bf16.mxu1 %v2187_v25  ;;  %v308_v59 = vor.u32 %v307_v56, %v303_v52  ;;  %v2247_v12 = vld [vmem:[%s3118_s1 + $0x270] ss:$8 sps:$4 sm:$0xff]   ;;  %v2252_v14 = vld [vmem:[%s3118_s1 + $0x264] ss:$8 sps:$4 sm:$0xff]   ;;  %v2250_v15 = vld [vmem:[%s3118_s1 + $0x260] ss:$8 sps:$4 sm:$0xff]  }
  0x24   : > { %v301_v11 = vor.u32 %v300_v8, %v296_v7  ;;  %v2255_v16 = vld [vmem:[%s3118_s1 + $0x254] ss:$8 sps:$4 sm:$0xff]   ;;  %v2253_v17 = vld [vmem:[%s3118_s1 + $0x250] ss:$8 sps:$4 sm:$0xff]   ;;  %v2258_v18 = vld [vmem:[%s3118_s1 + $0x244] ss:$8 sps:$4 sm:$0xff]  }
  0x25   : > { %484 = vmatpush1.bf16.msra.mxu0 %v2189_v26  ;;  %503 = vmatprep.mubr.bf16.mxu0 %v308_v59  ;;  %v2256_v19 = vld [vmem:[%s3118_s1 + $0x240] ss:$8 sps:$4 sm:$0xff]   ;;  %v2261_v20 = vld [vmem:[%s3118_s1 + $0x234] ss:$8 sps:$4 sm:$0xff]   ;;  %v2259_v21 = vld [vmem:[%s3118_s1 + $0x230] ss:$8 sps:$4 sm:$0xff]  }
  0x26   : > { %685 = vmatpush1.bf16.msra.mxu1 %v2190_v27  ;;  %485 = vmatprep.subr.bf16.mxu0 %v2191_v28  ;;  %v2264_v22 = vld [vmem:[%s3118_s1 + $0x224] ss:$8 sps:$4 sm:$0xff]   ;;  %v2262_v23 = vld [vmem:[%s3118_s1 + $0x220] ss:$8 sps:$4 sm:$0xff]   ;;  %v2267_v24 = vld [vmem:[%s3118_s1 + $0x214] ss:$8 sps:$4 sm:$0xff]  }
  0x27   : > { %686 = vmatprep.subr.bf16.mxu1 %v2193_v29  ;;  %v2265_v25 = vld [vmem:[%s3118_s1 + $0x210] ss:$8 sps:$4 sm:$0xff]   ;;  %v2270_v26 = vld [vmem:[%s3118_s1 + $0x204] ss:$8 sps:$4 sm:$0xff]   ;;  %v2268_v27 = vld [vmem:[%s3118_s1 + $0x200] ss:$8 sps:$4 sm:$0xff]  }
  0x28   : > { %v2273_v28 = vld [vmem:[%s3118_s1 + $0x2f4] ss:$8 sps:$4 sm:$0xff]   ;;  %v2271_v29 = vld [vmem:[%s3118_s1 + $0x2f0] ss:$8 sps:$4 sm:$0xff]   ;;  %v2300_v48 = vld [vmem:[%s3120_s3 + $0x64] ss:$8 sps:$4 sm:$0xff]  }
  0x29   : > { %486 = vmatpush1.bf16.msra.mxu0 %v2195_v30  ;;  %v2276_v30 = vld [vmem:[%s3118_s1 + $0x2e4] ss:$8 sps:$4 sm:$0xff]   ;;  %v2306_v53 = vld [vmem:[%s3120_s3 + $0x54] ss:$8 sps:$4 sm:$0xff]   ;;  %v2304_v56 = vld [vmem:[%s3120_s3 + $0x50] ss:$8 sps:$4 sm:$0xff]  }
  0x2a   : > { %687 = vmatpush1.bf16.msra.mxu1 %v2196_v31  ;;  %487 = vmatprep.subr.bf16.mxu0 %v2197_v32  ;;  %v2274_v31 = vld [vmem:[%s3118_s1 + $0x2e0] ss:$8 sps:$4 sm:$0xff]   ;;  %v2279_v32 = vld [vmem:[%s3118_s1 + $0x2d4] ss:$8 sps:$4 sm:$0xff]   ;;  %v2309_v52 = vld [vmem:[%s3120_s3 + $0x164] ss:$8 sps:$4 sm:$0xff]  }
  0x2b   : > { %688 = vmatprep.subr.bf16.mxu1 %v2199_v33  ;;  %v2277_v33 = vld [vmem:[%s3118_s1 + $0x2d0] ss:$8 sps:$4 sm:$0xff]   ;;  %v2321_v59 = vld [vmem:[%s3120_s3 + $0x144] ss:$8 sps:$4 sm:$0xff]   ;;  %v2339_v7 = vld [vmem:[%s3120_s3 + $0x114] ss:$8 sps:$4 sm:$0xff]  }
  0x2c   : > { %v2333_v3 = vld [vmem:[%s3120_s3 + $0x124] ss:$8 sps:$4 sm:$0xff]   ;;  %v2328_v8 = vld [vmem:[%s3120_s3 + $0x10] ss:$8 sps:$4 sm:$0xff]  }
  0x2d   : > { %488 = vmatpush2.bf16.msra.mxu0 %v2201_v34  ;;  %v2282_v34 = vld [vmem:[%s3118_s1 + $0x2c4] ss:$8 sps:$4 sm:$0xff]  }
  0x2e   : > { %689 = vmatpush2.bf16.msra.mxu1 %v2202_v35  ;;  %489 = vmatprep.subr.bf16.mxu0 %v2203_v36  ;;  %v2280_v35 = vld [vmem:[%s3118_s1 + $0x2c0] ss:$8 sps:$4 sm:$0xff]   ;;  %v2285_v36 = vld [vmem:[%s3118_s1 + $0x2b4] ss:$8 sps:$4 sm:$0xff]  }
  0x2f   : > { %690 = vmatprep.subr.bf16.mxu1 %v2205_v37  ;;  %v2283_v37 = vld [vmem:[%s3118_s1 + $0x2b0] ss:$8 sps:$4 sm:$0xff]  }
  0x31   : > { %490 = vmatpush2.bf16.msra.mxu0 %v2207_v38  ;;  %v2288_v38 = vld [vmem:[%s3118_s1 + $0x2a4] ss:$8 sps:$4 sm:$0xff]  }
  0x32   : > { %691 = vmatpush2.bf16.msra.mxu1 %v2208_v39  ;;  %491 = vmatprep.subr.bf16.mxu0 %v2209_v40  ;;  %v2286_v39 = vld [vmem:[%s3118_s1 + $0x2a0] ss:$8 sps:$4 sm:$0xff]   ;;  %v2291_v40 = vld [vmem:[%s3118_s1 + $0x294] ss:$8 sps:$4 sm:$0xff]  }
  0x33   : > { %692 = vmatprep.subr.bf16.mxu1 %v2211_v41  ;;  %v2289_v41 = vld [vmem:[%s3118_s1 + $0x290] ss:$8 sps:$4 sm:$0xff]  }
  0x35   : > { %492 = vmatpush2.bf16.msra.mxu0 %v2213_v42  ;;  %v2294_v42 = vld [vmem:[%s3118_s1 + $0x284] ss:$8 sps:$4 sm:$0xff]  }
  0x36   : > { %693 = vmatpush2.bf16.msra.mxu1 %v2214_v43  ;;  %493 = vmatprep.subr.bf16.mxu0 %v2215_v44  ;;  %v2292_v43 = vld [vmem:[%s3118_s1 + $0x280] ss:$8 sps:$4 sm:$0xff]   ;;  %v748_v44 = vrot.slane %v2670_v62, 1 }
  0x37   : > { %694 = vmatprep.subr.bf16.mxu1 %v2217_v45  ;;  %v2295_v45 = vld [vmem:[%s3120_s3 + $0x70] ss:$8 sps:$4 sm:$0xff]  }
  0x39   : > { %494 = vmatpush2.bf16.msra.mxu0 %v2219_v47  ;;  %v2297_v47 = vld [vmem:[%s3120_s3 + $0x74] ss:$8 sps:$4 sm:$0xff]  }
  0x3a   : > { %695 = vmatpush2.bf16.msra.mxu1 %v2220_v49  ;;  %495 = vmatprep.subr.bf16.mxu0 %v2221_v50  ;;  %v2301_v49 = vld [vmem:[%s3120_s3 + $0x170] ss:$8 sps:$4 sm:$0xff]   ;;  %v2303_v50 = vld [vmem:[%s3120_s3 + $0x174] ss:$8 sps:$4 sm:$0xff]  }
  0x3b   : > { %696 = vmatprep.subr.bf16.mxu1 %v2223_v51  ;;  %v2298_v51 = vld [vmem:[%s3120_s3 + $0x60] ss:$8 sps:$4 sm:$0xff]  }
  0x3d   : > { %496 = vmatpush2.bf16.msra.mxu0 %v2225_v54  ;;  %v2307_v54 = vld [vmem:[%s3120_s3 + $0x160] ss:$8 sps:$4 sm:$0xff]  }
  0x3e   : > { %697 = vmatpush2.bf16.msra.mxu1 %v2226_v55  ;;  %497 = vmatprep.subr.bf16.mxu0 %v2227_v57  ;;  %v2315_v55 = vld [vmem:[%s3120_s3 + $0x154] ss:$8 sps:$4 sm:$0xff]   ;;  %v2312_v57 = vld [vmem:[%s3120_s3 + $0x44] ss:$8 sps:$4 sm:$0xff]  }
  0x3f   : > { %698 = vmatprep.subr.bf16.mxu1 %v2229_v58  ;;  %v2313_v58 = vld [vmem:[%s3120_s3 + $0x150] ss:$8 sps:$4 sm:$0xff]  }
  0x41   : > { %498 = vmatpush2.bf16.msra.mxu0 %v2231_v60  ;;  %v2310_v60 = vld [vmem:[%s3120_s3 + $0x40] ss:$8 sps:$4 sm:$0xff]  }
  0x42   : > { %699 = vmatpush2.bf16.msra.mxu1 %v2232_v61  ;;  %499 = vmatprep.subr.bf16.mxu0 %v2233_v63  ;;  %v2318_v61 = vld [vmem:[%s3120_s3 + $0x34] ss:$8 sps:$4 sm:$0xff]  }
  0x43   : > { %700 = vmatprep.subr.bf16.mxu1 %v2235_v0  ;;  %v2327_v63 = vld [vmem:[%s3120_s3 + $0x134] ss:$8 sps:$4 sm:$0xff]   ;;  %v2316_v0 = vld [vmem:[%s3120_s3 + $0x30] ss:$8 sps:$4 sm:$0xff]  }
  0x45   : > { %500 = vmatpush2.bf16.msra.mxu0 %v2237_v1  ;;  %v2324_v1 = vld [vmem:[%s3120_s3 + $0x24] ss:$8 sps:$4 sm:$0xff]  }
  0x46   : > { %701 = vmatpush2.bf16.msra.mxu1 %v2238_v2  ;;  %501 = vmatprep.subr.bf16.mxu0 %v2239_v4  ;;  %v2325_v2 = vld [vmem:[%s3120_s3 + $0x130] ss:$8 sps:$4 sm:$0xff]   ;;  %v2322_v4 = vld [vmem:[%s3120_s3 + $0x20] ss:$8 sps:$4 sm:$0xff]  }
  0x47   : > { %702 = vmatprep.subr.bf16.mxu1 %v2241_v5  ;;  %v2330_v5 = vld [vmem:[%s3120_s3 + $0x14] ss:$8 sps:$4 sm:$0xff]  }
  0x49   : > { %502 = vmatpush2.bf16.msra.mxu0 %v2243_v6  ;;  %v2331_v6 = vld [vmem:[%s3120_s3 + $0x120] ss:$8 sps:$4 sm:$0xff]  }
  0x4a   : > { %703 = vmatpush2.bf16.msra.mxu1 %v2244_v9  ;;  %912 = vmatprep.subr.bf16.mxu0 %v2249_v10  ;;  %v2336_v9 = vld [vmem:[%s3120_s3 + $0x4] ss:$8 sps:$4 sm:$0xff]   ;;  %v2337_v10 = vld [vmem:[%s3120_s3 + $0x110] ss:$8 sps:$4 sm:$0xff]  }
  0x4b   : > { %1226 = vmatprep.subr.bf16.mxu1 %v2303_v50 }
  0x4c   : > { %504 = vmatmul.mubr.bf16.vlgmr.msra.gmra.mxu0 %v301_v11  ;;  %v2345_v11 = vld [vmem:[%s3120_s3 + $0x104] ss:$8 sps:$4 sm:$0xff]  }
  0x4d   : > { %705 = vmatmul.mubr.bf16.vlgmr.msra.gmra.mxu1 %v2670_v62  ;;  %913 = vmatpush1.bf16.msra.mxu0 %v2247_v12  ;;  %v2319_v62 = vld [vmem:[%s3120_s3 + $0x140] ss:$8 sps:$4 sm:$0xff]  }
  0x4e   : > { %944 = vmatprep.mubr.bf16.mxu0 %v749_v13  ;;  %914 = vmatprep.subr.bf16.mxu0 %v2252_v14  ;;  %v2334_v12 = vld [vmem:[%s3120_s3] ss:$8 sps:$4 sm:$0xff]   ;;  %v2342_v13 = vld [vmem:[%s3120_s3 + $0xf4] ss:$8 sps:$4 sm:$0xff]  }
  0x4f   : > { %1227 = vmatpush1.bf16.msra.mxu1 %v2301_v49  ;;  %v2343_v14 = vld [vmem:[%s3120_s3 + $0x100] ss:$8 sps:$4 sm:$0xff]  }
  0x50   : > { %1228 = vmatprep.subr.bf16.mxu1 %v2309_v52 }
  0x51   : > { %915 = vmatpush1.bf16.msra.mxu0 %v2250_v15  ;;  %v2351_v15 = vld [vmem:[%s3120_s3 + $0x1f4] ss:$8 sps:$4 sm:$0xff]  }
  0x52   : > { %916 = vmatprep.subr.bf16.mxu0 %v2255_v16  ;;  %v2340_v16 = vld [vmem:[%s3120_s3 + $0xf0] ss:$8 sps:$4 sm:$0xff]  }
  0x53   : > { %1229 = vmatpush1.bf16.msra.mxu1 %v2307_v54 }
  0x54   : > { %1230 = vmatprep.subr.bf16.mxu1 %v2315_v55 }
  0x55   : > { %917 = vmatpush1.bf16.msra.mxu0 %v2253_v17  ;;  %v2348_v17 = vld [vmem:[%s3120_s3 + $0xe4] ss:$8 sps:$4 sm:$0xff]  }
  0x56   : > { %918 = vmatprep.subr.bf16.mxu0 %v2258_v18  ;;  %v2349_v18 = vld [vmem:[%s3120_s3 + $0x1f0] ss:$8 sps:$4 sm:$0xff]  }
  0x57   : > { %1231 = vmatpush1.bf16.msra.mxu1 %v2313_v58 }
  0x58   : > { %1232 = vmatprep.subr.bf16.mxu1 %v2321_v59 }
  0x59   : > { %919 = vmatpush1.bf16.msra.mxu0 %v2256_v19  ;;  %v2357_v19 = vld [vmem:[%s3120_s3 + $0x1e4] ss:$8 sps:$4 sm:$0xff]  }
  0x5a   : > { %920 = vmatprep.subr.bf16.mxu0 %v2261_v20  ;;  %v2346_v20 = vld [vmem:[%s3120_s3 + $0xe0] ss:$8 sps:$4 sm:$0xff]  }
  0x5b   : > { %1233 = vmatpush1.bf16.msra.mxu1 %v2319_v62 }
  0x5c   : > { %1234 = vmatprep.subr.bf16.mxu1 %v2327_v63 }
  0x5d   : > { %921 = vmatpush1.bf16.msra.mxu0 %v2259_v21  ;;  %v2354_v21 = vld [vmem:[%s3120_s3 + $0xd4] ss:$8 sps:$4 sm:$0xff]  }
  0x5e   : > { %922 = vmatprep.subr.bf16.mxu0 %v2264_v22  ;;  %v2355_v22 = vld [vmem:[%s3120_s3 + $0x1e0] ss:$8 sps:$4 sm:$0xff]  }
  0x5f   : > { %1235 = vmatpush1.bf16.msra.mxu1 %v2325_v2 }
  0x60   : > { %1236 = vmatprep.subr.bf16.mxu1 %v2333_v3 }
  0x61   : > { %923 = vmatpush1.bf16.msra.mxu0 %v2262_v23  ;;  %v2352_v23 = vld [vmem:[%s3120_s3 + $0xd0] ss:$8 sps:$4 sm:$0xff]  }
  0x62   : > { %924 = vmatprep.subr.bf16.mxu0 %v2267_v24  ;;  %v2360_v24 = vld [vmem:[%s3120_s3 + $0xc4] ss:$8 sps:$4 sm:$0xff]  }
  0x63   : > { %1237 = vmatpush1.bf16.msra.mxu1 %v2331_v6 }
  0x64   : > { %1238 = vmatprep.subr.bf16.mxu1 %v2339_v7 }
  0x65   : > { %925 = vmatpush1.bf16.msra.mxu0 %v2265_v25  ;;  %v2358_v25 = vld [vmem:[%s3120_s3 + $0xc0] ss:$8 sps:$4 sm:$0xff]  }
  0x66   : > { %926 = vmatprep.subr.bf16.mxu0 %v2270_v26  ;;  %v2363_v26 = vld [vmem:[%s3120_s3 + $0x1d4] ss:$8 sps:$4 sm:$0xff]  }
  0x67   : > { %1239 = vmatpush1.bf16.msra.mxu1 %v2337_v10 }
  0x68   : > { %1240 = vmatprep.subr.bf16.mxu1 %v2345_v11 }
  0x69   : > { %927 = vmatpush1.bf16.msra.mxu0 %v2268_v27  ;;  %v2361_v27 = vld [vmem:[%s3120_s3 + $0x1d0] ss:$8 sps:$4 sm:$0xff]  }
  0x6a   : > { %928 = vmatprep.subr.bf16.mxu0 %v2273_v28  ;;  %v2366_v28 = vld [vmem:[%s3120_s3 + $0xb4] ss:$8 sps:$4 sm:$0xff]  }
  0x6b   : > { %1241 = vmatpush1.bf16.msra.mxu1 %v2343_v14 }
  0x6c   : > { %1242 = vmatprep.subr.bf16.mxu1 %v2351_v15 }
  0x6d   : > { %929 = vmatpush2.bf16.msra.mxu0 %v2271_v29  ;;  %v2364_v29 = vld [vmem:[%s3120_s3 + $0xb0] ss:$8 sps:$4 sm:$0xff]  }
  0x6e   : > { %930 = vmatprep.subr.bf16.mxu0 %v2276_v30  ;;  %v2369_v30 = vld [vmem:[%s3120_s3 + $0x1c4] ss:$8 sps:$4 sm:$0xff]  }
  0x6f   : > { %1243 = vmatpush2.bf16.msra.mxu1 %v2349_v18 }
  0x70   : > { %1244 = vmatprep.subr.bf16.mxu1 %v2357_v19 }
  0x71   : > { %931 = vmatpush2.bf16.msra.mxu0 %v2274_v31  ;;  %v2447_v31 = vmov 0.0  }
  0x72   : > { %932 = vmatprep.subr.bf16.mxu0 %v2279_v32  ;;  %971 = vst [vmem:[#allocation2] sm:$0x3f] %v2447_v31  ;;  %972 = vst [vmem:[#allocation2 + $0x8] sm:$0x3f] %v2447_v31  ;;  %v2367_v32 = vld [vmem:[%s3120_s3 + $0x1c0] ss:$8 sps:$4 sm:$0xff]  }
  0x73   : > { %1245 = vmatpush2.bf16.msra.mxu1 %v2355_v22  ;;  %v2397_v31 = vld [vmem:[%s3120_s3 + $0x250] ss:$8 sps:$4 sm:$0xff]  }
  0x74   : > { %1246 = vmatprep.subr.bf16.mxu1 %v2363_v26 }
  0x75   : > { %933 = vmatpush2.bf16.msra.mxu0 %v2277_v33  ;;  %v2372_v33 = vld [vmem:[%s3120_s3 + $0xa4] ss:$8 sps:$4 sm:$0xff]  }
  0x76   : > { %934 = vmatprep.subr.bf16.mxu0 %v2282_v34  ;;  %v2370_v34 = vld [vmem:[%s3120_s3 + $0xa0] ss:$8 sps:$4 sm:$0xff]  }
  0x77   : > { %1247 = vmatpush2.bf16.msra.mxu1 %v2361_v27  ;;  %v2396_v27 = vld [vmem:[%s3120_s3 + $0x264] ss:$8 sps:$4 sm:$0xff]  }
  0x78   : > { %1248 = vmatprep.subr.bf16.mxu1 %v2369_v30  ;;  %v2399_v30 = vld [vmem:[%s3120_s3 + $0x254] ss:$8 sps:$4 sm:$0xff]  }
  0x79   : > { %935 = vmatpush2.bf16.msra.mxu0 %v2280_v35  ;;  %v2375_v35 = vld [vmem:[%s3120_s3 + $0x1b4] ss:$8 sps:$4 sm:$0xff]  }
  0x7a   : > { %936 = vmatprep.subr.bf16.mxu0 %v2285_v36  ;;  %v2373_v36 = vld [vmem:[%s3120_s3 + $0x1b0] ss:$8 sps:$4 sm:$0xff]  }
  0x7b   : > { %1249 = vmatpush2.bf16.msra.mxu1 %v2367_v32  ;;  %v2402_v32 = vld [vmem:[%s3120_s3 + $0x244] ss:$8 sps:$4 sm:$0xff]  }
  0x7c   : > { %1250 = vmatprep.subr.bf16.mxu1 %v2375_v35  ;;  %v2403_v35 = vld [vmem:[%s3120_s3 + $0x230] ss:$8 sps:$4 sm:$0xff]  }
  0x7d   : > { %937 = vmatpush2.bf16.msra.mxu0 %v2283_v37  ;;  %v2376_v37 = vld [vmem:[%s3120_s3 + $0x90] ss:$8 sps:$4 sm:$0xff]  }
  0x7e   : > { %938 = vmatprep.subr.bf16.mxu0 %v2288_v38  ;;  %v2378_v38 = vld [vmem:[%s3120_s3 + $0x94] ss:$8 sps:$4 sm:$0xff]  }
  0x7f   : > { %1251 = vmatpush2.bf16.msra.mxu1 %v2373_v36  ;;  %v2408_v36 = vld [vmem:[%s3120_s3 + $0x224] ss:$8 sps:$4 sm:$0xff]  }
  0x81   : > { %939 = vmatpush2.bf16.msra.mxu0 %v2286_v39  ;;  %v2379_v39 = vld [vmem:[%s3120_s3 + $0x1a0] ss:$8 sps:$4 sm:$0xff]  }
  0x82   : > { %940 = vmatprep.subr.bf16.mxu0 %v2291_v40  ;;  %v2381_v40 = vld [vmem:[%s3120_s3 + $0x1a4] ss:$8 sps:$4 sm:$0xff]  }
  0x83   : > { %1252 = vmatprep.subr.bf16.mxu1 %v2381_v40  ;;  %v2414_v40 = vld [vmem:[%s3120_s3 + $0x204] ss:$8 sps:$4 sm:$0xff]  }
  0x84   : > { %1253 = vmatpush2.bf16.msra.mxu1 %v2379_v39  ;;  %v2409_v39 = vld [vmem:[%s3120_s3 + $0x210] ss:$8 sps:$4 sm:$0xff]  }
  0x85   : > { %941 = vmatpush2.bf16.msra.mxu0 %v2289_v41  ;;  %v2384_v41 = vld [vmem:[%s3120_s3 + $0x84] ss:$8 sps:$4 sm:$0xff]  }
  0x86   : > { %942 = vmatprep.subr.bf16.mxu0 %v2294_v42  ;;  %v2387_v42 = vld [vmem:[%s3120_s3 + $0x194] ss:$8 sps:$4 sm:$0xff]  }
  0x87   : > { %1254 = vmatprep.subr.bf16.mxu1 %v2387_v42  ;;  %v2417_v42 = vld [vmem:[%s3120_s3 + $0x2f4] ss:$8 sps:$4 sm:$0xff]  }
  0x89   : > { %943 = vmatpush2.bf16.msra.mxu0 %v2292_v43  ;;  %v2382_v43 = vld [vmem:[%s3120_s3 + $0x80] ss:$8 sps:$4 sm:$0xff]  }
  0x8a   : > { %1427 = vmatprep.subr.bf16.mxu0 %v2297_v47  ;;  %v2388_v47 = vld [vmem:[%s3120_s3 + $0x180] ss:$8 sps:$4 sm:$0xff]  }
  0x8c   : > { %945 = vmatmul.mubr.bf16.vlgmr.msra.gmra.mxu0 %v748_v44  ;;  %v2385_v44 = vld [vmem:[%s3120_s3 + $0x190] ss:$8 sps:$4 sm:$0xff]  }
  0x8d   : > { %1428 = vmatpush1.bf16.msra.mxu0 %v2295_v45  ;;  %1255 = vmatpush2.bf16.msra.mxu1 %v2385_v44  ;;  %v2390_v45 = vld [vmem:[%s3120_s3 + $0x184] ss:$8 sps:$4 sm:$0xff]  }
  0x8e   : > { %1429 = vmatprep.subr.bf16.mxu0 %v2300_v48  ;;  %1256 = vmatprep.subr.bf16.mxu1 %v2390_v45  ;;  %v2393_v48 = vld [vmem:[%s3120_s3 + $0x274] ss:$8 sps:$4 sm:$0xff]   ;;  %v2420_v44 = vld [vmem:[%s3120_s3 + $0x2e4] ss:$8 sps:$4 sm:$0xff]   ;;  %v2418_v45 = vld [vmem:[%s3120_s3 + $0x2e0] ss:$8 sps:$4 sm:$0xff]  }
  0x91   : > { %1430 = vmatpush1.bf16.msra.mxu0 %v2298_v51  ;;  %1257 = vmatpush2.bf16.msra.mxu1 %v2388_v47  ;;  %v2423_v47 = vld [vmem:[%s3120_s3 + $0x2d4] ss:$8 sps:$4 sm:$0xff]  }
  0x92   : > { %1431 = vmatprep.subr.bf16.mxu0 %v2306_v53  ;;  %1667 = vmatprep.subr.bf16.mxu1 %v2393_v48  ;;  %v2421_v48 = vld [vmem:[%s3120_s3 + $0x2d0] ss:$8 sps:$4 sm:$0xff]  }
  0x95   : > { %1432 = vmatpush1.bf16.msra.mxu0 %v2304_v56 }
  0x96   : > { %1433 = vmatprep.subr.bf16.mxu0 %v2312_v57  ;;  %v957_v57 = vlaneseq }
  0x98   : > { %v2991_v58 = vshrl.u32 %v957_v57, 7  ;;  %v2438_v57 = vld [vmem:[%s3120_s3 + $0x284] ss:$8 sps:$4 sm:$0xff]  }
  0x99   : > { %1434 = vmatpush1.bf16.msra.mxu0 %v2310_v60  ;;  %v955_v60 = vld [vmem:[%s3119_s2] sm:$0x3] }
  0x9a   : > { %1435 = vmatprep.subr.bf16.mxu0 %v2318_v61  ;;  %v959_v59 = vsub.s32 0, %v2991_v58  ;;  %v963_v61 = vsub.s32 1, %v2991_v58 }
  0x9c   : > { %v960_v63 = vrot.slane %v955_v60, %v959_v59  ;;  %v964_v3 = vrot.slane %v955_v60, %v963_v61  ;;  %v2436_v60 = vld [vmem:[%s3120_s3 + $0x280] ss:$8 sps:$4 sm:$0xff]  }
  0x9d   : > { %1436 = vmatpush1.bf16.msra.mxu0 %v2316_v0 }
  0x9e   : > { %1437 = vmatprep.subr.bf16.mxu0 %v2324_v1 }
  0xa1   : > { %1438 = vmatpush1.bf16.msra.mxu0 %v2322_v4 }
  0xa2   : > { %1439 = vmatprep.subr.bf16.mxu0 %v2330_v5 }
  0xa5   : > { %1440 = vmatpush1.bf16.msra.mxu0 %v2328_v8 }
  0xa6   : > { %1441 = vmatprep.subr.bf16.mxu0 %v2336_v9 }
  0xa9   : > { %1442 = vmatpush1.bf16.msra.mxu0 %v2334_v12 }
  0xaa   : > { %1443 = vmatprep.subr.bf16.mxu0 %v2342_v13 }
  0xad   : > { %1444 = vmatpush2.bf16.msra.mxu0 %v2340_v16 }
  0xae   : > { %1445 = vmatprep.subr.bf16.mxu0 %v2348_v17 }
  0xb1   : > { %1446 = vmatpush2.bf16.msra.mxu0 %v2346_v20 }
  0xb2   : > { %1447 = vmatprep.subr.bf16.mxu0 %v2354_v21 }
  0xb5   : > { %1448 = vmatpush2.bf16.msra.mxu0 %v2352_v23 }
  0xb6   : > { %1449 = vmatprep.subr.bf16.mxu0 %v2360_v24 }
  0xb9   : > { %1450 = vmatpush2.bf16.msra.mxu0 %v2358_v25  ;;  %v2391_v25 = vld [vmem:[%s3120_s3 + $0x270] ss:$8 sps:$4 sm:$0xff]  }
  0xba   : > { %1451 = vmatprep.subr.bf16.mxu0 %v2366_v28 }
  0xbd   : > { %1452 = vmatpush2.bf16.msra.mxu0 %v2364_v29  ;;  %v2394_v29 = vld [vmem:[%s3120_s3 + $0x260] ss:$8 sps:$4 sm:$0xff]  }
  0xbe   : > { %1453 = vmatprep.subr.bf16.mxu0 %v2372_v33  ;;  %v2400_v33 = vld [vmem:[%s3120_s3 + $0x240] ss:$8 sps:$4 sm:$0xff]  }
  0xc1   : > { %1454 = vmatpush2.bf16.msra.mxu0 %v2370_v34  ;;  %v2405_v34 = vld [vmem:[%s3120_s3 + $0x234] ss:$8 sps:$4 sm:$0xff]  }
  0xc2   : > { %1455 = vmatprep.subr.bf16.mxu0 %v2378_v38  ;;  %v2411_v38 = vld [vmem:[%s3120_s3 + $0x214] ss:$8 sps:$4 sm:$0xff]  }
  0xc5   : > { %1456 = vmatpush2.bf16.msra.mxu0 %v2376_v37  ;;  %v2406_v37 = vld [vmem:[%s3120_s3 + $0x220] ss:$8 sps:$4 sm:$0xff]  }
  0xc6   : > { %1457 = vmatprep.subr.bf16.mxu0 %v2384_v41  ;;  %v2412_v41 = vld [vmem:[%s3120_s3 + $0x200] ss:$8 sps:$4 sm:$0xff]  }
  0xc9   : > { %1458 = vmatpush2.bf16.msra.mxu0 %v2382_v43  ;;  %v2415_v43 = vld [vmem:[%s3120_s3 + $0x2f0] ss:$8 sps:$4 sm:$0xff]  }
 0x10c   : > { %v505_v49 = vpop.f32.mrf.mxu0 }
 0x10d   : > { %v706_v50 = vpop.f32.mrf.mxu1 }
 0x10e   : > { %v507_v51 = vpop.f32.mrf.mxu0  ;;  %v707_v62 = vadd.f32 %v706_v50, %v505_v49  ;;  %v2426_v49 = vld [vmem:[%s3120_s3 + $0x2c4] ss:$8 sps:$4 sm:$0xff]   ;;  %v2424_v50 = vld [vmem:[%s3120_s3 + $0x2c0] ss:$8 sps:$4 sm:$0xff]  }
 0x10f   : > { %v708_v52 = vpop.f32.mrf.mxu1 }
 0x110   : > { %v509_v53 = vpop.f32.mrf.mxu0  ;;  %v709_v1 = vadd.f32 %v708_v52, %v507_v51  ;;  %v2429_v51 = vld [vmem:[%s3120_s3 + $0x2b4] ss:$8 sps:$4 sm:$0xff]   ;;  %v2427_v52 = vld [vmem:[%s3120_s3 + $0x2b0] ss:$8 sps:$4 sm:$0xff]  }
 0x111   : > { %v710_v54 = vpop.f32.mrf.mxu1  ;;  %v2432_v53 = vld [vmem:[%s3120_s3 + $0x2a4] ss:$8 sps:$4 sm:$0xff]  }
 0x112   : > { %v510_v55 = vpop.f32.mrf.mxu0  ;;  %v2430_v54 = vld [vmem:[%s3120_s3 + $0x2a0] ss:$8 sps:$4 sm:$0xff]  }
 0x113   : > { %v711_v56 = vpop.f32.mrf.mxu1  ;;  %v2435_v55 = vld [vmem:[%s3120_s3 + $0x294] ss:$8 sps:$4 sm:$0xff]  }
 0x114   : > { %v2433_v56 = vld [vmem:[%s3120_s3 + $0x290] ss:$8 sps:$4 sm:$0xff]  }
 0x14c   : > { %v946_v0 = vpop.f32.mrf.mxu0 }
 0x14d   : > { %v953_v2 = vadd.f32 %v946_v0, %v707_v62 }
 0x14e   : > { %v948_v4 = vpop.f32.mrf.mxu0 }
 0x14f   : > { %v967_v5 = vadd.f32 %v960_v63, %v953_v2  ;;  %v954_v6 = vadd.f32 %v948_v4, %v709_v1 }
 0x150   : > { %v950_v7 = vpop.f32.mrf.mxu0 }
 0x151   : > { %v969_v8 = vmax.f32 %v967_v5, 0.0  ;;  %v968_v9 = vadd.f32 %v964_v3, %v954_v6 }
 0x152   : > { %v951_v10 = vpop.f32.mrf.mxu0 }
 0x153   : > { %v975_v11 = vrot.slane %v969_v8, 7  ;;  %v970_v12 = vmax.f32 %v968_v9, 0.0  ;;  %v1710_v8 = vld [vmem:[%s3121_s4] sm:$0x3]  ;;  %v226_v9 = vunpack.c.l.bf16 %v2634_v46 }
 0x154   : > { %v1715_v10 = vrot.slane %v1710_v8, %v959_v59 }
 0x155   : > { %979 = vst [vmem:[#allocation2] sm:$0x1e] %v975_v11  ;;  %v976_v13 = vrot.slane %v970_v12, 7  ;;  %v227_v11 = vunpack.c.h.bf16 %v2634_v46 }
 0x157   : > { %980 = vst [vmem:[#allocation2 + $0x8] sm:$0x1e] %v976_v13 }
 0x15c   : > { %v981_v14 = vld [vmem:[#allocation2] sm:$0x3f] }
 0x15d   : > { %v3002_v15 = vpack.c.bf16 %v981_v14, %v981_v14 }
 0x15e   : > { %v982_v16 = vld [vmem:[#allocation2 + $0x8] sm:$0x3f] }
 0x15f   : > { %v984_v17 = vpack.c.bf16 %v982_v16, %v982_v16  ;;  %v1053_v18 = vshll.u32 %v3002_v15, 16  ;;  %v1051_v23 = vshrl.u32 %v3002_v15, 16  ;;  %v1503_v62 = vrot.slane %v3002_v15, 1 }
 0x160   : > { %v1719_v16 = vrot.slane %v1710_v8, %v963_v61 }
 0x161   : > { %1459 = vmatprep.mubr.bf16.mxu0 %v984_v17  ;;  %v1060_v19 = vshll.u32 %v984_v17, 16  ;;  %v1055_v20 = vrot.slane %v1053_v18, 1  ;;  %v1058_v21 = vshrl.u32 %v984_v17, 16  ;;  %v1504_v28 = vrot.slane %v984_v17, 1 }
 0x162   : > { %1460 = vmatmul.mubr.bf16.vlgmr.msra.gmra.mxu0 %v3002_v15  ;;  %v1726_v15 = vrot.slane %v226_v9, 1 }
 0x163   : > { %v1062_v22 = vrot.slane %v1060_v19, 1  ;;  %v1056_v26 = vor.u32 %v1055_v20, %v1051_v23  ;;  %v1727_v20 = vrot.slane %v227_v11, 1 }
 0x165   : > { %v1063_v24 = vor.u32 %v1062_v22, %v1058_v21 }
 0x167   : > { %1258 = vmatprep.mubr.bf16.mxu1 %v1063_v24 }
 0x168   : > { %1259 = vmatmul.mubr.bf16.vlgmr.msra.gmra.mxu1 %v1056_v26 }
 0x169   : > { %1668 = vmatpush1.bf16.msra.mxu1 %v2391_v25  ;;  %1699 = vmatprep.mubr.bf16.mxu1 %v1504_v28 }
 0x16a   : > { %1669 = vmatprep.subr.bf16.mxu1 %v2396_v27 }
 0x16d   : > { %1670 = vmatpush1.bf16.msra.mxu1 %v2394_v29 }
 0x16e   : > { %1671 = vmatprep.subr.bf16.mxu1 %v2399_v30 }
 0x171   : > { %1672 = vmatpush1.bf16.msra.mxu1 %v2397_v31 }
 0x172   : > { %1673 = vmatprep.subr.bf16.mxu1 %v2402_v32 }
 0x175   : > { %1674 = vmatpush1.bf16.msra.mxu1 %v2400_v33 }
 0x176   : > { %1675 = vmatprep.subr.bf16.mxu1 %v2405_v34 }
 0x179   : > { %1676 = vmatpush1.bf16.msra.mxu1 %v2403_v35 }
 0x17a   : > { %1677 = vmatprep.subr.bf16.mxu1 %v2408_v36 }
 0x17d   : > { %1678 = vmatpush1.bf16.msra.mxu1 %v2406_v37 }
 0x17e   : > { %1679 = vmatprep.subr.bf16.mxu1 %v2411_v38 }
 0x181   : > { %1680 = vmatpush1.bf16.msra.mxu1 %v2409_v39 }
 0x182   : > { %1681 = vmatprep.subr.bf16.mxu1 %v2414_v40 }
 0x185   : > { %1682 = vmatpush1.bf16.msra.mxu1 %v2412_v41 }
 0x186   : > { %1683 = vmatprep.subr.bf16.mxu1 %v2417_v42 }
 0x189   : > { %1684 = vmatpush2.bf16.msra.mxu1 %v2415_v43 }
 0x18a   : > { %1685 = vmatprep.subr.bf16.mxu1 %v2420_v44 }
 0x18d   : > { %1686 = vmatpush2.bf16.msra.mxu1 %v2418_v45 }
 0x18e   : > { %1687 = vmatprep.subr.bf16.mxu1 %v2423_v47 }
 0x191   : > { %1688 = vmatpush2.bf16.msra.mxu1 %v2421_v48 }
 0x192   : > { %1689 = vmatprep.subr.bf16.mxu1 %v2426_v49 }
 0x195   : > { %1690 = vmatpush2.bf16.msra.mxu1 %v2424_v50 }
 0x196   : > { %1691 = vmatprep.subr.bf16.mxu1 %v2429_v51 }
 0x199   : > { %1692 = vmatpush2.bf16.msra.mxu1 %v2427_v52 }
 0x19a   : > { %1693 = vmatprep.subr.bf16.mxu1 %v2432_v53 }
 0x19d   : > { %1694 = vmatpush2.bf16.msra.mxu1 %v2430_v54 }
 0x19e   : > { %1695 = vmatprep.subr.bf16.mxu1 %v2435_v55 }
 0x1a1   : > { %1696 = vmatpush2.bf16.msra.mxu1 %v2433_v56 }
 0x1a2   : > { %1697 = vmatprep.subr.bf16.mxu1 %v2438_v57 }
 0x1a5   : > { %1698 = vmatpush2.bf16.msra.mxu1 %v2436_v60 }
 0x1a8   : > { %1700 = vmatmul.mubr.bf16.vlgmr.msra.gmra.mxu1 %v1503_v62 }
 0x222   : > { %v1461_v63 = vpop.f32.mrf.mxu0 }
 0x224   : > { %v1463_v0 = vpop.f32.mrf.mxu0 }
 0x226   : > { %v1465_v1 = vpop.f32.mrf.mxu0 }
 0x228   : > { %v1260_v2 = vpop.f32.mrf.mxu1  ;;  %v1466_v3 = vpop.f32.mrf.mxu0 }
 0x229   : > { %v1462_v4 = vadd.f32 %v1461_v63, %v1260_v2 }
 0x22a   : > { %v1262_v5 = vpop.f32.mrf.mxu1 }
 0x22b   : > { %v1464_v13 = vadd.f32 %v1463_v0, %v1262_v5 }
 0x22c   : > { %v1264_v6 = vpop.f32.mrf.mxu1 }
 0x22e   : > { %v1265_v7 = vpop.f32.mrf.mxu1 }
 0x268   : > { %v1701_v12 = vpop.f32.mrf.mxu1 }
 0x269   : > { %v1708_v14 = vadd.f32 %v1701_v12, %v1462_v4 }
 0x26a   : > { %v1703_v17 = vpop.f32.mrf.mxu1 }
 0x26b   : > { %v1722_v18 = vadd.f32 %v1715_v10, %v1708_v14  ;;  %v1709_v19 = vadd.f32 %v1703_v17, %v1464_v13 }
 0x26c   : > { %v1705_v21 = vpop.f32.mrf.mxu1 }
 0x26d   : > { %v1730_v22 = vadd.f32 %v1726_v15, %v1722_v18  ;;  %v1723_v23 = vadd.f32 %v1719_v16, %v1709_v19 }
 0x26e   : > { %v1706_v24 = vpop.f32.mrf.mxu1 }
 0x26f   : > { %v1731_v25 = vadd.f32 %v1727_v20, %v1723_v23  ;;  %v1732_v59 = vmax.f32 %v1730_v22, 0.0 }
 0x271   : > { %v1733_v26 = vmax.f32 %v1731_v25, 0.0 }
 0x273   : > { %v2134_v46 = vpack.c.bf16 %v1733_v26, %v1732_v59 }
 0x275   : > { %2135 = vst.sshfl [vmem:[%s224_s24] sm:$0x33 pattern:$0x76325410] %v2134_v46 }
 0x276 PF: > { %s15_s18 = sadd.s32 1, %s2445_s18  }
 0x277   : > { %p12_p4 = scmp.ge.s32.totalorder %s15_s18, 4  }
 0x279   :  { %14 = sbr.rel (!%p12_p4) target bundleno = 1 (0x1), region = 74 }

// kernel: _lambda_.18
= control target key start
LH: loop header
LB: loop body
LE: loop exit
PB: predicated region body
PF: predicated region fallthrough
CT: control target
= control target key end

     0   :  { %s2931_s27 = smov 0   ;;  %s3675_s0 = inlined_call_operand.vmem [shape: bf16[2,5,256], index: 0, kind: input, shape index: {}]   ;;  %s3676_s1 = inlined_call_operand.vmem [shape: bf16[2,5,256], index: 1, kind: input, shape index: {}]   ;;  %s3677_s2 = inlined_call_operand.vmem [shape: bf16[3,256,256], index: 2, kind: input, shape index: {}]   ;;  %s3678_s3 = inlined_call_operand.vmem [shape: f32[1,256], index: 3, kind: input, shape index: {}]   ;;  %s3679_s4 = inlined_call_operand.vmem [shape: bf16[3,256,256], index: 4, kind: input, shape index: {}]   ;;  %s3680_s5 = inlined_call_operand.vmem [shape: f32[1,256], index: 5, kind: input, shape index: {}]   ;;  %s3681_s6 = inlined_call_operand.vmem [shape: bf16[256,256], index: 6, kind: input, shape index: {}]   ;;  %s3682_s7 = inlined_call_operand.vmem [shape: f32[1,256], index: 7, kind: input, shape index: {}]   ;;  %s3683_s8 = inlined_call_operand.vmem [shape: bf16[2,4,256], index: 8, kind: output, shape index: {}]  }
   0x1 LB: > { %s2154_s28 = sadd.s32 4294967295, %s2883_s27   ;;  %p2158_p0 = scmp.ge.s32.totalorder %s2883_s27, 1  ;;  %s2883_s27 = sphi %s2931_s27, %s18_s27  }
   0x2   : > { %p272_p1 = scmp.lt.s32.totalorder %s2883_s27, 3 }
   0x4   : > { %p273_p2 = pnand %p2158_p0, %p272_p1 }
   0x5   : > { %p311_p3 = scmp.lt.s32.totalorder (!%p273_p2), %s2154_s28, 1 }
   0x6   : > { %276 = sbr.rel (%p273_p2) target bundleno = 630 (0x276), region = 52 }
   0xb   : > { %v2537_v0 = vld [vmem:[%s3677_s2 + $0x174] ss:$8 sps:$4 sm:$0xff]   ;;  %v2541_v2 = vld [vmem:[%s3677_s2 + $0x170] ss:$8 sps:$4 sm:$0xff]   ;;  %v2543_v4 = vld [vmem:[%s3677_s2 + $0x164] ss:$8 sps:$4 sm:$0xff]  }
   0xc   : > { %v2539_v1 = vld [vmem:[%s3677_s2 + $0x74] ss:$8 sps:$4 sm:$0xff]   ;;  %561 = vmatprep.subr.bf16.mxu0 %v2537_v0  ;;  %v2542_v3 = vld [vmem:[%s3677_s2 + $0x70] ss:$8 sps:$4 sm:$0xff]   ;;  %v2545_v5 = vld [vmem:[%s3677_s2 + $0x64] ss:$8 sps:$4 sm:$0xff]  }
   0xd   : > { %762 = vmatprep.subr.bf16.mxu1 %v2539_v1  ;;  %562 = vmatpush1.bf16.msra.mxu0 %v2541_v2  ;;  %v2547_v6 = vld [vmem:[%s3677_s2 + $0x160] ss:$8 sps:$4 sm:$0xff]   ;;  %v2549_v8 = vld [vmem:[%s3677_s2 + $0x154] ss:$8 sps:$4 sm:$0xff]   ;;  %v2553_v10 = vld [vmem:[%s3677_s2 + $0x150] ss:$8 sps:$4 sm:$0xff]  }
   0xe   : > { %763 = vmatpush1.bf16.msra.mxu1 %v2542_v3  ;;  %563 = vmatprep.subr.bf16.mxu0 %v2543_v4  ;;  %v2548_v7 = vld [vmem:[%s3677_s2 + $0x60] ss:$8 sps:$4 sm:$0xff]   ;;  %v2551_v9 = vld [vmem:[%s3677_s2 + $0x54] ss:$8 sps:$4 sm:$0xff]   ;;  %v2554_v11 = vld [vmem:[%s3677_s2 + $0x50] ss:$8 sps:$4 sm:$0xff]  }
   0xf   : > { %764 = vmatprep.subr.bf16.mxu1 %v2545_v5  ;;  %v2555_v12 = vld [vmem:[%s3677_s2 + $0x144] ss:$8 sps:$4 sm:$0xff]   ;;  %v2559_v14 = vld [vmem:[%s3677_s2 + $0x140] ss:$8 sps:$4 sm:$0xff]   ;;  %v2561_v16 = vld [vmem:[%s3677_s2 + $0x134] ss:$8 sps:$4 sm:$0xff]  }
  0x10   : > { %v2557_v13 = vld [vmem:[%s3677_s2 + $0x44] ss:$8 sps:$4 sm:$0xff]   ;;  %v2560_v15 = vld [vmem:[%s3677_s2 + $0x40] ss:$8 sps:$4 sm:$0xff]   ;;  %v2563_v17 = vld [vmem:[%s3677_s2 + $0x34] ss:$8 sps:$4 sm:$0xff]  }
  0x11   : > { %564 = vmatpush1.bf16.msra.mxu0 %v2547_v6  ;;  %v2565_v18 = vld [vmem:[%s3677_s2 + $0x130] ss:$8 sps:$4 sm:$0xff]   ;;  %v2567_v20 = vld [vmem:[%s3677_s2 + $0x124] ss:$8 sps:$4 sm:$0xff]   ;;  %v2571_v22 = vld [vmem:[%s3677_s2 + $0x120] ss:$8 sps:$4 sm:$0xff]  }
  0x12   : > { %765 = vmatpush1.bf16.msra.mxu1 %v2548_v7  ;;  %565 = vmatprep.subr.bf16.mxu0 %v2549_v8  ;;  %v2566_v19 = vld [vmem:[%s3677_s2 + $0x30] ss:$8 sps:$4 sm:$0xff]   ;;  %v2569_v21 = vld [vmem:[%s3677_s2 + $0x24] ss:$8 sps:$4 sm:$0xff]   ;;  %v2572_v23 = vld [vmem:[%s3677_s2 + $0x20] ss:$8 sps:$4 sm:$0xff]  }
  0x13   : > { %766 = vmatprep.subr.bf16.mxu1 %v2551_v9  ;;  %v2573_v24 = vld [vmem:[%s3677_s2 + $0x114] ss:$8 sps:$4 sm:$0xff]   ;;  %v2577_v26 = vld [vmem:[%s3677_s2 + $0x110] ss:$8 sps:$4 sm:$0xff]   ;;  %v2579_v28 = vld [vmem:[%s3677_s2 + $0x104] ss:$8 sps:$4 sm:$0xff]  }
  0x14   : > { %v2575_v25 = vld [vmem:[%s3677_s2 + $0x14] ss:$8 sps:$4 sm:$0xff]   ;;  %v2578_v27 = vld [vmem:[%s3677_s2 + $0x10] ss:$8 sps:$4 sm:$0xff]   ;;  %v2581_v29 = vld [vmem:[%s3677_s2 + $0x4] ss:$8 sps:$4 sm:$0xff]  }
  0x15   : > { %566 = vmatpush1.bf16.msra.mxu0 %v2553_v10  ;;  %v2583_v30 = vld [vmem:[%s3677_s2 + $0x100] ss:$8 sps:$4 sm:$0xff]   ;;  %v2585_v32 = vld [vmem:[%s3677_s2 + $0x1f4] ss:$8 sps:$4 sm:$0xff]   ;;  %v2589_v34 = vld [vmem:[%s3677_s2 + $0x1f0] ss:$8 sps:$4 sm:$0xff]  }
  0x16   : > { %767 = vmatpush1.bf16.msra.mxu1 %v2554_v11  ;;  %567 = vmatprep.subr.bf16.mxu0 %v2555_v12  ;;  %v2584_v31 = vld [vmem:[%s3677_s2] ss:$8 sps:$4 sm:$0xff]   ;;  %v2587_v33 = vld [vmem:[%s3677_s2 + $0xf4] ss:$8 sps:$4 sm:$0xff]   ;;  %v2590_v35 = vld [vmem:[%s3677_s2 + $0xf0] ss:$8 sps:$4 sm:$0xff]  }
  0x17   : > { %768 = vmatprep.subr.bf16.mxu1 %v2557_v13  ;;  %v2591_v36 = vld [vmem:[%s3677_s2 + $0x1e4] ss:$8 sps:$4 sm:$0xff]   ;;  %s3685_s28 = smov (!%p311_p3, %s2154_s28), 1  ;;  %v2595_v38 = vld [vmem:[%s3677_s2 + $0x1e0] ss:$8 sps:$4 sm:$0xff]  }
  0x18   : > { %v2593_v37 = vld [vmem:[%s3677_s2 + $0xe4] ss:$8 sps:$4 sm:$0xff]   ;;  %v2596_v39 = vld [vmem:[%s3677_s2 + $0xe0] ss:$8 sps:$4 sm:$0xff]   ;;  %v2597_v40 = vld [vmem:[%s3677_s2 + $0x1d4] ss:$8 sps:$4 sm:$0xff]  }
  0x19   : > { %568 = vmatpush1.bf16.msra.mxu0 %v2559_v14  ;;  %s2525_s9 = sshll.u32 %s3685_s28, 3  ;;  %v2599_v41 = vld [vmem:[%s3677_s2 + $0xd4] ss:$8 sps:$4 sm:$0xff]   ;;  %v2601_v42 = vld [vmem:[%s3677_s2 + $0x1d0] ss:$8 sps:$4 sm:$0xff]   ;;  %s2527_s30 = sshll.u32 %s3685_s28, 2 }
  0x1a   : > { %769 = vmatpush1.bf16.msra.mxu1 %v2560_v15  ;;  %569 = vmatprep.subr.bf16.mxu0 %v2561_v16  ;;  %v2602_v43 = vld [vmem:[%s3677_s2 + $0xd0] ss:$8 sps:$4 sm:$0xff]   ;;  %s320_s18 = scalar_lea.vmem %s3676_s1, %s2525_s9  ;;  %v2603_v44 = vld [vmem:[%s3677_s2 + $0x1c4] ss:$8 sps:$4 sm:$0xff]   ;;  %s315_s23 = scalar_lea.vmem %s3675_s0, %s2525_s9  ;;  %v2607_v49 = vld [vmem:[%s3677_s2 + $0x1c0] ss:$8 sps:$4 sm:$0xff]  }
  0x1b   : > { %770 = vmatprep.subr.bf16.mxu1 %v2563_v17  ;;  %v2605_v45 = vld [vmem:[%s3677_s2 + $0xc4] ss:$8 sps:$4 sm:$0xff]   ;;  %v2608_v50 = vld [vmem:[%s3677_s2 + $0xc0] ss:$8 sps:$4 sm:$0xff]   ;;  %v2609_v52 = vld [vmem:[%s3677_s2 + $0x1b4] ss:$8 sps:$4 sm:$0xff]   ;;  %s325_s11 = scalar_lea.vmem %s3683_s8, %s2527_s30 }
  0x1c   : > { %v329_v46 = vld [vmem:[%s320_s18] sm:$0x77]  ;;  %v2611_v53 = vld [vmem:[%s3677_s2 + $0xb4] ss:$8 sps:$4 sm:$0xff]   ;;  %v2613_v54 = vld [vmem:[%s3677_s2 + $0x1b0] ss:$8 sps:$4 sm:$0xff]  }
  0x1d   : > { %570 = vmatpush1.bf16.msra.mxu0 %v2565_v18  ;;  %v3090_v47 = vcombine.high %v329_v46, %v329_v46  ;;  %v326_v48 = vld [vmem:[%s315_s23] sm:$0x77]  ;;  %v2614_v55 = vld [vmem:[%s3677_s2 + $0xb0] ss:$8 sps:$4 sm:$0xff]   ;;  %v2621_v60 = vld [vmem:[%s3677_s2 + $0x194] ss:$8 sps:$4 sm:$0xff]   ;;  %v3150_v8 = vcombine.low %v329_v46, %v329_v46 }
  0x1e   : > { %771 = vmatpush1.bf16.msra.mxu1 %v2566_v19  ;;  %571 = vmatprep.subr.bf16.mxu0 %v2567_v20  ;;  %v2166_v51 = vcombine.high %v326_v48, %v326_v48  ;;  %v2615_v56 = vld [vmem:[%s3677_s2 + $0x1a4] ss:$8 sps:$4 sm:$0xff]   ;;  %v2619_v58 = vld [vmem:[%s3677_s2 + $0x1a0] ss:$8 sps:$4 sm:$0xff]   ;;  %v2623_v61 = vld [vmem:[%s3677_s2 + $0x94] ss:$8 sps:$4 sm:$0xff]   ;;  %v3152_v9 = vcombine.low %v326_v48, %v326_v48 }
  0x1f   : > { %772 = vmatprep.subr.bf16.mxu1 %v2569_v21  ;;  %593 = vmatprep.mubr.bf16.mxu0 %v3090_v47  ;;  %v2617_v57 = vld [vmem:[%s3677_s2 + $0xa4] ss:$8 sps:$4 sm:$0xff]   ;;  %v2620_v59 = vld [vmem:[%s3677_s2 + $0xa0] ss:$8 sps:$4 sm:$0xff]   ;;  %v2625_v62 = vld [vmem:[%s3677_s2 + $0x190] ss:$8 sps:$4 sm:$0xff]  }
  0x20   : > { %794 = vmatprep.mubr.bf16.mxu1 %v2166_v51  ;;  %v2626_v63 = vld [vmem:[%s3677_s2 + $0x90] ss:$8 sps:$4 sm:$0xff]   ;;  %v846_v0 = vshll.u32 %v2166_v51, 16  ;;  %v2627_v1 = vld [vmem:[%s3677_s2 + $0x184] ss:$8 sps:$4 sm:$0xff]   ;;  %v844_v5 = vshrl.u32 %v2166_v51, 16 }
  0x21   : > { %572 = vmatpush1.bf16.msra.mxu0 %v2571_v22  ;;  %v2629_v2 = vld [vmem:[%s3677_s2 + $0x84] ss:$8 sps:$4 sm:$0xff]   ;;  %v2631_v3 = vld [vmem:[%s3677_s2 + $0x180] ss:$8 sps:$4 sm:$0xff]   ;;  %v2639_v7 = vld [vmem:[%s3677_s2 + $0x274] ss:$8 sps:$4 sm:$0xff]  }
  0x22   : > { %773 = vmatpush1.bf16.msra.mxu1 %v2572_v23  ;;  %573 = vmatprep.subr.bf16.mxu0 %v2573_v24  ;;  %v2632_v4 = vld [vmem:[%s3677_s2 + $0x80] ss:$8 sps:$4 sm:$0xff]   ;;  %v848_v6 = vrot.slane %v846_v0, 1  ;;  %v2637_v10 = vld [vmem:[%s3677_s2 + $0x270] ss:$8 sps:$4 sm:$0xff]   ;;  %v837_v0 = vshrl.u32 %v3152_v9, 16 }
  0x23   : > { %774 = vmatprep.subr.bf16.mxu1 %v2575_v25  ;;  %v2642_v12 = vld [vmem:[%s3677_s2 + $0x264] ss:$8 sps:$4 sm:$0xff]   ;;  %v2687_v13 = vld [vmem:[%s3681_s6 + $0x74] ss:$8 sps:$4 sm:$0xff]   ;;  %v2685_v14 = vld [vmem:[%s3681_s6 + $0x70] ss:$8 sps:$4 sm:$0xff]  }
  0x24   : > { %v849_v11 = vor.u32 %v848_v6, %v844_v5  ;;  %v2690_v15 = vld [vmem:[%s3681_s6 + $0x64] ss:$8 sps:$4 sm:$0xff]   ;;  %v2640_v16 = vld [vmem:[%s3677_s2 + $0x260] ss:$8 sps:$4 sm:$0xff]   ;;  %v2645_v17 = vld [vmem:[%s3677_s2 + $0x254] ss:$8 sps:$4 sm:$0xff]  }
  0x25   : > { %574 = vmatpush1.bf16.msra.mxu0 %v2577_v26  ;;  %v2688_v18 = vld [vmem:[%s3681_s6 + $0x60] ss:$8 sps:$4 sm:$0xff]   ;;  %v2693_v19 = vld [vmem:[%s3681_s6 + $0x54] ss:$8 sps:$4 sm:$0xff]   ;;  %v2643_v20 = vld [vmem:[%s3677_s2 + $0x250] ss:$8 sps:$4 sm:$0xff]  }
  0x26   : > { %775 = vmatpush1.bf16.msra.mxu1 %v2578_v27  ;;  %575 = vmatprep.subr.bf16.mxu0 %v2579_v28  ;;  %v2648_v21 = vld [vmem:[%s3677_s2 + $0x244] ss:$8 sps:$4 sm:$0xff]   ;;  %v2691_v22 = vld [vmem:[%s3681_s6 + $0x50] ss:$8 sps:$4 sm:$0xff]   ;;  %v2646_v24 = vld [vmem:[%s3677_s2 + $0x240] ss:$8 sps:$4 sm:$0xff]  }
  0x27   : > { %776 = vmatprep.subr.bf16.mxu1 %v2581_v29  ;;  %v2696_v23 = vld [vmem:[%s3681_s6 + $0x44] ss:$8 sps:$4 sm:$0xff]   ;;  %v2651_v25 = vld [vmem:[%s3677_s2 + $0x234] ss:$8 sps:$4 sm:$0xff]   ;;  %v2649_v26 = vld [vmem:[%s3677_s2 + $0x230] ss:$8 sps:$4 sm:$0xff]  }
  0x28   : > { %v2694_v27 = vld [vmem:[%s3681_s6 + $0x40] ss:$8 sps:$4 sm:$0xff]   ;;  %v2654_v28 = vld [vmem:[%s3677_s2 + $0x224] ss:$8 sps:$4 sm:$0xff]   ;;  %v2699_v29 = vld [vmem:[%s3681_s6 + $0x34] ss:$8 sps:$4 sm:$0xff]  }
  0x29   : > { %576 = vmatpush1.bf16.msra.mxu0 %v2583_v30  ;;  %v2697_v30 = vld [vmem:[%s3681_s6 + $0x30] ss:$8 sps:$4 sm:$0xff]   ;;  %v2664_v48 = vld [vmem:[%s3677_s2 + $0x2e0] ss:$8 sps:$4 sm:$0xff]   ;;  %v2717_v51 = vld [vmem:[%s3681_s6 + $0xd4] ss:$8 sps:$4 sm:$0xff]  }
  0x2a   : > { %777 = vmatpush1.bf16.msra.mxu1 %v2584_v31  ;;  %577 = vmatprep.subr.bf16.mxu0 %v2585_v32  ;;  %v2702_v31 = vld [vmem:[%s3681_s6 + $0x24] ss:$8 sps:$4 sm:$0xff]   ;;  %v2652_v32 = vld [vmem:[%s3677_s2 + $0x220] ss:$8 sps:$4 sm:$0xff]   ;;  %v2709_v46 = vld [vmem:[%s3681_s6 + $0xf0] ss:$8 sps:$4 sm:$0xff]  }
  0x2b   : > { %778 = vmatprep.subr.bf16.mxu1 %v2587_v33  ;;  %v2657_v33 = vld [vmem:[%s3677_s2 + $0x214] ss:$8 sps:$4 sm:$0xff]   ;;  %v2718_v5 = vld [vmem:[%s3681_s6 + $0xc0] ss:$8 sps:$4 sm:$0xff]  }
  0x2c   : > { %v2723_v6 = vld [vmem:[%s3681_s6 + $0xb4] ss:$8 sps:$4 sm:$0xff]  }
  0x2d   : > { %578 = vmatpush2.bf16.msra.mxu0 %v2589_v34  ;;  %v2700_v34 = vld [vmem:[%s3681_s6 + $0x20] ss:$8 sps:$4 sm:$0xff]  }
  0x2e   : > { %779 = vmatpush2.bf16.msra.mxu1 %v2590_v35  ;;  %579 = vmatprep.subr.bf16.mxu0 %v2591_v36  ;;  %v2705_v35 = vld [vmem:[%s3681_s6 + $0x14] ss:$8 sps:$4 sm:$0xff]   ;;  %v2655_v36 = vld [vmem:[%s3677_s2 + $0x210] ss:$8 sps:$4 sm:$0xff]  }
  0x2f   : > { %780 = vmatprep.subr.bf16.mxu1 %v2593_v37  ;;  %v2660_v37 = vld [vmem:[%s3677_s2 + $0x204] ss:$8 sps:$4 sm:$0xff]  }
  0x31   : > { %580 = vmatpush2.bf16.msra.mxu0 %v2595_v38  ;;  %v2703_v38 = vld [vmem:[%s3681_s6 + $0x10] ss:$8 sps:$4 sm:$0xff]  }
  0x32   : > { %781 = vmatpush2.bf16.msra.mxu1 %v2596_v39  ;;  %581 = vmatprep.subr.bf16.mxu0 %v2597_v40  ;;  %v2708_v39 = vld [vmem:[%s3681_s6 + $0x4] ss:$8 sps:$4 sm:$0xff]   ;;  %v2658_v40 = vld [vmem:[%s3677_s2 + $0x200] ss:$8 sps:$4 sm:$0xff]  }
  0x33   : > { %782 = vmatprep.subr.bf16.mxu1 %v2599_v41  ;;  %v2663_v41 = vld [vmem:[%s3677_s2 + $0x2f4] ss:$8 sps:$4 sm:$0xff]  }
  0x35   : > { %582 = vmatpush2.bf16.msra.mxu0 %v2601_v42  ;;  %v2706_v42 = vld [vmem:[%s3681_s6] ss:$8 sps:$4 sm:$0xff]  }
  0x36   : > { %783 = vmatpush2.bf16.msra.mxu1 %v2602_v43  ;;  %583 = vmatprep.subr.bf16.mxu0 %v2603_v44  ;;  %v2711_v43 = vld [vmem:[%s3681_s6 + $0xf4] ss:$8 sps:$4 sm:$0xff]   ;;  %v2661_v44 = vld [vmem:[%s3677_s2 + $0x2f0] ss:$8 sps:$4 sm:$0xff]  }
  0x37   : > { %784 = vmatprep.subr.bf16.mxu1 %v2605_v45  ;;  %v2666_v45 = vld [vmem:[%s3677_s2 + $0x2e4] ss:$8 sps:$4 sm:$0xff]  }
  0x39   : > { %584 = vmatpush2.bf16.msra.mxu0 %v2607_v49  ;;  %v2669_v49 = vld [vmem:[%s3677_s2 + $0x2d4] ss:$8 sps:$4 sm:$0xff]  }
  0x3a   : > { %785 = vmatpush2.bf16.msra.mxu1 %v2608_v50  ;;  %585 = vmatprep.subr.bf16.mxu0 %v2609_v52  ;;  %v2712_v50 = vld [vmem:[%s3681_s6 + $0xe0] ss:$8 sps:$4 sm:$0xff]   ;;  %v2667_v52 = vld [vmem:[%s3677_s2 + $0x2d0] ss:$8 sps:$4 sm:$0xff]  }
  0x3b   : > { %786 = vmatprep.subr.bf16.mxu1 %v2611_v53  ;;  %v2672_v53 = vld [vmem:[%s3677_s2 + $0x2c4] ss:$8 sps:$4 sm:$0xff]  }
  0x3d   : > { %586 = vmatpush2.bf16.msra.mxu0 %v2613_v54  ;;  %v2715_v54 = vld [vmem:[%s3681_s6 + $0xd0] ss:$8 sps:$4 sm:$0xff]  }
  0x3e   : > { %787 = vmatpush2.bf16.msra.mxu1 %v2614_v55  ;;  %587 = vmatprep.subr.bf16.mxu0 %v2615_v56  ;;  %v2670_v55 = vld [vmem:[%s3677_s2 + $0x2c0] ss:$8 sps:$4 sm:$0xff]   ;;  %v2675_v56 = vld [vmem:[%s3677_s2 + $0x2b4] ss:$8 sps:$4 sm:$0xff]  }
  0x3f   : > { %788 = vmatprep.subr.bf16.mxu1 %v2617_v57  ;;  %v2673_v57 = vld [vmem:[%s3677_s2 + $0x2b0] ss:$8 sps:$4 sm:$0xff]  }
  0x41   : > { %588 = vmatpush2.bf16.msra.mxu0 %v2619_v58  ;;  %v2678_v58 = vld [vmem:[%s3677_s2 + $0x2a4] ss:$8 sps:$4 sm:$0xff]  }
  0x42   : > { %789 = vmatpush2.bf16.msra.mxu1 %v2620_v59  ;;  %589 = vmatprep.subr.bf16.mxu0 %v2621_v60  ;;  %v2676_v59 = vld [vmem:[%s3677_s2 + $0x2a0] ss:$8 sps:$4 sm:$0xff]   ;;  %v2681_v60 = vld [vmem:[%s3677_s2 + $0x294] ss:$8 sps:$4 sm:$0xff]  }
  0x43   : > { %790 = vmatprep.subr.bf16.mxu1 %v2623_v61  ;;  %v839_v61 = vshll.u32 %v3152_v9, 16 }
  0x45   : > { %590 = vmatpush2.bf16.msra.mxu0 %v2625_v62  ;;  %v2679_v62 = vld [vmem:[%s3677_s2 + $0x290] ss:$8 sps:$4 sm:$0xff]  }
  0x46   : > { %791 = vmatpush2.bf16.msra.mxu1 %v2626_v63  ;;  %591 = vmatprep.subr.bf16.mxu0 %v2627_v1  ;;  %v2684_v63 = vld [vmem:[%s3677_s2 + $0x284] ss:$8 sps:$4 sm:$0xff]   ;;  %v841_v1 = vrot.slane %v839_v61, 1  ;;  %v2802_v61 = vld [vmem:[%s3679_s4 + $0xb0] ss:$8 sps:$4 sm:$0xff]  }
  0x47   : > { %792 = vmatprep.subr.bf16.mxu1 %v2629_v2  ;;  %v2682_v2 = vld [vmem:[%s3677_s2 + $0x280] ss:$8 sps:$4 sm:$0xff]  }
  0x49   : > { %592 = vmatpush2.bf16.msra.mxu0 %v2631_v3  ;;  %v842_v3 = vor.u32 %v841_v1, %v837_v0  ;;  %v2805_v0 = vld [vmem:[%s3679_s4 + $0x1c0] ss:$8 sps:$4 sm:$0xff]   ;;  %v2810_v1 = vld [vmem:[%s3679_s4 + $0xa4] ss:$8 sps:$4 sm:$0xff]  }
  0x4a   : > { %793 = vmatpush2.bf16.msra.mxu1 %v2632_v4  ;;  %1012 = vmatprep.subr.bf16.mxu0 %v2639_v7  ;;  %v2720_v4 = vld [vmem:[%s3681_s6 + $0xc4] ss:$8 sps:$4 sm:$0xff]   ;;  %v2721_v7 = vld [vmem:[%s3681_s6 + $0xb0] ss:$8 sps:$4 sm:$0xff]  }
  0x4b   : > { %1275 = vmatprep.subr.bf16.mxu1 %v2687_v13  ;;  %v2741_v13 = vld [vmem:[%s3679_s4 + $0x174] ss:$8 sps:$4 sm:$0xff]  }
  0x4c   : > { %594 = vmatmul.mubr.bf16.vlgmr.msra.gmra.mxu0 %v3150_v8 }
  0x4d   : > { %795 = vmatmul.mubr.bf16.vlgmr.msra.gmra.mxu1 %v3152_v9  ;;  %1013 = vmatpush1.bf16.msra.mxu0 %v2637_v10  ;;  %v2726_v9 = vld [vmem:[%s3681_s6 + $0xa4] ss:$8 sps:$4 sm:$0xff]   ;;  %v2724_v10 = vld [vmem:[%s3681_s6 + $0xa0] ss:$8 sps:$4 sm:$0xff]  }
  0x4e   : > { %1044 = vmatprep.mubr.bf16.mxu0 %v849_v11  ;;  %1014 = vmatprep.subr.bf16.mxu0 %v2642_v12  ;;  %v2729_v11 = vld [vmem:[%s3681_s6 + $0x94] ss:$8 sps:$4 sm:$0xff]   ;;  %v2739_v12 = vld [vmem:[%s3679_s4 + $0x170] ss:$8 sps:$4 sm:$0xff]  }
  0x4f   : > { %1276 = vmatpush1.bf16.msra.mxu1 %v2685_v14  ;;  %1307 = vmatprep.mubr.bf16.mxu1 %v3090_v47  ;;  %v2714_v47 = vld [vmem:[%s3681_s6 + $0xe4] ss:$8 sps:$4 sm:$0xff]   ;;  %v2727_v14 = vld [vmem:[%s3681_s6 + $0x90] ss:$8 sps:$4 sm:$0xff]  }
  0x50   : > { %1277 = vmatprep.subr.bf16.mxu1 %v2690_v15  ;;  %v2747_v15 = vld [vmem:[%s3679_s4 + $0x164] ss:$8 sps:$4 sm:$0xff]  }
  0x51   : > { %1015 = vmatpush1.bf16.msra.mxu0 %v2640_v16  ;;  %v2732_v16 = vld [vmem:[%s3681_s6 + $0x84] ss:$8 sps:$4 sm:$0xff]  }
  0x52   : > { %1016 = vmatprep.subr.bf16.mxu0 %v2645_v17  ;;  %v2745_v17 = vld [vmem:[%s3679_s4 + $0x160] ss:$8 sps:$4 sm:$0xff]  }
  0x53   : > { %1278 = vmatpush1.bf16.msra.mxu1 %v2688_v18  ;;  %v2753_v18 = vld [vmem:[%s3679_s4 + $0x154] ss:$8 sps:$4 sm:$0xff]  }
  0x54   : > { %1279 = vmatprep.subr.bf16.mxu1 %v2693_v19  ;;  %v2730_v19 = vld [vmem:[%s3681_s6 + $0x80] ss:$8 sps:$4 sm:$0xff]  }
  0x55   : > { %1017 = vmatpush1.bf16.msra.mxu0 %v2643_v20  ;;  %v2735_v20 = vld [vmem:[%s3679_s4 + $0x74] ss:$8 sps:$4 sm:$0xff]  }
  0x56   : > { %1018 = vmatprep.subr.bf16.mxu0 %v2648_v21  ;;  %v2751_v21 = vld [vmem:[%s3679_s4 + $0x150] ss:$8 sps:$4 sm:$0xff]  }
  0x57   : > { %1280 = vmatpush1.bf16.msra.mxu1 %v2691_v22  ;;  %v2759_v22 = vld [vmem:[%s3679_s4 + $0x144] ss:$8 sps:$4 sm:$0xff]  }
  0x58   : > { %1281 = vmatprep.subr.bf16.mxu1 %v2696_v23  ;;  %v2733_v23 = vld [vmem:[%s3679_s4 + $0x70] ss:$8 sps:$4 sm:$0xff]  }
  0x59   : > { %1019 = vmatpush1.bf16.msra.mxu0 %v2646_v24  ;;  %v2738_v24 = vld [vmem:[%s3679_s4 + $0x64] ss:$8 sps:$4 sm:$0xff]  }
  0x5a   : > { %1020 = vmatprep.subr.bf16.mxu0 %v2651_v25  ;;  %v2757_v25 = vld [vmem:[%s3679_s4 + $0x140] ss:$8 sps:$4 sm:$0xff]  }
  0x5b   : > { %1282 = vmatpush1.bf16.msra.mxu1 %v2694_v27  ;;  %v2736_v27 = vld [vmem:[%s3679_s4 + $0x60] ss:$8 sps:$4 sm:$0xff]  }
  0x5c   : > { %1283 = vmatprep.subr.bf16.mxu1 %v2699_v29  ;;  %v2763_v29 = vld [vmem:[%s3679_s4 + $0x130] ss:$8 sps:$4 sm:$0xff]  }
  0x5d   : > { %1021 = vmatpush1.bf16.msra.mxu0 %v2649_v26  ;;  %v2765_v26 = vld [vmem:[%s3679_s4 + $0x134] ss:$8 sps:$4 sm:$0xff]  }
  0x5e   : > { %1022 = vmatprep.subr.bf16.mxu0 %v2654_v28  ;;  %v2744_v28 = vld [vmem:[%s3679_s4 + $0x54] ss:$8 sps:$4 sm:$0xff]  }
  0x5f   : > { %1284 = vmatpush1.bf16.msra.mxu1 %v2697_v30  ;;  %v2742_v30 = vld [vmem:[%s3679_s4 + $0x50] ss:$8 sps:$4 sm:$0xff]  }
  0x60   : > { %1285 = vmatprep.subr.bf16.mxu1 %v2702_v31  ;;  %v2750_v31 = vld [vmem:[%s3679_s4 + $0x44] ss:$8 sps:$4 sm:$0xff]  }
  0x61   : > { %1023 = vmatpush1.bf16.msra.mxu0 %v2652_v32  ;;  %v2769_v32 = vld [vmem:[%s3679_s4 + $0x120] ss:$8 sps:$4 sm:$0xff]  }
  0x62   : > { %1024 = vmatprep.subr.bf16.mxu0 %v2657_v33  ;;  %v2777_v33 = vld [vmem:[%s3679_s4 + $0x114] ss:$8 sps:$4 sm:$0xff]  }
  0x63   : > { %1286 = vmatpush1.bf16.msra.mxu1 %v2700_v34  ;;  %v2748_v34 = vld [vmem:[%s3679_s4 + $0x40] ss:$8 sps:$4 sm:$0xff]  }
  0x64   : > { %1287 = vmatprep.subr.bf16.mxu1 %v2705_v35  ;;  %v2756_v35 = vld [vmem:[%s3679_s4 + $0x34] ss:$8 sps:$4 sm:$0xff]  }
  0x65   : > { %1025 = vmatpush1.bf16.msra.mxu0 %v2655_v36  ;;  %v2775_v36 = vld [vmem:[%s3679_s4 + $0x110] ss:$8 sps:$4 sm:$0xff]  }
  0x66   : > { %1026 = vmatprep.subr.bf16.mxu0 %v2660_v37  ;;  %v2783_v37 = vld [vmem:[%s3679_s4 + $0x104] ss:$8 sps:$4 sm:$0xff]  }
  0x67   : > { %1288 = vmatpush1.bf16.msra.mxu1 %v2703_v38  ;;  %v2754_v38 = vld [vmem:[%s3679_s4 + $0x30] ss:$8 sps:$4 sm:$0xff]  }
  0x68   : > { %1289 = vmatprep.subr.bf16.mxu1 %v2708_v39  ;;  %v2762_v39 = vld [vmem:[%s3679_s4 + $0x24] ss:$8 sps:$4 sm:$0xff]  }
  0x69   : > { %1027 = vmatpush1.bf16.msra.mxu0 %v2658_v40  ;;  %v2781_v40 = vld [vmem:[%s3679_s4 + $0x100] ss:$8 sps:$4 sm:$0xff]  }
  0x6a   : > { %1028 = vmatprep.subr.bf16.mxu0 %v2663_v41  ;;  %v2789_v41 = vld [vmem:[%s3679_s4 + $0x1f4] ss:$8 sps:$4 sm:$0xff]  }
  0x6b   : > { %1290 = vmatpush1.bf16.msra.mxu1 %v2706_v42  ;;  %v2760_v42 = vld [vmem:[%s3679_s4 + $0x20] ss:$8 sps:$4 sm:$0xff]  }
  0x6c   : > { %1291 = vmatprep.subr.bf16.mxu1 %v2711_v43  ;;  %v2768_v43 = vld [vmem:[%s3679_s4 + $0x14] ss:$8 sps:$4 sm:$0xff]  }
  0x6d   : > { %1029 = vmatpush2.bf16.msra.mxu0 %v2661_v44  ;;  %v2787_v44 = vld [vmem:[%s3679_s4 + $0x1f0] ss:$8 sps:$4 sm:$0xff]  }
  0x6e   : > { %1030 = vmatprep.subr.bf16.mxu0 %v2666_v45  ;;  %v2795_v45 = vld [vmem:[%s3679_s4 + $0x1e4] ss:$8 sps:$4 sm:$0xff]  }
  0x6f   : > { %1292 = vmatpush2.bf16.msra.mxu1 %v2709_v46  ;;  %v2766_v46 = vld [vmem:[%s3679_s4 + $0x10] ss:$8 sps:$4 sm:$0xff]  }
  0x70   : > { %1293 = vmatprep.subr.bf16.mxu1 %v2714_v47  ;;  %v2774_v47 = vld [vmem:[%s3679_s4 + $0x4] ss:$8 sps:$4 sm:$0xff]  }
  0x71   : > { %1031 = vmatpush2.bf16.msra.mxu0 %v2664_v48  ;;  %v2793_v48 = vld [vmem:[%s3679_s4 + $0x1e0] ss:$8 sps:$4 sm:$0xff]  }
  0x72   : > { %1032 = vmatprep.subr.bf16.mxu0 %v2669_v49  ;;  %v2772_v49 = vld [vmem:[%s3679_s4] ss:$8 sps:$4 sm:$0xff]  }
  0x73   : > { %1294 = vmatpush2.bf16.msra.mxu1 %v2712_v50  ;;  %v2780_v50 = vld [vmem:[%s3679_s4 + $0xf4] ss:$8 sps:$4 sm:$0xff]  }
  0x74   : > { %1295 = vmatprep.subr.bf16.mxu1 %v2717_v51  ;;  %v2778_v51 = vld [vmem:[%s3679_s4 + $0xf0] ss:$8 sps:$4 sm:$0xff]  }
  0x75   : > { %1033 = vmatpush2.bf16.msra.mxu0 %v2667_v52  ;;  %v2786_v52 = vld [vmem:[%s3679_s4 + $0xe4] ss:$8 sps:$4 sm:$0xff]  }
  0x76   : > { %1034 = vmatprep.subr.bf16.mxu0 %v2672_v53  ;;  %v2784_v53 = vld [vmem:[%s3679_s4 + $0xe0] ss:$8 sps:$4 sm:$0xff]  }
  0x77   : > { %1296 = vmatpush2.bf16.msra.mxu1 %v2715_v54  ;;  %v2792_v54 = vld [vmem:[%s3679_s4 + $0xd4] ss:$8 sps:$4 sm:$0xff]  }
  0x78   : > { %1297 = vmatprep.subr.bf16.mxu1 %v2720_v4  ;;  %v2811_v4 = vld [vmem:[%s3679_s4 + $0x1b0] ss:$8 sps:$4 sm:$0xff]  }
  0x79   : > { %1035 = vmatpush2.bf16.msra.mxu0 %v2670_v55  ;;  %v2790_v55 = vld [vmem:[%s3679_s4 + $0xd0] ss:$8 sps:$4 sm:$0xff]  }
  0x7a   : > { %1036 = vmatprep.subr.bf16.mxu0 %v2675_v56  ;;  %v2798_v56 = vld [vmem:[%s3679_s4 + $0xc4] ss:$8 sps:$4 sm:$0xff]  }
  0x7b   : > { %1298 = vmatpush2.bf16.msra.mxu1 %v2718_v5  ;;  %v2814_v5 = vld [vmem:[%s3679_s4 + $0x90] ss:$8 sps:$4 sm:$0xff]  }
  0x7c   : > { %1299 = vmatprep.subr.bf16.mxu1 %v2723_v6  ;;  %v2816_v6 = vld [vmem:[%s3679_s4 + $0x94] ss:$8 sps:$4 sm:$0xff]  }
  0x7d   : > { %1037 = vmatpush2.bf16.msra.mxu0 %v2673_v57  ;;  %v2796_v57 = vld [vmem:[%s3679_s4 + $0xc0] ss:$8 sps:$4 sm:$0xff]  }
  0x7e   : > { %1038 = vmatprep.subr.bf16.mxu0 %v2678_v58  ;;  %v2801_v58 = vld [vmem:[%s3679_s4 + $0x1d4] ss:$8 sps:$4 sm:$0xff]  }
  0x7f   : > { %1300 = vmatpush2.bf16.msra.mxu1 %v2721_v7  ;;  %v2817_v7 = vld [vmem:[%s3679_s4 + $0x1a0] ss:$8 sps:$4 sm:$0xff]  }
  0x80   : > { %1301 = vmatprep.subr.bf16.mxu1 %v2726_v9  ;;  %v2819_v9 = vld [vmem:[%s3679_s4 + $0x1a4] ss:$8 sps:$4 sm:$0xff]  }
  0x81   : > { %1039 = vmatpush2.bf16.msra.mxu0 %v2676_v59  ;;  %v2799_v59 = vld [vmem:[%s3679_s4 + $0x1d0] ss:$8 sps:$4 sm:$0xff]  }
  0x82   : > { %1040 = vmatprep.subr.bf16.mxu0 %v2681_v60  ;;  %v2804_v60 = vld [vmem:[%s3679_s4 + $0xb4] ss:$8 sps:$4 sm:$0xff]  }
  0x83   : > { %1302 = vmatpush2.bf16.msra.mxu1 %v2724_v10  ;;  %v2822_v10 = vld [vmem:[%s3679_s4 + $0x84] ss:$8 sps:$4 sm:$0xff]  }
  0x84   : > { %1303 = vmatprep.subr.bf16.mxu1 %v2729_v11  ;;  %v2825_v11 = vld [vmem:[%s3679_s4 + $0x194] ss:$8 sps:$4 sm:$0xff]  }
  0x85   : > { %1041 = vmatpush2.bf16.msra.mxu0 %v2679_v62  ;;  %v2807_v62 = vld [vmem:[%s3679_s4 + $0x1c4] ss:$8 sps:$4 sm:$0xff]  }
  0x86   : > { %1042 = vmatprep.subr.bf16.mxu0 %v2684_v63  ;;  %v2885_v63 = vmov 0.0  }
  0x87   : > { %1304 = vmatpush2.bf16.msra.mxu1 %v2727_v14  ;;  %1316 = vst [vmem:[#allocation2] sm:$0x3f] %v2885_v63  ;;  %1317 = vst [vmem:[#allocation2 + $0x8] sm:$0x3f] %v2885_v63  ;;  %v2828_v14 = vld [vmem:[%s3679_s4 + $0x184] ss:$8 sps:$4 sm:$0xff]  }
  0x88   : > { %1305 = vmatprep.subr.bf16.mxu1 %v2732_v16  ;;  %v2831_v16 = vld [vmem:[%s3679_s4 + $0x274] ss:$8 sps:$4 sm:$0xff]  }
  0x89   : > { %1043 = vmatpush2.bf16.msra.mxu0 %v2682_v2  ;;  %v2808_v2 = vld [vmem:[%s3679_s4 + $0xa0] ss:$8 sps:$4 sm:$0xff]  }
  0x8a   : > { %1571 = vmatprep.subr.bf16.mxu0 %v2741_v13  ;;  %v2823_v13 = vld [vmem:[%s3679_s4 + $0x190] ss:$8 sps:$4 sm:$0xff]  }
  0x8b   : > { %1306 = vmatpush2.bf16.msra.mxu1 %v2730_v19 }
  0x8c   : > { %1045 = vmatmul.mubr.bf16.vlgmr.msra.gmra.mxu0 %v842_v3  ;;  %1772 = vmatprep.subr.bf16.mxu1 %v2735_v20  ;;  %v2813_v3 = vld [vmem:[%s3679_s4 + $0x1b4] ss:$8 sps:$4 sm:$0xff]  }
  0x8d   : > { %1572 = vmatpush1.bf16.msra.mxu0 %v2739_v12  ;;  %v2820_v12 = vld [vmem:[%s3679_s4 + $0x80] ss:$8 sps:$4 sm:$0xff]  }
  0x8e   : > { %1573 = vmatprep.subr.bf16.mxu0 %v2747_v15  ;;  %1308 = vmatmul.mubr.bf16.vlgmr.msra.gmra.mxu1 %v3150_v8  ;;  %v2771_v8 = vld [vmem:[%s3679_s4 + $0x124] ss:$8 sps:$4 sm:$0xff]   ;;  %v2826_v15 = vld [vmem:[%s3679_s4 + $0x180] ss:$8 sps:$4 sm:$0xff]  }
  0x8f   : > { %1773 = vmatpush1.bf16.msra.mxu1 %v2733_v23 }
  0x90   : > { %1774 = vmatprep.subr.bf16.mxu1 %v2738_v24 }
  0x91   : > { %1574 = vmatpush1.bf16.msra.mxu0 %v2745_v17 }
  0x92   : > { %1575 = vmatprep.subr.bf16.mxu0 %v2753_v18 }
  0x93   : > { %1775 = vmatpush1.bf16.msra.mxu1 %v2736_v27 }
  0x94   : > { %1776 = vmatprep.subr.bf16.mxu1 %v2744_v28  ;;  %v1055_v28 = vld [vmem:[%s3678_s3] sm:$0x3] }
  0x95   : > { %1576 = vmatpush1.bf16.msra.mxu0 %v2751_v21 }
  0x96   : > { %1577 = vmatprep.subr.bf16.mxu0 %v2759_v22 }
  0x97   : > { %1777 = vmatpush1.bf16.msra.mxu1 %v2742_v30 }
  0x98   : > { %1778 = vmatprep.subr.bf16.mxu1 %v2750_v31 }
  0x99   : > { %1578 = vmatpush1.bf16.msra.mxu0 %v2757_v25  ;;  %v1057_v25 = vlaneseq }
  0x9a   : > { %1579 = vmatprep.subr.bf16.mxu0 %v2765_v26 }
  0x9b   : > { %1779 = vmatpush1.bf16.msra.mxu1 %v2748_v34  ;;  %v1058_v26 = vshrl.u32 %v1057_v25, 7  ;;  %v2868_v25 = vld [vmem:[%s3679_s4 + $0x2a0] ss:$8 sps:$4 sm:$0xff]  }
  0x9c   : > { %1780 = vmatprep.subr.bf16.mxu1 %v2756_v35 }
  0x9d   : > { %1580 = vmatpush1.bf16.msra.mxu0 %v2763_v29  ;;  %v3544_v27 = vsub.s32 0, %v1058_v26  ;;  %v3549_v29 = vsub.s32 1, %v1058_v26  ;;  %v2873_v26 = vld [vmem:[%s3679_s4 + $0x294] ss:$8 sps:$4 sm:$0xff]  }
  0x9e   : > { %1581 = vmatprep.subr.bf16.mxu0 %v2771_v8 }
  0x9f   : > { %1781 = vmatpush1.bf16.msra.mxu1 %v2754_v38  ;;  %v1060_v30 = vrot.slane %v1055_v28, %v3544_v27  ;;  %v1064_v34 = vrot.slane %v1055_v28, %v3549_v29  ;;  %v2871_v28 = vld [vmem:[%s3679_s4 + $0x290] ss:$8 sps:$4 sm:$0xff]  }
  0xa0   : > { %1782 = vmatprep.subr.bf16.mxu1 %v2762_v39 }
  0xa1   : > { %1582 = vmatpush1.bf16.msra.mxu0 %v2769_v32 }
  0xa2   : > { %1583 = vmatprep.subr.bf16.mxu0 %v2777_v33 }
  0xa3   : > { %1783 = vmatpush1.bf16.msra.mxu1 %v2760_v42 }
  0xa4   : > { %1784 = vmatprep.subr.bf16.mxu1 %v2768_v43 }
  0xa5   : > { %1584 = vmatpush1.bf16.msra.mxu0 %v2775_v36 }
  0xa6   : > { %1585 = vmatprep.subr.bf16.mxu0 %v2783_v37 }
  0xa7   : > { %1785 = vmatpush1.bf16.msra.mxu1 %v2766_v46 }
  0xa8   : > { %1786 = vmatprep.subr.bf16.mxu1 %v2774_v47 }
  0xa9   : > { %1586 = vmatpush1.bf16.msra.mxu0 %v2781_v40 }
  0xaa   : > { %1587 = vmatprep.subr.bf16.mxu0 %v2789_v41 }
  0xab   : > { %1787 = vmatpush1.bf16.msra.mxu1 %v2772_v49 }
  0xac   : > { %1788 = vmatprep.subr.bf16.mxu1 %v2780_v50 }
  0xad   : > { %1588 = vmatpush2.bf16.msra.mxu0 %v2787_v44 }
  0xae   : > { %1589 = vmatprep.subr.bf16.mxu0 %v2795_v45 }
  0xaf   : > { %1789 = vmatpush2.bf16.msra.mxu1 %v2778_v51 }
  0xb0   : > { %1790 = vmatprep.subr.bf16.mxu1 %v2786_v52 }
  0xb1   : > { %1590 = vmatpush2.bf16.msra.mxu0 %v2793_v48 }
  0xb2   : > { %1591 = vmatprep.subr.bf16.mxu0 %v2801_v58  ;;  %v2829_v58 = vld [vmem:[%s3679_s4 + $0x270] ss:$8 sps:$4 sm:$0xff]  }
  0xb3   : > { %1791 = vmatpush2.bf16.msra.mxu1 %v2784_v53 }
  0xb4   : > { %1792 = vmatprep.subr.bf16.mxu1 %v2792_v54 }
  0xb5   : > { %1592 = vmatpush2.bf16.msra.mxu0 %v2799_v59 }
  0xb6   : > { %1593 = vmatprep.subr.bf16.mxu0 %v2807_v62 }
  0xb7   : > { %1793 = vmatpush2.bf16.msra.mxu1 %v2790_v55 }
  0xb8   : > { %1794 = vmatprep.subr.bf16.mxu1 %v2798_v56 }
  0xb9   : > { %1594 = vmatpush2.bf16.msra.mxu0 %v2805_v0  ;;  %v2832_v0 = vld [vmem:[%s3679_s4 + $0x260] ss:$8 sps:$4 sm:$0xff]  }
  0xba   : > { %1595 = vmatprep.subr.bf16.mxu0 %v2813_v3  ;;  %v2840_v3 = vld [vmem:[%s3679_s4 + $0x244] ss:$8 sps:$4 sm:$0xff]  }
  0xbb   : > { %1795 = vmatpush2.bf16.msra.mxu1 %v2796_v57 }
  0xbc   : > { %1796 = vmatprep.subr.bf16.mxu1 %v2804_v60  ;;  %v2834_v60 = vld [vmem:[%s3679_s4 + $0x264] ss:$8 sps:$4 sm:$0xff]  }
  0xbd   : > { %1596 = vmatpush2.bf16.msra.mxu0 %v2811_v4  ;;  %v2838_v4 = vld [vmem:[%s3679_s4 + $0x240] ss:$8 sps:$4 sm:$0xff]  }
  0xbe   : > { %1597 = vmatprep.subr.bf16.mxu0 %v2819_v9  ;;  %v2844_v9 = vld [vmem:[%s3679_s4 + $0x220] ss:$8 sps:$4 sm:$0xff]  }
  0xbf   : > { %1797 = vmatpush2.bf16.msra.mxu1 %v2802_v61 }
  0xc0   : > { %1798 = vmatprep.subr.bf16.mxu1 %v2810_v1  ;;  %v2837_v1 = vld [vmem:[%s3679_s4 + $0x254] ss:$8 sps:$4 sm:$0xff]  }
  0xc1   : > { %1598 = vmatpush2.bf16.msra.mxu0 %v2817_v7  ;;  %v2846_v7 = vld [vmem:[%s3679_s4 + $0x224] ss:$8 sps:$4 sm:$0xff]  }
  0xc2   : > { %1599 = vmatprep.subr.bf16.mxu0 %v2825_v11  ;;  %v2847_v11 = vld [vmem:[%s3679_s4 + $0x210] ss:$8 sps:$4 sm:$0xff]  }
  0xc3   : > { %1799 = vmatpush2.bf16.msra.mxu1 %v2808_v2  ;;  %v2835_v2 = vld [vmem:[%s3679_s4 + $0x250] ss:$8 sps:$4 sm:$0xff]  }
  0xc4   : > { %1800 = vmatprep.subr.bf16.mxu1 %v2816_v6  ;;  %v2841_v6 = vld [vmem:[%s3679_s4 + $0x230] ss:$8 sps:$4 sm:$0xff]  }
  0xc5   : > { %1600 = vmatpush2.bf16.msra.mxu0 %v2823_v13  ;;  %v2850_v13 = vld [vmem:[%s3679_s4 + $0x200] ss:$8 sps:$4 sm:$0xff]  }
  0xc6   : > { %1601 = vmatprep.subr.bf16.mxu0 %v2828_v14  ;;  %v2855_v14 = vld [vmem:[%s3679_s4 + $0x2f4] ss:$8 sps:$4 sm:$0xff]  }
  0xc7   : > { %1801 = vmatpush2.bf16.msra.mxu1 %v2814_v5  ;;  %v2843_v5 = vld [vmem:[%s3679_s4 + $0x234] ss:$8 sps:$4 sm:$0xff]  }
  0xc8   : > { %1802 = vmatprep.subr.bf16.mxu1 %v2822_v10  ;;  %v2849_v10 = vld [vmem:[%s3679_s4 + $0x214] ss:$8 sps:$4 sm:$0xff]  }
  0xc9   : > { %1602 = vmatpush2.bf16.msra.mxu0 %v2826_v15  ;;  %v2853_v15 = vld [vmem:[%s3679_s4 + $0x2f0] ss:$8 sps:$4 sm:$0xff]  }
  0xca   : > { %2012 = vmatprep.subr.bf16.mxu0 %v2831_v16  ;;  %v2858_v16 = vld [vmem:[%s3679_s4 + $0x2e4] ss:$8 sps:$4 sm:$0xff]  }
  0xcb   : > { %1803 = vmatpush2.bf16.msra.mxu1 %v2820_v12  ;;  %v2852_v12 = vld [vmem:[%s3679_s4 + $0x204] ss:$8 sps:$4 sm:$0xff]  }
 0x10c   : > { %v595_v17 = vpop.f32.mrf.mxu0 }
 0x10d   : > { %v796_v18 = vpop.f32.mrf.mxu1 }
 0x10e   : > { %v597_v19 = vpop.f32.mrf.mxu0  ;;  %v797_v8 = vadd.f32 %v796_v18, %v595_v17  ;;  %v2856_v17 = vld [vmem:[%s3679_s4 + $0x2e0] ss:$8 sps:$4 sm:$0xff]   ;;  %v2861_v18 = vld [vmem:[%s3679_s4 + $0x2d4] ss:$8 sps:$4 sm:$0xff]  }
 0x10f   : > { %v798_v20 = vpop.f32.mrf.mxu1 }
 0x110   : > { %v599_v21 = vpop.f32.mrf.mxu0  ;;  %v799_v32 = vadd.f32 %v798_v20, %v597_v19  ;;  %v2859_v19 = vld [vmem:[%s3679_s4 + $0x2d0] ss:$8 sps:$4 sm:$0xff]   ;;  %v2864_v20 = vld [vmem:[%s3679_s4 + $0x2c4] ss:$8 sps:$4 sm:$0xff]  }
 0x111   : > { %v800_v22 = vpop.f32.mrf.mxu1  ;;  %v2862_v21 = vld [vmem:[%s3679_s4 + $0x2c0] ss:$8 sps:$4 sm:$0xff]  }
 0x112   : > { %v600_v23 = vpop.f32.mrf.mxu0  ;;  %v2867_v22 = vld [vmem:[%s3679_s4 + $0x2b4] ss:$8 sps:$4 sm:$0xff]  }
 0x113   : > { %v801_v24 = vpop.f32.mrf.mxu1  ;;  %v2865_v23 = vld [vmem:[%s3679_s4 + $0x2b0] ss:$8 sps:$4 sm:$0xff]  }
 0x114   : > { %v2870_v24 = vld [vmem:[%s3679_s4 + $0x2a4] ss:$8 sps:$4 sm:$0xff]  }
 0x14c   : > { %v1046_v31 = vpop.f32.mrf.mxu0 }
 0x14d   : > { %v1053_v33 = vadd.f32 %v1046_v31, %v797_v8  ;;  %v2876_v8 = vld [vmem:[%s3679_s4 + $0x284] ss:$8 sps:$4 sm:$0xff]  }
 0x14e   : > { %v1048_v35 = vpop.f32.mrf.mxu0  ;;  %v3557_v52 = vpop.f32.mrf.mxu1 }
 0x14f   : > { %v1067_v36 = vadd.f32 %v1060_v30, %v1053_v33  ;;  %v1054_v37 = vadd.f32 %v1048_v35, %v799_v32  ;;  %v2874_v30 = vld [vmem:[%s3679_s4 + $0x280] ss:$8 sps:$4 sm:$0xff]  }
 0x150   : > { %v1050_v38 = vpop.f32.mrf.mxu0  ;;  %v3560_v56 = vpop.f32.mrf.mxu1 }
 0x151   : > { %v1069_v39 = vmax.f32 %v1067_v36, 0.0  ;;  %v1068_v40 = vadd.f32 %v1064_v34, %v1054_v37 }
 0x152   : > { %v1051_v41 = vpop.f32.mrf.mxu0  ;;  %v1313_v61 = vpop.f32.mrf.mxu1 }
 0x153   : > { %v1320_v42 = vrot.slane %v1069_v39, 7  ;;  %v1070_v43 = vmax.f32 %v1068_v40, 0.0  ;;  %v1103_v41 = vld [vmem:[%s3682_s7] sm:$0x3] }
 0x154   : > { %v1314_v63 = vpop.f32.mrf.mxu1 }
 0x155   : > { %1324 = vst [vmem:[#allocation2] sm:$0x1e] %v1320_v42  ;;  %v1321_v44 = vrot.slane %v1070_v43, 7  ;;  %v2055_v42 = vld [vmem:[%s3680_s5] sm:$0x3]  ;;  %v1108_v43 = vrot.slane %v1103_v41, %v3544_v27 }
 0x157   : > { %1325 = vst [vmem:[#allocation2 + $0x8] sm:$0x1e] %v1321_v44  ;;  %v2060_v44 = vrot.slane %v2055_v42, %v3544_v27 }
 0x15c   : > { %v1326_v45 = vld [vmem:[#allocation2] sm:$0x3f] }
 0x15d   : > { %v3553_v46 = vpack.c.bf16 %v1326_v45, %v1326_v45 }
 0x15e   : > { %v1327_v47 = vld [vmem:[#allocation2 + $0x8] sm:$0x3f] }
 0x15f   : > { %v1329_v48 = vpack.c.bf16 %v1327_v47, %v1327_v47  ;;  %v1398_v49 = vshll.u32 %v3553_v46, 16  ;;  %v1396_v55 = vshrl.u32 %v3553_v46, 16  ;;  %v1848_v31 = vrot.slane %v3553_v46, 1 }
 0x161   : > { %1804 = vmatprep.mubr.bf16.mxu1 %v1329_v48  ;;  %v1405_v50 = vshll.u32 %v1329_v48, 16  ;;  %v1400_v51 = vrot.slane %v1398_v49, 1  ;;  %v1403_v53 = vshrl.u32 %v1329_v48, 16  ;;  %v1849_v62 = vrot.slane %v1329_v48, 1 }
 0x162   : > { %1805 = vmatmul.mubr.bf16.vlgmr.msra.gmra.mxu1 %v3553_v46  ;;  %v1112_v46 = vrot.slane %v1103_v41, %v3549_v29  ;;  %v2064_v49 = vrot.slane %v2055_v42, %v3549_v29 }
 0x163   : > { %v1407_v54 = vrot.slane %v1405_v50, 1  ;;  %v1401_v59 = vor.u32 %v1400_v51, %v1396_v55  ;;  %v1310_v51 = vadd.f32 %v3557_v52, %v1108_v43 }
 0x165   : > { %v1408_v57 = vor.u32 %v1407_v54, %v1403_v53 }
 0x167   : > { %1603 = vmatprep.mubr.bf16.mxu0 %v1408_v57  ;;  %v1312_v57 = vadd.f32 %v3560_v56, %v1112_v46 }
 0x168   : > { %1604 = vmatmul.mubr.bf16.vlgmr.msra.gmra.mxu0 %v1401_v59 }
 0x169   : > { %2013 = vmatpush1.bf16.msra.mxu0 %v2829_v58  ;;  %2044 = vmatprep.mubr.bf16.mxu0 %v1849_v62 }
 0x16a   : > { %2014 = vmatprep.subr.bf16.mxu0 %v2834_v60 }
 0x16d   : > { %2015 = vmatpush1.bf16.msra.mxu0 %v2832_v0 }
 0x16e   : > { %2016 = vmatprep.subr.bf16.mxu0 %v2837_v1 }
 0x171   : > { %2017 = vmatpush1.bf16.msra.mxu0 %v2835_v2 }
 0x172   : > { %2018 = vmatprep.subr.bf16.mxu0 %v2840_v3 }
 0x175   : > { %2019 = vmatpush1.bf16.msra.mxu0 %v2838_v4 }
 0x176   : > { %2020 = vmatprep.subr.bf16.mxu0 %v2843_v5 }
 0x179   : > { %2021 = vmatpush1.bf16.msra.mxu0 %v2841_v6 }
 0x17a   : > { %2022 = vmatprep.subr.bf16.mxu0 %v2846_v7 }
 0x17d   : > { %2023 = vmatpush1.bf16.msra.mxu0 %v2844_v9 }
 0x17e   : > { %2024 = vmatprep.subr.bf16.mxu0 %v2849_v10 }
 0x181   : > { %2025 = vmatpush1.bf16.msra.mxu0 %v2847_v11 }
 0x182   : > { %2026 = vmatprep.subr.bf16.mxu0 %v2852_v12 }
 0x185   : > { %2027 = vmatpush1.bf16.msra.mxu0 %v2850_v13 }
 0x186   : > { %2028 = vmatprep.subr.bf16.mxu0 %v2855_v14 }
 0x189   : > { %2029 = vmatpush2.bf16.msra.mxu0 %v2853_v15 }
 0x18a   : > { %2030 = vmatprep.subr.bf16.mxu0 %v2858_v16 }
 0x18d   : > { %2031 = vmatpush2.bf16.msra.mxu0 %v2856_v17 }
 0x18e   : > { %2032 = vmatprep.subr.bf16.mxu0 %v2861_v18 }
 0x191   : > { %2033 = vmatpush2.bf16.msra.mxu0 %v2859_v19 }
 0x192   : > { %2034 = vmatprep.subr.bf16.mxu0 %v2864_v20 }
 0x195   : > { %2035 = vmatpush2.bf16.msra.mxu0 %v2862_v21 }
 0x196   : > { %2036 = vmatprep.subr.bf16.mxu0 %v2867_v22 }
 0x199   : > { %2037 = vmatpush2.bf16.msra.mxu0 %v2865_v23 }
 0x19a   : > { %2038 = vmatprep.subr.bf16.mxu0 %v2870_v24 }
 0x19d   : > { %2039 = vmatpush2.bf16.msra.mxu0 %v2868_v25 }
 0x19e   : > { %2040 = vmatprep.subr.bf16.mxu0 %v2873_v26 }
 0x1a1   : > { %2041 = vmatpush2.bf16.msra.mxu0 %v2871_v28 }
 0x1a2   : > { %2042 = vmatprep.subr.bf16.mxu0 %v2876_v8 }
 0x1a5   : > { %2043 = vmatpush2.bf16.msra.mxu0 %v2874_v30 }
 0x1a8   : > { %2045 = vmatmul.mubr.bf16.vlgmr.msra.gmra.mxu0 %v1848_v31 }
 0x222   : > { %v1806_v32 = vpop.f32.mrf.mxu1 }
 0x224   : > { %v1808_v33 = vpop.f32.mrf.mxu1 }
 0x226   : > { %v1810_v34 = vpop.f32.mrf.mxu1 }
 0x228   : > { %v1605_v35 = vpop.f32.mrf.mxu0  ;;  %v1811_v36 = vpop.f32.mrf.mxu1 }
 0x229   : > { %v1807_v37 = vadd.f32 %v1806_v32, %v1605_v35 }
 0x22a   : > { %v1607_v38 = vpop.f32.mrf.mxu0 }
 0x22b   : > { %v1809_v47 = vadd.f32 %v1808_v33, %v1607_v38 }
 0x22c   : > { %v1609_v39 = vpop.f32.mrf.mxu0 }
 0x22e   : > { %v1610_v40 = vpop.f32.mrf.mxu0 }
 0x268   : > { %v2046_v45 = vpop.f32.mrf.mxu0 }
 0x269   : > { %v2053_v48 = vadd.f32 %v2046_v45, %v1807_v37 }
 0x26a   : > { %v2048_v50 = vpop.f32.mrf.mxu0 }
 0x26b   : > { %v2067_v53 = vadd.f32 %v2060_v44, %v2053_v48  ;;  %v2054_v54 = vadd.f32 %v2048_v50, %v1809_v47 }
 0x26c   : > { %v2050_v55 = vpop.f32.mrf.mxu0 }
 0x26d   : > { %v2069_v58 = vadd.f32 %v2067_v53, %v1310_v51  ;;  %v2068_v59 = vadd.f32 %v2064_v49, %v2054_v54 }
 0x26e   : > { %v2051_v60 = vpop.f32.mrf.mxu0 }
 0x26f   : > { %v2070_v27 = vadd.f32 %v2068_v59, %v1312_v57  ;;  %v2071_v61 = vmax.f32 %v2069_v58, 0.0 }
 0x271   : > { %v2072_v62 = vmax.f32 %v2070_v27, 0.0 }
 0x273   : > { %v2521_v29 = vpack.c.bf16 %v2072_v62, %v2071_v61 }
 0x275   : > { %2522 = vst.sshfl [vmem:[%s325_s11] sm:$0x33 pattern:$0x76325410] %v2521_v29 }
 0x276 PF: > { %s18_s27 = sadd.s32 1, %s2883_s27  }
 0x277   : > { %p15_p4 = scmp.ge.s32.totalorder %s18_s27, 4  }
 0x279   :  { %17 = sbr.rel (!%p15_p4) target bundleno = 1 (0x1), region = 89 }

</bundles_post_ra>
